<compile_context>
chip_gen: v5e
topology: v5e:2x2
jax: 0.10.0
libtpu: 0.0.40
codegen_flags: <defaults>
</compile_context>

<pallas_src>
import functools
import re

import jax
import jax.numpy as jnp
from jax.experimental import pallas as pl
from jax.experimental.pallas import tpu as pltpu


# ----------------------------------------------------------------------------
# Kernel
# ----------------------------------------------------------------------------
def _coattn_kernel(x_ref, s_ref, Wt_ref, Ut_ref, v_ref, W1t_ref, b1_ref,
                   w2_ref, out_ref, *, l_valid, m_valid):
    # Blocks per grid step:
    #   x_ref (B, Lp, D), s_ref (B, Mp, D), out_ref (B, D)
    #   Wt/Ut (D, D) compute dtype, W1t (D, D) f32, v/b1/w2 (1, D) f32
    B, Lp, D = x_ref.shape
    Mp = s_ref.shape[1]
    f32 = jnp.float32

    x3 = x_ref[...]                           # (B, Lp, D)
    s3 = s_ref[...]                           # (B, Mp, D)
    Wt = Wt_ref[...]
    Ut = Ut_ref[...]
    v_row = v_ref[...]                        # (1, D)
    W1t = W1t_ref[...]
    b1 = b1_ref[...]                          # (1, D)
    w2_row = w2_ref[...]                      # (1, D)

    # ---- CoAttentionEncoder, batched over every s-item m ----
    # Two MXU matmuls per grid step (previously 1 + M tiny ones). Lp / Mp are
    # padded to the compute dtype's sublane packing, so these reshapes are
    # pure layout collapses (no relayout copy).
    Wx = jnp.dot(x3.reshape(B * Lp, D), Wt,
                 preferred_element_type=f32).reshape(B, Lp, D)
    Us = jnp.dot(s3.reshape(B * Mp, D), Ut,
                 preferred_element_type=f32).reshape(B, Mp, D)

    # tanh(W x_l + U s_m) for every (b, m, l): VPU add + EUP tanh.
    t = jnp.tanh(Wx[:, None, :, :] + Us[:, :, None, :])      # (B, Mp, Lp, D)

    # v-dot over D as a lane reduction: the score comes out lane-dense as
    # (B, Mp, Lp) directly -- no 1-lane MXU column and no per-m relayout.
    score = jnp.sum(t * v_row.reshape(1, 1, 1, D), axis=-1)   # (B, Mp, Lp)

    # One softmax pass over L for every (b, m); padded l positions masked.
    if l_valid != Lp:
        l_ids = jax.lax.broadcasted_iota(jnp.int32, (1, 1, Lp), 2)
        score = jnp.where(l_ids < l_valid, score, -jnp.inf)
    score = score - jnp.max(score, axis=-1, keepdims=True)
    p = jnp.exp(score)
    alpha = p * pl.reciprocal(jnp.sum(p, axis=-1, keepdims=True), approx=True)

    # Context c[b,m] = sum_l alpha[b,m,l] * x[b,l]: batched matmul on the MXU
    # (reads x3 once instead of M times, no VALU/XLU reduction).
    c = jnp.einsum("bml,bld->bmd", alpha.astype(x3.dtype), x3,
                   preferred_element_type=f32)                 # (B, Mp, D)

    # ---- SelfAttentionEncoder over m, single batched pass ----
    h = jnp.tanh(jnp.dot(c.reshape(B * Mp, D), W1t,
                         preferred_element_type=f32) + b1)     # (B*Mp, D)
    e = jnp.sum(h.reshape(B, Mp, D) * w2_row.reshape(1, 1, D), axis=-1)  # (B, Mp)

    if m_valid != Mp:
        m_ids = jax.lax.broadcasted_iota(jnp.int32, (1, Mp), 1)
        e = jnp.where(m_ids < m_valid, e, -jnp.inf)
    e = e - jnp.max(e, axis=-1, keepdims=True)
    q = jnp.exp(e)
    # Exact division here (only B rows) -- tightens accuracy at no cost.
    a = q / jnp.sum(q, axis=-1, keepdims=True)                 # (B, Mp)

    g = jnp.sum(a[:, :, None] * c, axis=1)                     # (B, D)
    out_ref[...] = g.astype(out_ref.dtype)


# ----------------------------------------------------------------------------
# Wrapper
# ----------------------------------------------------------------------------
def _device_kind():
    try:
        return jax.devices()[0].device_kind.lower()
    except Exception:
        return ""


def _tpu_generation(kind):
    m = re.search(r"(?:tpu[\s_-]?v?|v)(\d+)", kind)
    return int(m.group(1)) if m else 0


def _round_up(a, m):
    return ((a + m - 1) // m) * m


def _pick_block_b(N, max_b, num_cores, per_row_bytes, vmem_budget):
    """Largest divisor of N that (a) respects max_b and a rough VMEM budget
    for the in-kernel intermediates, (b) is sublane-aligned (multiple of 8)
    or the full batch, and (c) on multi-TensorCore chips (v7x) leaves at
    least one grid step per core. Single-core chips get a single step when
    it fits (the grid is a serial loop there)."""
    cap = max(8, int(vmem_budget // max(per_row_bytes, 1)))
    target = max(1, min(max_b, N, cap))
    if num_cores > 1 and N >= 2 * num_cores:
        target = min(target, N // num_cores)
    for b in range(target, 0, -1):
        if N % b == 0 and (b % 8 == 0 or b == N):
            return b
    return N


def coattention_layer(x, s, params, *, max_block_b=128, compute_dtype="auto",
                      num_tensorcores=None,
                      vmem_limit_bytes=32 * 1024 * 1024):
    N, L, D = x.shape
    Ns, M, Ds = s.shape
    assert Ns == N and Ds == D
    out_dtype = x.dtype
    f32 = jnp.float32

    gen = _tpu_generation(_device_kind())
    if compute_dtype == "auto":
        # bf16 feeds the 256x256 MXU and halves x/s/W/U DMA bytes on
        # v6e/v7x; v5e has no bf16 VPU/EUP so it stays f32 there. f32
        # accumulation is kept inside the kernel either way.
        compute_dtype = jnp.bfloat16 if gen >= 6 else None
    if num_tensorcores is None:
        num_tensorcores = 2 if gen >= 7 else 1

    cdt = jnp.dtype(compute_dtype) if compute_dtype is not None else jnp.dtype(f32)
    pack = {4: 8, 2: 16, 1: 32}[cdt.itemsize]

    # Pad L and M to the compute dtype's sublane packing so every in-kernel
    # reshape is a free layout collapse (also fixes the bf16 L%16 caveat).
    # Padded rows are masked out of the softmaxes inside the kernel.
    Lp = _round_up(L, pack)
    Mp = _round_up(M, pack)
    if Lp != L:
        x = jnp.pad(x, ((0, 0), (0, Lp - L), (0, 0)))
    if Mp != M:
        s = jnp.pad(s, ((0, 0), (0, Mp - M), (0, 0)))

    W, U, v, W1, b1, w2 = (params[k] for k in ("W", "U", "v", "W1", "b1", "w2"))
    # One-time weight transposes hoisted out of the kernel.
    Wt, Ut, W1t = W.T, U.T, W1.T
    v_row = v.astype(f32)            # (1, D)
    b1_row = b1.astype(f32)          # (1, D)
    w2_row = w2.astype(f32)          # (1, D)
    W1t = W1t.astype(f32)            # multiplies the f32 context, keep f32

    if compute_dtype is not None:
        x = x.astype(compute_dtype)
        s = s.astype(compute_dtype)
        Wt = Wt.astype(compute_dtype)
        Ut = Ut.astype(compute_dtype)
    else:
        Wt = Wt.astype(f32)
        Ut = Ut.astype(f32)

    # Rough per-batch-row footprint of the big f32 intermediates (the
    # (Mp, Lp, D) tanh tensor dominates; lanes are padded to 128).
    lanes = _round_up(max(D, 1), 128)
    per_row_bytes = 4 * lanes * (3 * Mp * Lp + 2 * Lp + 6 * Mp)
    vmem_budget = int(0.6 * vmem_limit_bytes)

    B = _pick_block_b(N, max_block_b, num_tensorcores, per_row_bytes,
                      vmem_budget)
    grid = (N // B,)

    # Loop-invariant (D, D) weights: single-buffer them when D is large so
    # they do not eat double VMEM (matters under v7x's 64 MiB/TC budget).
    wspec_kwargs = {}
    if D >= 512:
        wspec_kwargs = dict(pipeline_mode=pl.Buffered(1))

    kernel = functools.partial(_coattn_kernel, l_valid=L, m_valid=M)

    out = pl.pallas_call(
        kernel,
        out_shape=jax.ShapeDtypeStruct((N, D), out_dtype),
        grid_spec=pltpu.PrefetchScalarGridSpec(
            num_scalar_prefetch=0,
            grid=grid,
            in_specs=[
                pl.BlockSpec((B, Lp, D), lambda n: (n, 0, 0)),            # x
                pl.BlockSpec((B, Mp, D), lambda n: (n, 0, 0)),            # s
                pl.BlockSpec((D, D), lambda n: (0, 0), **wspec_kwargs),   # W^T
                pl.BlockSpec((D, D), lambda n: (0, 0), **wspec_kwargs),   # U^T
                pl.BlockSpec((1, D), lambda n: (0, 0)),                   # v
                pl.BlockSpec((D, D), lambda n: (0, 0), **wspec_kwargs),   # W1^T
                pl.BlockSpec((1, D), lambda n: (0, 0)),                   # b1
                pl.BlockSpec((1, D), lambda n: (0, 0)),                   # w2
            ],
            out_specs=pl.BlockSpec((B, D), lambda n: (n, 0)),             # lane-dense
        ),
        compiler_params=pltpu.CompilerParams(
            dimension_semantics=("parallel",),
            vmem_limit_bytes=vmem_limit_bytes,
        ),
    )(x, s, Wt, Ut, v_row, W1t, b1_row, w2_row)
    return out


# ----------------------------------------------------------------------------
# Pure-JAX reference (mirrors the PyTorch forward)
# ----------------------------------------------------------------------------
def coattention_layer_ref(x, s, params):
    W, U, v, W1, b1, w2 = (params[k] for k in ("W", "U", "v", "W1", "b1", "w2"))
    Wx = jnp.einsum("nld,ed->nle", x, W)
    Us = jnp.einsum("nmd,ed->nme", s, U)
    t = jnp.tanh(Wx[:, None, :, :] + Us[:, :, None, :])       # (N, M, L, D)
    scores = jnp.einsum("nmld,d->nml", t, v[0])
    alpha = jax.nn.softmax(scores, axis=-1)                    # softmax over L
    c = jnp.einsum("nml,nld->nmd", alpha, x)                   # (N, M, D)
    h = jnp.tanh(jnp.einsum("nmd,ed->nme", c, W1) + b1[0])
    e = jnp.einsum("nmd,d->nm", h, w2[0])
    a = jax.nn.softmax(e, axis=1)                              # softmax over M
    return jnp.einsum("nm,nmd->nd", a, c)


def init_params(key, dim):
    ks = jax.random.split(key, 6)
    k = 1.0 / jnp.sqrt(dim)
    u = lambda kk, shape: jax.random.uniform(kk, shape, jnp.float32, -k, k)
    return {
        "W": u(ks[0], (dim, dim)),    # CoAttentionEncoder.W.weight
        "U": u(ks[1], (dim, dim)),    # CoAttentionEncoder.U.weight
        "v": u(ks[2], (1, dim)),      # CoAttentionEncoder.attn[1].weight
        "W1": u(ks[3], (dim, dim)),   # SelfAttentionEncoder.attn[0].weight
        "b1": u(ks[4], (1, dim)),     # SelfAttentionEncoder.attn[0].bias
        "w2": u(ks[5], (1, dim)),     # SelfAttentionEncoder.attn[2].weight
    }


if __name__ == "__main__":
    # batch, seq-len of x, #s-items, feature dim.
    N, L, M, D = 16, 8, 4, 32
    key = jax.random.PRNGKey(0)
    kx, ks, kp = jax.random.split(key, 3)

    x = jax.random.normal(kx, (N, L, D), jnp.float32)
    s = jax.random.normal(ks, (N, M, D), jnp.float32)
    params = init_params(kp, D)

    g = coattention_layer(x, s, params)
    g = jax.block_until_ready(g)

    g_ref = coattention_layer_ref(x, s, params)
    assert g.shape == (N, D)
    err = float(jnp.max(jnp.abs(g - g_ref)))

    # bf16 compute is auto-enabled on v6e/v7x -> looser tolerance there; the
    # f32 path (v5e/others) only carries the approx-EUP-reciprocal error of
    # the L-softmax.
    gen = _tpu_generation(_device_kind())
    tol = 4e-2 if gen >= 6 else 5e-3
    assert jnp.allclose(g, g_ref, atol=tol, rtol=tol), f"max abs err = {err}"

    print("KERNEL_OK")
</pallas_src>

<mosaic_0001>
module attributes {stable_mosaic.version = 11 : i64} {
  func.func @_coattn_kernel(%arg0: i32, %arg1: memref<16x8x32xf32, #tpu.memory_space<vmem>>, %arg2: memref<16x8x32xf32, #tpu.memory_space<vmem>>, %arg3: memref<32x32xf32, #tpu.memory_space<vmem>>, %arg4: memref<32x32xf32, #tpu.memory_space<vmem>>, %arg5: memref<1x32xf32, #tpu.memory_space<vmem>>, %arg6: memref<32x32xf32, #tpu.memory_space<vmem>>, %arg7: memref<1x32xf32, #tpu.memory_space<vmem>>, %arg8: memref<1x32xf32, #tpu.memory_space<vmem>>, %arg9: memref<16x32xf32, #tpu.memory_space<vmem>>) attributes {dimension_semantics = [#tpu.dimension_semantics<parallel>], iteration_bounds = array<i64: 1>, scalar_prefetch = 0 : i64, scratch_operands = 0 : i64, tpu.core_type = #tpu.core_type<tc>, window_params = [{transform_indices = @transform_0, window_bounds = array<i64: 16, 8, 32>}, {transform_indices = @transform_1, window_bounds = array<i64: 16, 8, 32>}, {pipeline_mode = #tpu.pipeline_mode<synchronous>, transform_indices = @transform_2, window_bounds = array<i64: 32, 32>}, {pipeline_mode = #tpu.pipeline_mode<synchronous>, transform_indices = @transform_3, window_bounds = array<i64: 32, 32>}, {pipeline_mode = #tpu.pipeline_mode<synchronous>, transform_indices = @transform_4, window_bounds = array<i64: 1, 32>}, {pipeline_mode = #tpu.pipeline_mode<synchronous>, transform_indices = @transform_5, window_bounds = array<i64: 32, 32>}, {pipeline_mode = #tpu.pipeline_mode<synchronous>, transform_indices = @transform_6, window_bounds = array<i64: 1, 32>}, {pipeline_mode = #tpu.pipeline_mode<synchronous>, transform_indices = @transform_7, window_bounds = array<i64: 1, 32>}, {transform_indices = @transform_8, window_bounds = array<i64: 16, 32>}]} {
    %c0 = arith.constant 0 : index
    %c0_0 = arith.constant 0 : index
    %c0_1 = arith.constant 0 : index
    %0 = vector.load %arg1[%c0, %c0_0, %c0_1] : memref<16x8x32xf32, #tpu.memory_space<vmem>>, vector<16x8x32xf32>
    %c0_2 = arith.constant 0 : index
    %c0_3 = arith.constant 0 : index
    %c0_4 = arith.constant 0 : index
    %1 = vector.load %arg2[%c0_2, %c0_3, %c0_4] : memref<16x8x32xf32, #tpu.memory_space<vmem>>, vector<16x8x32xf32>
    %c0_5 = arith.constant 0 : index
    %c0_6 = arith.constant 0 : index
    %2 = vector.load %arg3[%c0_5, %c0_6] : memref<32x32xf32, #tpu.memory_space<vmem>>, vector<32x32xf32>
    %c0_7 = arith.constant 0 : index
    %c0_8 = arith.constant 0 : index
    %3 = vector.load %arg4[%c0_7, %c0_8] : memref<32x32xf32, #tpu.memory_space<vmem>>, vector<32x32xf32>
    %c0_9 = arith.constant 0 : index
    %c0_10 = arith.constant 0 : index
    %4 = vector.load %arg5[%c0_9, %c0_10] : memref<1x32xf32, #tpu.memory_space<vmem>>, vector<1x32xf32>
    %c0_11 = arith.constant 0 : index
    %c0_12 = arith.constant 0 : index
    %5 = vector.load %arg6[%c0_11, %c0_12] : memref<32x32xf32, #tpu.memory_space<vmem>>, vector<32x32xf32>
    %c0_13 = arith.constant 0 : index
    %c0_14 = arith.constant 0 : index
    %6 = vector.load %arg7[%c0_13, %c0_14] : memref<1x32xf32, #tpu.memory_space<vmem>>, vector<1x32xf32>
    %c0_15 = arith.constant 0 : index
    %c0_16 = arith.constant 0 : index
    %7 = vector.load %arg8[%c0_15, %c0_16] : memref<1x32xf32, #tpu.memory_space<vmem>>, vector<1x32xf32>
    %8 = vector.shape_cast %0 : vector<16x8x32xf32> to vector<128x32xf32>
    %cst = arith.constant dense<0.000000e+00> : vector<128x32xf32>
    %9 = tpu.matmul %8, %2, %cst {dimension_numbers = #tpu.dot_dimension_numbers<[1], [0], [0], [1], [0, 0, 1, 1], [], []>} : vector<128x32xf32>, vector<32x32xf32>, vector<128x32xf32> -> vector<128x32xf32>
    %10 = vector.shape_cast %9 : vector<128x32xf32> to vector<16x8x32xf32>
    %11 = vector.shape_cast %1 : vector<16x8x32xf32> to vector<128x32xf32>
    %cst_17 = arith.constant dense<0.000000e+00> : vector<128x32xf32>
    %12 = tpu.matmul %11, %3, %cst_17 {dimension_numbers = #tpu.dot_dimension_numbers<[1], [0], [0], [1], [0, 0, 1, 1], [], []>} : vector<128x32xf32>, vector<32x32xf32>, vector<128x32xf32> -> vector<128x32xf32>
    %13 = vector.shape_cast %12 : vector<128x32xf32> to vector<16x8x32xf32>
    %14 = vector.shape_cast %10 : vector<16x8x32xf32> to vector<16x1x8x32xf32>
    %15 = vector.shape_cast %13 : vector<16x8x32xf32> to vector<16x8x1x32xf32>
    %16 = vector.broadcast %14 : vector<16x1x8x32xf32> to vector<16x8x8x32xf32>
    %17 = vector.broadcast %15 : vector<16x8x1x32xf32> to vector<16x8x8x32xf32>
    %18 = arith.addf %16, %17 : vector<16x8x8x32xf32>
    %19 = math.tanh %18 : vector<16x8x8x32xf32>
    %20 = vector.shape_cast %4 : vector<1x32xf32> to vector<1x1x1x32xf32>
    %21 = vector.broadcast %20 : vector<1x1x1x32xf32> to vector<16x8x8x32xf32>
    %22 = arith.mulf %19, %21 : vector<16x8x8x32xf32>
    %cst_18 = arith.constant dense<0.000000e+00> : vector<16x8x8xf32>
    %23 = vector.multi_reduction <add>, %22, %cst_18 [3] : vector<16x8x8x32xf32> to vector<16x8x8xf32>
    %cst_19 = arith.constant dense<0xFF800000> : vector<16x8xf32>
    %24 = vector.multi_reduction <maximumf>, %23, %cst_19 [2] : vector<16x8x8xf32> to vector<16x8xf32>
    %25 = vector.shape_cast %24 : vector<16x8xf32> to vector<16x8x1xf32>
    %26 = vector.broadcast %25 : vector<16x8x1xf32> to vector<16x8x8xf32>
    %27 = arith.subf %23, %26 : vector<16x8x8xf32>
    %28 = math.exp %27 : vector<16x8x8xf32>
    %cst_20 = arith.constant dense<0.000000e+00> : vector<16x8xf32>
    %29 = vector.multi_reduction <add>, %28, %cst_20 [2] : vector<16x8x8xf32> to vector<16x8xf32>
    %30 = vector.shape_cast %29 : vector<16x8xf32> to vector<16x8x1xf32>
    %31 = tpu.reciprocal %30 {approx = true} : vector<16x8x1xf32> -> vector<16x8x1xf32>
    %32 = vector.broadcast %31 : vector<16x8x1xf32> to vector<16x8x8xf32>
    %33 = arith.mulf %28, %32 : vector<16x8x8xf32>
    "tpu.trace_start"() <{level = 10 : i32, message = "bml,bld->bmd"}> : () -> ()
    %cst_21 = arith.constant dense<0.000000e+00> : vector<16x8x32xf32>
    %34 = tpu.matmul %33, %0, %cst_21 {dimension_numbers = #tpu.dot_dimension_numbers<[2], [1], [1], [2], [0, 0, 0, 1, 1, 2], [0], [0]>} : vector<16x8x8xf32>, vector<16x8x32xf32>, vector<16x8x32xf32> -> vector<16x8x32xf32>
    "tpu.trace_stop"() : () -> ()
    %35 = vector.shape_cast %34 : vector<16x8x32xf32> to vector<128x32xf32>
    %cst_22 = arith.constant dense<0.000000e+00> : vector<128x32xf32>
    %36 = tpu.matmul %35, %5, %cst_22 {dimension_numbers = #tpu.dot_dimension_numbers<[1], [0], [0], [1], [0, 0, 1, 1], [], []>} : vector<128x32xf32>, vector<32x32xf32>, vector<128x32xf32> -> vector<128x32xf32>
    %37 = vector.broadcast %6 : vector<1x32xf32> to vector<128x32xf32>
    %38 = arith.addf %36, %37 : vector<128x32xf32>
    %39 = math.tanh %38 : vector<128x32xf32>
    %40 = vector.shape_cast %39 : vector<128x32xf32> to vector<16x8x32xf32>
    %41 = vector.shape_cast %7 : vector<1x32xf32> to vector<1x1x32xf32>
    %42 = vector.broadcast %41 : vector<1x1x32xf32> to vector<16x8x32xf32>
    %43 = arith.mulf %40, %42 : vector<16x8x32xf32>
    %cst_23 = arith.constant dense<0.000000e+00> : vector<16x8xf32>
    %44 = vector.multi_reduction <add>, %43, %cst_23 [2] : vector<16x8x32xf32> to vector<16x8xf32>
    %45 = tpu.iota {dimensions = array<i32: 1>} : vector<1x8xi32>
    %c4_i32 = arith.constant 4 : i32
    %46 = vector.broadcast %c4_i32 : i32 to vector<1x8xi32>
    %47 = arith.cmpi slt, %45, %46 : vector<1x8xi32>
    %cst_24 = arith.constant 0xFF800000 : f32
    %48 = vector.shape_cast %47 : vector<1x8xi1> to vector<1x8xi1>
    %49 = vector.broadcast %48 : vector<1x8xi1> to vector<16x8xi1>
    %50 = vector.broadcast %cst_24 : f32 to vector<16x8xf32>
    %51 = arith.select %49, %44, %50 : vector<16x8xi1>, vector<16x8xf32>
    %cst_25 = arith.constant dense<0xFF800000> : vector<16xf32>
    %52 = vector.multi_reduction <maximumf>, %51, %cst_25 [1] : vector<16x8xf32> to vector<16xf32>
    %53 = vector.shape_cast %52 : vector<16xf32> to vector<16x1xf32>
    %54 = vector.broadcast %53 : vector<16x1xf32> to vector<16x8xf32>
    %55 = arith.subf %51, %54 : vector<16x8xf32>
    %56 = math.exp %55 : vector<16x8xf32>
    %cst_26 = arith.constant dense<0.000000e+00> : vector<16xf32>
    %57 = vector.multi_reduction <add>, %56, %cst_26 [1] : vector<16x8xf32> to vector<16xf32>
    %58 = vector.shape_cast %57 : vector<16xf32> to vector<16x1xf32>
    %59 = vector.broadcast %58 : vector<16x1xf32> to vector<16x8xf32>
    %60 = arith.divf %56, %59 : vector<16x8xf32>
    %61 = vector.shape_cast %60 : vector<16x8xf32> to vector<16x8x1xf32>
    %62 = vector.broadcast %61 : vector<16x8x1xf32> to vector<16x8x32xf32>
    %63 = arith.mulf %62, %34 : vector<16x8x32xf32>
    %cst_27 = arith.constant dense<0.000000e+00> : vector<16x32xf32>
    %64 = vector.multi_reduction <add>, %63, %cst_27 [1] : vector<16x8x32xf32> to vector<16x32xf32>
    %c0_28 = arith.constant 0 : index
    %c0_29 = arith.constant 0 : index
    %65 = vector.load %arg9[%c0_28, %c0_29] : memref<16x32xf32, #tpu.memory_space<vmem>>, vector<16x32xf32>
    tpu.vector_store %arg9[%c0_28, %c0_29], %64 {strides = array<i32>} : memref<16x32xf32, #tpu.memory_space<vmem>>, vector<16x32xf32>,
    return
  }
  func.func @transform_0(%arg0: i32) -> (i32, i32, i32) {
    %c0_i32 = arith.constant 0 : i32
    %c0_i32_0 = arith.constant 0 : i32
    %c0_i32_1 = arith.constant 0 : i32
    return %arg0, %c0_i32, %c0_i32_0 : i32, i32, i32
  }
  func.func @transform_1(%arg0: i32) -> (i32, i32, i32) {
    %c0_i32 = arith.constant 0 : i32
    %c0_i32_0 = arith.constant 0 : i32
    %c0_i32_1 = arith.constant 0 : i32
    return %arg0, %c0_i32, %c0_i32_0 : i32, i32, i32
  }
  func.func @transform_2(%arg0: i32) -> (i32, i32) {
    %c0_i32 = arith.constant 0 : i32
    %c0_i32_0 = arith.constant 0 : i32
    %c0_i32_1 = arith.constant 0 : i32
    return %c0_i32, %c0_i32_0 : i32, i32
  }
  func.func @transform_3(%arg0: i32) -> (i32, i32) {
    %c0_i32 = arith.constant 0 : i32
    %c0_i32_0 = arith.constant 0 : i32
    %c0_i32_1 = arith.constant 0 : i32
    return %c0_i32, %c0_i32_0 : i32, i32
  }
  func.func @transform_4(%arg0: i32) -> (i32, i32) {
    %c0_i32 = arith.constant 0 : i32
    %c0_i32_0 = arith.constant 0 : i32
    %c0_i32_1 = arith.constant 0 : i32
    return %c0_i32, %c0_i32_0 : i32, i32
  }
  func.func @transform_5(%arg0: i32) -> (i32, i32) {
    %c0_i32 = arith.constant 0 : i32
    %c0_i32_0 = arith.constant 0 : i32
    %c0_i32_1 = arith.constant 0 : i32
    return %c0_i32, %c0_i32_0 : i32, i32
  }
  func.func @transform_6(%arg0: i32) -> (i32, i32) {
    %c0_i32 = arith.constant 0 : i32
    %c0_i32_0 = arith.constant 0 : i32
    %c0_i32_1 = arith.constant 0 : i32
    return %c0_i32, %c0_i32_0 : i32, i32
  }
  func.func @transform_7(%arg0: i32) -> (i32, i32) {
    %c0_i32 = arith.constant 0 : i32
    %c0_i32_0 = arith.constant 0 : i32
    %c0_i32_1 = arith.constant 0 : i32
    return %c0_i32, %c0_i32_0 : i32, i32
  }
  func.func @transform_8(%arg0: i32) -> (i32, i32) {
    %c0_i32 = arith.constant 0 : i32
    %c0_i32_0 = arith.constant 0 : i32
    return %arg0, %c0_i32 : i32, i32
  }
}

</mosaic_0001>

<bundles_post_ra>
// kernel: tpu_custom_call.1
= control target key start
LH: loop header
LB: loop body
LE: loop exit
PB: predicated region body
PF: predicated region fallthrough
CT: control target
= control target key end

     0   :  { %13 = vsyncpa [#allocation3], 0  ;;  %s9879_s0 = inlined_call_operand.hbm [shape: f32[16,8,32], index: 0, kind: input, shape index: {}]   ;;  %s9880_s1 = inlined_call_operand.hbm [shape: f32[16,8,32], index: 1, kind: input, shape index: {}]   ;;  %s9881_s2 = inlined_call_operand.hbm [shape: f32[32,32], index: 2, kind: input, shape index: {}]   ;;  %s9882_s3 = inlined_call_operand.hbm [shape: f32[32,32], index: 3, kind: input, shape index: {}]   ;;  %s9883_s4 = inlined_call_operand.vmem [shape: f32[1,32], index: 4, kind: input, shape index: {}]   ;;  %s9884_s5 = inlined_call_operand.hbm [shape: f32[32,32], index: 5, kind: input, shape index: {}]   ;;  %s9885_s6 = inlined_call_operand.vmem [shape: f32[1,32], index: 6, kind: input, shape index: {}]   ;;  %s9886_s7 = inlined_call_operand.vmem [shape: f32[1,32], index: 7, kind: input, shape index: {}]   ;;  %s9887_s8 = inlined_call_operand.hbm [shape: f32[16,32], index: 8, kind: output, shape index: {}]  }
   0x1   :  { %14 = vsyncpa [#allocation6], 0 }
   0x2   :  { %15 = vsyncpa [#allocation9], 0 }
   0x3   :  { %16 = vsyncpa [#allocation4], 0  ;;  %s34_s29 = sshll.u32 %s9880_s1, 4  ;;  %s6402_s30 = smov [#allocation5]   ;;  %s35_s29 = int_to_ptr.hbm [resolvable:$true] %s34_s29 }
   0x4   :  { %s36_s9 = sshll.u32 %s6402_s30, 4  ;;  %s60_s12 = sshll.u32 %s9882_s3, 4  ;;  %s37_s9 = int_to_ptr.vmem [resolvable:$true] %s36_s9  ;;  %s61_s12 = int_to_ptr.hbm [resolvable:$true] %s60_s12 }
   0x5   :  { %s6403_s13 = smov 128   ;;  %s6404_s14 = smov 8  }
   0x6   :  { %42 = dma.hbm_to_vmem [thread:$0]  %s35_s29, 2048, %s37_s9, [#allocation6], %s6403_s13, %s6403_s13, %s6404_s14  }
   0x7   :  { %s6405_s15 = smov [#allocation8]   ;;  %s21_s1 = sshll.u32 %s9879_s0, 4  ;;  %s22_s1 = int_to_ptr.hbm [resolvable:$true] %s21_s1 }
   0x8   :  { %s62_s16 = sshll.u32 %s6405_s15, 4  ;;  %s47_s20 = sshll.u32 %s9881_s2, 4  ;;  %s63_s16 = int_to_ptr.vmem [resolvable:$true] %s62_s16  ;;  %s48_s20 = int_to_ptr.hbm [resolvable:$true] %s47_s20 }
   0x9   :  { %68 = dma.hbm_to_vmem [thread:$0]  %s61_s12, 512, %s63_s16, [#allocation9], %s6403_s13, %s6403_s13, %s6404_s14  }
   0xa   :  { %s6406_s21 = smov [#allocation2]   ;;  %s6407_s23 = smov [#allocation7]  }
   0xb   :  { %s23_s22 = sshll.u32 %s6406_s21, 4  ;;  %s49_s0 = sshll.u32 %s6407_s23, 4  ;;  %s24_s22 = int_to_ptr.vmem [resolvable:$true] %s23_s22  ;;  %s50_s0 = int_to_ptr.vmem [resolvable:$true] %s49_s0 }
   0xc   :  { %29 = dma.hbm_to_vmem [thread:$0]  %s22_s1, 2048, %s24_s22, [#allocation3], %s6403_s13, %s6403_s13, %s6404_s14  }
   0xd   :  { %s75_s26 = sshll.u32 %s9884_s5, 4  ;;  %s6408_s2 = smov [#allocation10]   ;;  %s76_s26 = int_to_ptr.hbm [resolvable:$true] %s75_s26 }
   0xe   :  { %55 = dma.hbm_to_vmem [thread:$0]  %s48_s20, 512, %s50_s0, [#allocation6], %s6403_s13, %s6403_s13, %s6404_s14  }
   0xf   :  { %s77_s27 = sshll.u32 %s6408_s2, 4  ;;  %s78_s27 = int_to_ptr.vmem [resolvable:$true] %s77_s27 }
  0x10   :  { %83 = dma.hbm_to_vmem [thread:$0]  %s76_s26, 512, %s78_s27, [#allocation9], %s6403_s13, %s6403_s13, %s6404_s14  }
  0x11   :  { %6394 = dma.done.wait [#allocation3], 2048  }
  0x12   :  { %6395 = vsyncadd [#allocation3], 4294965248 }
  0x13   :  { %6396 = dma.done.wait [#allocation6], 2560  }
  0x14   :  { %6397 = vsyncadd [#allocation6], 4294964736 }
  0x15   :  { %6398 = dma.done.wait [#allocation9], 1024  }
  0x16   :  { %6399 = vsyncadd [#allocation9], 4294966272  ;;  %v147_v0 = vld [vmem:[#allocation8 + $0x18] sm:$0xff]  ;;  %v146_v2 = vld [vmem:[#allocation8 + $0x10] sm:$0xff]  ;;  %vm155_vm0 = vcmask 261120   ;;  %vm1795_vm1 = vcmask 1041409  }
  0x17   :  { %329 = vmatpush.msra.mxu1 %v147_v0  ;;  %v143_v1 = vld [vmem:[#allocation7 + $0x18] sm:$0xff]  ;;  %v142_v3 = vld [vmem:[#allocation7 + $0x10] sm:$0xff]  ;;  %v145_v4 = vld [vmem:[#allocation8 + $0x8] sm:$0xff]  ;;  %vm1797_vm2 = vcmask 1042434   ;;  %vm1799_vm3 = vcmask 1043459   ;;  %vm1801_vm4 = vcmask 1044484  }
  0x18   :  { %216 = vmatpush.msra.mxu0 %v143_v1  ;;  %v141_v5 = vld [vmem:[#allocation7 + $0x8] sm:$0xff]  ;;  %v108_v6 = vld [vmem:[#allocation2] sm:$0xff]  ;;  %v110_v11 = vld [vmem:[#allocation2 + $0x10] sm:$0xff]  ;;  %vm1803_vm5 = vcmask 1045509   ;;  %vm1805_vm6 = vcmask 1046534   ;;  %vm1807_vm7 = vcmask 1047559  }
  0x19   :  { %330 = vmatpush.msra.mxu1 %v146_v2  ;;  %v144_v7 = vld [vmem:[#allocation8] sm:$0xff]  ;;  %v109_v8 = vld [vmem:[#allocation2 + $0x8] sm:$0xff]  ;;  %3931 = vmatpush.msra.mxu3 %v108_v6  ;;  %v126_v14 = vld [vmem:[#allocation5 + $0x10] sm:$0xff]  ;;  %vm1930_vm8 = vcmask 64512   ;;  %s5551_s18 = sshll.u32 %s9887_s8, 4  ;;  %s5552_s18 = int_to_ptr.hbm [resolvable:$true] %s5551_s18 }
  0x1a   :  { %217 = vmatpush.msra.mxu0 %v142_v3  ;;  %v124_v9 = vld [vmem:[#allocation5] sm:$0xff]  ;;  %4069 = vmatpush.msra.mxu2 %v110_v11  ;;  %v125_v13 = vld [vmem:[#allocation5 + $0x8] sm:$0xff]  ;;  %v127_v15 = vld [vmem:[#allocation5 + $0x18] sm:$0xff] }
  0x1b   :  { %331 = vmatpush.msra.mxu1 %v145_v4  ;;  %v140_v10 = vld [vmem:[#allocation7] sm:$0xff]  ;;  %4000 = vmatpush.msrb.mxu3 %v109_v8  ;;  %v111_v16 = vld [vmem:[#allocation2 + $0x18] sm:$0xff]  ;;  %v129_v18 = vld [vmem:[#allocation5 + $0x28] sm:$0xff] }
  0x1c   :  { %218 = vmatpush.msra.mxu0 %v141_v5  ;;  %v112_v12 = vld [vmem:[#allocation2 + $0x20] sm:$0xff]  ;;  %v113_v19 = vld [vmem:[#allocation2 + $0x28] sm:$0xff]  ;;  %v130_v20 = vld [vmem:[#allocation5 + $0x30] sm:$0xff] }
  0x1d   :  { %332 = vmatpush.msra.mxu1 %v144_v7  ;;  %4207 = vmatpush.msrb.mxu2 %v112_v12  ;;  %v128_v17 = vld [vmem:[#allocation5 + $0x20] sm:$0xff]  ;;  %v114_v21 = vld [vmem:[#allocation2 + $0x30] sm:$0xff]  ;;  %v131_v22 = vld [vmem:[#allocation5 + $0x38] sm:$0xff] }
  0x1e   :  { %5582 = vmatmul.msk.f32.vlgmr.msra.gmra.mxu1 %vm155_vm0, %v124_v9  ;;  %219 = vmatpush.msra.mxu0 %v140_v10  ;;  %v115_v23 = vld [vmem:[#allocation2 + $0x38] sm:$0xff]  ;;  %v6505_v43 = vld [vmem:[%s9883_s4] ss:$0 sm:$0xff] }
  0x1f   :  { %5566 = vmatmul.msk.f32.vlgmr.msra.gmra.mxu0 %vm155_vm0, %v108_v6  ;;  %v132_v50 = vld [vmem:[#allocation5 + $0x40] sm:$0xff] }
  0x20   :  { %v116_v51 = vld [vmem:[#allocation2 + $0x40] sm:$0xff] }
  0x26   :  { %5583 = vmatmul.msk.f32.gmra.mxu1 %vm155_vm0, %v125_v13 }
  0x27   :  { %5567 = vmatmul.msk.f32.gmra.mxu0 %vm155_vm0, %v109_v8 }
  0x2e   :  { %5584 = vmatmul.msk.f32.gmra.mxu1 %vm155_vm0, %v126_v14 }
  0x2f   :  { %5568 = vmatmul.msk.f32.gmra.mxu0 %vm155_vm0, %v110_v11 }
  0x36   :  { %5585 = vmatmul.msk.f32.gmra.mxu1 %vm155_vm0, %v127_v15 }
  0x37   :  { %5569 = vmatmul.msk.f32.gmra.mxu0 %vm155_vm0, %v111_v16 }
  0x3e   :  { %5586 = vmatmul.msk.f32.gmra.mxu1 %vm155_vm0, %v128_v17 }
  0x3f   :  { %5570 = vmatmul.msk.f32.gmra.mxu0 %vm155_vm0, %v112_v12 }
  0x46   :  { %5587 = vmatmul.msk.f32.gmra.mxu1 %vm155_vm0, %v129_v18 }
  0x47   :  { %5571 = vmatmul.msk.f32.gmra.mxu0 %vm155_vm0, %v113_v19 }
  0x4e   :  { %5588 = vmatmul.msk.f32.gmra.mxu1 %vm155_vm0, %v130_v20 }
  0x4f   :  { %5572 = vmatmul.msk.f32.gmra.mxu0 %vm155_vm0, %v114_v21 }
  0x56   :  { %5589 = vmatmul.msk.f32.gmra.mxu1 %vm155_vm0, %v131_v22 }
  0x57   :  { %5573 = vmatmul.msk.f32.gmra.mxu0 %vm155_vm0, %v115_v23 }
  0x5e   :  { %5590 = vmatmul.msk.f32.gmra.mxu1 %vm155_vm0, %v132_v50  ;;  %v133_v50 = vld [vmem:[#allocation5 + $0x48] sm:$0xff] }
  0x5f   :  { %5574 = vmatmul.msk.f32.gmra.mxu0 %vm155_vm0, %v116_v51  ;;  %v117_v51 = vld [vmem:[#allocation2 + $0x48] sm:$0xff] }
  0x66   :  { %5591 = vmatmul.msk.f32.gmra.mxu1 %vm155_vm0, %v133_v50 }
  0x67   :  { %5575 = vmatmul.msk.f32.gmra.mxu0 %vm155_vm0, %v117_v51 }
  0x9b   :  { %v334_v24 = vpop.f32.mrf.mxu1 }
  0x9c   :  { %v221_v25 = vpop.f32.mrf.mxu0  ;;  %v510_v26 = vperm.slane %v334_v24, 0  ;;  %v401_v27 = vrot.slane %v334_v24, 4  ;;  %v399_v28 = vrot.slane %v334_v24, 2  ;;  %v398_v29 = vrot.slane %v334_v24, 1 }
  0x9d   :  { %v402_v30 = vrot.slane %v334_v24, 5  ;;  %v400_v31 = vrot.slane %v334_v24, 3  ;;  %v403_v38 = vrot.slane %v334_v24, 6  ;;  %v404_v47 = vrot.slane %v334_v24, 7 }
  0x9e   :  { %v766_v32 = vadd.f32 %v510_v26, %v221_v25  ;;  %v514_v33 = vperm.slane %v401_v27, 0  ;;  %v512_v34 = vperm.slane %v399_v28, 0  ;;  %v511_v35 = vperm.slane %v398_v29, 0 }
  0x9f   :  { %v515_v36 = vperm.slane %v402_v30, 0  ;;  %v513_v37 = vperm.slane %v400_v31, 0  ;;  %v516_v46 = vperm.slane %v403_v38, 0  ;;  %v517_v55 = vperm.slane %v404_v47, 0 }
  0xa0   :  { %5652 = vtanh.f32 %v766_v32  ;;  %v770_v39 = vadd.f32 %v514_v33, %v221_v25  ;;  %v768_v40 = vadd.f32 %v512_v34, %v221_v25  ;;  %v767_v41 = vadd.f32 %v511_v35, %v221_v25 }
  0xa1   :  { %v771_v42 = vadd.f32 %v515_v36, %v221_v25  ;;  %v769_v45 = vadd.f32 %v513_v37, %v221_v25  ;;  %v772_v54 = vadd.f32 %v516_v46, %v221_v25  ;;  %v773_v2 = vadd.f32 %v517_v55, %v221_v25 }
  0xa2   :  { %5654 = vtanh.f32 %v770_v39 }
  0xa3   :  { %v6507_v44 = vpop.f32.mrf.mxu1  ;;  %5656 = vtanh.f32 %v768_v40 }
  0xa4   :  { %5658 = vtanh.f32 %v767_v41  ;;  %v518_v48 = vperm.slane %v6507_v44, 0  ;;  %v6510_v49 = vpop.f32.mrf.mxu0  ;;  %v405_v58 = vrot.slane %v6507_v44, 1  ;;  %v407_v0 = vrot.slane %v6507_v44, 3 }
  0xa5   :  { %5660 = vtanh.f32 %v771_v42  ;;  %v406_v3 = vrot.slane %v6507_v44, 2  ;;  %v408_v14 = vrot.slane %v6507_v44, 4  ;;  %v410_v19 = vrot.slane %v6507_v44, 6 }
  0xa6   :  { %v5653_v52 = vpop.eup %5652  ;;  %5662 = vtanh.f32 %v769_v45  ;;  %v774_v57 = vadd.f32 %v518_v48, %v6510_v49  ;;  %v519_v6 = vperm.slane %v405_v58, 0  ;;  %v521_v9 = vperm.slane %v407_v0, 0 }
  0xa7   :  { %v1025_v53 = vmul.f32 %v5653_v52, %v6505_v43  ;;  %5664 = vtanh.f32 %v772_v54  ;;  %v520_v11 = vperm.slane %v406_v3, 0  ;;  %v409_v22 = vrot.slane %v6507_v44, 5 }
  0xa8   :  { %v5655_v56 = vpop.eup %5654  ;;  %5666 = vtanh.f32 %v774_v57  ;;  %v775_v13 = vadd.f32 %v519_v6, %v6510_v49  ;;  %v777_v18 = vadd.f32 %v521_v9, %v6510_v49  ;;  %v522_v24 = vperm.slane %v408_v14, 0 }
  0xa9   :  { %v5657_v59 = vpop.eup %5656  ;;  %v1153_v60 = vsel %vm155_vm0, %v1025_v53, 0.0  ;;  %v1029_v61 = vmul.f32 %v5655_v56, %v6505_v43  ;;  %5668 = vtanh.f32 %v773_v2  ;;  %v776_v21 = vadd.f32 %v520_v11, %v6510_v49 }
  0xaa   :  { %v5659_v62 = vpop.eup %5658  ;;  %1154 = vadd.xlane.f32.xlu0 %v1153_v60  ;;  %v1027_v63 = vmul.f32 %v5657_v59, %v6505_v43  ;;  %5670 = vtanh.f32 %v775_v13  ;;  %v524_v29 = vperm.slane %v410_v19, 0  ;;  %v523_v30 = vperm.slane %v409_v22, 0 }
  0xab   :  { %v1165_v1 = vsel %vm155_vm0, %v1029_v61, 0.0  ;;  %v5661_v4 = vpop.eup %5660  ;;  %v1026_v8 = vmul.f32 %v5659_v62, %v6505_v43  ;;  %v6538_v28 = vpop.f32.mrf.mxu1  ;;  %5672 = vtanh.f32 %v777_v18  ;;  %v411_v31 = vrot.slane %v6507_v44, 7 }
  0xac   :  { %1166 = vadd.xlane.f32.xlu2 %v1165_v1  ;;  %v1159_v5 = vsel %vm155_vm0, %v1027_v63, 0.0  ;;  %v5663_v7 = vpop.eup %5662  ;;  %v1030_v10 = vmul.f32 %v5661_v4, %v6505_v43  ;;  %5674 = vtanh.f32 %v776_v21  ;;  %v778_v33 = vadd.f32 %v522_v24, %v6510_v49  ;;  %v6550_v47 = vpop.f32.mrf.mxu0  ;;  %v134_v24 = vld [vmem:[#allocation5 + $0x50] sm:$0xff] }
  0xad   :  { %1160 = vadd.xlane.f32.xlu1 %v1159_v5  ;;  %v1028_v12 = vmul.f32 %v5663_v7, %v6505_v43  ;;  %v5665_v15 = vpop.eup %5664  ;;  %v1156_v16 = vsel %vm155_vm0, %v1026_v8, 0.0  ;;  %v412_v34 = vrot.slane %v6538_v28, 1  ;;  %v780_v38 = vadd.f32 %v524_v29, %v6510_v49  ;;  %5592 = vmatmul.msk.f32.gmra.mxu1 %vm155_vm0, %v134_v24 }
  0xae   :  { %v5667_v17 = vpop.eup %5666  ;;  %v1168_v20 = vsel %vm155_vm0, %v1030_v10, 0.0  ;;  %v1031_v26 = vmul.f32 %v5665_v15, %v6505_v43  ;;  %v779_v39 = vadd.f32 %v523_v30, %v6510_v49  ;;  %v525_v40 = vperm.slane %v411_v31, 0 }
  0xaf   :  { %v1162_v23 = vsel %vm155_vm0, %v1028_v12, 0.0  ;;  %v5669_v25 = vpop.eup %5668  ;;  %v1033_v27 = vmul.f32 %v5667_v17, %v6505_v43  ;;  %5676 = vtanh.f32 %v778_v33  ;;  %v527_v44 = vperm.slane %v412_v34, 0 }
  0xb0   :  { %v1032_v32 = vmul.f32 %v5669_v25, %v6505_v43  ;;  %v1171_v35 = vsel %vm155_vm0, %v1031_v26, 0.0  ;;  %v5671_v37 = vpop.eup %5670  ;;  %v526_v48 = vperm.slane %v6538_v28, 0  ;;  %5678 = vtanh.f32 %v780_v38  ;;  %v118_v25 = vld [vmem:[#allocation2 + $0x50] sm:$0xff] }
  0xb1   :  { %v1177_v36 = vsel %vm155_vm0, %v1033_v27, 0.0  ;;  %v5673_v41 = vpop.eup %5672  ;;  %v1034_v46 = vmul.f32 %v5671_v37, %v6505_v43  ;;  %5680 = vtanh.f32 %v779_v39  ;;  %v781_v53 = vadd.f32 %v525_v40, %v6510_v49  ;;  %5576 = vmatmul.msk.f32.gmra.mxu0 %vm155_vm0, %v118_v25 }
  0xb2   :  { %1157 = vadd.xlane.f32.xlu0 %v1156_v16  ;;  %v1174_v42 = vsel %vm155_vm0, %v1032_v32, 0.0  ;;  %v5675_v45 = vpop.eup %5674  ;;  %v1036_v52 = vmul.f32 %v5673_v41, %v6505_v43  ;;  %v783_v55 = vadd.f32 %v527_v44, %v6550_v47  ;;  %v413_v56 = vrot.slane %v6538_v28, 2 }
  0xb3   :  { %v1035_v54 = vmul.f32 %v5675_v45, %v6505_v43  ;;  %v1180_v57 = vsel %vm155_vm0, %v1034_v46, 0.0  ;;  %v782_v58 = vadd.f32 %v526_v48, %v6550_v47  ;;  %v415_v60 = vrot.slane %v6538_v28, 4  ;;  %v6580_v22 = vpop.f32.mrf.mxu1 }
  0xb4   :  { %1169 = vadd.xlane.f32.xlu2 %v1168_v20  ;;  %v1186_v61 = vsel %vm155_vm0, %v1036_v52, 0.0  ;;  %5682 = vtanh.f32 %v781_v53  ;;  %v414_v62 = vrot.slane %v6538_v28, 3  ;;  %v528_v0 = vperm.slane %v413_v56, 0  ;;  %v6593_v37 = vpop.f32.mrf.mxu0 }
  0xb5   :  { %1163 = vadd.xlane.f32.xlu1 %v1162_v23  ;;  %v5677_v59 = vpop.eup %5676  ;;  %v1183_v63 = vsel %vm155_vm0, %v1035_v54, 0.0  ;;  %5684 = vtanh.f32 %v783_v55  ;;  %v530_v3 = vperm.slane %v415_v60, 0  ;;  %v416_v8 = vrot.slane %v6538_v28, 5 }
  0xb6   :  { %v5679_v49 = vpop.eup %5678  ;;  %v1037_v2 = vmul.f32 %v5677_v59, %v6505_v43  ;;  %5686 = vtanh.f32 %v782_v58  ;;  %v529_v5 = vperm.slane %v414_v62, 0  ;;  %v784_v7 = vadd.f32 %v528_v0, %v6550_v47 }
  0xb7   :  { %v5681_v1 = vpop.eup %5680  ;;  %v1039_v4 = vmul.f32 %v5679_v49, %v6505_v43  ;;  %v418_v11 = vrot.slane %v6538_v28, 7  ;;  %v786_v13 = vadd.f32 %v530_v3, %v6550_v47  ;;  %v417_v17 = vrot.slane %v6538_v28, 6 }
  0xb8   :  { %v1038_v6 = vmul.f32 %v5681_v1, %v6505_v43  ;;  %v1189_v10 = vsel %vm155_vm0, %v1037_v2, 0.0  ;;  %v785_v16 = vadd.f32 %v529_v5, %v6550_v47  ;;  %5688 = vtanh.f32 %v784_v7 }
  0xb9   :  { %v1195_v15 = vsel %vm155_vm0, %v1039_v4, 0.0  ;;  %v531_v19 = vperm.slane %v416_v8, 0  ;;  %v533_v23 = vperm.slane %v418_v11, 0  ;;  %5690 = vtanh.f32 %v786_v13 }
  0xba   :  { %1172 = vadd.xlane.f32.xlu0 %v1171_v35  ;;  %v5683_v9 = vpop.eup %5682  ;;  %v1192_v18 = vsel %vm155_vm0, %v1038_v6, 0.0  ;;  %5692 = vtanh.f32 %v785_v16  ;;  %v532_v27 = vperm.slane %v417_v17, 0  ;;  %v420_v29 = vrot.slane %v6580_v22, 2 }
  0xbb   :  { %v5685_v12 = vpop.eup %5684  ;;  %v1040_v20 = vmul.f32 %v5683_v9, %v6505_v43  ;;  %v787_v28 = vadd.f32 %v531_v19, %v6550_v47  ;;  %v789_v32 = vadd.f32 %v533_v23, %v6550_v47  ;;  %v419_v33 = vrot.slane %v6580_v22, 1  ;;  %v6614_v5 = vpop.f32.mrf.mxu1  ;;  %v119_v19 = vld [vmem:[#allocation2 + $0x58] sm:$0xff] }
  0xbc   :  { %1178 = vadd.xlane.f32.xlu2 %v1177_v36  ;;  %v5687_v14 = vpop.eup %5686  ;;  %v1042_v21 = vmul.f32 %v5685_v12, %v6505_v43  ;;  %v534_v36 = vperm.slane %v6580_v22, 0  ;;  %v788_v38 = vadd.f32 %v532_v27, %v6550_v47  ;;  %v536_v40 = vperm.slane %v420_v29, 0  ;;  %v6624_v17 = vpop.f32.mrf.mxu0  ;;  %5577 = vmatmul.msk.f32.gmra.mxu0 %vm155_vm0, %v119_v19 }
  0xbd   :  { %1175 = vadd.xlane.f32.xlu1 %v1174_v42  ;;  %v1041_v26 = vmul.f32 %v5687_v14, %v6505_v43  ;;  %v1198_v30 = vsel %vm155_vm0, %v1040_v20, 0.0  ;;  %5694 = vtanh.f32 %v787_v28  ;;  %v535_v44 = vperm.slane %v419_v33, 0 }
  0xbe   :  { %v1204_v31 = vsel %vm155_vm0, %v1042_v21, 0.0  ;;  %v5689_v34 = vpop.eup %5688  ;;  %5696 = vtanh.f32 %v789_v32  ;;  %v790_v45 = vadd.f32 %v534_v36, %v6593_v37  ;;  %v792_v50 = vadd.f32 %v536_v40, %v6593_v37 }
  0xbf   :  { %v1201_v35 = vsel %vm155_vm0, %v1041_v26, 0.0  ;;  %v5691_v39 = vpop.eup %5690  ;;  %v1043_v42 = vmul.f32 %v5689_v34, %v6505_v43  ;;  %5698 = vtanh.f32 %v788_v38  ;;  %v421_v47 = vrot.slane %v6580_v22, 3 }
  0xc0   :  { %v5693_v41 = vpop.eup %5692  ;;  %v1045_v46 = vmul.f32 %v5691_v39, %v6505_v43  ;;  %v791_v52 = vadd.f32 %v535_v44, %v6593_v37  ;;  %5700 = vtanh.f32 %v790_v45  ;;  %v423_v54 = vrot.slane %v6580_v22, 5 }
  0xc1   :  { %v1044_v48 = vmul.f32 %v5693_v41, %v6505_v43  ;;  %v1207_v51 = vsel %vm155_vm0, %v1043_v42, 0.0  ;;  %5702 = vtanh.f32 %v792_v50  ;;  %v537_v59 = vperm.slane %v421_v47, 0 }
  0xc2   :  { %1181 = vadd.xlane.f32.xlu0 %v1180_v57  ;;  %v1213_v56 = vsel %vm155_vm0, %v1045_v46, 0.0  ;;  %v422_v57 = vrot.slane %v6580_v22, 4  ;;  %5704 = vtanh.f32 %v791_v52  ;;  %v539_v49 = vperm.slane %v423_v54, 0 }
  0xc3   :  { %v5695_v53 = vpop.eup %5694  ;;  %v1210_v58 = vsel %vm155_vm0, %v1044_v48, 0.0  ;;  %v424_v0 = vrot.slane %v6580_v22, 6  ;;  %v793_v3 = vadd.f32 %v537_v59, %v6593_v37  ;;  %v425_v13 = vrot.slane %v6580_v22, 7 }
  0xc4   :  { %1187 = vadd.xlane.f32.xlu2 %v1186_v61  ;;  %v5697_v55 = vpop.eup %5696  ;;  %v1046_v61 = vmul.f32 %v5695_v53, %v6505_v43  ;;  %v795_v8 = vadd.f32 %v539_v49, %v6593_v37  ;;  %v426_v25 = vrot.slane %v6614_v5, 1  ;;  %v428_v29 = vrot.slane %v6614_v5, 3 }
  0xc5   :  { %1184 = vadd.xlane.f32.xlu1 %v1183_v63  ;;  %v5699_v60 = vpop.eup %5698  ;;  %v1048_v62 = vmul.f32 %v5697_v55, %v6505_v43  ;;  %v538_v63 = vperm.slane %v422_v57, 0  ;;  %v540_v12 = vperm.slane %v424_v0, 0  ;;  %5706 = vtanh.f32 %v793_v3  ;;  %v6652_v57 = vpop.f32.mrf.mxu1 }
  0xc6   :  { %v5701_v1 = vpop.eup %5700  ;;  %v1047_v2 = vmul.f32 %v5699_v60, %v6505_v43  ;;  %v1216_v4 = vsel %vm155_vm0, %v1046_v61, 0.0  ;;  %5708 = vtanh.f32 %v795_v8  ;;  %v541_v23 = vperm.slane %v425_v13, 0 }
  0xc7   :  { %v5703_v6 = vpop.eup %5702  ;;  %v1222_v7 = vsel %vm155_vm0, %v1048_v62, 0.0  ;;  %v794_v11 = vadd.f32 %v538_v63, %v6593_v37  ;;  %v796_v22 = vadd.f32 %v540_v12, %v6593_v37  ;;  %v543_v33 = vperm.slane %v426_v25, 0  ;;  %v136_v12 = vld [vmem:[#allocation5 + $0x60] sm:$0xff] }
  0xc8   :  { %v5705_v9 = vpop.eup %5704  ;;  %v1219_v14 = vsel %vm155_vm0, %v1047_v2, 0.0  ;;  %v1051_v16 = vmul.f32 %v5703_v6, %v6505_v43  ;;  %v545_v36 = vperm.slane %v428_v29, 0  ;;  %v431_v48 = vrot.slane %v6614_v5, 6 }
  0xc9   :  { %v1050_v20 = vmul.f32 %v5705_v9, %v6505_v43  ;;  %5710 = vtanh.f32 %v794_v11  ;;  %v799_v41 = vadd.f32 %v543_v33, %v6624_v17  ;;  %v432_v60 = vrot.slane %v6614_v5, 7 }
  0xca   :  { %1190 = vadd.xlane.f32.xlu0 %v1189_v10  ;;  %v1049_v10 = vmul.f32 %v5701_v1, %v6505_v43  ;;  %v1231_v26 = vsel %vm155_vm0, %v1051_v16, 0.0  ;;  %5712 = vtanh.f32 %v796_v22  ;;  %v801_v46 = vadd.f32 %v545_v36, %v6624_v17 }
  0xcb   :  { %v5707_v27 = vpop.eup %5706  ;;  %v1228_v28 = vsel %vm155_vm0, %v1050_v20, 0.0  ;;  %v433_v49 = vrot.slane %v6652_v57, 1  ;;  %v550_v11 = vperm.slane %v6652_v57, 0 }
  0xcc   :  { %1196 = vadd.xlane.f32.xlu2 %v1195_v15  ;;  %v542_v15 = vperm.slane %v6614_v5, 0  ;;  %v1225_v21 = vsel %vm155_vm0, %v1049_v10, 0.0  ;;  %v5709_v32 = vpop.eup %5708  ;;  %v6664_v10 = vpop.f32.mrf.mxu0 }
  0xcd   :  { %1193 = vadd.xlane.f32.xlu1 %v1192_v18  ;;  %v135_v18 = vld [vmem:[#allocation5 + $0x58] sm:$0xff]  ;;  %v1054_v38 = vmul.f32 %v5709_v32, %v6505_v43  ;;  %v806_v20 = vadd.f32 %v550_v11, %v6664_v10 }
  0xce   :  { %5593 = vmatmul.msk.f32.gmra.mxu1 %vm155_vm0, %v135_v18  ;;  %v798_v24 = vadd.f32 %v542_v15, %v6624_v17  ;;  %v434_v18 = vrot.slane %v6652_v57, 2 }
  0xcf   :  { %v5711_v34 = vpop.eup %5710  ;;  %v1240_v50 = vsel %vm155_vm0, %v1054_v38, 0.0 }
  0xd0   :  { %5714 = vtanh.f32 %v798_v24  ;;  %v1053_v40 = vmul.f32 %v5711_v34, %v6505_v43  ;;  %v5713_v42 = vpop.eup %5712 }
  0xd1   :  { %v1055_v55 = vmul.f32 %v5713_v42, %v6505_v43 }
  0xd2   :  { %1199 = vadd.xlane.f32.xlu0 %v1198_v30  ;;  %v797_v30 = vadd.f32 %v541_v23, %v6593_v37  ;;  %v429_v37 = vrot.slane %v6614_v5, 4  ;;  %v1237_v52 = vsel %vm155_vm0, %v1053_v40, 0.0  ;;  %v436_v23 = vrot.slane %v6652_v57, 4 }
  0xd3   :  { %v1243_v63 = vsel %vm155_vm0, %v1055_v55, 0.0 }
  0xd4   :  { %1205 = vadd.xlane.f32.xlu2 %v1204_v31  ;;  %v427_v31 = vrot.slane %v6614_v5, 2  ;;  %5716 = vtanh.f32 %v797_v30  ;;  %v546_v53 = vperm.slane %v429_v37, 0  ;;  %v554_v30 = vperm.slane %v436_v23, 0 }
  0xd5   :  { %1202 = vadd.xlane.f32.xlu1 %v1201_v35  ;;  %v1052_v35 = vmul.f32 %v5707_v27, %v6505_v43  ;;  %5718 = vtanh.f32 %v799_v41  ;;  %v552_v27 = vperm.slane %v434_v18, 0 }
  0xd6   :  { %v544_v39 = vperm.slane %v427_v31, 0  ;;  %v5715_v45 = vpop.eup %5714  ;;  %5720 = vtanh.f32 %v801_v46  ;;  %v802_v62 = vadd.f32 %v546_v53, %v6624_v17  ;;  %5594 = vmatmul.msk.f32.gmra.mxu1 %vm155_vm0, %v136_v12  ;;  %v810_v41 = vadd.f32 %v554_v30, %v6664_v10 }
  0xd7   :  { %v1234_v44 = vsel %vm155_vm0, %v1052_v35, 0.0  ;;  %v808_v34 = vadd.f32 %v552_v27, %v6664_v10  ;;  %v437_v35 = vrot.slane %v6652_v57, 5 }
  0xd8   :  { %v800_v47 = vadd.f32 %v544_v39, %v6624_v17  ;;  %v439_v39 = vrot.slane %v6652_v57, 7 }
  0xda   :  { %1208 = vadd.xlane.f32.xlu0 %v1207_v51  ;;  %v430_v51 = vrot.slane %v6614_v5, 5  ;;  %v5717_v54 = vpop.eup %5716  ;;  %5722 = vtanh.f32 %v800_v47 }
  0xdb   :  { %v1056_v61 = vmul.f32 %v5717_v54, %v6505_v43  ;;  %v5719_v1 = vpop.eup %5718  ;;  %5724 = vtanh.f32 %v802_v62  ;;  %v137_v54 = vld [vmem:[#allocation5 + $0x68] sm:$0xff] }
  0xdc   :  { %1214 = vadd.xlane.f32.xlu2 %v1213_v56  ;;  %v1057_v56 = vmul.f32 %v5715_v45, %v6505_v43  ;;  %v547_v59 = vperm.slane %v430_v51, 0  ;;  %v5721_v6 = vpop.eup %5720  ;;  %v1058_v9 = vmul.f32 %v5719_v1, %v6505_v43  ;;  %v438_v45 = vrot.slane %v6652_v57, 6  ;;  %v6694_v51 = vpop.f32.mrf.mxu1  ;;  %v121_v62 = vld [vmem:[#allocation2 + $0x68] sm:$0xff] }
  0xdd   :  { %1211 = vadd.xlane.f32.xlu1 %v1210_v58  ;;  %v548_v58 = vperm.slane %v431_v48, 0  ;;  %v1246_v5 = vsel %vm155_vm0, %v1056_v61, 0.0  ;;  %v1060_v13 = vmul.f32 %v5721_v6, %v6505_v43  ;;  %v555_v48 = vperm.slane %v437_v35, 0  ;;  %v6707_v1 = vpop.f32.mrf.mxu0 }
  0xde   :  { %v1249_v0 = vsel %vm155_vm0, %v1057_v56, 0.0  ;;  %v803_v3 = vadd.f32 %v547_v59, %v6624_v17  ;;  %v1252_v19 = vsel %vm155_vm0, %v1058_v9, 0.0  ;;  %v556_v55 = vperm.slane %v438_v45, 0  ;;  %5595 = vmatmul.msk.f32.gmra.mxu1 %vm155_vm0, %v137_v54 }
  0xdf   :  { %v804_v2 = vadd.f32 %v548_v58, %v6624_v17  ;;  %v1258_v24 = vsel %vm155_vm0, %v1060_v13, 0.0  ;;  %v811_v56 = vadd.f32 %v555_v48, %v6664_v10  ;;  %v440_v61 = vrot.slane %v6694_v51, 1 }
  0xe0   :  { %v5723_v8 = vpop.eup %5722 }
  0xe1   :  { %5726 = vtanh.f32 %v804_v2  ;;  %v1059_v15 = vmul.f32 %v5723_v8, %v6505_v43  ;;  %v5725_v22 = vpop.eup %5724  ;;  %v812_v2 = vadd.f32 %v556_v55, %v6664_v10 }
  0xe2   :  { %1217 = vadd.xlane.f32.xlu0 %v1216_v4  ;;  %v549_v4 = vperm.slane %v432_v60, 0  ;;  %5728 = vtanh.f32 %v803_v3  ;;  %v1061_v29 = vmul.f32 %v5725_v22, %v6505_v43 }
  0xe4   :  { %1223 = vadd.xlane.f32.xlu2 %v1222_v7  ;;  %v551_v7 = vperm.slane %v433_v49, 0  ;;  %v1261_v38 = vsel %vm155_vm0, %v1061_v29, 0.0  ;;  %v445_v29 = vrot.slane %v6694_v51, 6  ;;  %v6734_v35 = vpop.f32.mrf.mxu1 }
  0xe5   :  { %1220 = vadd.xlane.f32.xlu1 %v1219_v14  ;;  %v805_v14 = vadd.f32 %v549_v4, %v6624_v17  ;;  %v435_v17 = vrot.slane %v6652_v57, 3  ;;  %v441_v57 = vrot.slane %v6694_v51, 2 }
  0xe6   :  { %v807_v16 = vadd.f32 %v551_v7, %v6664_v10  ;;  %v559_v7 = vperm.slane %v440_v61, 0 }
  0xe7   :  { %5730 = vtanh.f32 %v805_v14  ;;  %v5727_v25 = vpop.eup %5726  ;;  %v553_v32 = vperm.slane %v435_v17, 0  ;;  %v560_v4 = vperm.slane %v441_v57, 0 }
  0xe8   :  { %5732 = vtanh.f32 %v807_v16  ;;  %v1063_v31 = vmul.f32 %v5727_v25, %v6505_v43  ;;  %v815_v14 = vadd.f32 %v559_v7, %v6707_v1  ;;  %v444_v16 = vrot.slane %v6694_v51, 5 }
  0xe9   :  { %5734 = vtanh.f32 %v806_v20  ;;  %v816_v12 = vadd.f32 %v560_v4, %v6707_v1  ;;  %v443_v20 = vrot.slane %v6694_v51, 4 }
  0xea   :  { %1226 = vadd.xlane.f32.xlu0 %v1225_v21  ;;  %v120_v21 = vld [vmem:[#allocation2 + $0x60] sm:$0xff]  ;;  %v1267_v42 = vsel %vm155_vm0, %v1063_v31, 0.0  ;;  %5736 = vtanh.f32 %v808_v34 }
  0xeb   :  { %5578 = vmatmul.msk.f32.gmra.mxu0 %vm155_vm0, %v120_v21  ;;  %5738 = vtanh.f32 %v810_v41 }
  0xec   :  { %1232 = vadd.xlane.f32.xlu2 %v1231_v26  ;;  %v1255_v26 = vsel %vm155_vm0, %v1059_v15, 0.0 }
  0xed   :  { %1229 = vadd.xlane.f32.xlu1 %v1228_v28  ;;  %v5729_v28 = vpop.eup %5728 }
  0xee   :  { %v1062_v33 = vmul.f32 %v5729_v28, %v6505_v43  ;;  %v5731_v36 = vpop.eup %5730  ;;  %v562_v28 = vperm.slane %v443_v20, 0  ;;  %v452_v20 = vrot.slane %v6734_v35, 6 }
  0xef   :  { %v5733_v40 = vpop.eup %5732 }
  0xf0   :  { %v5735_v37 = vpop.eup %5734  ;;  %v1264_v46 = vsel %vm155_vm0, %v1062_v33, 0.0  ;;  %v1066_v47 = vmul.f32 %v5733_v40, %v6505_v43 }
  0xf1   :  { %v1065_v53 = vmul.f32 %v5735_v37, %v6505_v43  ;;  %v5737_v49 = vpop.eup %5736  ;;  %v818_v37 = vadd.f32 %v562_v28, %v6707_v1 }
  0xf2   :  { %1235 = vadd.xlane.f32.xlu0 %v1234_v44  ;;  %v809_v44 = vadd.f32 %v553_v32, %v6664_v10  ;;  %v1276_v59 = vsel %vm155_vm0, %v1066_v47, 0.0  ;;  %v5739_v3 = vpop.eup %5738  ;;  %v6746_v47 = vpop.f32.mrf.mxu0 }
  0xf3   :  { %5579 = vmatmul.msk.f32.gmra.mxu0 %vm155_vm0, %v121_v62  ;;  %v1069_v9 = vmul.f32 %v5739_v3, %v6505_v43 }
  0xf4   :  { %1241 = vadd.xlane.f32.xlu2 %v1240_v50  ;;  %v1064_v50 = vmul.f32 %v5731_v36, %v6505_v43  ;;  %5740 = vtanh.f32 %v809_v44  ;;  %v446_v44 = vrot.slane %v6694_v51, 7 }
  0xf5   :  { %1238 = vadd.xlane.f32.xlu1 %v1237_v52  ;;  %v557_v52 = vperm.slane %v439_v39, 0  ;;  %5742 = vtanh.f32 %v811_v56 }
  0xf6   :  { %v1270_v58 = vsel %vm155_vm0, %v1064_v50, 0.0  ;;  %v565_v56 = vperm.slane %v446_v44, 0 }
  0xf7   :  { %v813_v60 = vadd.f32 %v557_v52, %v6664_v10  ;;  %v442_v10 = vrot.slane %v6694_v51, 3 }
  0xf9   :  { %5744 = vtanh.f32 %v813_v60  ;;  %v561_v22 = vperm.slane %v442_v10, 0 }
  0xfa   :  { %1244 = vadd.xlane.f32.xlu0 %v1243_v63  ;;  %v1273_v63 = vsel %vm155_vm0, %v1065_v53, 0.0  ;;  %v5741_v6 = vpop.eup %5740  ;;  %5746 = vtanh.f32 %v812_v2  ;;  %v138_v53 = vld [vmem:[#allocation5 + $0x70] sm:$0xff] }
  0xfb   :  { %v1068_v11 = vmul.f32 %v5741_v6, %v6505_v43  ;;  %v5743_v15 = vpop.eup %5742  ;;  %v817_v33 = vadd.f32 %v561_v22, %v6707_v1  ;;  %5596 = vmatmul.msk.f32.gmra.mxu1 %vm155_vm0, %v138_v53  ;;  %v122_v2 = vld [vmem:[#allocation2 + $0x70] sm:$0xff] }
  0xfc   :  { %1250 = vadd.xlane.f32.xlu2 %v1249_v0  ;;  %v558_v0 = vperm.slane %v6694_v51, 0  ;;  %v1070_v17 = vmul.f32 %v5743_v15, %v6505_v43  ;;  %5580 = vmatmul.msk.f32.gmra.mxu0 %vm155_vm0, %v122_v2 }
  0xfd   :  { %1247 = vadd.xlane.f32.xlu1 %v1246_v5  ;;  %v1067_v5 = vmul.f32 %v5737_v49, %v6505_v43  ;;  %v1282_v21 = vsel %vm155_vm0, %v1068_v11, 0.0  ;;  %v449_v49 = vrot.slane %v6734_v35, 3 }
  0xfe   :  { %v814_v8 = vadd.f32 %v558_v0, %v6707_v1  ;;  %v1288_v34 = vsel %vm155_vm0, %v1070_v17, 0.0  ;;  %v448_v0 = vrot.slane %v6734_v35, 2 }
  0xff   :  { %v1279_v13 = vsel %vm155_vm0, %v1067_v5, 0.0  ;;  %v5745_v18 = vpop.eup %5744 }
 0x100   :  { %5748 = vtanh.f32 %v814_v8  ;;  %v5747_v23 = vpop.eup %5746  ;;  %v1072_v25 = vmul.f32 %v5745_v18, %v6505_v43  ;;  %v569_v8 = vperm.slane %v449_v49, 0  ;;  %v568_v11 = vperm.slane %v448_v0, 0 }
 0x101   :  { %5750 = vtanh.f32 %v816_v12  ;;  %v1071_v32 = vmul.f32 %v5747_v23, %v6505_v43  ;;  %v451_v23 = vrot.slane %v6734_v35, 5 }
 0x102   :  { %1253 = vadd.xlane.f32.xlu0 %v1252_v19  ;;  %v1285_v19 = vsel %vm155_vm0, %v1069_v9, 0.0  ;;  %5752 = vtanh.f32 %v815_v14  ;;  %v450_v14 = vrot.slane %v6734_v35, 4  ;;  %v824_v22 = vadd.f32 %v568_v11, %v6746_v47 }
 0x103   :  { %v1291_v45 = vsel %vm155_vm0, %v1071_v32, 0.0  ;;  %5754 = vtanh.f32 %v817_v33  ;;  %v6786_v32 = vpop.f32.mrf.mxu1  ;;  %v572_v33 = vperm.slane %v452_v20, 0 }
 0x104   :  { %1259 = vadd.xlane.f32.xlu2 %v1258_v24 }
 0x105   :  { %1256 = vadd.xlane.f32.xlu1 %v1255_v26  ;;  %v563_v26 = vperm.slane %v444_v16, 0 }
 0x106   :  { %v5749_v30 = vpop.eup %5748 }
 0x107   :  { %v5751_v36 = vpop.eup %5750  ;;  %v819_v39 = vadd.f32 %v563_v26, %v6707_v1  ;;  %v1073_v41 = vmul.f32 %v5749_v30, %v6505_v43 }
 0x108   :  { %v5753_v40 = vpop.eup %5752  ;;  %v1075_v50 = vmul.f32 %v5751_v36, %v6505_v43  ;;  %v571_v36 = vperm.slane %v451_v23, 0 }
 0x109   :  { %v1074_v52 = vmul.f32 %v5753_v40, %v6505_v43  ;;  %5756 = vtanh.f32 %v819_v39  ;;  %v1297_v51 = vsel %vm155_vm0, %v1073_v41, 0.0  ;;  %v5755_v61 = vpop.eup %5754 }
 0x10a   :  { %1262 = vadd.xlane.f32.xlu0 %v1261_v38  ;;  %v1294_v38 = vsel %vm155_vm0, %v1072_v25, 0.0  ;;  %5758 = vtanh.f32 %v818_v37  ;;  %v1303_v60 = vsel %vm155_vm0, %v1075_v50, 0.0  ;;  %v1076_v7 = vmul.f32 %v5755_v61, %v6505_v43  ;;  %v139_v61 = vld [vmem:[#allocation5 + $0x78] sm:$0xff] }
 0x10b   :  { %v1300_v62 = vsel %vm155_vm0, %v1074_v52, 0.0  ;;  %v570_v25 = vperm.slane %v450_v14, 0  ;;  %v454_v37 = vrot.slane %v6786_v32, 1  ;;  %v827_v50 = vadd.f32 %v571_v36, %v6746_v47  ;;  %5597 = vmatmul.msk.f32.gmra.mxu1 %vm155_vm0, %v139_v61 }
 0x10c   :  { %1268 = vadd.xlane.f32.xlu2 %v1267_v42  ;;  %v564_v42 = vperm.slane %v445_v29, 0  ;;  %v1306_v16 = vsel %vm155_vm0, %v1076_v7, 0.0  ;;  %v460_v36 = vrot.slane %v6786_v32, 7 }
 0x10d   :  { %1265 = vadd.xlane.f32.xlu1 %v1264_v46  ;;  %v566_v46 = vperm.slane %v6734_v35, 0  ;;  %v826_v41 = vadd.f32 %v570_v25, %v6746_v47 }
 0x10e   :  { %v820_v55 = vadd.f32 %v564_v42, %v6707_v1 }
 0x10f   :  { %v5757_v3 = vpop.eup %5756 }
 0x110   :  { %5760 = vtanh.f32 %v820_v55  ;;  %v5759_v6 = vpop.eup %5758 }
 0x111   :  { %v1077_v10 = vmul.f32 %v5759_v6, %v6505_v43 }
 0x112   :  { %1271 = vadd.xlane.f32.xlu0 %v1270_v58  ;;  %v822_v58 = vadd.f32 %v566_v46, %v6746_v47  ;;  %v828_v46 = vadd.f32 %v572_v33, %v6746_v47 }
 0x113   :  { %v1309_v17 = vsel %vm155_vm0, %v1077_v10, 0.0  ;;  %v123_v10 = vld [vmem:[#allocation2 + $0x78] sm:$0xff] }
 0x114   :  { %1277 = vadd.xlane.f32.xlu2 %v1276_v59  ;;  %v447_v59 = vrot.slane %v6734_v35, 1  ;;  %5762 = vtanh.f32 %v822_v58  ;;  %5581 = vmatmul.msk.f32.gmra.mxu0 %vm155_vm0, %v123_v10 }
 0x115   :  { %1274 = vadd.xlane.f32.xlu1 %v1273_v63  ;;  %v821_v63 = vadd.f32 %v565_v56, %v6707_v1  ;;  %v1078_v1 = vmul.f32 %v5757_v3, %v6505_v43  ;;  %v6806_v56 = vld [vmem:[%s9883_s4] ss:$0 sm:$0xff] }
 0x116   :  { %v567_v4 = vperm.slane %v447_v59, 0  ;;  %v5761_v15 = vpop.eup %5760  ;;  %v6809_v59 = vpop.f32.mrf.mxu0 }
 0x117   :  { %5764 = vtanh.f32 %v821_v63  ;;  %v1079_v29 = vmul.f32 %v5761_v15, %v6505_v43 }
 0x119   :  { %v1315_v42 = vsel %vm155_vm0, %v1079_v29, 0.0  ;;  %v458_v29 = vrot.slane %v6786_v32, 5 }
 0x11a   :  { %1280 = vadd.xlane.f32.xlu0 %v1279_v13  ;;  %v823_v13 = vadd.f32 %v567_v4, %v6746_v47  ;;  %v5763_v18 = vpop.eup %5762  ;;  %v455_v4 = vrot.slane %v6786_v32, 2 }
 0x11b   :  { %v1081_v30 = vmul.f32 %v5763_v18, %v6505_v43 }
 0x11c   :  { %1286 = vadd.xlane.f32.xlu2 %v1285_v19  ;;  %v825_v19 = vadd.f32 %v569_v8, %v6746_v47  ;;  %5766 = vtanh.f32 %v823_v13  ;;  %v576_v15 = vperm.slane %v455_v4, 0 }
 0x11d   :  { %1283 = vadd.xlane.f32.xlu1 %v1282_v21  ;;  %v6722_v24 = vpop.xlane.xlu0 %1154  ;;  %v1312_v21 = vsel %vm155_vm0, %v1078_v1, 0.0  ;;  %v5765_v26 = vpop.eup %5764  ;;  %v1321_v44 = vsel %vm155_vm0, %v1081_v30, 0.0  ;;  %v457_v1 = vrot.slane %v6786_v32, 4 }
 0x11e   :  { %5768 = vtanh.f32 %v825_v19  ;;  %v1080_v40 = vmul.f32 %v5765_v26, %v6505_v43  ;;  %v575_v43 = vperm.slane %v454_v37, 0  ;;  %v832_v26 = vadd.f32 %v576_v15, %v6809_v59 }
 0x11f   :  { %v6726_v27 = vpop.xlane.xlu2 %1166  ;;  %5770 = vtanh.f32 %v824_v22  ;;  %v578_v20 = vperm.slane %v457_v1, 0  ;;  %v6866_v1 = vpop.f32.mrf.mxu0 }
 0x120   :  { %10097 = vst [vmem:[#allocation16_spill] sm:$0xff] %v6726_v27  ;;  %v6729_v31 = vpop.xlane.xlu1 %1160  ;;  %v1318_v53 = vsel %vm155_vm0, %v1080_v40, 0.0  ;;  %5772 = vtanh.f32 %v826_v41  ;;  %v831_v3 = vadd.f32 %v575_v43, %v6809_v59  ;;  %v581_v43 = vperm.slane %v460_v36, 0 }
 0x121   :  { %10098 = vst [vmem:[#allocation17_spill] sm:$0xff] %v6729_v31  ;;  %5774 = vtanh.f32 %v828_v46  ;;  %v834_v40 = vadd.f32 %v578_v20, %v6809_v59  ;;  %v579_v46 = vperm.slane %v458_v29, 0 }
 0x122   :  { %1289 = vadd.xlane.f32.xlu0 %v1288_v34  ;;  %5776 = vtanh.f32 %v827_v50 }
 0x123   :  { %v835_v61 = vadd.f32 %v579_v46, %v6809_v59 }
 0x124   :  { %1295 = vadd.xlane.f32.xlu2 %v1294_v38  ;;  %v453_v38 = vrot.slane %v6734_v35, 7 }
 0x125   :  { %1292 = vadd.xlane.f32.xlu1 %v1291_v45  ;;  %v6743_v48 = vpop.xlane.xlu0 %1157  ;;  %v5767_v45 = vpop.eup %5766 }
 0x126   :  { %10099 = vst [vmem:[#allocation18_spill] sm:$0xff] %v6743_v48  ;;  %v573_v52 = vperm.slane %v453_v38, 0  ;;  %v5769_v35 = vpop.eup %5768  ;;  %v1082_v58 = vmul.f32 %v6806_v56, %v5767_v45 }
 0x127   :  { %v6749_v54 = vpop.xlane.xlu2 %1169  ;;  %v1084_v49 = vmul.f32 %v6806_v56, %v5769_v35 }
 0x128   :  { %10100 = vst [vmem:[#allocation19_spill] sm:$0xff] %v6749_v54  ;;  %v6754_v57 = vpop.xlane.xlu1 %1163  ;;  %v829_v63 = vadd.f32 %v573_v52, %v6746_v47  ;;  %v1324_v6 = vsel %vm155_vm0, %v1082_v58, 0.0  ;;  %v456_v47 = vrot.slane %v6786_v32, 3 }
 0x129   :  { %10101 = vst [vmem:[#allocation20_spill] sm:$0xff] %v6754_v57  ;;  %v1330_v11 = vsel %vm155_vm0, %v1084_v49, 0.0 }
 0x12a   :  { %1298 = vadd.xlane.f32.xlu0 %v1297_v51  ;;  %v5771_v51 = vpop.eup %5770  ;;  %5778 = vtanh.f32 %v829_v63  ;;  %v577_v23 = vperm.slane %v456_v47, 0 }
 0x12b   :  { %v1083_v2 = vmul.f32 %v6806_v56, %v5771_v51  ;;  %v5773_v8 = vpop.eup %5772  ;;  %5780 = vtanh.f32 %v831_v3  ;;  %v837_v3 = vadd.f32 %v581_v43, %v6809_v59 }
 0x12c   :  { %1304 = vadd.xlane.f32.xlu2 %v1303_v60  ;;  %v574_v60 = vperm.slane %v6786_v32, 0  ;;  %v5775_v13 = vpop.eup %5774  ;;  %v1085_v19 = vmul.f32 %v6806_v56, %v5773_v8 }
 0x12d   :  { %1301 = vadd.xlane.f32.xlu1 %v1300_v62  ;;  %v6764_v5 = vpop.xlane.xlu0 %1172  ;;  %v1327_v14 = vsel %vm155_vm0, %v1083_v2, 0.0  ;;  %v1087_v22 = vmul.f32 %v6806_v56, %v5775_v13 }
 0x12e   :  { %10102 = vst [vmem:[#allocation21_spill] sm:$0xff] %v6764_v5  ;;  %v830_v7 = vadd.f32 %v574_v60, %v6809_v59  ;;  %v1333_v33 = vsel %vm155_vm0, %v1085_v19, 0.0 }
 0x12f   :  { %v6767_v9 = vpop.xlane.xlu2 %1178  ;;  %v1339_v37 = vsel %vm155_vm0, %v1087_v22, 0.0 }
 0x130   :  { %10103 = vst [vmem:[#allocation22_spill] sm:$0xff] %v6767_v9  ;;  %v6770_v12 = vpop.xlane.xlu1 %1175  ;;  %5782 = vtanh.f32 %v830_v7 }
 0x131   :  { %10104 = vst [vmem:[#allocation23_spill] sm:$0xff] %v6770_v12  ;;  %5784 = vtanh.f32 %v832_v26 }
 0x132   :  { %1307 = vadd.xlane.f32.xlu0 %v1306_v16  ;;  %v5777_v16 = vpop.eup %5776  ;;  %5786 = vtanh.f32 %v834_v40 }
 0x133   :  { %v1086_v25 = vmul.f32 %v6806_v56, %v5777_v16  ;;  %v5779_v30 = vpop.eup %5778 }
 0x134   :  { %1313 = vadd.xlane.f32.xlu2 %v1312_v21  ;;  %v5781_v38 = vpop.eup %5780  ;;  %v1088_v52 = vmul.f32 %v6806_v56, %v5779_v30 }
 0x135   :  { %1310 = vadd.xlane.f32.xlu1 %v1309_v17  ;;  %v6782_v28 = vpop.xlane.xlu0 %1181  ;;  %v1336_v45 = vsel %vm155_vm0, %v1086_v25, 0.0  ;;  %v1090_v35 = vmul.f32 %v6806_v56, %v5781_v38 }
 0x136   :  { %10105 = vst [vmem:[#allocation24_spill] sm:$0xff] %v6782_v28  ;;  %v5783_v41 = vpop.eup %5782  ;;  %v1342_v63 = vsel %vm155_vm0, %v1088_v52, 0.0 }
 0x137   :  { %v6788_v34 = vpop.xlane.xlu2 %1187  ;;  %v1089_v51 = vmul.f32 %v6806_v56, %v5783_v41  ;;  %v1348_v2 = vsel %vm155_vm0, %v1090_v35, 0.0 }
 0x138   :  { %10106 = vst [vmem:[#allocation25_spill] sm:$0xff] %v6788_v34  ;;  %v6791_v39 = vpop.xlane.xlu1 %1184 }
 0x139   :  { %10107 = vst [vmem:[#allocation26_spill] sm:$0xff] %v6791_v39  ;;  %v1345_v7 = vsel %vm155_vm0, %v1089_v51, 0.0 }
 0x13a   :  { %1316 = vadd.xlane.f32.xlu0 %v1315_v42  ;;  %v833_v42 = vadd.f32 %v577_v23, %v6809_v59 }
 0x13c   :  { %1322 = vadd.xlane.f32.xlu2 %v1321_v44  ;;  %v459_v44 = vrot.slane %v6786_v32, 6  ;;  %5788 = vtanh.f32 %v833_v42 }
 0x13d   :  { %1319 = vadd.xlane.f32.xlu1 %v1318_v53  ;;  %v6801_v55 = vpop.xlane.xlu0 %1190  ;;  %v6851_v53 = vpop.f32.mrf.mxu1  ;;  %5790 = vtanh.f32 %v835_v61 }
 0x13e   :  { %v580_v32 = vperm.slane %v459_v44, 0  ;;  %v462_v49 = vrot.slane %v6851_v53, 2  ;;  %v461_v4 = vrot.slane %v6851_v53, 1  ;;  %v582_v8 = vperm.slane %v6851_v53, 0 }
 0x13f   :  { %v6813_v62 = vpop.xlane.xlu2 %1196  ;;  %5792 = vtanh.f32 %v837_v3  ;;  %v463_v26 = vrot.slane %v6851_v53, 3  ;;  %v465_v36 = vrot.slane %v6851_v53, 5  ;;  %v464_v41 = vrot.slane %v6851_v53, 4 }
 0x140   :  { %v6817_v0 = vpop.xlane.xlu1 %1193  ;;  %v584_v10 = vperm.slane %v462_v49, 0  ;;  %v583_v16 = vperm.slane %v461_v4, 0  ;;  %v838_v19 = vadd.f32 %v582_v8, %v6866_v1 }
 0x141   :  { %v585_v42 = vperm.slane %v463_v26, 0  ;;  %v587_v35 = vperm.slane %v465_v36, 0  ;;  %v586_v51 = vperm.slane %v464_v41, 0 }
 0x142   :  { %1325 = vadd.xlane.f32.xlu0 %v1324_v6  ;;  %v5785_v6 = vpop.eup %5784  ;;  %v840_v25 = vadd.f32 %v584_v10, %v6866_v1  ;;  %v839_v30 = vadd.f32 %v583_v16, %v6866_v1 }
 0x143   :  { %v5787_v47 = vpop.eup %5786  ;;  %v1091_v15 = vmul.f32 %v6806_v56, %v5785_v6  ;;  %v843_v8 = vadd.f32 %v587_v35, %v6866_v1  ;;  %v842_v10 = vadd.f32 %v586_v51, %v6866_v1 }
 0x144   :  { %1331 = vadd.xlane.f32.xlu2 %v1330_v11  ;;  %v836_v11 = vadd.f32 %v580_v32, %v6809_v59  ;;  %v5789_v13 = vpop.eup %5788  ;;  %v1093_v22 = vmul.f32 %v6806_v56, %v5787_v47  ;;  %v466_v32 = vrot.slane %v6851_v53, 6 }
 0x145   :  { %1328 = vadd.xlane.f32.xlu1 %v1327_v14  ;;  %v6829_v18 = vpop.xlane.xlu0 %1199  ;;  %v1092_v23 = vmul.f32 %v6806_v56, %v5789_v13  ;;  %v1351_v29 = vsel %vm155_vm0, %v1091_v15, 0.0  ;;  %v6899_v4 = vpop.f32.mrf.mxu1  ;;  %v467_v15 = vrot.slane %v6851_v53, 7 }
 0x146   :  { %5794 = vtanh.f32 %v836_v11  ;;  %v1357_v40 = vsel %vm155_vm0, %v1093_v22, 0.0  ;;  %v588_v13 = vperm.slane %v466_v32, 0 }
 0x147   :  { %v6832_v21 = vpop.xlane.xlu2 %1205  ;;  %5796 = vtanh.f32 %v838_v19  ;;  %v590_v19 = vperm.slane %v6899_v4, 0 }
 0x148   :  { %10108 = vst [vmem:[#allocation27_spill] sm:$0xff] %v6832_v21  ;;  %v6835_v17 = vpop.xlane.xlu1 %1202  ;;  %5798 = vtanh.f32 %v840_v25  ;;  %v6911_v25 = vpop.f32.mrf.mxu0 }
 0x149   :  { %5800 = vtanh.f32 %v839_v30  ;;  %v844_v30 = vadd.f32 %v588_v13, %v6866_v1 }
 0x14a   :  { %1334 = vadd.xlane.f32.xlu0 %v1333_v33  ;;  %v5791_v33 = vpop.eup %5790 }
 0x14b   :  { %v5793_v38 = vpop.eup %5792  ;;  %v1094_v46 = vmul.f32 %v6806_v56, %v5791_v33  ;;  %v589_v33 = vperm.slane %v467_v15, 0 }
 0x14c   :  { %1340 = vadd.xlane.f32.xlu2 %v1339_v37  ;;  %v1354_v37 = vsel %vm155_vm0, %v1092_v23, 0.0  ;;  %v5795_v44 = vpop.eup %5794  ;;  %v1096_v52 = vmul.f32 %v6806_v56, %v5793_v38  ;;  %v846_v38 = vadd.f32 %v590_v19, %v6911_v25  ;;  %v473_v19 = vrot.slane %v6899_v4, 6 }
 0x14d   :  { %1337 = vadd.xlane.f32.xlu1 %v1336_v45  ;;  %v6847_v50 = vpop.xlane.xlu0 %1208  ;;  %v5797_v61 = vpop.eup %5796  ;;  %v1360_v3 = vsel %vm155_vm0, %v1094_v46, 0.0  ;;  %v845_v46 = vadd.f32 %v589_v33, %v6866_v1 }
 0x14e   :  { %v5799_v6 = vpop.eup %5798  ;;  %v1097_v47 = vmul.f32 %v6806_v56, %v5797_v61 }
 0x14f   :  { %v6854_v58 = vpop.xlane.xlu2 %1214  ;;  %v5801_v11 = vpop.eup %5800  ;;  %v1099_v23 = vmul.f32 %v6806_v56, %v5799_v6 }
 0x150   :  { %v6856_v60 = vpop.xlane.xlu1 %1211  ;;  %v1098_v26 = vmul.f32 %v6806_v56, %v5801_v11  ;;  %v1369_v53 = vsel %vm155_vm0, %v1097_v47, 0.0  ;;  %v471_v47 = vrot.slane %v6899_v4, 4 }
 0x151   :  { %v1375_v41 = vsel %vm155_vm0, %v1099_v23, 0.0 }
 0x152   :  { %1343 = vadd.xlane.f32.xlu0 %v1342_v63  ;;  %v1095_v63 = vmul.f32 %v6806_v56, %v5795_v44  ;;  %v470_v44 = vrot.slane %v6899_v4, 3  ;;  %v594_v33 = vperm.slane %v471_v47, 0 }
 0x154   :  { %1349 = vadd.xlane.f32.xlu2 %v1348_v2  ;;  %v841_v2 = vadd.f32 %v585_v42, %v6866_v1  ;;  %v1363_v16 = vsel %vm155_vm0, %v1095_v63, 0.0  ;;  %v1372_v42 = vsel %vm155_vm0, %v1098_v26, 0.0 }
 0x155   :  { %1346 = vadd.xlane.f32.xlu1 %v1345_v7  ;;  %v6869_v14 = vpop.xlane.xlu0 %1217  ;;  %v1366_v7 = vsel %vm155_vm0, %v1096_v52, 0.0  ;;  %v469_v52 = vrot.slane %v6899_v4, 2 }
 0x156   :  { %5802 = vtanh.f32 %v841_v2  ;;  %v593_v2 = vperm.slane %v470_v44, 0  ;;  %v596_v44 = vperm.slane %v473_v19, 0 }
 0x157   :  { %v6873_v20 = vpop.xlane.xlu2 %1223  ;;  %5804 = vtanh.f32 %v843_v8 }
 0x158   :  { %10109 = vst [vmem:[#allocation28_spill] sm:$0xff] %v6873_v20  ;;  %v6876_v59 = vpop.xlane.xlu1 %1220  ;;  %5806 = vtanh.f32 %v842_v10 }
 0x159   :  { %5808 = vtanh.f32 %v844_v30 }
 0x15a   :  { %1352 = vadd.xlane.f32.xlu0 %v1351_v29  ;;  %5810 = vtanh.f32 %v846_v38 }
 0x15b   :  { %5812 = vtanh.f32 %v845_v46 }
 0x15c   :  { %1358 = vadd.xlane.f32.xlu2 %v1357_v40  ;;  %v468_v40 = vrot.slane %v6899_v4, 1 }
 0x15d   :  { %1355 = vadd.xlane.f32.xlu1 %v1354_v37  ;;  %v6887_v45 = vpop.xlane.xlu0 %1226  ;;  %v5803_v37 = vpop.eup %5802 }
 0x15e   :  { %10110 = vst [vmem:[#allocation29_spill] sm:$0xff] %v6887_v45  ;;  %v5805_v35 = vpop.eup %5804  ;;  %v591_v51 = vperm.slane %v468_v40, 0  ;;  %v1100_v63 = vmul.f32 %v6806_v56, %v5803_v37 }
 0x15f   :  { %v6891_v43 = vpop.xlane.xlu2 %1232  ;;  %v5807_v32 = vpop.eup %5806  ;;  %v1102_v6 = vmul.f32 %v6806_v56, %v5805_v35  ;;  %v474_v35 = vrot.slane %v6899_v4, 7 }
 0x160   :  { %10111 = vst [vmem:[#allocation30_spill] sm:$0xff] %v6891_v43  ;;  %v6894_v49 = vpop.xlane.xlu1 %1229  ;;  %v1101_v8 = vmul.f32 %v6806_v56, %v5807_v32  ;;  %v847_v11 = vadd.f32 %v591_v51, %v6911_v25  ;;  %v5809_v10 = vpop.eup %5808  ;;  %v1378_v13 = vsel %vm155_vm0, %v1100_v63, 0.0  ;;  %v850_v63 = vadd.f32 %v594_v33, %v6911_v25 }
 0x161   :  { %v5811_v15 = vpop.eup %5810  ;;  %v1384_v23 = vsel %vm155_vm0, %v1102_v6, 0.0 }
 0x162   :  { %1361 = vadd.xlane.f32.xlu0 %v1360_v3  ;;  %v1381_v30 = vsel %vm155_vm0, %v1101_v8, 0.0  ;;  %5814 = vtanh.f32 %v847_v11  ;;  %v5813_v38 = vpop.eup %5812  ;;  %v1105_v37 = vmul.f32 %v6806_v56, %v5811_v15  ;;  %v852_v11 = vadd.f32 %v596_v44, %v6911_v25 }
 0x163   :  { %v1104_v32 = vmul.f32 %v6806_v56, %v5813_v38 }
 0x164   :  { %1367 = vadd.xlane.f32.xlu2 %v1366_v7  ;;  %v592_v7 = vperm.slane %v469_v52, 0 }
 0x165   :  { %1364 = vadd.xlane.f32.xlu1 %v1363_v16  ;;  %v6908_v22 = vpop.xlane.xlu0 %1235  ;;  %v849_v16 = vadd.f32 %v593_v2, %v6911_v25 }
 0x166   :  { %v848_v26 = vadd.f32 %v592_v7, %v6911_v25  ;;  %v1393_v7 = vsel %vm155_vm0, %v1105_v37, 0.0 }
 0x167   :  { %v6914_v29 = vpop.xlane.xlu2 %1241  ;;  %5816 = vtanh.f32 %v849_v16 }
 0x168   :  { %10112 = vst [vmem:[#allocation31_spill] sm:$0xff] %v6914_v29  ;;  %v6918_v36 = vpop.xlane.xlu1 %1238  ;;  %5818 = vtanh.f32 %v848_v26  ;;  %v5815_v8 = vpop.eup %5814 }
 0x169   :  { %5820 = vtanh.f32 %v850_v63  ;;  %v6967_v26 = vpop.f32.mrf.mxu0 }
 0x16a   :  { %1370 = vadd.xlane.f32.xlu0 %v1369_v53  ;;  %v472_v53 = vrot.slane %v6899_v4, 5  ;;  %5822 = vtanh.f32 %v852_v11 }
 0x16c   :  { %1376 = vadd.xlane.f32.xlu2 %v1375_v41  ;;  %v1103_v41 = vmul.f32 %v6806_v56, %v5809_v10  ;;  %v595_v52 = vperm.slane %v472_v53, 0  ;;  %v597_v10 = vperm.slane %v474_v35, 0 }
 0x16d   :  { %1373 = vadd.xlane.f32.xlu1 %v1372_v42  ;;  %v6927_v61 = vpop.xlane.xlu0 %1244  ;;  %v6949_v42 = vpop.f32.mrf.mxu1 }
 0x16e   :  { %v475_v2 = vrot.slane %v6949_v42, 1  ;;  %v1387_v6 = vsel %vm155_vm0, %v1103_v41, 0.0  ;;  %v851_v47 = vadd.f32 %v595_v52, %v6911_v25  ;;  %v5817_v4 = vpop.eup %5816  ;;  %v598_v53 = vperm.slane %v6949_v42, 0 }
 0x16f   :  { %v6930_v3 = vpop.xlane.xlu2 %1250  ;;  %v5819_v16 = vpop.eup %5818  ;;  %v1108_v33 = vmul.f32 %v6806_v56, %v5817_v4  ;;  %v853_v38 = vadd.f32 %v597_v10, %v6911_v25  ;;  %v476_v52 = vrot.slane %v6949_v42, 2  ;;  %v477_v25 = vrot.slane %v6949_v42, 3 }
 0x170   :  { %10113 = vst [vmem:[#allocation32_spill] sm:$0xff] %v6930_v3  ;;  %v6933_v1 = vpop.xlane.xlu1 %1247  ;;  %v599_v15 = vperm.slane %v475_v2, 0  ;;  %5824 = vtanh.f32 %v851_v47  ;;  %v1107_v37 = vmul.f32 %v6806_v56, %v5819_v16  ;;  %v5821_v63 = vpop.eup %5820  ;;  %v478_v2 = vrot.slane %v6949_v42, 4 }
 0x171   :  { %5826 = vtanh.f32 %v853_v38  ;;  %v600_v11 = vperm.slane %v476_v52, 0  ;;  %v1109_v4 = vmul.f32 %v6806_v56, %v5821_v63 }
 0x172   :  { %1379 = vadd.xlane.f32.xlu0 %v1378_v13  ;;  %v1390_v13 = vsel %vm155_vm0, %v1104_v32, 0.0  ;;  %v855_v44 = vadd.f32 %v599_v15, %v6967_v26  ;;  %v854_v32 = vadd.f32 %v598_v53, %v6967_v26 }
 0x173   :  { %v856_v38 = vadd.f32 %v600_v11, %v6967_v26  ;;  %v1405_v52 = vsel %vm155_vm0, %v1109_v4, 0.0 }
 0x174   :  { %1385 = vadd.xlane.f32.xlu2 %v1384_v23  ;;  %v1106_v23 = vmul.f32 %v6806_v56, %v5815_v8  ;;  %v1399_v8 = vsel %vm155_vm0, %v1107_v37, 0.0  ;;  %5828 = vtanh.f32 %v855_v44  ;;  %v479_v37 = vrot.slane %v6949_v42, 5 }
 0x175   :  { %1382 = vadd.xlane.f32.xlu1 %v1381_v30  ;;  %v6945_v40 = vpop.xlane.xlu0 %1253  ;;  %5830 = vtanh.f32 %v854_v32 }
 0x176   :  { %10114 = vst [vmem:[#allocation33_spill] sm:$0xff] %v6945_v40  ;;  %v1396_v35 = vsel %vm155_vm0, %v1106_v23, 0.0  ;;  %v601_v23 = vperm.slane %v477_v25, 0  ;;  %5832 = vtanh.f32 %v856_v38  ;;  %v603_v11 = vperm.slane %v479_v37, 0 }
 0x177   :  { %v6951_v46 = vpop.xlane.xlu2 %1259 }
 0x178   :  { %10115 = vst [vmem:[#allocation34_spill] sm:$0xff] %v6951_v46  ;;  %v6954_v51 = vpop.xlane.xlu1 %1256  ;;  %v857_v25 = vadd.f32 %v601_v23, %v6967_v26  ;;  %v859_v38 = vadd.f32 %v603_v11, %v6967_v26 }
 0x17a   :  { %1388 = vadd.xlane.f32.xlu0 %v1387_v6  ;;  %v1402_v6 = vsel %vm155_vm0, %v1108_v33, 0.0 }
 0x17c   :  { %1394 = vadd.xlane.f32.xlu2 %v1393_v7  ;;  %v5823_v7 = vpop.eup %5822 }
 0x17d   :  { %1391 = vadd.xlane.f32.xlu1 %v1390_v13  ;;  %v6964_v19 = vpop.xlane.xlu0 %1262  ;;  %v5825_v47 = vpop.eup %5824  ;;  %v602_v13 = vperm.slane %v478_v2, 0  ;;  %v1111_v16 = vmul.f32 %v6806_v56, %v5823_v7  ;;  %v480_v7 = vrot.slane %v6949_v42, 6 }
 0x17e   :  { %10116 = vst [vmem:[#allocation35_spill] sm:$0xff] %v6964_v19  ;;  %v1110_v33 = vmul.f32 %v6806_v56, %v5825_v47  ;;  %v5827_v44 = vpop.eup %5826 }
 0x17f   :  { %v6970_v30 = vpop.xlane.xlu2 %1268  ;;  %v5829_v32 = vpop.eup %5828  ;;  %v858_v63 = vadd.f32 %v602_v13, %v6967_v26  ;;  %v1112_v4 = vmul.f32 %v6806_v56, %v5827_v44 }
 0x180   :  { %10117 = vst [vmem:[#allocation36_spill] sm:$0xff] %v6970_v30  ;;  %v6974_v41 = vpop.xlane.xlu1 %1265  ;;  %v5831_v2 = vpop.eup %5830 }
 0x181   :  { %10118 = vst [vmem:[#allocation37_spill] sm:$0xff] %v6974_v41  ;;  %v7007_v13 = vpop.f32.mrf.mxu1  ;;  %5834 = vtanh.f32 %v858_v63  ;;  %v1414_v44 = vsel %vm155_vm0, %v1112_v4, 0.0  ;;  %v10147_v41 = vlaneseq }
 0x182   :  { %1397 = vadd.xlane.f32.xlu0 %v1396_v35  ;;  %v481_v35 = vrot.slane %v6949_v42, 7  ;;  %5836 = vtanh.f32 %v857_v25  ;;  %v604_v42 = vperm.slane %v480_v7, 0  ;;  %v483_v37 = vrot.slane %v7007_v13, 2  ;;  %v7022_v7 = vpop.f32.mrf.mxu0 }
 0x183   :  { %v606_v25 = vperm.slane %v7007_v13, 0  ;;  %5838 = vtanh.f32 %v859_v38 }
 0x184   :  { %1403 = vadd.xlane.f32.xlu2 %v1402_v6  ;;  %v1411_v6 = vsel %vm155_vm0, %v1111_v16, 0.0  ;;  %v1113_v16 = vmul.f32 %v6806_v56, %v5831_v2  ;;  %v5833_v2 = vpop.eup %5832  ;;  %v608_v4 = vperm.slane %v483_v37, 0  ;;  %v484_v37 = vrot.slane %v7007_v13, 3 }
 0x185   :  { %1400 = vadd.xlane.f32.xlu1 %v1399_v8  ;;  %v6985_v10 = vpop.xlane.xlu0 %1271  ;;  %v1408_v8 = vsel %vm155_vm0, %v1110_v33, 0.0 }
 0x186   :  { %10119 = vst [vmem:[#allocation38_spill] sm:$0xff] %v6985_v10  ;;  %v605_v10 = vperm.slane %v481_v35, 0  ;;  %v482_v35 = vrot.slane %v7007_v13, 1  ;;  %v1417_v63 = vsel %vm155_vm0, %v1113_v16, 0.0  ;;  %v862_v16 = vadd.f32 %v606_v25, %v7022_v7 }
 0x187   :  { %v6988_v15 = vpop.xlane.xlu2 %1277  ;;  %v5835_v11 = vpop.eup %5834  ;;  %v864_v38 = vadd.f32 %v608_v4, %v7022_v7 }
 0x188   :  { %10120 = vst [vmem:[#allocation39_spill] sm:$0xff] %v6988_v15  ;;  %v6991_v53 = vpop.xlane.xlu1 %1274 }
 0x189   :  { %10121 = vst [vmem:[#allocation40_spill] sm:$0xff] %v6991_v53 }
 0x18a   :  { %1406 = vadd.xlane.f32.xlu0 %v1405_v52  ;;  %v1114_v52 = vmul.f32 %v6806_v56, %v5829_v32 }
 0x18c   :  { %1412 = vadd.xlane.f32.xlu2 %v1411_v6  ;;  %v1420_v32 = vsel %vm155_vm0, %v1114_v52, 0.0  ;;  %v861_v6 = vadd.f32 %v605_v10, %v6967_v26  ;;  %v1115_v10 = vmul.f32 %v6806_v56, %v5833_v2  ;;  %v486_v2 = vrot.slane %v7007_v13, 5 }
 0x18d   :  { %1409 = vadd.xlane.f32.xlu1 %v1408_v8  ;;  %v7003_v47 = vpop.xlane.xlu0 %1280  ;;  %v860_v8 = vadd.f32 %v604_v42, %v6967_v26 }
 0x18e   :  { %10122 = vst [vmem:[#allocation41_spill] sm:$0xff] %v7003_v47  ;;  %5840 = vtanh.f32 %v861_v6 }
 0x18f   :  { %v7010_v23 = vpop.xlane.xlu2 %1286  ;;  %5842 = vtanh.f32 %v860_v8  ;;  %v485_v8 = vrot.slane %v7007_v13, 4 }
 0x190   :  { %10123 = vst [vmem:[#allocation42_spill] sm:$0xff] %v7010_v23  ;;  %v7012_v33 = vpop.xlane.xlu1 %1283  ;;  %v5837_v23 = vpop.eup %5836  ;;  %5844 = vtanh.f32 %v862_v16 }
 0x191   :  { %10124 = vst [vmem:[#allocation43_spill] sm:$0xff] %v7012_v33  ;;  %v1117_v33 = vmul.f32 %v6806_v56, %v5835_v11  ;;  %v1116_v42 = vmul.f32 %v6806_v56, %v5837_v23  ;;  %5846 = vtanh.f32 %v864_v38  ;;  %v609_v11 = vperm.slane %v484_v37, 0 }
 0x192   :  { %1415 = vadd.xlane.f32.xlu0 %v1414_v44  ;;  %v607_v44 = vperm.slane %v482_v35, 0  ;;  %v5839_v35 = vpop.eup %5838 }
 0x193   :  { %v1429_v25 = vsel %vm155_vm0, %v1117_v33, 0.0  ;;  %v1426_v23 = vsel %vm155_vm0, %v1116_v42, 0.0  ;;  %v610_v33 = vperm.slane %v485_v8, 0  ;;  %v865_v38 = vadd.f32 %v609_v11, %v7022_v7 }
 0x194   :  { %1421 = vadd.xlane.f32.xlu2 %v1420_v32  ;;  %v1423_v32 = vsel %vm155_vm0, %v1115_v10, 0.0  ;;  %v863_v6 = vadd.f32 %v607_v44, %v7022_v7  ;;  %v1118_v44 = vmul.f32 %v6806_v56, %v5839_v35 }
 0x195   :  { %1418 = vadd.xlane.f32.xlu1 %v1417_v63  ;;  %v7025_v52 = vpop.xlane.xlu0 %1289  ;;  %v5841_v63 = vpop.eup %5840 }
 0x196   :  { %10125 = vst [vmem:[#allocation44_spill] sm:$0xff] %v7025_v52  ;;  %v5843_v4 = vpop.eup %5842  ;;  %5848 = vtanh.f32 %v863_v6  ;;  %v1120_v16 = vmul.f32 %v6806_v56, %v5841_v63  ;;  %v1432_v37 = vsel %vm155_vm0, %v1118_v44, 0.0 }
 0x197   :  { %v7029_v30 = vpop.xlane.xlu2 %1295  ;;  %v1119_v42 = vmul.f32 %v6806_v56, %v5843_v4  ;;  %v488_v4 = vrot.slane %v7007_v13, 7  ;;  %5850 = vtanh.f32 %v865_v38 }
 0x198   :  { %10126 = vst [vmem:[#allocation45_spill] sm:$0xff] %v7029_v30  ;;  %v7032_v26 = vpop.xlane.xlu1 %1292  ;;  %v1438_v35 = vsel %vm155_vm0, %v1120_v16, 0.0 }
 0x199   :  { %10127 = vst [vmem:[#allocation46_spill] sm:$0xff] %v7032_v26  ;;  %v487_v26 = vrot.slane %v7007_v13, 6  ;;  %v1435_v11 = vsel %vm155_vm0, %v1119_v42, 0.0  ;;  %v613_v42 = vperm.slane %v488_v4, 0 }
 0x19a   :  { %1424 = vadd.xlane.f32.xlu0 %v1423_v32  ;;  %v611_v32 = vperm.slane %v486_v2, 0 }
 0x19c   :  { %1430 = vadd.xlane.f32.xlu2 %v1429_v25  ;;  %v5845_v25 = vpop.eup %5844  ;;  %v867_v2 = vadd.f32 %v611_v32, %v7022_v7  ;;  %v7067_v32 = vpop.f32.mrf.mxu0 }
 0x19d   :  { %1427 = vadd.xlane.f32.xlu1 %v1426_v23  ;;  %v7043_v10 = vpop.xlane.xlu0 %1298  ;;  %v7055_v23 = vpop.f32.mrf.mxu1  ;;  %v1121_v8 = vmul.f32 %v6806_v56, %v5845_v25 }
 0x19e   :  { %10128 = vst [vmem:[#allocation47_spill] sm:$0xff] %v7043_v10  ;;  %v5847_v6 = vpop.eup %5846  ;;  %v612_v10 = vperm.slane %v487_v26, 0  ;;  %v614_v44 = vperm.slane %v7055_v23, 0  ;;  %5852 = vtanh.f32 %v867_v2 }
 0x19f   :  { %v7047_v30 = vpop.xlane.xlu2 %1304  ;;  %v5849_v63 = vpop.eup %5848  ;;  %v1123_v16 = vmul.f32 %v6806_v56, %v5847_v6  ;;  %v1441_v13 = vsel %vm155_vm0, %v1121_v8, 0.0 }
 0x1a0   :  { %10129 = vst [vmem:[#allocation48_spill] sm:$0xff] %v7047_v30  ;;  %v7050_v52 = vpop.xlane.xlu1 %1301  ;;  %v866_v30 = vadd.f32 %v610_v33, %v7022_v7  ;;  %v1122_v25 = vmul.f32 %v6806_v56, %v5849_v63  ;;  %v868_v26 = vadd.f32 %v612_v10, %v7022_v7  ;;  %v491_v63 = vrot.slane %v7055_v23, 3 }
 0x1a1   :  { %10130 = vst [vmem:[#allocation49_spill] sm:$0xff] %v7050_v52  ;;  %v1447_v6 = vsel %vm155_vm0, %v1123_v16, 0.0  ;;  %v490_v10 = vrot.slane %v7055_v23, 2 }
 0x1a2   :  { %1433 = vadd.xlane.f32.xlu0 %v1432_v37  ;;  %5854 = vtanh.f32 %v866_v30  ;;  %v1444_v2 = vsel %vm155_vm0, %v1122_v25, 0.0  ;;  %v869_v30 = vadd.f32 %v613_v42, %v7022_v7 }
 0x1a3   :  { %5856 = vtanh.f32 %v868_v26  ;;  %v616_v26 = vperm.slane %v490_v10, 0 }
 0x1a4   :  { %1439 = vadd.xlane.f32.xlu2 %v1438_v35  ;;  %v870_v35 = vadd.f32 %v614_v44, %v7067_v32 }
 0x1a5   :  { %1436 = vadd.xlane.f32.xlu1 %v1435_v11  ;;  %v7064_v37 = vpop.xlane.xlu0 %1307  ;;  %v489_v11 = vrot.slane %v7055_v23, 1  ;;  %v872_v10 = vadd.f32 %v616_v26, %v7067_v32 }
 0x1a6   :  { %10131 = vst [vmem:[#allocation50_spill] sm:$0xff] %v7064_v37  ;;  %v5851_v37 = vpop.eup %5850  ;;  %5858 = vtanh.f32 %v870_v35 }
 0x1a7   :  { %v7070_v33 = vpop.xlane.xlu2 %1313  ;;  %v5853_v8 = vpop.eup %5852  ;;  %v615_v4 = vperm.slane %v489_v11, 0  ;;  %v1124_v16 = vmul.f32 %v6806_v56, %v5851_v37  ;;  %5860 = vtanh.f32 %v869_v30  ;;  %v492_v11 = vrot.slane %v7055_v23, 4 }
 0x1a8   :  { %10132 = vst [vmem:[#allocation51_spill] sm:$0xff] %v7070_v33  ;;  %v7074_v38 = vpop.xlane.xlu1 %1310  ;;  %v5855_v44 = vpop.eup %5854  ;;  %v1126_v25 = vmul.f32 %v6806_v56, %v5853_v8  ;;  %v493_v8 = vrot.slane %v7055_v23, 5 }
 0x1a9   :  { %10133 = vst [vmem:[#allocation52_spill] sm:$0xff] %v7074_v38  ;;  %v1125_v42 = vmul.f32 %v6806_v56, %v5855_v44  ;;  %v871_v35 = vadd.f32 %v615_v4, %v7067_v32  ;;  %v618_v44 = vperm.slane %v492_v11, 0 }
 0x1aa   :  { %1442 = vadd.xlane.f32.xlu0 %v1441_v13  ;;  %v617_v13 = vperm.slane %v491_v63, 0  ;;  %v494_v63 = vrot.slane %v7055_v23, 6  ;;  %v1456_v30 = vsel %vm155_vm0, %v1126_v25, 0.0 }
 0x1ab   :  { %v1453_v4 = vsel %vm155_vm0, %v1125_v42, 0.0  ;;  %5862 = vtanh.f32 %v871_v35  ;;  %v495_v42 = vrot.slane %v7055_v23, 7 }
 0x1ac   :  { %1448 = vadd.xlane.f32.xlu2 %v1447_v6  ;;  %v5857_v6 = vpop.eup %5856  ;;  %v873_v37 = vadd.f32 %v617_v13, %v7067_v32  ;;  %v620_v25 = vperm.slane %v494_v63, 0 }
 0x1ad   :  { %1445 = vadd.xlane.f32.xlu1 %v1444_v2  ;;  %v7083_v33 = vpop.xlane.xlu0 %1316  ;;  %v1450_v2 = vsel %vm155_vm0, %v1124_v16, 0.0 }
 0x1ae   :  { %10134 = vst [vmem:[#allocation53_spill] sm:$0xff] %v7083_v33  ;;  %v5859_v33 = vpop.eup %5858  ;;  %5864 = vtanh.f32 %v873_v37  ;;  %v876_v63 = vadd.f32 %v620_v25, %v7067_v32 }
 0x1af   :  { %v7086_v38 = vpop.xlane.xlu2 %1322  ;;  %v1129_v13 = vmul.f32 %v6806_v56, %v5859_v33  ;;  %5866 = vtanh.f32 %v872_v10 }
 0x1b0   :  { %10135 = vst [vmem:[#allocation54_spill] sm:$0xff] %v7086_v38  ;;  %v7089_v7 = vpop.xlane.xlu1 %1319  ;;  %v7105_v38 = vpop.f32.mrf.mxu1 }
 0x1b1   :  { %10136 = vst [vmem:[#allocation55_spill] sm:$0xff] %v7089_v7  ;;  %v5861_v7 = vpop.eup %5860 }
 0x1b2   :  { %1451 = vadd.xlane.f32.xlu0 %v1450_v2  ;;  %v1127_v2 = vmul.f32 %v6806_v56, %v5857_v6  ;;  %v1128_v11 = vmul.f32 %v6806_v56, %v5861_v7  ;;  %v496_v6 = vrot.slane %v7105_v38, 1  ;;  %v5863_v37 = vpop.eup %5862 }
 0x1b4   :  { %1457 = vadd.xlane.f32.xlu2 %v1456_v30  ;;  %v619_v30 = vperm.slane %v493_v8, 0  ;;  %v1459_v33 = vsel %vm155_vm0, %v1127_v2, 0.0  ;;  %v621_v8 = vperm.slane %v495_v42, 0  ;;  %v5865_v23 = vpop.eup %5864  ;;  %v623_v7 = vperm.slane %v496_v6, 0 }
 0x1b5   :  { %1454 = vadd.xlane.f32.xlu1 %v1453_v4  ;;  %v7101_v16 = vpop.xlane.xlu0 %1325  ;;  %v874_v4 = vadd.f32 %v618_v44, %v7067_v32  ;;  %v5867_v44 = vpop.eup %5866  ;;  %v1130_v2 = vmul.f32 %v6806_v56, %v5863_v37 }
 0x1b6   :  { %10137 = vst [vmem:[#allocation56_spill] sm:$0xff] %v7101_v16  ;;  %v1465_v16 = vsel %vm155_vm0, %v1129_v13, 0.0  ;;  %v875_v10 = vadd.f32 %v619_v30, %v7067_v32  ;;  %v7123_v13 = vpop.f32.mrf.mxu0  ;;  %v1132_v30 = vmul.f32 %v6806_v56, %v5865_v23 }
 0x1b7   :  { %v7107_v26 = vpop.xlane.xlu2 %1331  ;;  %5868 = vtanh.f32 %v874_v4  ;;  %v497_v4 = vrot.slane %v7105_v38, 2  ;;  %v1468_v6 = vsel %vm155_vm0, %v1130_v2, 0.0 }
 0x1b8   :  { %10138 = vst [vmem:[#allocation57_spill] sm:$0xff] %v7107_v26  ;;  %v7110_v35 = vpop.xlane.xlu1 %1328  ;;  %v1462_v26 = vsel %vm155_vm0, %v1128_v11, 0.0  ;;  %5870 = vtanh.f32 %v876_v63  ;;  %v879_v11 = vadd.f32 %v623_v7, %v7123_v13 }
 0x1b9   :  { %10139 = vst [vmem:[#allocation58_spill] sm:$0xff] %v7110_v35  ;;  %5872 = vtanh.f32 %v875_v10  ;;  %v1474_v10 = vsel %vm155_vm0, %v1132_v30, 0.0  ;;  %v624_v7 = vperm.slane %v497_v4, 0  ;;  %v500_v4 = vrot.slane %v7105_v38, 5 }
 0x1ba   :  { %1460 = vadd.xlane.f32.xlu0 %v1459_v33  ;;  %v622_v33 = vperm.slane %v7105_v38, 0 }
 0x1bc   :  { %1466 = vadd.xlane.f32.xlu2 %v1465_v16  ;;  %v877_v16 = vadd.f32 %v621_v8, %v7067_v32  ;;  %v878_v37 = vadd.f32 %v622_v33, %v7123_v13  ;;  %v498_v32 = vrot.slane %v7105_v38, 3 }
 0x1bd   :  { %1463 = vadd.xlane.f32.xlu1 %v1462_v26  ;;  %v7120_v35 = vpop.xlane.xlu0 %1334  ;;  %v1131_v26 = vmul.f32 %v6806_v56, %v5867_v44  ;;  %v5869_v63 = vpop.eup %5868 }
 0x1be   :  { %10140 = vst [vmem:[#allocation59_spill] sm:$0xff] %v7120_v35  ;;  %5874 = vtanh.f32 %v877_v16  ;;  %v5871_v8 = vpop.eup %5870  ;;  %v1133_v33 = vmul.f32 %v6806_v56, %v5869_v63  ;;  %v625_v16 = vperm.slane %v498_v32, 0  ;;  %v7163_v63 = vpop.f32.mrf.mxu1 }
 0x1bf   :  { %v7126_v25 = vpop.xlane.xlu2 %1340  ;;  %v1471_v23 = vsel %vm155_vm0, %v1131_v26, 0.0  ;;  %5876 = vtanh.f32 %v879_v11  ;;  %v5873_v44 = vpop.eup %5872  ;;  %v1135_v30 = vmul.f32 %v6806_v56, %v5871_v8  ;;  %v880_v11 = vadd.f32 %v624_v7, %v7123_v13 }
 0x1c0   :  { %10141 = vst [vmem:[#allocation60_spill] sm:$0xff] %v7126_v25  ;;  %v7130_v42 = vpop.xlane.xlu1 %1337  ;;  %v499_v25 = vrot.slane %v7105_v38, 4  ;;  %5878 = vtanh.f32 %v878_v37  ;;  %v1134_v26 = vmul.f32 %v6806_v56, %v5873_v44  ;;  %v502_v37 = vrot.slane %v7105_v38, 7 }
 0x1c1   :  { %10142 = vst [vmem:[#allocation61_spill] sm:$0xff] %v7130_v42  ;;  %v1483_v32 = vsel %vm155_vm0, %v1135_v30, 0.0  ;;  %v501_v44 = vrot.slane %v7105_v38, 6  ;;  %5880 = vtanh.f32 %v880_v11  ;;  %v7166_v30 = vand.u32 127, %v10147_v41  ;;  %v7185_v41 = vpop.f32.mrf.mxu0 }
 0x1c2   :  { %1469 = vadd.xlane.f32.xlu0 %v1468_v6  ;;  %v626_v6 = vperm.slane %v499_v25, 0  ;;  %v1480_v7 = vsel %vm155_vm0, %v1134_v26, 0.0  ;;  %v629_v38 = vperm.slane %v502_v37, 0 }
 0x1c3   :  { %10148 = vst [vmem:[#allocation66_spill] sm:$0xff] %v7166_v30  ;;  %v628_v11 = vperm.slane %v501_v44, 0 }
 0x1c4   :  { %1475 = vadd.xlane.f32.xlu2 %v1474_v10  ;;  %v5875_v10 = vpop.eup %5874  ;;  %v882_v25 = vadd.f32 %v626_v6, %v7123_v13  ;;  %v885_v44 = vadd.f32 %v629_v38, %v7123_v13  ;;  %v7196_v38 = vld [vmem:[%s9883_s4] ss:$0 sm:$0xff] }
 0x1c5   :  { %1472 = vadd.xlane.f32.xlu1 %v1471_v23  ;;  %v7141_v2 = vpop.xlane.xlu0 %1343  ;;  %v1477_v23 = vsel %vm155_vm0, %v1133_v33, 0.0 }
 0x1c6   :  { %10143 = vst [vmem:[#allocation62_spill] sm:$0xff] %v7141_v2  ;;  %v5877_v2 = vpop.eup %5876  ;;  %5882 = vtanh.f32 %v882_v25  ;;  %v503_v25 = vrot.slane %v7163_v63, 1 }
 0x1c7   :  { %v7144_v42 = vpop.xlane.xlu2 %1349  ;;  %v5879_v8 = vpop.eup %5878  ;;  %v1138_v6 = vmul.f32 %v6806_v56, %v5877_v2 }
 0x1c8   :  { %10144 = vst [vmem:[#allocation63_spill] sm:$0xff] %v7144_v42  ;;  %v7147_v35 = vpop.xlane.xlu1 %1346  ;;  %v627_v42 = vperm.slane %v500_v4, 0  ;;  %v1668_v4 = vperm.slane %v6743_v48, %v7166_v30  ;;  %v5881_v37 = vpop.eup %5880  ;;  %v884_v48 = vadd.f32 %v628_v11, %v7123_v13  ;;  %v631_v11 = vperm.slane %v503_v25, 0 }
 0x1c9   :  { %10145 = vst [vmem:[#allocation64_spill] sm:$0xff] %v7147_v35  ;;  %v881_v35 = vadd.f32 %v625_v16, %v7123_v13  ;;  %v1137_v16 = vmul.f32 %v6806_v56, %v5879_v8 }
 0x1ca   :  { %1478 = vadd.xlane.f32.xlu0 %v1477_v23  ;;  %v1136_v23 = vmul.f32 %v6806_v56, %v5875_v10  ;;  %v883_v2 = vadd.f32 %v627_v42, %v7123_v13  ;;  %v504_v10 = vrot.slane %v7163_v63, 2  ;;  %v1492_v56 = vsel %vm155_vm0, %v1138_v6, 0.0 }
 0x1cb   :  { %5884 = vtanh.f32 %v881_v35  ;;  %v1667_v35 = vperm.slane %v6722_v24, %v7166_v30  ;;  %v1489_v8 = vsel %vm155_vm0, %v1137_v16, 0.0  ;;  %v630_v42 = vperm.slane %v7163_v63, 0 }
 0x1cc   :  { %1484 = vadd.xlane.f32.xlu2 %v1483_v32  ;;  %5886 = vtanh.f32 %v883_v2  ;;  %v1139_v13 = vmul.f32 %v7196_v38, %v5881_v37  ;;  %v505_v37 = vrot.slane %v7163_v63, 3 }
 0x1cd   :  { %1481 = vadd.xlane.f32.xlu1 %v1480_v7  ;;  %v7159_v33 = vpop.xlane.xlu0 %1352  ;;  %v1486_v7 = vsel %vm155_vm0, %v1136_v23, 0.0  ;;  %v5883_v23 = vpop.eup %5882  ;;  %v1796_v6 = vsel %vm1795_vm1, %v1668_v4, %v1667_v35  ;;  %v1670_v4 = vperm.slane %v6754_v57, %v7166_v30  ;;  %5888 = vtanh.f32 %v885_v44 }
 0x1ce   :  { %10146 = vst [vmem:[#allocation65_spill] sm:$0xff] %v7159_v33  ;;  %v886_v2 = vadd.f32 %v630_v42, %v7185_v41  ;;  %v1141_v35 = vmul.f32 %v7196_v38, %v5883_v23  ;;  %5890 = vtanh.f32 %v884_v48  ;;  %v1495_v44 = vsel %vm155_vm0, %v1139_v13, 0.0 }
 0x1cf   :  { %v7169_v26 = vpop.xlane.xlu2 %1358  ;;  %v887_v42 = vadd.f32 %v631_v11, %v7185_v41  ;;  %v507_v48 = vrot.slane %v7163_v63, 5  ;;  %v1673_v11 = vperm.slane %v6764_v5, %v7166_v30  ;;  %v1672_v5 = vperm.slane %v6749_v54, %v7166_v30 }
 0x1d0   :  { %10149 = vst [vmem:[#allocation67_spill] sm:$0xff] %v7169_v26  ;;  %v7173_v32 = vpop.xlane.xlu1 %1355  ;;  %v632_v26 = vperm.slane %v504_v10, 0  ;;  %5892 = vtanh.f32 %v886_v2  ;;  %v1501_v23 = vsel %vm155_vm0, %v1141_v35, 0.0  ;;  %v633_v2 = vperm.slane %v505_v37, 0 }
 0x1d1   :  { %10150 = vst [vmem:[#allocation68_spill] sm:$0xff] %v7173_v32  ;;  %v5885_v32 = vpop.eup %5884  ;;  %v508_v54 = vrot.slane %v7163_v63, 6 }
 0x1d2   :  { %1487 = vadd.xlane.f32.xlu0 %v1486_v7  ;;  %v1669_v7 = vperm.slane %v6729_v31, %v7166_v30  ;;  %v1140_v31 = vmul.f32 %v7196_v38, %v5885_v32  ;;  %v888_v25 = vadd.f32 %v632_v26, %v7185_v41  ;;  %v5887_v57 = vpop.eup %5886  ;;  %v1671_v32 = vperm.slane %v6726_v27, %v7166_v30 }
 0x1d3   :  { %v1676_v26 = vperm.slane %v6782_v28, %v7166_v30  ;;  %v5889_v13 = vpop.eup %5888  ;;  %v1142_v35 = vmul.f32 %v7196_v38, %v5887_v57 }
 0x1d4   :  { %1493 = vadd.xlane.f32.xlu2 %v1492_v56  ;;  %v1798_v10 = vsel %vm1797_vm2, %v1669_v7, %v1796_v6  ;;  %v506_v7 = vrot.slane %v7163_v63, 4  ;;  %5894 = vtanh.f32 %v888_v25  ;;  %v635_v25 = vperm.slane %v507_v48, 0 }
 0x1d5   :  { %1490 = vadd.xlane.f32.xlu1 %v1489_v8  ;;  %v7191_v16 = vpop.xlane.xlu0 %1361  ;;  %v1800_v6 = vsel %vm1799_vm3, %v1670_v4, %v1798_v10  ;;  %v1498_v4 = vsel %vm155_vm0, %v1140_v31, 0.0  ;;  %v5891_v10 = vpop.eup %5890  ;;  %5896 = vtanh.f32 %v887_v42  ;;  %v1677_v31 = vperm.slane %v6791_v39, %v7166_v30 }
 0x1d6   :  { %v1802_v28 = vsel %vm1801_vm4, %v1671_v32, %v1800_v6  ;;  %v5893_v57 = vpop.eup %5892  ;;  %v1143_v6 = vmul.f32 %v7196_v38, %v5891_v10  ;;  %v889_v32 = vadd.f32 %v633_v2, %v7185_v41  ;;  %v1678_v10 = vperm.slane %v6788_v34, %v7166_v30 }
 0x1d7   :  { %v7203_v56 = vpop.xlane.xlu2 %1367  ;;  %v1804_v48 = vsel %vm1803_vm5, %v1672_v5, %v1802_v28  ;;  %v1684_v2 = vperm.slane %v6832_v21, %v7166_v30  ;;  %v891_v5 = vadd.f32 %v635_v25, %v7185_v41  ;;  %v636_v21 = vperm.slane %v508_v54, 0 }
 0x1d8   :  { %v7206_v8 = vpop.xlane.xlu1 %1364  ;;  %5898 = vtanh.f32 %v889_v32  ;;  %v1679_v25 = vperm.slane %v6801_v55, %v7166_v30 }
 0x1d9   :  { %5900 = vtanh.f32 %v891_v5 }
 0x1da   :  { %1496 = vadd.xlane.f32.xlu0 %v1495_v44  ;;  %v1675_v44 = vperm.slane %v6767_v9, %v7166_v30  ;;  %v634_v9 = vperm.slane %v506_v7, 0  ;;  %v5895_v7 = vpop.eup %5894 }
 0x1db   :  { %v5897_v28 = vpop.eup %5896 }
 0x1dc   :  { %1502 = vadd.xlane.f32.xlu2 %v1501_v23  ;;  %v1809_v37 = vsel %vm1795_vm1, %v1676_v26, %v1675_v44  ;;  %v1674_v26 = vperm.slane %v6770_v12, %v7166_v30  ;;  %v1504_v44 = vsel %vm155_vm0, %v1142_v35, 0.0  ;;  %v1145_v35 = vmul.f32 %v7196_v38, %v5893_v57 }
 0x1dd   :  { %1499 = vadd.xlane.f32.xlu1 %v1498_v4  ;;  %v7226_v27 = vpop.xlane.xlu0 %1370  ;;  %v1144_v4 = vmul.f32 %v7196_v38, %v5889_v13  ;;  %v1806_v13 = vsel %vm1805_vm6, %v1673_v11, %v1804_v48  ;;  %v1810_v39 = vsel %vm1797_vm2, %v1677_v31, %v1809_v37  ;;  %v890_v11 = vadd.f32 %v634_v9, %v7185_v41 }
 0x1de   :  { %10151 = vst [vmem:[#allocation69_spill] sm:$0xff] %v7226_v27  ;;  %v509_v48 = vrot.slane %v7163_v63, 7  ;;  %v1683_v31 = vperm.slane %v6835_v17, %v7166_v30  ;;  %v1507_v37 = vsel %vm155_vm0, %v1143_v6, 0.0  ;;  %v1147_v9 = vmul.f32 %v7196_v38, %v5895_v7 }
 0x1df   :  { %v7235_v23 = vpop.xlane.xlu2 %1376  ;;  %v1510_v12 = vsel %vm155_vm0, %v1144_v4, 0.0  ;;  %v1685_v4 = vperm.slane %v6847_v50, %v7166_v30  ;;  %v1808_v63 = vsel %vm1807_vm7, %v1674_v26, %v1806_v13  ;;  %v1146_v54 = vmul.f32 %v7196_v38, %v5897_v28 }
 0x1e0   :  { %10152 = vst [vmem:[#allocation70_spill] sm:$0xff] %v7235_v23  ;;  %v7238_v42 = vpop.xlane.xlu1 %1373  ;;  %v1680_v6 = vperm.slane %v6817_v0, %v7166_v30  ;;  %5902 = vtanh.f32 %v890_v11  ;;  %v637_v34 = vperm.slane %v509_v48, 0  ;;  %v1816_v7 = vsel %vm1795_vm1, %v1684_v2, %v1683_v31  ;;  %v5899_v2 = vpop.eup %5898 }
 0x1e1   :  { %10153 = vst [vmem:[#allocation71_spill] sm:$0xff] %v7238_v42  ;;  %v1691_v26 = vperm.slane %v6887_v45, %v7166_v30  ;;  %v1817_v28 = vsel %vm1797_vm2, %v1685_v4, %v1816_v7  ;;  %v1519_v11 = vsel %vm155_vm0, %v1147_v9, 0.0  ;;  %v1694_v31 = vperm.slane %v6908_v22, %v7166_v30 }
 0x1e2   :  { %1505 = vadd.xlane.f32.xlu0 %v1504_v44  ;;  %v1811_v44 = vsel %vm1799_vm3, %v1678_v10, %v1810_v39  ;;  %v1686_v39 = vperm.slane %v6856_v60, %v7166_v30  ;;  %v892_v10 = vadd.f32 %v636_v21, %v7185_v41  ;;  %v1516_v45 = vsel %vm155_vm0, %v1146_v54, 0.0 }
 0x1e3   :  { %v1812_v5 = vsel %vm1801_vm4, %v1679_v25, %v1811_v44  ;;  %v7296_v21 = vsel %vm1930_vm8, %v1808_v63, -inf  ;;  %v1681_v25 = vperm.slane %v6813_v62, %v7166_v30  ;;  %v1687_v4 = vperm.slane %v6854_v58, %v7166_v30 }
 0x1e4   :  { %1511 = vadd.xlane.f32.xlu2 %v1510_v12  ;;  %v1692_v12 = vperm.slane %v6894_v49, %v7166_v30  ;;  %v1700_v9 = vperm.slane %v6945_v40, %v7166_v30  ;;  %v893_v44 = vadd.f32 %v637_v34, %v7185_v41  ;;  %v1818_v7 = vsel %vm1799_vm3, %v1686_v39, %v1817_v28 }
 0x1e5   :  { %1508 = vadd.xlane.f32.xlu1 %v1507_v37  ;;  %v7265_v57 = vpop.xlane.xlu0 %1379  ;;  %v1513_v37 = vsel %vm155_vm0, %v1145_v35, 0.0  ;;  %v1693_v35 = vperm.slane %v6891_v43, %v7166_v30  ;;  %v1688_v54 = vperm.slane %v6869_v14, %v7166_v30  ;;  %5904 = vtanh.f32 %v892_v10 }
 0x1e6   :  { %v1823_v48 = vsel %vm1795_vm1, %v1692_v12, %v1691_v26  ;;  %v5901_v12 = vpop.eup %5900  ;;  %v1813_v63 = vsel %vm1803_vm5, %v1680_v6, %v1812_v5  ;;  %v1695_v43 = vperm.slane %v6918_v36, %v7166_v30  ;;  %v1699_v40 = vperm.slane %v6930_v3, %v7166_v30 }
 0x1e7   :  { %v7275_v32 = vpop.xlane.xlu2 %1385  ;;  %v1824_v26 = vsel %vm1797_vm2, %v1693_v35, %v1823_v48  ;;  %v1148_v41 = vmul.f32 %v7196_v38, %v5899_v2  ;;  %v1682_v39 = vperm.slane %v6829_v18, %v7166_v30  ;;  %v1689_v6 = vperm.slane %v6876_v59, %v7166_v30 }
 0x1e8   :  { %v7283_v13 = vpop.xlane.xlu1 %1382  ;;  %v1825_v10 = vsel %vm1799_vm3, %v1694_v31, %v1824_v26  ;;  %v1701_v5 = vperm.slane %v6954_v51, %v7166_v30  ;;  %v1830_v28 = vsel %vm1795_vm1, %v1700_v9, %v1699_v40  ;;  %5906 = vtanh.f32 %v893_v44 }
 0x1e9   :  { %v1696_v2 = vperm.slane %v6914_v29, %v7166_v30  ;;  %v1814_v31 = vsel %vm1805_vm6, %v1681_v25, %v1813_v63  ;;  %v1826_v40 = vsel %vm1801_vm4, %v1695_v43, %v1825_v10  ;;  %v1697_v9 = vperm.slane %v6927_v61, %v7166_v30  ;;  %v10155_v29 = vld [vmem:[#allocation37_spill] sm:$0xff] }
 0x1ea   :  { %1514 = vadd.xlane.f32.xlu0 %v1513_v37  ;;  %v5903_v37 = vpop.eup %5902  ;;  %v1702_v44 = vperm.slane %v6951_v46, %v7166_v30  ;;  %v1708_v25 = vperm.slane %v6988_v15, %v7166_v30  ;;  %v1707_v43 = vperm.slane %v6991_v53, %v7166_v30  ;;  %v1709_v63 = vperm.slane %v7003_v47, %v7166_v30 }
 0x1eb   :  { %v1149_v3 = vmul.f32 %v7196_v38, %v5903_v37  ;;  %v1831_v37 = vsel %vm1797_vm2, %v1701_v5, %v1830_v28  ;;  %v1698_v5 = vperm.slane %v6933_v1, %v7166_v30  ;;  %v1716_v28 = vperm.slane %v7050_v52, %v7166_v30 }
 0x1ec   :  { %1520 = vadd.xlane.f32.xlu2 %v1519_v11  ;;  %v1819_v11 = vsel %vm1801_vm4, %v1687_v4, %v1818_v7  ;;  %v1522_v4 = vsel %vm155_vm0, %v1148_v41, 0.0  ;;  %v1690_v7 = vperm.slane %v6873_v20, %v7166_v30  ;;  %v1832_v46 = vsel %vm1799_vm3, %v1702_v44, %v1831_v37 }
 0x1ed   :  { %1517 = vadd.xlane.f32.xlu1 %v1516_v45  ;;  %v7314_v34 = vpop.xlane.xlu0 %1388  ;;  %v1150_v45 = vmul.f32 %v7196_v38, %v5901_v12  ;;  %v1820_v26 = vsel %vm1803_vm5, %v1688_v54, %v1819_v11  ;;  %v5905_v12 = vpop.eup %5904  ;;  %v1703_v54 = vperm.slane %v6964_v19, %v7166_v30  ;;  %v1525_v11 = vsel %vm155_vm0, %v1149_v3, 0.0  ;;  %v10156_v3 = vld [vmem:[#allocation43_spill] sm:$0xff] }
 0x1ee   :  { %v1821_v10 = vsel %vm1805_vm6, %v1689_v6, %v1820_v26  ;;  %v5907_v15 = vpop.eup %5906  ;;  %v1815_v6 = vsel %vm1807_vm7, %v1682_v39, %v1814_v31  ;;  %v1704_v52 = vperm.slane %v10155_v29, %v7166_v30 }
 0x1ef   :  { %v7325_v35 = vpop.xlane.xlu2 %1394  ;;  %v1528_v41 = vsel %vm155_vm0, %v1150_v45, 0.0  ;;  %v1151_v45 = vmul.f32 %v7196_v38, %v5905_v12  ;;  %v1833_v37 = vsel %vm1801_vm4, %v1703_v54, %v1832_v46  ;;  %v10158_v12 = vld [vmem:[#allocation48_spill] sm:$0xff] }
 0x1f0   :  { %10154 = vst [vmem:[#allocation72_spill] sm:$0xff] %v7325_v35  ;;  %v7331_v48 = vpop.xlane.xlu1 %1391  ;;  %v1717_v39 = vperm.slane %v10158_v12, %v7166_v30  ;;  %v10161_v54 = vld [vmem:[#allocation36_spill] sm:$0xff] }
 0x1f1   :  { %v1531_v19 = vsel %vm155_vm0, %v1151_v45, 0.0 }
 0x1f2   :  { %1523 = vadd.xlane.f32.xlu0 %v1522_v4  ;;  %v1827_v4 = vsel %vm1803_vm5, %v1696_v2, %v1826_v40  ;;  %v1710_v2 = vperm.slane %v10156_v3, %v7166_v30  ;;  %v10157_v40 = vld [vmem:[#allocation47_spill] sm:$0xff] }
 0x1f3   :  { %v1828_v26 = vsel %vm1805_vm6, %v1697_v9, %v1827_v4  ;;  %v1715_v44 = vperm.slane %v10157_v40, %v7166_v30  ;;  %v1822_v9 = vsel %vm1807_vm7, %v1690_v7, %v1821_v10  ;;  %v1152_v40 = vmul.f32 %v7196_v38, %v5907_v15 }
 0x1f4   :  { %1529 = vadd.xlane.f32.xlu2 %v1528_v41  ;;  %v1837_v41 = vsel %vm1795_vm1, %v1708_v25, %v1707_v43  ;;  %v10160_v25 = vld [vmem:[#allocation50_spill] sm:$0xff]  ;;  %v1829_v46 = vsel %vm1807_vm7, %v1698_v5, %v1828_v26  ;;  %v1934_v7 = vsel %vm1930_vm8, %v1815_v6, -inf  ;;  %v1834_v38 = vsel %vm1803_vm5, %v1704_v52, %v1833_v37  ;;  %v10165_v26 = vld [vmem:[#allocation52_spill] sm:$0xff] }
 0x1f5   :  { %1526 = vadd.xlane.f32.xlu1 %v1525_v11  ;;  %v7362_v47 = vpop.xlane.xlu0 %1397  ;;  %v1838_v11 = vsel %vm1797_vm2, %v1709_v63, %v1837_v41  ;;  %v1844_v4 = vsel %vm1795_vm1, %v1716_v28, %v1715_v44  ;;  %v1718_v43 = vperm.slane %v10160_v25, %v7166_v30  ;;  %v1705_v63 = vperm.slane %v10161_v54, %v7166_v30  ;;  %v10162_v41 = vld [vmem:[#allocation42_spill] sm:$0xff]  ;;  %v10163_v28 = vld [vmem:[#allocation44_spill] sm:$0xff] }
 0x1f6   :  { %v1711_v12 = vperm.slane %v10162_v41, %v7166_v30  ;;  %v1839_v10 = vsel %vm1799_vm3, %v1710_v2, %v1838_v11  ;;  %v1712_v44 = vperm.slane %v10163_v28, %v7166_v30  ;;  %v10164_v25 = vld [vmem:[#allocation56_spill] sm:$0xff]  ;;  %v1845_v5 = vsel %vm1797_vm2, %v1717_v39, %v1844_v4  ;;  %v10166_v2 = vld [vmem:[#allocation38_spill] sm:$0xff] }
 0x1f7   :  { %v7378_v31 = vpop.xlane.xlu2 %1403  ;;  %v1724_v15 = vperm.slane %v10164_v25, %v7166_v30  ;;  %v1719_v41 = vperm.slane %v10165_v26, %v7166_v30  ;;  %v1940_v45 = vsel %vm1930_vm8, %v1829_v46, -inf  ;;  %v1937_v6 = vsel %vm1930_vm8, %v1822_v9, -inf  ;;  %v10167_v28 = vld [vmem:[#allocation54_spill] sm:$0xff] }
 0x1f8   :  { %10159 = vst [vmem:[#allocation37_spill] sm:$0xff] %v7378_v31  ;;  %v7384_v3 = vpop.xlane.xlu1 %1400  ;;  %v1706_v11 = vperm.slane %v10166_v2, %v7166_v30  ;;  %v1846_v54 = vsel %vm1799_vm3, %v1718_v43, %v1845_v5  ;;  %v1723_v25 = vperm.slane %v10167_v28, %v7166_v30  ;;  %v10168_v52 = vld [vmem:[#allocation46_spill] sm:$0xff]  ;;  %v1835_v46 = vsel %vm1805_vm6, %v1705_v63, %v1834_v38  ;;  %v10170_v5 = vld [vmem:[#allocation51_spill] sm:$0xff] }
 0x1f9   :  { %v1713_v37 = vperm.slane %v10168_v52, %v7166_v30  ;;  %v10169_v39 = vld [vmem:[#allocation58_spill] sm:$0xff]  ;;  %v1840_v43 = vsel %vm1801_vm4, %v1711_v12, %v1839_v10  ;;  %v1720_v28 = vperm.slane %v10170_v5, %v7166_v30  ;;  %v1847_v52 = vsel %vm1801_vm4, %v1719_v41, %v1846_v54  ;;  %v10172_v2 = vld [vmem:[#allocation63_spill] sm:$0xff]  ;;  %v10173_v12 = vld [vmem:[#allocation64_spill] sm:$0xff] }
 0x1fa   :  { %1532 = vadd.xlane.f32.xlu0 %v1531_v19  ;;  %v1534_v19 = vsel %vm155_vm0, %v1152_v40, 0.0  ;;  %v1725_v4 = vperm.slane %v10169_v39, %v7166_v30  ;;  %v1740_v40 = vperm.slane %v7238_v42, %v7166_v30  ;;  %v1841_v26 = vsel %vm1803_vm5, %v1712_v44, %v1840_v43  ;;  %v10175_v42 = vld [vmem:[#allocation57_spill] sm:$0xff] }
 0x1fb   :  { %v1732_v63 = vperm.slane %v10172_v2, %v7166_v30  ;;  %v1731_v10 = vperm.slane %v10173_v12, %v7166_v30  ;;  %v1726_v5 = vperm.slane %v10175_v42, %v7166_v30  ;;  %v1733_v54 = vperm.slane %v7159_v33, %v7166_v30  ;;  %v10176_v2 = vld [vmem:[#allocation59_spill] sm:$0xff] }
 0x1fc   :  { %1932 = vmax.xlane.f32.xlu2 %v7296_v21  ;;  %v1851_v21 = vsel %vm1795_vm1, %v1724_v15, %v1723_v25  ;;  %v10174_v25 = vld [vmem:[#allocation45_spill] sm:$0xff]  ;;  %v1739_v41 = vperm.slane %v7226_v27, %v7166_v30  ;;  %v1727_v12 = vperm.slane %v10176_v2, %v7166_v30  ;;  %v10177_v42 = vld [vmem:[#allocation55_spill] sm:$0xff]  ;;  %v1742_v27 = vperm.slane %v7265_v57, %v7166_v30 }
 0x1fd   :  { %1535 = vadd.xlane.f32.xlu1 %v1534_v19  ;;  %v7416_v9 = vpop.xlane.xlu0 %1406  ;;  %v10171_v19 = vld [vmem:[#allocation53_spill] sm:$0xff]  ;;  %v1714_v15 = vperm.slane %v10174_v25, %v7166_v30  ;;  %v1852_v43 = vsel %vm1797_vm2, %v1725_v4, %v1851_v21  ;;  %v1842_v25 = vsel %vm1805_vm6, %v1713_v37, %v1841_v26  ;;  %v1722_v53 = vperm.slane %v10177_v42, %v7166_v30  ;;  %v10178_v21 = vld [vmem:[#allocation68_spill] sm:$0xff] }
 0x1fe   :  { %v1721_v39 = vperm.slane %v10171_v19, %v7166_v30  ;;  %v1741_v19 = vperm.slane %v7235_v23, %v7166_v30  ;;  %v1865_v33 = vsel %vm1795_vm1, %v1740_v40, %v1739_v41  ;;  %v1848_v20 = vsel %vm1803_vm5, %v1720_v28, %v1847_v52  ;;  %v10179_v42 = vld [vmem:[#allocation61_spill] sm:$0xff] }
 0x1ff   :  { %v7433_v38 = vpop.xlane.xlu2 %1412  ;;  %v1858_v4 = vsel %vm1795_vm1, %v1732_v63, %v1731_v10  ;;  %v1734_v2 = vperm.slane %v10178_v21, %v7166_v30  ;;  %v1836_v23 = vsel %vm1807_vm7, %v1706_v11, %v1835_v46  ;;  %v1853_v37 = vsel %vm1799_vm3, %v1726_v5, %v1852_v43  ;;  %v10180_v46 = vld [vmem:[#allocation67_spill] sm:$0xff] }
 0x200   :  { %v7443_v44 = vpop.xlane.xlu1 %1409  ;;  %v1849_v26 = vsel %vm1805_vm6, %v1721_v39, %v1848_v20  ;;  %v1728_v40 = vperm.slane %v10179_v42, %v7166_v30  ;;  %v1859_v41 = vsel %vm1797_vm2, %v1733_v54, %v1858_v4  ;;  %v1854_v28 = vsel %vm1801_vm4, %v1727_v12, %v1853_v37 }
 0x201   :  { %v1866_v52 = vsel %vm1797_vm2, %v1741_v19, %v1865_v33  ;;  %v1743_v11 = vperm.slane %v7283_v13, %v7166_v30  ;;  %v1843_v39 = vsel %vm1807_vm7, %v1714_v15, %v1842_v25  ;;  %v1735_v5 = vperm.slane %v10180_v46, %v7166_v30  ;;  %v10181_v33 = vld [vmem:[#allocation60_spill] sm:$0xff] }
 0x202   :  { %1935 = vmax.xlane.f32.xlu0 %v1934_v7  ;;  %v1748_v7 = vperm.slane %v7362_v47, %v7166_v30  ;;  %v1867_v63 = vsel %vm1799_vm3, %v1742_v27, %v1866_v52  ;;  %v1850_v12 = vsel %vm1807_vm7, %v1722_v53, %v1849_v26  ;;  %v1729_v19 = vperm.slane %v10181_v33, %v7166_v30 }
 0x203   :  { %v1860_v10 = vsel %vm1799_vm3, %v1734_v2, %v1859_v41  ;;  %v1749_v25 = vperm.slane %v7384_v3, %v7166_v30  ;;  %v1744_v27 = vperm.slane %v7275_v32, %v7166_v30  ;;  %v1943_v53 = vsel %vm1930_vm8, %v1836_v23, -inf  ;;  %v10183_v2 = vld [vmem:[#allocation62_spill] sm:$0xff] }
 0x204   :  { %1941 = vmax.xlane.f32.xlu2 %v1940_v45  ;;  %v1747_v45 = vperm.slane %v7325_v35, %v7166_v30  ;;  %v1855_v4 = vsel %vm1803_vm5, %v1728_v40, %v1854_v28  ;;  %v1730_v26 = vperm.slane %v10183_v2, %v7166_v30  ;;  %v1868_v37 = vsel %vm1801_vm4, %v1743_v11, %v1867_v63 }
 0x205   :  { %1938 = vmax.xlane.f32.xlu1 %v1937_v6  ;;  %v7472_v20 = vpop.xlane.xlu0 %1415  ;;  %v1736_v6 = vperm.slane %v7191_v16, %v7166_v30  ;;  %v1745_v41 = vperm.slane %v7314_v34, %v7166_v30  ;;  %v1946_v52 = vsel %vm1930_vm8, %v1843_v39, -inf  ;;  %v1737_v35 = vperm.slane %v7206_v8, %v7166_v30 }
 0x206   :  { %v1872_v54 = vsel %vm1795_vm1, %v1748_v7, %v1747_v45  ;;  %v1750_v7 = vperm.slane %v7378_v31, %v7166_v30  ;;  %v1949_v23 = vsel %vm1930_vm8, %v1850_v12, -inf  ;;  %v1861_v40 = vsel %vm1801_vm4, %v1735_v5, %v1860_v10 }
 0x207   :  { %v7488_v15 = vpop.xlane.xlu2 %1421  ;;  %v1873_v28 = vsel %vm1797_vm2, %v1749_v25, %v1872_v54  ;;  %v1751_v11 = vperm.slane %v7416_v9, %v7166_v30  ;;  %v1856_v63 = vsel %vm1805_vm6, %v1729_v19, %v1855_v4  ;;  %v1862_v39 = vsel %vm1803_vm5, %v1736_v6, %v1861_v40 }
 0x208   :  { %10182 = vst [vmem:[#allocation68_spill] sm:$0xff] %v7488_v15  ;;  %v7493_v43 = vpop.xlane.xlu1 %1418  ;;  %v1746_v45 = vperm.slane %v7331_v48, %v7166_v30  ;;  %v1756_v31 = vperm.slane %v7488_v15, %v7166_v30  ;;  %v1869_v5 = vsel %vm1803_vm5, %v1744_v27, %v1868_v37  ;;  %v1738_v10 = vperm.slane %v7203_v56, %v7166_v30 }
 0x209   :  { %v1755_v12 = vperm.slane %v7493_v43, %v7166_v30  ;;  %v1857_v19 = vsel %vm1807_vm7, %v1730_v26, %v1856_v63  ;;  %v1870_v6 = vsel %vm1805_vm6, %v1745_v41, %v1869_v5  ;;  %v1874_v54 = vsel %vm1799_vm3, %v1750_v7, %v1873_v28 }
 0x20a   :  { %1944 = vmax.xlane.f32.xlu0 %v1943_v53  ;;  %v1752_v53 = vperm.slane %v7443_v44, %v7166_v30  ;;  %v1863_v27 = vsel %vm1805_vm6, %v1737_v35, %v1862_v39  ;;  %v1875_v37 = vsel %vm1801_vm4, %v1751_v11, %v1874_v54  ;;  %v1952_v26 = vsel %vm1930_vm8, %v1857_v19, -inf }
 0x20b   :  { %v1871_v41 = vsel %vm1807_vm7, %v1746_v45, %v1870_v6  ;;  %v1753_v7 = vperm.slane %v7433_v38, %v7166_v30  ;;  %v1864_v11 = vsel %vm1807_vm7, %v1738_v10, %v1863_v27  ;;  %v1754_v63 = vperm.slane %v7472_v20, %v7166_v30 }
 0x20c   :  { %1950 = vmax.xlane.f32.xlu2 %v1949_v23  ;;  %v1958_v45 = vsel %vm1930_vm8, %v1871_v41, -inf  ;;  %v1955_v5 = vsel %vm1930_vm8, %v1864_v11, -inf }
 0x20d   :  { %1947 = vmax.xlane.f32.xlu1 %v1946_v52  ;;  %v7523_v25 = vpop.xlane.xlu0 %1424  ;;  %v1879_v52 = vsel %vm1795_vm1, %v1756_v31, %v1755_v12  ;;  %v1876_v31 = vsel %vm1803_vm5, %v1752_v53, %v1875_v37 }
 0x20e   :  { %v1757_v4 = vperm.slane %v7523_v25, %v7166_v30  ;;  %v1877_v10 = vsel %vm1805_vm6, %v1753_v7, %v1876_v31 }
 0x20f   :  { %v7534_v23 = vpop.xlane.xlu2 %1430  ;;  %v1878_v54 = vsel %vm1807_vm7, %v1754_v63, %v1877_v10 }
 0x210   :  { %10184 = vst [vmem:[#allocation61_spill] sm:$0xff] %v7534_v23  ;;  %v7537_v40 = vpop.xlane.xlu1 %1427  ;;  %v1880_v28 = vsel %vm1797_vm2, %v1757_v4, %v1879_v52  ;;  %v1759_v39 = vperm.slane %v7534_v23, %v7166_v30  ;;  %v1961_v41 = vsel %vm1930_vm8, %v1878_v54, -inf }
 0x211   :  { %v1758_v35 = vperm.slane %v7537_v40, %v7166_v30 }
 0x212   :  { %1953 = vmax.xlane.f32.xlu0 %v1952_v26 }
 0x213   :  { %v1881_v12 = vsel %vm1799_vm3, %v1758_v35, %v1880_v28 }
 0x214   :  { %1959 = vmax.xlane.f32.xlu2 %v1958_v45  ;;  %v1882_v4 = vsel %vm1801_vm4, %v1759_v39, %v1881_v12 }
 0x215   :  { %1956 = vmax.xlane.f32.xlu1 %v1955_v5  ;;  %v7555_v19 = vpop.xlane.xlu0 %1433 }
 0x216   :  { %v1760_v6 = vperm.slane %v7555_v19, %v7166_v30 }
 0x217   :  { %v7561_v53 = vpop.xlane.xlu2 %1439 }
 0x218   :  { %10185 = vst [vmem:[#allocation67_spill] sm:$0xff] %v7561_v53  ;;  %v1762_v27 = vperm.slane %v7561_v53, %v7166_v30  ;;  %v7566_v37 = vpop.xlane.xlu1 %1436  ;;  %v1883_v52 = vsel %vm1803_vm5, %v1760_v6, %v1882_v4 }
 0x219   :  { %v1761_v26 = vperm.slane %v7566_v37, %v7166_v30 }
 0x21a   :  { %1962 = vmax.xlane.f32.xlu0 %v1961_v41 }
 0x21b   :  { %v1884_v7 = vsel %vm1805_vm6, %v1761_v26, %v1883_v52 }
 0x21c   :  { %v1885_v28 = vsel %vm1807_vm7, %v1762_v27, %v1884_v7 }
 0x21d   :  { %v7574_v35 = vpop.xlane.xlu0 %1442  ;;  %v1964_v11 = vsel %vm1930_vm8, %v1885_v28, -inf }
 0x21e   :  { %1965 = vmax.xlane.f32.xlu1 %v1964_v11  ;;  %v1763_v45 = vperm.slane %v7574_v35, %v7166_v30 }
 0x21f   :  { %v7577_v63 = vpop.xlane.xlu2 %1448 }
 0x220   :  { %10186 = vst [vmem:[#allocation60_spill] sm:$0xff] %v7577_v63  ;;  %v7579_v31 = vpop.xlane.xlu1 %1445  ;;  %v1765_v12 = vperm.slane %v7577_v63, %v7166_v30 }
 0x221   :  { %v1764_v39 = vperm.slane %v7579_v31, %v7166_v30 }
 0x223   :  { %v1886_v5 = vsel %vm1795_vm1, %v1764_v39, %v1763_v45 }
 0x224   :  { %v1887_v4 = vsel %vm1797_vm2, %v1765_v12, %v1886_v5 }
 0x225   :  { %v7588_v10 = vpop.xlane.xlu0 %1451 }
 0x226   :  { %v1766_v6 = vperm.slane %v7588_v10, %v7166_v30 }
 0x227   :  { %v7592_v54 = vpop.xlane.xlu2 %1457 }
 0x228   :  { %10187 = vst [vmem:[#allocation62_spill] sm:$0xff] %v7592_v54  ;;  %v7595_v27 = vpop.xlane.xlu1 %1454  ;;  %v1888_v52 = vsel %vm1799_vm3, %v1766_v6, %v1887_v4  ;;  %v1768_v41 = vperm.slane %v7592_v54, %v7166_v30 }
 0x229   :  { %v1767_v26 = vperm.slane %v7595_v27, %v7166_v30 }
 0x22b   :  { %v1889_v7 = vsel %vm1801_vm4, %v1767_v26, %v1888_v52 }
 0x22c   :  { %v1890_v45 = vsel %vm1803_vm5, %v1768_v41, %v1889_v7 }
 0x22d   :  { %v7603_v28 = vpop.xlane.xlu0 %1460 }
 0x22e   :  { %10188 = vst [vmem:[#allocation73_spill] sm:$0xff] %v7603_v28  ;;  %v1769_v11 = vperm.slane %v7603_v28, %v7166_v30 }
 0x22f   :  { %v7607_v39 = vpop.xlane.xlu2 %1466 }
 0x230   :  { %10189 = vst [vmem:[#allocation74_spill] sm:$0xff] %v7607_v39  ;;  %v7610_v12 = vpop.xlane.xlu1 %1463  ;;  %v1891_v5 = vsel %vm1805_vm6, %v1769_v11, %v1890_v45  ;;  %v1771_v41 = vperm.slane %v7607_v39, %v7166_v30 }
 0x231   :  { %v1770_v6 = vperm.slane %v7610_v12, %v7166_v30 }
 0x233   :  { %v1892_v4 = vsel %vm1807_vm7, %v1770_v6, %v1891_v5 }
 0x234   :  { %v1967_v52 = vsel %vm1930_vm8, %v1892_v4, -inf }
 0x235   :  { %1968 = vmax.xlane.f32.xlu2 %v1967_v52  ;;  %v7617_v26 = vpop.xlane.xlu0 %1469 }
 0x236   :  { %10190 = vst [vmem:[#allocation75_spill] sm:$0xff] %v7617_v26  ;;  %v1772_v54 = vperm.slane %v7617_v26, %v7166_v30 }
 0x237   :  { %v7621_v63 = vpop.xlane.xlu2 %1475 }
 0x238   :  { %10191 = vst [vmem:[#allocation76_spill] sm:$0xff] %v7621_v63  ;;  %v7625_v7 = vpop.xlane.xlu1 %1472  ;;  %v1893_v45 = vsel %vm1795_vm1, %v1772_v54, %v1771_v41  ;;  %v1774_v5 = vperm.slane %v7621_v63, %v7166_v30 }
 0x239   :  { %10192 = vst [vmem:[#allocation77_spill] sm:$0xff] %v7625_v7  ;;  %v1773_v11 = vperm.slane %v7625_v7, %v7166_v30 }
 0x23b   :  { %v1894_v6 = vsel %vm1797_vm2, %v1773_v11, %v1893_v45 }
 0x23c   :  { %v1895_v39 = vsel %vm1799_vm3, %v1774_v5, %v1894_v6 }
 0x23d   :  { %v7633_v4 = vpop.xlane.xlu0 %1478 }
 0x23e   :  { %10193 = vst [vmem:[#allocation78_spill] sm:$0xff] %v7633_v4  ;;  %v1775_v52 = vperm.slane %v7633_v4, %v7166_v30 }
 0x23f   :  { %v7637_v53 = vpop.xlane.xlu2 %1484 }
 0x240   :  { %10194 = vst [vmem:[#allocation79_spill] sm:$0xff] %v7637_v53  ;;  %v7640_v26 = vpop.xlane.xlu1 %1481  ;;  %v1896_v23 = vsel %vm1801_vm4, %v1775_v52, %v1895_v39  ;;  %v1777_v41 = vperm.slane %v7637_v53, %v7166_v30 }
 0x241   :  { %10195 = vst [vmem:[#allocation80_spill] sm:$0xff] %v7640_v26  ;;  %v1776_v54 = vperm.slane %v7640_v26, %v7166_v30 }
 0x243   :  { %v1897_v11 = vsel %vm1803_vm5, %v1776_v54, %v1896_v23 }
 0x244   :  { %v1898_v5 = vsel %vm1805_vm6, %v1777_v41, %v1897_v11 }
 0x245   :  { %v7648_v45 = vpop.xlane.xlu0 %1487 }
 0x246   :  { %10196 = vst [vmem:[#allocation81_spill] sm:$0xff] %v7648_v45  ;;  %v1778_v63 = vperm.slane %v7648_v45, %v7166_v30 }
 0x247   :  { %v7652_v4 = vpop.xlane.xlu2 %1493 }
 0x248   :  { %10197 = vst [vmem:[#allocation82_spill] sm:$0xff] %v7652_v4  ;;  %v7655_v6 = vpop.xlane.xlu1 %1490  ;;  %v1899_v39 = vsel %vm1807_vm7, %v1778_v63, %v1898_v5  ;;  %v1780_v53 = vperm.slane %v7652_v4, %v7166_v30 }
 0x249   :  { %10198 = vst [vmem:[#allocation83_spill] sm:$0xff] %v7655_v6  ;;  %v1970_v52 = vsel %vm1930_vm8, %v1899_v39, -inf  ;;  %v1779_v23 = vperm.slane %v7655_v6, %v7166_v30 }
 0x24a   :  { %1971 = vmax.xlane.f32.xlu0 %v1970_v52 }
 0x24b   :  { %v1900_v41 = vsel %vm1795_vm1, %v1780_v53, %v1779_v23 }
 0x24d   :  { %v7663_v54 = vpop.xlane.xlu0 %1496 }
 0x24e   :  { %10199 = vst [vmem:[#allocation84_spill] sm:$0xff] %v7663_v54  ;;  %v1781_v45 = vperm.slane %v7663_v54, %v7166_v30 }
 0x24f   :  { %v7667_v26 = vpop.xlane.xlu2 %1502 }
 0x250   :  { %10200 = vst [vmem:[#allocation85_spill] sm:$0xff] %v7667_v26  ;;  %v7670_v11 = vpop.xlane.xlu1 %1499  ;;  %v1901_v63 = vsel %vm1797_vm2, %v1781_v45, %v1900_v41  ;;  %v1783_v39 = vperm.slane %v7667_v26, %v7166_v30 }
 0x251   :  { %10201 = vst [vmem:[#allocation86_spill] sm:$0xff] %v7670_v11  ;;  %v1782_v5 = vperm.slane %v7670_v11, %v7166_v30 }
 0x253   :  { %v1902_v52 = vsel %vm1799_vm3, %v1782_v5, %v1901_v63 }
 0x254   :  { %v1903_v53 = vsel %vm1801_vm4, %v1783_v39, %v1902_v52 }
 0x255   :  { %v7678_v4 = vpop.xlane.xlu0 %1505 }
 0x256   :  { %10202 = vst [vmem:[#allocation87_spill] sm:$0xff] %v7678_v4  ;;  %v1784_v54 = vperm.slane %v7678_v4, %v7166_v30 }
 0x257   :  { %v7682_v6 = vpop.xlane.xlu2 %1511 }
 0x258   :  { %10203 = vst [vmem:[#allocation88_spill] sm:$0xff] %v7682_v6  ;;  %v1786_v45 = vperm.slane %v7682_v6, %v7166_v30  ;;  %v7687_v23 = vpop.xlane.xlu1 %1508  ;;  %v1904_v41 = vsel %vm1803_vm5, %v1784_v54, %v1903_v53 }
 0x259   :  { %10204 = vst [vmem:[#allocation89_spill] sm:$0xff] %v7687_v23  ;;  %v1785_v26 = vperm.slane %v7687_v23, %v7166_v30 }
 0x25b   :  { %v1905_v63 = vsel %vm1805_vm6, %v1785_v26, %v1904_v41 }
 0x25c   :  { %v1906_v5 = vsel %vm1807_vm7, %v1786_v45, %v1905_v63 }
 0x25d   :  { %v1973_v4 = vsel %vm1930_vm8, %v1906_v5, -inf  ;;  %v7695_v11 = vpop.xlane.xlu0 %1514 }
 0x25e   :  { %10205 = vst [vmem:[#allocation90_spill] sm:$0xff] %v7695_v11  ;;  %1974 = vmax.xlane.f32.xlu1 %v1973_v4  ;;  %v1787_v54 = vperm.slane %v7695_v11, %v7166_v30  ;;  %v6409_v11 = vmov 0  }
 0x25f   :  { %v7697_v39 = vpop.xlane.xlu2 %1520  ;;  %5644 = vset.pattern.permute.xlu1 %v6409_v11  ;;  %5643 = vset.pattern.permute.xlu0 %v6409_v11 }
 0x260   :  { %10206 = vst [vmem:[#allocation91_spill] sm:$0xff] %v7697_v39  ;;  %v7699_v52 = vpop.xlane.xlu1 %1517  ;;  %v1789_v26 = vperm.slane %v7697_v39, %v7166_v30  ;;  %5645 = vset.pattern.permute.xlu2 %v6409_v11 }
 0x261   :  { %10207 = vst [vmem:[#allocation92_spill] sm:$0xff] %v7699_v52  ;;  %v1788_v6 = vperm.slane %v7699_v52, %v7166_v30 }
 0x263   :  { %v1907_v45 = vsel %vm1795_vm1, %v1788_v6, %v1787_v54 }
 0x264   :  { %v1908_v63 = vsel %vm1797_vm2, %v1789_v26, %v1907_v45 }
 0x265   :  { %v7707_v53 = vpop.xlane.xlu0 %1523 }
 0x266   :  { %10208 = vst [vmem:[#allocation93_spill] sm:$0xff] %v7707_v53  ;;  %v1790_v4 = vperm.slane %v7707_v53, %v7166_v30 }
 0x267   :  { %v7715_v5 = vpop.xlane.xlu2 %1529 }
 0x268   :  { %v7712_v41 = vpop.xlane.xlu1 %1526  ;;  %10210 = vst [vmem:[#allocation95_spill] sm:$0xff] %v7715_v5  ;;  %v1909_v39 = vsel %vm1799_vm3, %v1790_v4, %v1908_v63  ;;  %v1792_v6 = vperm.slane %v7715_v5, %v7166_v30 }
 0x269   :  { %10209 = vst [vmem:[#allocation94_spill] sm:$0xff] %v7712_v41  ;;  %v1791_v52 = vperm.slane %v7712_v41, %v7166_v30 }
 0x26b   :  { %v1910_v54 = vsel %vm1801_vm4, %v1791_v52, %v1909_v39 }
 0x26c   :  { %v1911_v41 = vsel %vm1803_vm5, %v1792_v6, %v1910_v54 }
 0x26d   :  { %v7723_v53 = vpop.xlane.xlu0 %1532 }
 0x26e   :  { %10211 = vst [vmem:[#allocation96_spill] sm:$0xff] %v7723_v53  ;;  %v1793_v26 = vperm.slane %v7723_v53, %v7166_v30  ;;  %v10213_v53 = vld [vmem:[#allocation18_spill] sm:$0xff] }
 0x26f   :  { %v7735_v39 = vpop.xlane.xlu2 %1932 }
 0x270   :  { %v7727_v45 = vpop.xlane.xlu1 %1535  ;;  %v1912_v4 = vsel %vm1805_vm6, %v1793_v26, %v1911_v41  ;;  %v1996_v52 = vperm.slane %v7735_v39, 1  ;;  %v1995_v5 = vperm.slane %v7735_v39, 0  ;;  %v1999_v54 = vperm.slane %v7735_v39, 4 }
 0x271   :  { %10212 = vst [vmem:[#allocation97_spill] sm:$0xff] %v7727_v45  ;;  %v1794_v23 = vperm.slane %v7727_v45, %v7166_v30  ;;  %v2002_v30 = vperm.slane %v7735_v39, 7  ;;  %v2001_v15 = vperm.slane %v7735_v39, 6 }
 0x272   :  { %v2252_v28 = vsub.f32 %v10213_v53, %v1996_v52  ;;  %v2251_v6 = vsub.f32 %v6722_v24, %v1995_v5 }
 0x273   :  { %v1913_v11 = vsel %vm1807_vm7, %v1794_v23, %v1912_v4  ;;  %v10214_v23 = vld [vmem:[#allocation16_spill] sm:$0xff] }
 0x274   :  { %v1976_v63 = vsel %vm1930_vm8, %v1913_v11, -inf  ;;  %v2381_v41 = vmul.f32 1.442695, %v2252_v28  ;;  %v2379_v26 = vmul.f32 1.442695, %v2251_v6  ;;  %v2255_v4 = vsub.f32 %v10214_v23, %v1999_v54  ;;  %v10215_v11 = vld [vmem:[#allocation23_spill] sm:$0xff] }
 0x275   :  { %1977 = vmax.xlane.f32.xlu2 %v1976_v63  ;;  %v2258_v63 = vsub.f32 %v10215_v11, %v2002_v30  ;;  %v7745_v45 = vpop.xlane.xlu0 %1935  ;;  %v10218_v28 = vld [vmem:[#allocation21_spill] sm:$0xff]  ;;  %v10219_v6 = vld [vmem:[#allocation26_spill] sm:$0xff] }
 0x276   :  { %5908 = vpow2.f32 %v2381_v41  ;;  %v2387_v7 = vmul.f32 1.442695, %v2255_v4  ;;  %v2005_v24 = vperm.slane %v7745_v45, 2  ;;  %v2257_v30 = vsub.f32 %v10218_v28, %v2001_v15 }
 0x277   :  { %5910 = vpow2.f32 %v2379_v26  ;;  %v2393_v53 = vmul.f32 1.442695, %v2258_v63  ;;  %v2008_v23 = vperm.slane %v7745_v45, 5 }
 0x278   :  { %5912 = vpow2.f32 %v2387_v7  ;;  %v2261_v54 = vsub.f32 %v10219_v6, %v2005_v24  ;;  %v2391_v41 = vmul.f32 1.442695, %v2257_v30  ;;  %v2004_v7 = vperm.slane %v7745_v45, 1  ;;  %v7766_v63 = vpop.xlane.xlu1 %1938 }
 0x279   :  { %5914 = vpow2.f32 %v2393_v53  ;;  %v2264_v15 = vsub.f32 %v6817_v0, %v2008_v23  ;;  %v10222_v53 = vld [vmem:[#allocation24_spill] sm:$0xff] }
 0x27a   :  { %v2399_v4 = vmul.f32 1.442695, %v2261_v54  ;;  %5916 = vpow2.f32 %v2391_v41  ;;  %v2260_v24 = vsub.f32 %v10222_v53, %v2004_v7  ;;  %v2011_v54 = vperm.slane %v7766_v63, 0 }
 0x27b   :  { %v2405_v28 = vmul.f32 1.442695, %v2264_v15  ;;  %v2007_v41 = vperm.slane %v7745_v45, 4 }
 0x27c   :  { %v7748_v52 = vpop.eup %5908  ;;  %5918 = vpow2.f32 %v2399_v4  ;;  %v2267_v0 = vsub.f32 %v6835_v17, %v2011_v54  ;;  %v2014_v17 = vperm.slane %v7766_v63, 3 }
 0x27d   :  { %10216 = vst [vmem:[#allocation18_spill] sm:$0xff] %v7748_v52  ;;  %v7751_v5 = vpop.eup %5910  ;;  %2767 = vperm.xlu1 %5644, %v7748_v52   ;;  %5920 = vpow2.f32 %v2405_v28  ;;  %v2263_v23 = vsub.f32 %v6801_v55, %v2007_v41  ;;  %v2010_v55 = vperm.slane %v7745_v45, 7  ;;  %v10229_v41 = vld [vmem:[#allocation20_spill] sm:$0xff] }
 0x27e   :  { %10217 = vst [vmem:[#allocation16_spill] sm:$0xff] %v7751_v5  ;;  %2764 = vperm.xlu0 %5643, %v7751_v5   ;;  %v7757_v26 = vpop.eup %5912  ;;  %v2411_v7 = vmul.f32 1.442695, %v2267_v0 }
 0x27f   :  { %10220 = vst [vmem:[#allocation23_spill] sm:$0xff] %v7757_v26  ;;  %v7760_v11 = vpop.eup %5914  ;;  %v2403_v15 = vmul.f32 1.442695, %v2263_v23 }
 0x280   :  { %10221 = vst [vmem:[#allocation21_spill] sm:$0xff] %v7760_v11  ;;  %v7769_v30 = vpop.eup %5916 }
 0x281   :  { %10223 = vst [vmem:[#allocation26_spill] sm:$0xff] %v7769_v30 }
 0x282   :  { %v7771_v6 = vpop.eup %5918 }
 0x283   :  { %10224 = vst [vmem:[#allocation24_spill] sm:$0xff] %v7771_v6  ;;  %v7779_v4 = vpop.eup %5920 }
 0x284   :  { %10225 = vst [vmem:[#allocation98_spill] sm:$0xff] %v7779_v4 }
 0x285   :  { %2776 = vperm.xlu1 %5644, %v7757_v26   ;;  %v2266_v26 = vsub.f32 %v6829_v18, %v2010_v55  ;;  %v7807_v18 = vpop.xlane.xlu2 %1941 }
 0x286   :  { %2785 = vperm.xlu0 %5643, %v7760_v11   ;;  %v2397_v11 = vmul.f32 1.442695, %v2260_v24  ;;  %v1997_v24 = vperm.slane %v7735_v39, 2 }
 0x288   :  { %5922 = vpow2.f32 %v2397_v11  ;;  %v10227_v11 = vld [vmem:[#allocation17_spill] sm:$0xff] }
 0x289   :  { %5924 = vpow2.f32 %v2411_v7  ;;  %v2253_v28 = vsub.f32 %v10227_v11, %v1997_v24  ;;  %v2270_v7 = vsub.f32 %v6856_v60, %v2014_v17  ;;  %v2017_v24 = vperm.slane %v7766_v63, 6  ;;  %v10232_v60 = vld [vmem:[#allocation19_spill] sm:$0xff] }
 0x28a   :  { %5926 = vpow2.f32 %v2403_v15  ;;  %v2000_v15 = vperm.slane %v7735_v39, 5 }
 0x28b   :  { %v2383_v23 = vmul.f32 1.442695, %v2253_v28  ;;  %v2417_v11 = vmul.f32 1.442695, %v2270_v7 }
 0x28c   :  { %v2256_v17 = vsub.f32 %v10232_v60, %v2000_v15 }
 0x28d   :  { %2782 = vperm.xlu1 %5644, %v7769_v30   ;;  %5928 = vpow2.f32 %v2383_v23 }
 0x28e   :  { %2794 = vperm.xlu0 %5643, %v7771_v6   ;;  %v7782_v53 = vpop.eup %5922  ;;  %v1998_v6 = vperm.slane %v7735_v39, 3  ;;  %v2389_v55 = vmul.f32 1.442695, %v2256_v17 }
 0x28f   :  { %10226 = vst [vmem:[#allocation99_spill] sm:$0xff] %v7782_v53  ;;  %v7790_v54 = vpop.eup %5924 }
 0x290   :  { %10228 = vst [vmem:[#allocation17_spill] sm:$0xff] %v7790_v54  ;;  %v2254_v0 = vsub.f32 %v10229_v41, %v1998_v6  ;;  %v2013_v6 = vperm.slane %v7766_v63, 2  ;;  %v2273_v41 = vsub.f32 %v6876_v59, %v2017_v24 }
 0x292   :  { %v2385_v52 = vmul.f32 1.442695, %v2254_v0  ;;  %v2269_v39 = vsub.f32 %v6847_v50, %v2013_v6  ;;  %v2020_v0 = vperm.slane %v7807_v18, 1  ;;  %v2423_v23 = vmul.f32 1.442695, %v2273_v41 }
 0x293   :  { %v2006_v6 = vperm.slane %v7745_v45, 3  ;;  %v2023_v41 = vperm.slane %v7807_v18, 4 }
 0x294   :  { %5930 = vpow2.f32 %v2385_v52  ;;  %v2016_v52 = vperm.slane %v7766_v63, 5  ;;  %v2415_v15 = vmul.f32 1.442695, %v2269_v39  ;;  %v2276_v50 = vsub.f32 %v6894_v49, %v2020_v0 }
 0x295   :  { %2791 = vperm.xlu1 %5644, %v7782_v53   ;;  %v2409_v53 = vmul.f32 1.442695, %v2266_v26  ;;  %5932 = vpow2.f32 %v2417_v11  ;;  %v2003_v26 = vperm.slane %v7745_v45, 0  ;;  %v10236_v11 = vld [vmem:[#allocation22_spill] sm:$0xff] }
 0x296   :  { %2803 = vperm.xlu0 %5643, %v7779_v4   ;;  %v7795_v4 = vpop.eup %5926  ;;  %v2429_v39 = vmul.f32 1.442695, %v2276_v50 }
 0x297   :  { %10230 = vst [vmem:[#allocation20_spill] sm:$0xff] %v7795_v4  ;;  %v7802_v28 = vpop.eup %5928  ;;  %5934 = vpow2.f32 %v2409_v53  ;;  %v2259_v60 = vsub.f32 %v10236_v11, %v2003_v26  ;;  %v2272_v53 = vsub.f32 %v6869_v14, %v2016_v52  ;;  %v2279_v14 = vsub.f32 %v6918_v36, %v2023_v41  ;;  %v10241_v52 = vld [vmem:[#allocation29_spill] sm:$0xff] }
 0x298   :  { %10231 = vst [vmem:[#allocation100_spill] sm:$0xff] %v7802_v28  ;;  %2770 = vperm.xlu2 %5645, %v7802_v28   ;;  %5936 = vpow2.f32 %v2389_v55  ;;  %v2019_v55 = vperm.slane %v7807_v18, 0 }
 0x299   :  { %5938 = vpow2.f32 %v2423_v23  ;;  %v2395_v17 = vmul.f32 1.442695, %v2259_v60  ;;  %v2421_v11 = vmul.f32 1.442695, %v2272_v53  ;;  %v2009_v60 = vperm.slane %v7745_v45, 6 }
 0x29a   :  { %v7812_v7 = vpop.eup %5930  ;;  %5940 = vpow2.f32 %v2415_v15  ;;  %v2275_v15 = vsub.f32 %v10241_v52, %v2019_v55  ;;  %v2026_v53 = vperm.slane %v7807_v18, 7 }
 0x29b   :  { %10233 = vst [vmem:[#allocation19_spill] sm:$0xff] %v7812_v7  ;;  %v7815_v59 = vpop.eup %5932  ;;  %5942 = vpow2.f32 %v2395_v17 }
 0x29c   :  { %10234 = vst [vmem:[#allocation101_spill] sm:$0xff] %v7815_v59  ;;  %5944 = vpow2.f32 %v2429_v39  ;;  %v2427_v17 = vmul.f32 1.442695, %v2275_v15  ;;  %v2265_v39 = vsub.f32 %v6813_v62, %v2009_v60  ;;  %v2282_v45 = vsub.f32 %v6933_v1, %v2026_v53 }
 0x29d   :  { %2800 = vperm.xlu1 %5644, %v7795_v4   ;;  %v7817_v24 = vpop.eup %5934  ;;  %5946 = vpow2.f32 %v2421_v11  ;;  %v7855_v11 = vpop.xlane.xlu0 %1944  ;;  %v2025_v1 = vperm.slane %v7807_v18, 6 }
 0x29e   :  { %2812 = vperm.xlu0 %5643, %v7790_v54   ;;  %10235 = vst [vmem:[#allocation102_spill] sm:$0xff] %v7817_v24  ;;  %v7827_v26 = vpop.eup %5936  ;;  %v2435_v54 = vmul.f32 1.442695, %v2279_v14  ;;  %v2012_v14 = vperm.slane %v7766_v63, 1  ;;  %v2441_v52 = vmul.f32 1.442695, %v2282_v45 }
 0x29f   :  { %10237 = vst [vmem:[#allocation22_spill] sm:$0xff] %v7827_v26  ;;  %v7830_v49 = vpop.eup %5938  ;;  %v2029_v62 = vperm.slane %v7855_v11, 2 }
 0x2a0   :  { %2773 = vperm.xlu2 %5645, %v7812_v7   ;;  %10238 = vst [vmem:[#allocation103_spill] sm:$0xff] %v7830_v49  ;;  %v7832_v0 = vpop.eup %5940 }
 0x2a1   :  { %10239 = vst [vmem:[#allocation104_spill] sm:$0xff] %v7832_v0 }
 0x2a5   :  { %2809 = vperm.xlu1 %5644, %v7817_v24  }
 0x2a6   :  { %2821 = vperm.xlu0 %5643, %v7815_v59   ;;  %v10240_v59 = vld [vmem:[#allocation25_spill] sm:$0xff] }
 0x2a7   :  { %v2262_v23 = vsub.f32 %v10240_v59, %v2006_v6  ;;  %v7842_v59 = vpop.eup %5942  ;;  %v2022_v6 = vperm.slane %v7807_v18, 3 }
 0x2a8   :  { %2779 = vperm.xlu2 %5645, %v7827_v26   ;;  %10242 = vst [vmem:[#allocation25_spill] sm:$0xff] %v7842_v59  ;;  %v7845_v36 = vpop.eup %5944 }
 0x2a9   :  { %v2401_v50 = vmul.f32 1.442695, %v2262_v23  ;;  %10243 = vst [vmem:[#allocation29_spill] sm:$0xff] %v7845_v36  ;;  %v7847_v41 = vpop.eup %5946  ;;  %v2278_v55 = vsub.f32 %v6908_v22, %v2022_v6  ;;  %v2407_v23 = vmul.f32 1.442695, %v2265_v39  ;;  %v2285_v6 = vsub.f32 %v6954_v51, %v2029_v62 }
 0x2aa   :  { %10244 = vst [vmem:[#allocation105_spill] sm:$0xff] %v7847_v41  ;;  %v2015_v39 = vperm.slane %v7766_v63, 4  ;;  %v2028_v51 = vperm.slane %v7855_v11, 1 }
 0x2ab   :  { %5948 = vpow2.f32 %v2401_v50  ;;  %v2433_v60 = vmul.f32 1.442695, %v2278_v55  ;;  %v2032_v55 = vperm.slane %v7855_v11, 5 }
 0x2ac   :  { %5950 = vpow2.f32 %v2435_v54  ;;  %v10248_v54 = vld [vmem:[#allocation27_spill] sm:$0xff] }
 0x2ad   :  { %2818 = vperm.xlu1 %5644, %v7832_v0   ;;  %5952 = vpow2.f32 %v2427_v17  ;;  %v2268_v22 = vsub.f32 %v10248_v54, %v2012_v14  ;;  %v2281_v17 = vsub.f32 %v6927_v61, %v2025_v1  ;;  %v7874_v14 = vpop.xlane.xlu1 %1947  ;;  %v2271_v61 = vsub.f32 %v6854_v58, %v2015_v39  ;;  %v10252_v1 = vld [vmem:[#allocation33_spill] sm:$0xff] }
 0x2ae   :  { %2830 = vperm.xlu0 %5643, %v7830_v49   ;;  %5954 = vpow2.f32 %v2407_v23  ;;  %v2035_v49 = vperm.slane %v7874_v14, 0  ;;  %v2031_v39 = vperm.slane %v7855_v11, 4  ;;  %v2036_v30 = vperm.slane %v7874_v14, 1 }
 0x2af   :  { %5956 = vpow2.f32 %v2441_v52  ;;  %v2413_v45 = vmul.f32 1.442695, %v2268_v22  ;;  %v2439_v54 = vmul.f32 1.442695, %v2281_v17  ;;  %v2288_v52 = vsub.f32 %v10155_v29, %v2032_v55  ;;  %v7894_v29 = vpop.xlane.xlu0 %1953 }
 0x2b0   :  { %2788 = vperm.xlu2 %5645, %v7842_v59   ;;  %5958 = vpow2.f32 %v2433_v60  ;;  %v2284_v60 = vsub.f32 %v10252_v1, %v2028_v51  ;;  %v2018_v22 = vperm.slane %v7766_v63, 7  ;;  %v10257_v63 = vld [vmem:[#allocation40_spill] sm:$0xff]  ;;  %v2024_v59 = vperm.slane %v7807_v18, 5 }
 0x2b1   :  { %v7859_v15 = vpop.eup %5948  ;;  %5960 = vpow2.f32 %v2413_v45  ;;  %v2453_v17 = vmul.f32 1.442695, %v2288_v52  ;;  %v10258_v52 = vld [vmem:[#allocation35_spill] sm:$0xff]  ;;  %v2039_v5 = vperm.slane %v7874_v14, 4 }
 0x2b2   :  { %10245 = vst [vmem:[#allocation106_spill] sm:$0xff] %v7859_v15  ;;  %v7862_v50 = vpop.eup %5950  ;;  %v2445_v45 = vmul.f32 1.442695, %v2284_v60  ;;  %v2287_v1 = vsub.f32 %v10258_v52, %v2031_v39  ;;  %v2021_v60 = vperm.slane %v7807_v18, 2  ;;  %v10269_v18 = vld [vmem:[#allocation46_spill] sm:$0xff] }
 0x2b3   :  { %10246 = vst [vmem:[#allocation107_spill] sm:$0xff] %v7862_v50  ;;  %v7864_v53 = vpop.eup %5952 }
 0x2b4   :  { %10247 = vst [vmem:[#allocation108_spill] sm:$0xff] %v7864_v53  ;;  %v7876_v23 = vpop.eup %5954 }
 0x2b5   :  { %2827 = vperm.xlu1 %5644, %v7847_v41   ;;  %10249 = vst [vmem:[#allocation27_spill] sm:$0xff] %v7876_v23  ;;  %v7879_v62 = vpop.eup %5956 }
 0x2b6   :  { %2839 = vperm.xlu0 %5643, %v7845_v36   ;;  %v2447_v36 = vmul.f32 1.442695, %v2285_v6  ;;  %10250 = vst [vmem:[#allocation109_spill] sm:$0xff] %v7879_v62  ;;  %v2419_v6 = vmul.f32 1.442695, %v2271_v61  ;;  %v2291_v61 = vsub.f32 %v10257_v63, %v2035_v49  ;;  %v7915_v63 = vpop.xlane.xlu2 %1950 }
 0x2b8   :  { %2797 = vperm.xlu2 %5645, %v7859_v15   ;;  %5962 = vpow2.f32 %v2447_v36  ;;  %v2459_v15 = vmul.f32 1.442695, %v2291_v61 }
 0x2b9   :  { %5964 = vpow2.f32 %v2439_v54  ;;  %v10256_v54 = vld [vmem:[#allocation28_spill] sm:$0xff] }
 0x2ba   :  { %v2274_v51 = vsub.f32 %v10256_v54, %v2018_v22  ;;  %5966 = vpow2.f32 %v2419_v6  ;;  %v2034_v6 = vperm.slane %v7855_v11, 7  ;;  %v2451_v54 = vmul.f32 1.442695, %v2287_v1  ;;  %v10264_v1 = vld [vmem:[#allocation38_spill] sm:$0xff] }
 0x2bb   :  { %5968 = vpow2.f32 %v2453_v17  ;;  %v10262_v17 = vld [vmem:[#allocation30_spill] sm:$0xff] }
 0x2bc   :  { %5970 = vpow2.f32 %v2445_v45  ;;  %v2425_v28 = vmul.f32 1.442695, %v2274_v51  ;;  %v2277_v39 = vsub.f32 %v10262_v17, %v2021_v60  ;;  %v7920_v45 = vpop.xlane.xlu0 %1962  ;;  %v10263_v51 = vld [vmem:[#allocation43_spill] sm:$0xff]  ;;  %v2041_v17 = vperm.slane %v7874_v14, 6 }
 0x2bd   :  { %2836 = vperm.xlu1 %5644, %v7864_v53  }
 0x2be   :  { %2848 = vperm.xlu0 %5643, %v7862_v50   ;;  %v7881_v50 = vpop.eup %5958  ;;  %5972 = vpow2.f32 %v2425_v28  ;;  %v2431_v60 = vmul.f32 1.442695, %v2277_v39  ;;  %v10270_v39 = vld [vmem:[#allocation41_spill] sm:$0xff] }
 0x2bf   :  { %10251 = vst [vmem:[#allocation110_spill] sm:$0xff] %v7881_v50  ;;  %v7891_v58 = vpop.eup %5960  ;;  %5974 = vpow2.f32 %v2459_v15 }
 0x2c0   :  { %2806 = vperm.xlu2 %5645, %v7876_v23   ;;  %10253 = vst [vmem:[#allocation33_spill] sm:$0xff] %v7891_v58  ;;  %v7896_v55 = vpop.eup %5962  ;;  %v2038_v23 = vperm.slane %v7874_v14, 3  ;;  %5976 = vpow2.f32 %v2451_v54  ;;  %v7943_v54 = vpop.xlane.xlu2 %1959 }
 0x2c1   :  { %10254 = vst [vmem:[#allocation111_spill] sm:$0xff] %v7896_v55  ;;  %v7900_v36 = vpop.eup %5964  ;;  %5978 = vpow2.f32 %v2431_v60 }
 0x2c2   :  { %10255 = vst [vmem:[#allocation112_spill] sm:$0xff] %v7900_v36  ;;  %v7910_v22 = vpop.eup %5966  ;;  %v2294_v61 = vsub.f32 %v10263_v51, %v2038_v23  ;;  %v2037_v23 = vperm.slane %v7874_v14, 2 }
 0x2c3   :  { %10259 = vst [vmem:[#allocation28_spill] sm:$0xff] %v7910_v22  ;;  %v7913_v49 = vpop.eup %5968 }
 0x2c4   :  { %10260 = vst [vmem:[#allocation40_spill] sm:$0xff] %v7913_v49  ;;  %v2465_v28 = vmul.f32 1.442695, %v2294_v61  ;;  %v2293_v61 = vsub.f32 %v10270_v39, %v2037_v23  ;;  %v10276_v23 = vld [vmem:[#allocation49_spill] sm:$0xff] }
 0x2c5   :  { %2845 = vperm.xlu1 %5644, %v7881_v50  }
 0x2c6   :  { %2857 = vperm.xlu0 %5643, %v7879_v62   ;;  %v7898_v62 = vpop.xlane.xlu1 %1956  ;;  %5980 = vpow2.f32 %v2465_v28 }
 0x2c8   :  { %2815 = vperm.xlu2 %5645, %v7891_v58   ;;  %v2290_v58 = vsub.f32 %v10264_v1, %v2034_v6  ;;  %v2297_v6 = vsub.f32 %v10269_v18, %v2041_v17  ;;  %v2044_v1 = vperm.slane %v7915_v63, 1  ;;  %v2040_v17 = vperm.slane %v7874_v14, 5  ;;  %v7964_v39 = vpop.xlane.xlu2 %1968 }
 0x2c9   :  { %v2463_v18 = vmul.f32 1.442695, %v2293_v61  ;;  %v10278_v61 = vld [vmem:[#allocation44_spill] sm:$0xff] }
 0x2ca   :  { %v2471_v60 = vmul.f32 1.442695, %v2297_v6  ;;  %v2296_v53 = vsub.f32 %v10278_v61, %v2040_v17  ;;  %v10283_v17 = vld [vmem:[#allocation52_spill] sm:$0xff] }
 0x2cd   :  { %2854 = vperm.xlu1 %5644, %v7900_v36   ;;  %v7939_v36 = vpop.xlane.xlu0 %1971 }
 0x2ce   :  { %2866 = vperm.xlu0 %5643, %v7896_v55   ;;  %v7917_v55 = vpop.eup %5970  ;;  %v7924_v52 = vpop.xlane.xlu1 %1965 }
 0x2cf   :  { %10261 = vst [vmem:[#allocation35_spill] sm:$0xff] %v7917_v55  ;;  %v7931_v26 = vpop.eup %5972 }
 0x2d0   :  { %2824 = vperm.xlu2 %5645, %v7910_v22   ;;  %10265 = vst [vmem:[#allocation30_spill] sm:$0xff] %v7931_v26  ;;  %v7934_v51 = vpop.eup %5974 }
 0x2d1   :  { %10266 = vst [vmem:[#allocation43_spill] sm:$0xff] %v7934_v51  ;;  %v7936_v22 = vpop.eup %5976 }
 0x2d2   :  { %10267 = vst [vmem:[#allocation38_spill] sm:$0xff] %v7936_v22 }
 0x2d5   :  { %2863 = vperm.xlu1 %5644, %v7917_v55   ;;  %v10268_v55 = vld [vmem:[#allocation31_spill] sm:$0xff] }
 0x2d6   :  { %2875 = vperm.xlu0 %5643, %v7913_v49   ;;  %v2457_v49 = vmul.f32 1.442695, %v2290_v58  ;;  %v2280_v15 = vsub.f32 %v10268_v55, %v2024_v59  ;;  %v7946_v58 = vpop.xlane.xlu1 %1974  ;;  %v2027_v55 = vperm.slane %v7855_v11, 0 }
 0x2d8   :  { %2833 = vperm.xlu2 %5645, %v7931_v26   ;;  %5982 = vpow2.f32 %v2457_v49  ;;  %v2437_v59 = vmul.f32 1.442695, %v2280_v15  ;;  %v2300_v15 = vsub.f32 %v10276_v23, %v2044_v1  ;;  %v2043_v1 = vperm.slane %v7915_v63, 0 }
 0x2d9   :  { %v2469_v23 = vmul.f32 1.442695, %v2296_v53 }
 0x2da   :  { %5984 = vpow2.f32 %v2437_v59 }
 0x2db   :  { %5986 = vpow2.f32 %v2471_v60  ;;  %v10282_v60 = vld [vmem:[#allocation34_spill] sm:$0xff] }
 0x2dc   :  { %5988 = vpow2.f32 %v2463_v18 }
 0x2dd   :  { %2872 = vperm.xlu1 %5644, %v7936_v22   ;;  %v10274_v22 = vld [vmem:[#allocation32_spill] sm:$0xff] }
 0x2de   :  { %2884 = vperm.xlu0 %5643, %v7934_v51   ;;  %v7952_v51 = vpop.eup %5978  ;;  %v2283_v28 = vsub.f32 %v10274_v22, %v2027_v55  ;;  %v2030_v22 = vperm.slane %v7855_v11, 3  ;;  %v2047_v55 = vperm.slane %v7915_v63, 4 }
 0x2df   :  { %10271 = vst [vmem:[#allocation31_spill] sm:$0xff] %v7952_v51  ;;  %v7955_v26 = vpop.eup %5980 }
 0x2e0   :  { %10272 = vst [vmem:[#allocation46_spill] sm:$0xff] %v7955_v26  ;;  %v7957_v50 = vpop.eup %5982  ;;  %2842 = vperm.xlu2 %5645, %v7952_v51   ;;  %v2443_v59 = vmul.f32 1.442695, %v2283_v28  ;;  %v2286_v0 = vsub.f32 %v10282_v60, %v2030_v22  ;;  %v2303_v18 = vsub.f32 %v10283_v17, %v2047_v55  ;;  %v2033_v22 = vperm.slane %v7855_v11, 6 }
 0x2e1   :  { %10273 = vst [vmem:[#allocation41_spill] sm:$0xff] %v7957_v50  ;;  %v7973_v41 = vpop.eup %5984  ;;  %v2050_v60 = vperm.slane %v7915_v63, 7 }
 0x2e2   :  { %10279 = vst [vmem:[#allocation44_spill] sm:$0xff] %v7973_v41  ;;  %v7976_v51 = vpop.eup %5986  ;;  %5990 = vpow2.f32 %v2443_v59  ;;  %v2449_v59 = vmul.f32 1.442695, %v2286_v0  ;;  %v2483_v55 = vmul.f32 1.442695, %v2303_v18  ;;  %v10293_v0 = vld [vmem:[#allocation50_spill] sm:$0xff] }
 0x2e3   :  { %10280 = vst [vmem:[#allocation113_spill] sm:$0xff] %v7976_v51 }
 0x2e5   :  { %2881 = vperm.xlu1 %5644, %v7957_v50   ;;  %v7978_v50 = vpop.eup %5988 }
 0x2e6   :  { %2893 = vperm.xlu0 %5643, %v7955_v26   ;;  %v2477_v26 = vmul.f32 1.442695, %v2300_v15  ;;  %10281 = vst [vmem:[#allocation114_spill] sm:$0xff] %v7978_v50  ;;  %v10285_v15 = vld [vmem:[#allocation47_spill] sm:$0xff] }
 0x2e7   :  { %v2299_v53 = vsub.f32 %v10285_v15, %v2043_v1  ;;  %v10291_v1 = vld [vmem:[#allocation36_spill] sm:$0xff]  ;;  %v10292_v15 = vld [vmem:[#allocation55_spill] sm:$0xff] }
 0x2e8   :  { %2851 = vperm.xlu2 %5645, %v7973_v41   ;;  %v7984_v28 = vpop.xlane.xlu2 %1977  ;;  %5992 = vpow2.f32 %v2477_v26  ;;  %v7994_v17 = vpop.eup %5990  ;;  %v2306_v11 = vsub.f32 %v10292_v15, %v2050_v60  ;;  %v2049_v15 = vperm.slane %v7915_v63, 6 }
 0x2e9   :  { %10284 = vst [vmem:[#allocation34_spill] sm:$0xff] %v7984_v28  ;;  %5994 = vpow2.f32 %v2469_v23  ;;  %v2475_v41 = vmul.f32 1.442695, %v2299_v53  ;;  %v2289_v23 = vsub.f32 %v10291_v1, %v2033_v22 }
 0x2ea   :  { %10288 = vst [vmem:[#allocation115_spill] sm:$0xff] %v7994_v17  ;;  %5996 = vpow2.f32 %v2449_v59  ;;  %v2489_v22 = vmul.f32 1.442695, %v2306_v11  ;;  %v2053_v59 = vperm.slane %v7894_v29, 2 }
 0x2eb   :  { %5998 = vpow2.f32 %v2483_v55  ;;  %v2455_v4 = vmul.f32 1.442695, %v2289_v23 }
 0x2ec   :  { %6000 = vpow2.f32 %v2475_v41 }
 0x2ed   :  { %2890 = vperm.xlu1 %5644, %v7978_v50   ;;  %6002 = vpow2.f32 %v2455_v4 }
 0x2ee   :  { %2902 = vperm.xlu0 %5643, %v7976_v51   ;;  %v2046_v51 = vperm.slane %v7915_v63, 3  ;;  %v7997_v50 = vpop.eup %5992  ;;  %6004 = vpow2.f32 %v2489_v22 }
 0x2ef   :  { %v7968_v6 = vpop.permute.xlu1 %2767  ;;  %10289 = vst [vmem:[#allocation116_spill] sm:$0xff] %v7997_v50  ;;  %v7999_v26 = vpop.eup %5994 }
 0x2f0   :  { %v7961_v49 = vpop.permute.xlu0 %2764  ;;  %10277 = vst [vmem:[#allocation49_spill] sm:$0xff] %v7968_v6  ;;  %2860 = vperm.xlu2 %5645, %v7994_v17   ;;  %v2302_v18 = vsub.f32 %v10293_v0, %v2046_v51  ;;  %v8015_v60 = vpop.eup %5996  ;;  %v10299_v51 = vld [vmem:[#allocation39_spill] sm:$0xff]  ;;  %v10300_v0 = vld [vmem:[#allocation58_spill] sm:$0xff]  ;;  %v10301_v17 = vld [vmem:[#allocation53_spill] sm:$0xff] }
 0x2f1   :  { %10275 = vst [vmem:[#allocation32_spill] sm:$0xff] %v7961_v49  ;;  %v2292_v23 = vsub.f32 %v10299_v51, %v2036_v30  ;;  %v2309_v11 = vsub.f32 %v10300_v0, %v2053_v59  ;;  %v2056_v30 = vperm.slane %v7894_v29, 5  ;;  %v2052_v59 = vperm.slane %v7894_v29, 1 }
 0x2f2   :  { %10290 = vst [vmem:[#allocation117_spill] sm:$0xff] %v7999_v26  ;;  %v8007_v53 = vpop.permute.xlu2 %2770  ;;  %v2481_v55 = vmul.f32 1.442695, %v2302_v18 }
 0x2f3   :  { %10294 = vst [vmem:[#allocation36_spill] sm:$0xff] %v8007_v53  ;;  %v2495_v4 = vmul.f32 1.442695, %v2309_v11 }
 0x2f4   :  { %10296 = vst [vmem:[#allocation50_spill] sm:$0xff] %v8015_v60  ;;  %6006 = vpow2.f32 %v2481_v55 }
 0x2f5   :  { %2899 = vperm.xlu1 %5644, %v7999_v26   ;;  %v2305_v26 = vsub.f32 %v10301_v17, %v2049_v15  ;;  %v10306_v15 = vld [vmem:[#allocation42_spill] sm:$0xff] }
 0x2f6   :  { %2911 = vperm.xlu0 %5643, %v7997_v50   ;;  %v8018_v50 = vpop.eup %5998  ;;  %v2295_v55 = vsub.f32 %v10306_v15, %v2039_v5  ;;  %v2059_v5 = vperm.slane %v7898_v62, 0 }
 0x2f7   :  { %v7990_v24 = vpop.permute.xlu1 %2776  ;;  %10297 = vst [vmem:[#allocation118_spill] sm:$0xff] %v8018_v50  ;;  %v8020_v41 = vpop.eup %6000 }
 0x2f8   :  { %v7988_v61 = vpop.permute.xlu0 %2785  ;;  %10287 = vst [vmem:[#allocation47_spill] sm:$0xff] %v7990_v24  ;;  %2869 = vperm.xlu2 %5645, %v8015_v60   ;;  %v8032_v51 = vpop.eup %6002  ;;  %v2467_v24 = vmul.f32 1.442695, %v2295_v55 }
 0x2f9   :  { %10286 = vst [vmem:[#allocation52_spill] sm:$0xff] %v7988_v61  ;;  %v2461_v61 = vmul.f32 1.442695, %v2292_v23  ;;  %v8037_v60 = vpop.eup %6004  ;;  %v2312_v23 = vsub.f32 %v10179_v42, %v2056_v30  ;;  %v2055_v42 = vperm.slane %v7894_v29, 4 }
 0x2fa   :  { %10298 = vst [vmem:[#allocation119_spill] sm:$0xff] %v8020_v41  ;;  %v8028_v18 = vpop.permute.xlu2 %2773  ;;  %v8041_v17 = vpop.eup %6006 }
 0x2fb   :  { %10302 = vst [vmem:[#allocation39_spill] sm:$0xff] %v8028_v18  ;;  %6008 = vpow2.f32 %v2461_v61  ;;  %v2501_v18 = vmul.f32 1.442695, %v2312_v23 }
 0x2fc   :  { %10303 = vst [vmem:[#allocation58_spill] sm:$0xff] %v8032_v51  ;;  %6010 = vpow2.f32 %v2495_v4  ;;  %v10312_v4 = vld [vmem:[#allocation45_spill] sm:$0xff] }
 0x2fd   :  { %2908 = vperm.xlu1 %5644, %v8020_v41   ;;  %10304 = vst [vmem:[#allocation53_spill] sm:$0xff] %v8037_v60 }
 0x2fe   :  { %2920 = vperm.xlu0 %5643, %v8018_v50   ;;  %v2487_v50 = vmul.f32 1.442695, %v2305_v26  ;;  %10305 = vst [vmem:[#allocation120_spill] sm:$0xff] %v8041_v17  ;;  %v10307_v26 = vld [vmem:[#allocation56_spill] sm:$0xff] }
 0x2ff   :  { %v8013_v1 = vpop.permute.xlu1 %2782  ;;  %v2308_v11 = vsub.f32 %v10307_v26, %v2052_v59  ;;  %v10314_v26 = vld [vmem:[#allocation59_spill] sm:$0xff] }
 0x300   :  { %v8010_v7 = vpop.permute.xlu0 %2794  ;;  %10295 = vst [vmem:[#allocation55_spill] sm:$0xff] %v8013_v1  ;;  %2878 = vperm.xlu2 %5645, %v8032_v51   ;;  %6012 = vpow2.f32 %v2487_v50  ;;  %v2042_v1 = vperm.slane %v7874_v14, 7  ;;  %v10313_v14 = vld [vmem:[#allocation64_spill] sm:$0xff] }
 0x301   :  { %v8053_v61 = vpop.eup %6008  ;;  %v2493_v30 = vmul.f32 1.442695, %v2308_v11  ;;  %6014 = vpow2.f32 %v2467_v24  ;;  %v2315_v55 = vsub.f32 %v10313_v14, %v2059_v5  ;;  %v2311_v11 = vsub.f32 %v10314_v26, %v2055_v42 }
 0x302   :  { %v8049_v41 = vpop.permute.xlu2 %2779  ;;  %10309 = vst [vmem:[#allocation56_spill] sm:$0xff] %v8053_v61  ;;  %v8056_v15 = vpop.eup %6010  ;;  %v2298_v59 = vsub.f32 %v10312_v4, %v2042_v1  ;;  %6016 = vpow2.f32 %v2501_v18  ;;  %v2045_v24 = vperm.slane %v7915_v63, 2  ;;  %v2062_v4 = vperm.slane %v7898_v62, 3  ;;  %v10318_v18 = vld [vmem:[#allocation48_spill] sm:$0xff] }
 0x303   :  { %10308 = vst [vmem:[#allocation42_spill] sm:$0xff] %v8049_v41  ;;  %6018 = vpow2.f32 %v2493_v30  ;;  %v2058_v5 = vperm.slane %v7894_v29, 7  ;;  %v2499_v14 = vmul.f32 1.442695, %v2311_v11 }
 0x304   :  { %10310 = vst [vmem:[#allocation121_spill] sm:$0xff] %v8056_v15  ;;  %v2473_v1 = vmul.f32 1.442695, %v2298_v59  ;;  %v2301_v42 = vsub.f32 %v10318_v18, %v2045_v24  ;;  %v2318_v30 = vsub.f32 %v10178_v21, %v2062_v4  ;;  %v2048_v24 = vperm.slane %v7915_v63, 5 }
 0x305   :  { %2917 = vperm.xlu1 %5644, %v8041_v17   ;;  %v2314_v59 = vsub.f32 %v10183_v2, %v2058_v5  ;;  %v2065_v18 = vperm.slane %v7898_v62, 6  ;;  %v10322_v5 = vld [vmem:[#allocation51_spill] sm:$0xff] }
 0x306   :  { %2929 = vperm.xlu0 %5643, %v8037_v60   ;;  %v8058_v60 = vpop.eup %6012  ;;  %6020 = vpow2.f32 %v2473_v1  ;;  %v2479_v1 = vmul.f32 1.442695, %v2301_v42  ;;  %v2513_v21 = vmul.f32 1.442695, %v2318_v30  ;;  %v10323_v42 = vld [vmem:[#allocation65_spill] sm:$0xff] }
 0x307   :  { %v8039_v22 = vpop.permute.xlu1 %2791  ;;  %10311 = vst [vmem:[#allocation122_spill] sm:$0xff] %v8058_v60  ;;  %v8074_v17 = vpop.eup %6014  ;;  %v2321_v63 = vsub.f32 %v7206_v8, %v2065_v18 }
 0x308   :  { %v8035_v0 = vpop.permute.xlu0 %2803  ;;  %2887 = vperm.xlu2 %5645, %v8053_v61   ;;  %10315 = vst [vmem:[#allocation45_spill] sm:$0xff] %v8074_v17  ;;  %v8077_v61 = vpop.eup %6016 }
 0x309   :  { %10316 = vst [vmem:[#allocation64_spill] sm:$0xff] %v8077_v61  ;;  %v2519_v8 = vmul.f32 1.442695, %v2321_v63 }
 0x30a   :  { %v8070_v51 = vpop.permute.xlu2 %2788 }
 0x30d   :  { %2926 = vperm.xlu1 %5644, %v8058_v60   ;;  %v8079_v60 = vpop.eup %6018 }
 0x30e   :  { %2938 = vperm.xlu0 %5643, %v8056_v15   ;;  %v2507_v15 = vmul.f32 1.442695, %v2315_v55  ;;  %10317 = vst [vmem:[#allocation59_spill] sm:$0xff] %v8079_v60  ;;  %v8095_v4 = vpop.eup %6020 }
 0x30f   :  { %v8067_v23 = vpop.permute.xlu1 %2800  ;;  %10319 = vst [vmem:[#allocation48_spill] sm:$0xff] %v8095_v4 }
 0x310   :  { %v8062_v50 = vpop.permute.xlu0 %2812  ;;  %2896 = vperm.xlu2 %5645, %v8074_v17   ;;  %6022 = vpow2.f32 %v2507_v15  ;;  %v2061_v15 = vperm.slane %v7898_v62, 2 }
 0x311   :  { %6024 = vpow2.f32 %v2499_v14  ;;  %v2304_v14 = vsub.f32 %v10322_v5, %v2048_v24  ;;  %v2068_v5 = vperm.slane %v7943_v54, 1 }
 0x312   :  { %v8089_v26 = vpop.permute.xlu2 %2797  ;;  %6026 = vpow2.f32 %v2479_v1  ;;  %v2317_v30 = vsub.f32 %v10323_v42, %v2061_v15  ;;  %v2051_v1 = vperm.slane %v7894_v29, 0 }
 0x313   :  { %6028 = vpow2.f32 %v2513_v21  ;;  %v2485_v24 = vmul.f32 1.442695, %v2304_v14  ;;  %v10328_v14 = vld [vmem:[#allocation71_spill] sm:$0xff] }
 0x314   :  { %v2511_v21 = vmul.f32 1.442695, %v2317_v30 }
 0x315   :  { %2935 = vperm.xlu1 %5644, %v8079_v60  }
 0x316   :  { %2947 = vperm.xlu0 %5643, %v8077_v61   ;;  %v2505_v61 = vmul.f32 1.442695, %v2314_v59  ;;  %v8098_v17 = vpop.eup %6022 }
 0x317   :  { %v8091_v11 = vpop.permute.xlu1 %2809  ;;  %10320 = vst [vmem:[#allocation123_spill] sm:$0xff] %v8098_v17  ;;  %v8100_v2 = vpop.eup %6024 }
 0x318   :  { %v8087_v55 = vpop.permute.xlu0 %2821  ;;  %10321 = vst [vmem:[#allocation124_spill] sm:$0xff] %v8100_v2  ;;  %2905 = vperm.xlu2 %5645, %v8095_v4   ;;  %6030 = vpow2.f32 %v2505_v61  ;;  %v8116_v18 = vpop.eup %6026  ;;  %v10327_v61 = vld [vmem:[#allocation54_spill] sm:$0xff] }
 0x319   :  { %10324 = vst [vmem:[#allocation51_spill] sm:$0xff] %v8116_v18  ;;  %v8119_v4 = vpop.eup %6028  ;;  %v2307_v42 = vsub.f32 %v10327_v61, %v2051_v1  ;;  %6032 = vpow2.f32 %v2485_v24  ;;  %v2054_v24 = vperm.slane %v7894_v29, 3  ;;  %v2071_v61 = vperm.slane %v7943_v54, 4 }
 0x31a   :  { %v8110_v60 = vpop.permute.xlu2 %2806  ;;  %10325 = vst [vmem:[#allocation65_spill] sm:$0xff] %v8119_v4  ;;  %6034 = vpow2.f32 %v2519_v8 }
 0x31b   :  { %6036 = vpow2.f32 %v2511_v21  ;;  %v2491_v1 = vmul.f32 1.442695, %v2307_v42 }
 0x31d   :  { %2944 = vperm.xlu1 %5644, %v8100_v2   ;;  %v2324_v2 = vsub.f32 %v10328_v14, %v2068_v5  ;;  %6038 = vpow2.f32 %v2491_v1 }
 0x31e   :  { %2956 = vperm.xlu0 %5643, %v8098_v17   ;;  %v2064_v17 = vperm.slane %v7898_v62, 5  ;;  %v8121_v15 = vpop.eup %6030 }
 0x31f   :  { %v8112_v41 = vpop.permute.xlu1 %2818  ;;  %10326 = vst [vmem:[#allocation125_spill] sm:$0xff] %v8121_v15  ;;  %v2525_v5 = vmul.f32 1.442695, %v2324_v2  ;;  %v8137_v14 = vpop.eup %6032  ;;  %v10334_v2 = vld [vmem:[#allocation69_spill] sm:$0xff] }
 0x320   :  { %v8108_v59 = vpop.permute.xlu0 %2830  ;;  %2914 = vperm.xlu2 %5645, %v8116_v18   ;;  %v2320_v63 = vsub.f32 %v7191_v16, %v2064_v17  ;;  %10330 = vst [vmem:[#allocation71_spill] sm:$0xff] %v8137_v14  ;;  %v8140_v18 = vpop.eup %6034  ;;  %v10333_v17 = vld [vmem:[#allocation57_spill] sm:$0xff] }
 0x321   :  { %10331 = vst [vmem:[#allocation126_spill] sm:$0xff] %v8140_v18  ;;  %v8142_v16 = vpop.eup %6036  ;;  %v2310_v21 = vsub.f32 %v10333_v17, %v2054_v24  ;;  %6040 = vpow2.f32 %v2525_v5  ;;  %v2057_v24 = vperm.slane %v7894_v29, 6  ;;  %v2074_v17 = vperm.slane %v7943_v54, 7 }
 0x322   :  { %v8131_v30 = vpop.permute.xlu2 %2815  ;;  %v2517_v8 = vmul.f32 1.442695, %v2320_v63  ;;  %10332 = vst [vmem:[#allocation127_spill] sm:$0xff] %v8142_v16 }
 0x323   :  { %v2497_v1 = vmul.f32 1.442695, %v2310_v21  ;;  %v2330_v29 = vsub.f32 %v7331_v48, %v2074_v17  ;;  %v2077_v48 = vperm.slane %v7920_v45, 2 }
 0x324   :  { %6042 = vpow2.f32 %v2517_v8  ;;  %v2313_v8 = vsub.f32 %v10181_v33, %v2057_v24  ;;  %v2060_v24 = vperm.slane %v7898_v62, 1 }
 0x325   :  { %2953 = vperm.xlu1 %5644, %v8121_v15   ;;  %v2327_v15 = vsub.f32 %v7283_v13, %v2071_v61  ;;  %v8158_v61 = vpop.eup %6038  ;;  %6044 = vpow2.f32 %v2497_v1  ;;  %v2537_v1 = vmul.f32 1.442695, %v2330_v29 }
 0x326   :  { %2965 = vperm.xlu0 %5643, %v8119_v4   ;;  %v2067_v4 = vperm.slane %v7943_v54, 0  ;;  %10336 = vst [vmem:[#allocation69_spill] sm:$0xff] %v8158_v61  ;;  %v2503_v33 = vmul.f32 1.442695, %v2313_v8  ;;  %v2333_v8 = vsub.f32 %v7384_v3, %v2077_v48 }
 0x327   :  { %v8133_v49 = vpop.permute.xlu1 %2827  ;;  %v2531_v13 = vmul.f32 1.442695, %v2327_v15 }
 0x328   :  { %v8129_v53 = vpop.permute.xlu0 %2839  ;;  %2923 = vperm.xlu2 %5645, %v8137_v14   ;;  %v2323_v42 = vsub.f32 %v10334_v2, %v2067_v4  ;;  %v2543_v3 = vmul.f32 1.442695, %v2333_v8 }
 0x329   :  { %10329 = vst [vmem:[#allocation54_spill] sm:$0xff] %v8129_v53  ;;  %6046 = vpow2.f32 %v2531_v13 }
 0x32a   :  { %v8152_v63 = vpop.permute.xlu2 %2824  ;;  %v2523_v5 = vmul.f32 1.442695, %v2323_v42 }
 0x32c   :  { %6048 = vpow2.f32 %v2523_v5 }
 0x32d   :  { %2962 = vperm.xlu1 %5644, %v8142_v16   ;;  %v8161_v16 = vpop.eup %6040  ;;  %6050 = vpow2.f32 %v2503_v33  ;;  %v2063_v33 = vperm.slane %v7898_v62, 4 }
 0x32e   :  { %2974 = vperm.xlu0 %5643, %v8140_v18   ;;  %v2070_v18 = vperm.slane %v7943_v54, 3  ;;  %10337 = vst [vmem:[#allocation128_spill] sm:$0xff] %v8161_v16  ;;  %v8163_v4 = vpop.eup %6042  ;;  %6052 = vpow2.f32 %v2537_v1  ;;  %v2076_v1 = vperm.slane %v7920_v45, 1 }
 0x32f   :  { %v8154_v6 = vpop.permute.xlu1 %2836  ;;  %10338 = vst [vmem:[#allocation129_spill] sm:$0xff] %v8163_v4  ;;  %v8179_v17 = vpop.eup %6044 }
 0x330   :  { %v8150_v53 = vpop.permute.xlu0 %2848  ;;  %2932 = vperm.xlu2 %5645, %v8158_v61   ;;  %v2326_v15 = vsub.f32 %v7265_v57, %v2070_v18  ;;  %10340 = vst [vmem:[#allocation131_spill] sm:$0xff] %v8179_v17  ;;  %v10343_v18 = vld [vmem:[#allocation63_spill] sm:$0xff] }
 0x331   :  { %10335 = vst [vmem:[#allocation57_spill] sm:$0xff] %v8150_v53  ;;  %v2316_v5 = vsub.f32 %v10343_v18, %v2060_v24  ;;  %v2080_v18 = vperm.slane %v7920_v45, 5 }
 0x332   :  { %v8173_v2 = vpop.permute.xlu2 %2833  ;;  %v2529_v13 = vmul.f32 1.442695, %v2326_v15 }
 0x333   :  { %v2509_v24 = vmul.f32 1.442695, %v2316_v5  ;;  %v2332_v5 = vsub.f32 %v7362_v47, %v2076_v1 }
 0x334   :  { %6054 = vpow2.f32 %v2529_v13  ;;  %v2336_v13 = vsub.f32 %v7443_v44, %v2080_v18  ;;  %v2083_v44 = vperm.slane %v7924_v52, 0 }
 0x335   :  { %2971 = vperm.xlu1 %5644, %v8163_v4   ;;  %v8182_v4 = vpop.eup %6046  ;;  %6056 = vpow2.f32 %v2509_v24 }
 0x336   :  { %2983 = vperm.xlu0 %5643, %v8161_v16   ;;  %v2073_v16 = vperm.slane %v7943_v54, 6  ;;  %10341 = vst [vmem:[#allocation132_spill] sm:$0xff] %v8182_v4  ;;  %v8184_v57 = vpop.eup %6048  ;;  %6058 = vpow2.f32 %v2543_v3  ;;  %v2549_v24 = vmul.f32 1.442695, %v2336_v13  ;;  %v2541_v3 = vmul.f32 1.442695, %v2332_v5 }
 0x337   :  { %v8175_v42 = vpop.permute.xlu1 %2845  ;;  %10342 = vst [vmem:[#allocation133_spill] sm:$0xff] %v8184_v57  ;;  %v8200_v48 = vpop.eup %6050 }
 0x338   :  { %v8171_v21 = vpop.permute.xlu0 %2857  ;;  %2941 = vperm.xlu2 %5645, %v8179_v17   ;;  %v2329_v29 = vsub.f32 %v7314_v34, %v2073_v16  ;;  %10345 = vst [vmem:[#allocation134_spill] sm:$0xff] %v8200_v48  ;;  %v8203_v17 = vpop.eup %6052  ;;  %v2319_v16 = vsub.f32 %v10180_v46, %v2063_v33  ;;  %v2066_v46 = vperm.slane %v7898_v62, 7  ;;  %v2339_v62 = vsub.f32 %v7493_v43, %v2083_v44 }
 0x339   :  { %10339 = vst [vmem:[#allocation130_spill] sm:$0xff] %v8171_v21 }
 0x33a   :  { %v8194_v15 = vpop.permute.xlu2 %2842  ;;  %10346 = vst [vmem:[#allocation135_spill] sm:$0xff] %v8203_v17  ;;  %v8205_v34 = vpop.eup %6054  ;;  %v2515_v33 = vmul.f32 1.442695, %v2319_v16  ;;  %v2555_v43 = vmul.f32 1.442695, %v2339_v62 }
 0x33b   :  { %10347 = vst [vmem:[#allocation136_spill] sm:$0xff] %v8205_v34  ;;  %v8221_v18 = vpop.eup %6056 }
 0x33c   :  { %10349 = vst [vmem:[#allocation138_spill] sm:$0xff] %v8221_v18 }
 0x33d   :  { %2980 = vperm.xlu1 %5644, %v8184_v57  }
 0x33e   :  { %2992 = vperm.xlu0 %5643, %v8182_v4   ;;  %v2535_v4 = vmul.f32 1.442695, %v2329_v29 }
 0x33f   :  { %v8196_v14 = vpop.permute.xlu1 %2854 }
 0x340   :  { %v8192_v61 = vpop.permute.xlu0 %2866  ;;  %10344 = vst [vmem:[#allocation63_spill] sm:$0xff] %v8196_v14  ;;  %2950 = vperm.xlu2 %5645, %v8200_v48   ;;  %6060 = vpow2.f32 %v2535_v4  ;;  %v2322_v4 = vsub.f32 %v7203_v56, %v2066_v46  ;;  %v2069_v56 = vperm.slane %v7943_v54, 2 }
 0x341   :  { %6062 = vpow2.f32 %v2515_v33  ;;  %v2086_v33 = vperm.slane %v7924_v52, 3 }
 0x342   :  { %v8215_v29 = vpop.permute.xlu2 %2851  ;;  %6064 = vpow2.f32 %v2549_v24  ;;  %v2521_v46 = vmul.f32 1.442695, %v2322_v4 }
 0x343   :  { %10348 = vst [vmem:[#allocation137_spill] sm:$0xff] %v8215_v29  ;;  %6066 = vpow2.f32 %v2541_v3  ;;  %v2105_v29 = vperm.slane %v7939_v36, 6 }
 0x344   :  { %6068 = vpow2.f32 %v2521_v46 }
 0x345   :  { %2989 = vperm.xlu1 %5644, %v8205_v34   ;;  %v8224_v34 = vpop.eup %6058  ;;  %6070 = vpow2.f32 %v2555_v43  ;;  %v2085_v43 = vperm.slane %v7924_v52, 2 }
 0x346   :  { %3001 = vperm.xlu0 %5643, %v8203_v17   ;;  %v2079_v17 = vperm.slane %v7920_v45, 4  ;;  %10350 = vst [vmem:[#allocation139_spill] sm:$0xff] %v8224_v34  ;;  %v8226_v47 = vpop.eup %6060 }
 0x347   :  { %v8217_v57 = vpop.permute.xlu1 %2863  ;;  %10351 = vst [vmem:[#allocation140_spill] sm:$0xff] %v8226_v47  ;;  %v8242_v44 = vpop.eup %6062 }
 0x348   :  { %v8213_v8 = vpop.permute.xlu0 %2875  ;;  %2959 = vperm.xlu2 %5645, %v8221_v18   ;;  %v2335_v1 = vsub.f32 %v7416_v9, %v2079_v17  ;;  %10353 = vst [vmem:[#allocation142_spill] sm:$0xff] %v8242_v44  ;;  %v10356_v17 = vld [vmem:[#allocation70_spill] sm:$0xff]  ;;  %v2342_v18 = vsub.f32 %v7537_v40, %v2086_v33 }
 0x349   :  { %v2325_v3 = vsub.f32 %v10356_v17, %v2069_v56  ;;  %v2072_v56 = vperm.slane %v7943_v54, 5  ;;  %v2089_v17 = vperm.slane %v7924_v52, 6 }
 0x34a   :  { %v8236_v13 = vpop.permute.xlu2 %2860  ;;  %v2547_v24 = vmul.f32 1.442695, %v2335_v1  ;;  %v2561_v40 = vmul.f32 1.442695, %v2342_v18  ;;  %v2341_v18 = vsub.f32 %v7523_v25, %v2085_v43 }
 0x34b   :  { %v2527_v46 = vmul.f32 1.442695, %v2325_v3  ;;  %v2345_v54 = vsub.f32 %v7566_v37, %v2089_v17  ;;  %v2092_v37 = vperm.slane %v7964_v39, 1 }
 0x34c   :  { %6072 = vpow2.f32 %v2547_v24 }
 0x34d   :  { %2998 = vperm.xlu1 %5644, %v8226_v47   ;;  %v8245_v47 = vpop.eup %6064  ;;  %6074 = vpow2.f32 %v2527_v46  ;;  %v2567_v46 = vmul.f32 1.442695, %v2345_v54 }
 0x34e   :  { %3010 = vperm.xlu0 %5643, %v8224_v34   ;;  %v2082_v34 = vperm.slane %v7920_v45, 7  ;;  %10354 = vst [vmem:[#allocation143_spill] sm:$0xff] %v8245_v47  ;;  %v8247_v9 = vpop.eup %6066  ;;  %6076 = vpow2.f32 %v2561_v40  ;;  %v2559_v40 = vmul.f32 1.442695, %v2341_v18 }
 0x34f   :  { %v8238_v5 = vpop.permute.xlu1 %2872  ;;  %10355 = vst [vmem:[#allocation144_spill] sm:$0xff] %v8247_v9  ;;  %v8263_v33 = vpop.eup %6068 }
 0x350   :  { %v8234_v16 = vpop.permute.xlu0 %2884  ;;  %2968 = vperm.xlu2 %5645, %v8242_v44   ;;  %v2338_v4 = vsub.f32 %v7472_v20, %v2082_v34  ;;  %10358 = vst [vmem:[#allocation145_spill] sm:$0xff] %v8263_v33  ;;  %v2328_v34 = vsub.f32 %v7275_v32, %v2072_v56  ;;  %v2075_v56 = vperm.slane %v7920_v45, 0 }
 0x351   :  { %10352 = vst [vmem:[#allocation141_spill] sm:$0xff] %v8234_v16 }
 0x352   :  { %v8257_v1 = vpop.permute.xlu2 %2869  ;;  %v2533_v32 = vmul.f32 1.442695, %v2328_v34  ;;  %v2348_v34 = vsub.f32 %v7579_v31, %v2092_v37 }
 0x354   :  { %v2573_v31 = vmul.f32 1.442695, %v2348_v34 }
 0x355   :  { %3007 = vperm.xlu1 %5644, %v8247_v9   ;;  %v8266_v9 = vpop.eup %6070 }
 0x356   :  { %3019 = vperm.xlu0 %5643, %v8245_v47   ;;  %v2553_v47 = vmul.f32 1.442695, %v2338_v4  ;;  %10359 = vst [vmem:[#allocation146_spill] sm:$0xff] %v8266_v9  ;;  %v8268_v20 = vpop.eup %6072 }
 0x357   :  { %v8259_v48 = vpop.permute.xlu1 %2881  ;;  %10360 = vst [vmem:[#allocation147_spill] sm:$0xff] %v8268_v20  ;;  %v8284_v17 = vpop.eup %6074 }
 0x358   :  { %v8255_v62 = vpop.permute.xlu0 %2893  ;;  %2977 = vperm.xlu2 %5645, %v8263_v33   ;;  %6078 = vpow2.f32 %v2553_v47  ;;  %10363 = vst [vmem:[#allocation150_spill] sm:$0xff] %v8284_v17  ;;  %v10366_v47 = vld [vmem:[#allocation72_spill] sm:$0xff] }
 0x359   :  { %10357 = vst [vmem:[#allocation70_spill] sm:$0xff] %v8255_v62  ;;  %v2331_v43 = vsub.f32 %v10366_v47, %v2075_v56  ;;  %6080 = vpow2.f32 %v2533_v32  ;;  %v2078_v32 = vperm.slane %v7920_v45, 3  ;;  %v2095_v47 = vperm.slane %v7964_v39, 4 }
 0x35a   :  { %v8278_v3 = vpop.permute.xlu2 %2878  ;;  %6082 = vpow2.f32 %v2567_v46  ;;  %v2091_v46 = vperm.slane %v7964_v39, 0 }
 0x35b   :  { %6084 = vpow2.f32 %v2559_v40  ;;  %v2539_v56 = vmul.f32 1.442695, %v2331_v43 }
 0x35c   :  { %v2347_v43 = vsub.f32 %v7574_v35, %v2091_v46 }
 0x35d   :  { %3016 = vperm.xlu1 %5644, %v8268_v20   ;;  %v8287_v20 = vpop.eup %6076  ;;  %6086 = vpow2.f32 %v2539_v56 }
 0x35e   :  { %3028 = vperm.xlu0 %5643, %v8266_v9   ;;  %v2088_v9 = vperm.slane %v7924_v52, 5  ;;  %10364 = vst [vmem:[#allocation151_spill] sm:$0xff] %v8287_v20  ;;  %v8289_v25 = vpop.eup %6078  ;;  %6088 = vpow2.f32 %v2573_v31  ;;  %v2571_v31 = vmul.f32 1.442695, %v2347_v43 }
 0x35f   :  { %v8280_v4 = vpop.permute.xlu1 %2890  ;;  %10365 = vst [vmem:[#allocation152_spill] sm:$0xff] %v8289_v25  ;;  %v8305_v37 = vpop.eup %6080 }
 0x360   :  { %v8276_v24 = vpop.permute.xlu0 %2902  ;;  %10362 = vst [vmem:[#allocation149_spill] sm:$0xff] %v8280_v4  ;;  %2986 = vperm.xlu2 %5645, %v8284_v17   ;;  %v2344_v54 = vsub.f32 %v7555_v19, %v2088_v9  ;;  %v10372_v9 = vld [vmem:[#allocation37_spill] sm:$0xff]  ;;  %v2351_v17 = vsub.f32 %v7595_v27, %v2095_v47 }
 0x361   :  { %10361 = vst [vmem:[#allocation148_spill] sm:$0xff] %v8276_v24  ;;  %v2334_v40 = vsub.f32 %v10372_v9, %v2078_v32  ;;  %v2081_v32 = vperm.slane %v7920_v45, 6  ;;  %v2098_v9 = vperm.slane %v7964_v39, 7 }
 0x362   :  { %v8299_v18 = vpop.permute.xlu2 %2887  ;;  %10369 = vst [vmem:[#allocation154_spill] sm:$0xff] %v8305_v37  ;;  %v2579_v27 = vmul.f32 1.442695, %v2351_v17 }
 0x363   :  { %10367 = vst [vmem:[#allocation72_spill] sm:$0xff] %v8299_v18  ;;  %v2545_v56 = vmul.f32 1.442695, %v2334_v40  ;;  %v2354_v45 = vsub.f32 %v7610_v12, %v2098_v9  ;;  %v2101_v12 = vperm.slane %v7939_v36, 2 }
 0x365   :  { %3025 = vperm.xlu1 %5644, %v8289_v25   ;;  %v8308_v25 = vpop.eup %6082 }
 0x366   :  { %3037 = vperm.xlu0 %5643, %v8287_v20   ;;  %v2565_v20 = vmul.f32 1.442695, %v2344_v54  ;;  %10370 = vst [vmem:[#allocation155_spill] sm:$0xff] %v8308_v25  ;;  %v8310_v19 = vpop.eup %6084 }
 0x367   :  { %v8301_v44 = vpop.permute.xlu1 %2899  ;;  %10371 = vst [vmem:[#allocation156_spill] sm:$0xff] %v8310_v19  ;;  %v8326_v47 = vpop.eup %6086 }
 0x368   :  { %v8297_v33 = vpop.permute.xlu0 %2911  ;;  %10368 = vst [vmem:[#allocation153_spill] sm:$0xff] %v8301_v44  ;;  %2995 = vperm.xlu2 %5645, %v8305_v37   ;;  %6090 = vpow2.f32 %v2565_v20  ;;  %v2337_v20 = vsub.f32 %v7433_v38, %v2081_v32  ;;  %v2084_v32 = vperm.slane %v7924_v52, 1 }
 0x369   :  { %10374 = vst [vmem:[#allocation157_spill] sm:$0xff] %v8326_v47  ;;  %6092 = vpow2.f32 %v2545_v56  ;;  %v2585_v56 = vmul.f32 1.442695, %v2354_v45  ;;  %v10383_v45 = vld [vmem:[#allocation73_spill] sm:$0xff] }
 0x36a   :  { %v8320_v54 = vpop.permute.xlu2 %2896  ;;  %6094 = vpow2.f32 %v2579_v27  ;;  %v2551_v38 = vmul.f32 1.442695, %v2337_v20  ;;  %v10382_v20 = vld [vmem:[#allocation77_spill] sm:$0xff] }
 0x36b   :  { %10373 = vst [vmem:[#allocation37_spill] sm:$0xff] %v8320_v54  ;;  %6096 = vpow2.f32 %v2571_v31 }
 0x36c   :  { %6098 = vpow2.f32 %v2551_v38  ;;  %v2087_v38 = vperm.slane %v7924_v52, 4 }
 0x36d   :  { %3034 = vperm.xlu1 %5644, %v8310_v19   ;;  %v8329_v19 = vpop.eup %6088  ;;  %6100 = vpow2.f32 %v2585_v56  ;;  %v2100_v56 = vperm.slane %v7939_v36, 1 }
 0x36e   :  { %3046 = vperm.xlu0 %5643, %v8308_v25   ;;  %v2094_v25 = vperm.slane %v7964_v39, 3  ;;  %10375 = vst [vmem:[#allocation158_spill] sm:$0xff] %v8329_v19  ;;  %v8331_v35 = vpop.eup %6090 }
 0x36f   :  { %v8322_v24 = vpop.permute.xlu1 %2908  ;;  %10376 = vst [vmem:[#allocation159_spill] sm:$0xff] %v8331_v35  ;;  %v8347_v9 = vpop.eup %6092 }
 0x370   :  { %v8318_v34 = vpop.permute.xlu0 %2920  ;;  %3004 = vperm.xlu2 %5645, %v8326_v47   ;;  %v2350_v17 = vsub.f32 %v7588_v10, %v2094_v25  ;;  %10378 = vst [vmem:[#allocation161_spill] sm:$0xff] %v8347_v9  ;;  %v8350_v47 = vpop.eup %6094  ;;  %v10381_v25 = vld [vmem:[#allocation68_spill] sm:$0xff] }
 0x371   :  { %10379 = vst [vmem:[#allocation162_spill] sm:$0xff] %v8350_v47  ;;  %v8352_v10 = vpop.eup %6096  ;;  %v2340_v31 = vsub.f32 %v10381_v25, %v2084_v32  ;;  %v2104_v25 = vperm.slane %v7939_v36, 5 }
 0x372   :  { %v8341_v40 = vpop.permute.xlu2 %2905  ;;  %v2577_v27 = vmul.f32 1.442695, %v2350_v17  ;;  %10380 = vst [vmem:[#allocation163_spill] sm:$0xff] %v8352_v10 }
 0x373   :  { %10377 = vst [vmem:[#allocation160_spill] sm:$0xff] %v8341_v40  ;;  %v2557_v32 = vmul.f32 1.442695, %v2340_v31 }
 0x374   :  { %6102 = vpow2.f32 %v2577_v27  ;;  %v10387_v27 = vld [vmem:[#allocation61_spill] sm:$0xff] }
 0x375   :  { %3043 = vperm.xlu1 %5644, %v8331_v35   ;;  %v2357_v35 = vsub.f32 %v10382_v20, %v2101_v12  ;;  %v8368_v20 = vpop.eup %6098  ;;  %6104 = vpow2.f32 %v2557_v32 }
 0x376   :  { %3055 = vperm.xlu0 %5643, %v8329_v19   ;;  %v2097_v19 = vperm.slane %v7964_v39, 6  ;;  %10384 = vst [vmem:[#allocation68_spill] sm:$0xff] %v8368_v20 }
 0x377   :  { %v8343_v43 = vpop.permute.xlu1 %2917  ;;  %v2591_v12 = vmul.f32 1.442695, %v2357_v35  ;;  %v10389_v35 = vld [vmem:[#allocation75_spill] sm:$0xff] }
 0x378   :  { %v8339_v46 = vpop.permute.xlu0 %2929  ;;  %3013 = vperm.xlu2 %5645, %v8347_v9   ;;  %v2353_v37 = vsub.f32 %v10383_v45, %v2097_v19  ;;  %v8371_v9 = vpop.eup %6100  ;;  %v2343_v45 = vsub.f32 %v10387_v27, %v2087_v38  ;;  %v2090_v38 = vperm.slane %v7924_v52, 7 }
 0x379   :  { %10385 = vst [vmem:[#allocation77_spill] sm:$0xff] %v8371_v9  ;;  %6106 = vpow2.f32 %v2591_v12 }
 0x37a   :  { %v8362_v17 = vpop.permute.xlu2 %2914  ;;  %v8373_v19 = vpop.eup %6102  ;;  %v2563_v32 = vmul.f32 1.442695, %v2343_v45 }
 0x37b   :  { %10386 = vst [vmem:[#allocation73_spill] sm:$0xff] %v8373_v19 }
 0x37d   :  { %3052 = vperm.xlu1 %5644, %v8352_v10   ;;  %v10388_v10 = vld [vmem:[#allocation80_spill] sm:$0xff] }
 0x37e   :  { %3064 = vperm.xlu0 %5643, %v8350_v47   ;;  %v2583_v47 = vmul.f32 1.442695, %v2353_v37  ;;  %v2360_v21 = vsub.f32 %v10388_v10, %v2104_v25  ;;  %v2356_v37 = vsub.f32 %v10389_v35, %v2100_v56  ;;  %v2107_v10 = vperm.slane %v7946_v58, 0  ;;  %v8389_v25 = vpop.eup %6104 }
 0x37f   :  { %v8364_v44 = vpop.permute.xlu1 %2926  ;;  %10390 = vst [vmem:[#allocation61_spill] sm:$0xff] %v8389_v25 }
 0x380   :  { %v8360_v40 = vpop.permute.xlu0 %2938  ;;  %3022 = vperm.xlu2 %5645, %v8368_v20   ;;  %6108 = vpow2.f32 %v2583_v47  ;;  %v2597_v27 = vmul.f32 1.442695, %v2360_v21  ;;  %v2589_v12 = vmul.f32 1.442695, %v2356_v37  ;;  %v8392_v20 = vpop.eup %6106  ;;  %v10393_v47 = vld [vmem:[#allocation67_spill] sm:$0xff]  ;;  %v10395_v21 = vld [vmem:[#allocation78_spill] sm:$0xff] }
 0x381   :  { %10391 = vst [vmem:[#allocation80_spill] sm:$0xff] %v8392_v20  ;;  %v2346_v35 = vsub.f32 %v10393_v47, %v2090_v38  ;;  %6110 = vpow2.f32 %v2563_v32  ;;  %v2093_v32 = vperm.slane %v7964_v39, 2  ;;  %v2110_v47 = vperm.slane %v7946_v58, 3 }
 0x382   :  { %v8383_v54 = vpop.permute.xlu2 %2923  ;;  %6112 = vpow2.f32 %v2597_v27 }
 0x383   :  { %6114 = vpow2.f32 %v2589_v12  ;;  %v2569_v38 = vmul.f32 1.442695, %v2346_v35  ;;  %v10400_v12 = vld [vmem:[#allocation60_spill] sm:$0xff]  ;;  %v10401_v35 = vld [vmem:[#allocation86_spill] sm:$0xff] }
 0x385   :  { %3061 = vperm.xlu1 %5644, %v8373_v19   ;;  %v10394_v19 = vld [vmem:[#allocation83_spill] sm:$0xff]  ;;  %6116 = vpow2.f32 %v2569_v38  ;;  %v2113_v38 = vperm.slane %v7946_v58, 6 }
 0x386   :  { %3073 = vperm.xlu0 %5643, %v8371_v9   ;;  %v2103_v9 = vperm.slane %v7939_v36, 4  ;;  %v8394_v56 = vpop.eup %6108  ;;  %v2363_v52 = vsub.f32 %v10394_v19, %v2107_v10 }
 0x387   :  { %v8385_v62 = vpop.permute.xlu1 %2935  ;;  %10392 = vst [vmem:[#allocation75_spill] sm:$0xff] %v8394_v56  ;;  %v8410_v10 = vpop.eup %6110 }
 0x388   :  { %v8381_v31 = vpop.permute.xlu0 %2947  ;;  %3031 = vperm.xlu2 %5645, %v8389_v25   ;;  %v2359_v45 = vsub.f32 %v10395_v21, %v2103_v9  ;;  %v2603_v19 = vmul.f32 1.442695, %v2363_v52  ;;  %10397 = vst [vmem:[#allocation83_spill] sm:$0xff] %v8410_v10  ;;  %v8413_v25 = vpop.eup %6112  ;;  %v2349_v21 = vsub.f32 %v10400_v12, %v2093_v32  ;;  %v10402_v52 = vld [vmem:[#allocation81_spill] sm:$0xff] }
 0x389   :  { %10398 = vst [vmem:[#allocation78_spill] sm:$0xff] %v8413_v25  ;;  %v8415_v9 = vpop.eup %6114 }
 0x38a   :  { %v8404_v37 = vpop.permute.xlu2 %2932  ;;  %v2595_v27 = vmul.f32 1.442695, %v2359_v45  ;;  %10399 = vst [vmem:[#allocation164_spill] sm:$0xff] %v8415_v9  ;;  %6118 = vpow2.f32 %v2603_v19  ;;  %v2575_v32 = vmul.f32 1.442695, %v2349_v21 }
 0x38c   :  { %6120 = vpow2.f32 %v2595_v27 }
 0x38d   :  { %3070 = vperm.xlu1 %5644, %v8394_v56   ;;  %v2366_v56 = vsub.f32 %v10401_v35, %v2110_v47  ;;  %v2096_v47 = vperm.slane %v7964_v39, 5  ;;  %6122 = vpow2.f32 %v2575_v32  ;;  %v2116_v32 = vperm.slane %v7984_v28, 1 }
 0x38e   :  { %3082 = vperm.xlu0 %5643, %v8392_v20   ;;  %v2106_v20 = vperm.slane %v7939_v36, 7 }
 0x38f   :  { %v8406_v4 = vpop.permute.xlu1 %2944  ;;  %v2609_v12 = vmul.f32 1.442695, %v2366_v56  ;;  %v10408_v56 = vld [vmem:[#allocation62_spill] sm:$0xff] }
 0x390   :  { %v8402_v14 = vpop.permute.xlu0 %2956  ;;  %3040 = vperm.xlu2 %5645, %v8410_v10   ;;  %v2352_v21 = vsub.f32 %v10408_v56, %v2096_v47  ;;  %v10414_v47 = vld [vmem:[#allocation92_spill] sm:$0xff] }
 0x391   :  { %10396 = vst [vmem:[#allocation67_spill] sm:$0xff] %v8402_v14  ;;  %v2362_v14 = vsub.f32 %v10402_v52, %v2106_v20  ;;  %v10407_v20 = vld [vmem:[#allocation89_spill] sm:$0xff]  ;;  %6124 = vpow2.f32 %v2609_v12 }
 0x392   :  { %v8425_v45 = vpop.permute.xlu2 %2941  ;;  %v2369_v27 = vsub.f32 %v10407_v20, %v2113_v38  ;;  %v2581_v38 = vmul.f32 1.442695, %v2352_v21  ;;  %v2099_v20 = vperm.slane %v7939_v36, 0 }
 0x393   :  { %v2601_v35 = vmul.f32 1.442695, %v2362_v14 }
 0x395   :  { %3079 = vperm.xlu1 %5644, %v8415_v9   ;;  %6126 = vpow2.f32 %v2601_v35  ;;  %v2615_v9 = vmul.f32 1.442695, %v2369_v27  ;;  %v2372_v35 = vsub.f32 %v10414_v47, %v2116_v32  ;;  %v10415_v27 = vld [vmem:[#allocation74_spill] sm:$0xff] }
 0x396   :  { %3091 = vperm.xlu0 %5643, %v8413_v25   ;;  %v8430_v25 = vpop.eup %6116  ;;  %v2355_v56 = vsub.f32 %v10415_v27, %v2099_v20  ;;  %v10421_v20 = vld [vmem:[#allocation76_spill] sm:$0xff] }
 0x397   :  { %v8427_v53 = vpop.permute.xlu1 %2953  ;;  %10404 = vst [vmem:[#allocation86_spill] sm:$0xff] %v8430_v25  ;;  %v8433_v10 = vpop.eup %6118  ;;  %6128 = vpow2.f32 %v2615_v9  ;;  %v10420_v9 = vld [vmem:[#allocation94_spill] sm:$0xff] }
 0x398   :  { %v8423_v16 = vpop.permute.xlu0 %2965  ;;  %10405 = vst [vmem:[#allocation81_spill] sm:$0xff] %v8433_v10  ;;  %v8435_v19 = vpop.eup %6120  ;;  %3049 = vperm.xlu2 %5645, %v8430_v25   ;;  %6130 = vpow2.f32 %v2581_v38  ;;  %v2587_v32 = vmul.f32 1.442695, %v2355_v56  ;;  %v2122_v56 = vperm.slane %v7984_v28, 7 }
 0x399   :  { %10403 = vst [vmem:[#allocation60_spill] sm:$0xff] %v8423_v16  ;;  %v2119_v16 = vperm.slane %v7984_v28, 4 }
 0x39a   :  { %10406 = vst [vmem:[#allocation165_spill] sm:$0xff] %v8435_v19  ;;  %v8444_v39 = vpop.permute.xlu2 %2950 }
 0x39b   :  { %v2375_v38 = vsub.f32 %v10420_v9, %v2119_v16 }
 0x39d   :  { %3088 = vperm.xlu1 %5644, %v8435_v19  }
 0x39e   :  { %3100 = vperm.xlu0 %5643, %v8433_v10   ;;  %v8449_v10 = vpop.eup %6122 }
 0x39f   :  { %v8446_v14 = vpop.permute.xlu1 %2962  ;;  %10411 = vst [vmem:[#allocation166_spill] sm:$0xff] %v8449_v10  ;;  %v8452_v25 = vpop.eup %6124 }
 0x3a0   :  { %v8442_v52 = vpop.permute.xlu0 %2974  ;;  %10410 = vst [vmem:[#allocation62_spill] sm:$0xff] %v8446_v14  ;;  %v8454_v12 = vpop.eup %6126  ;;  %3058 = vperm.xlu2 %5645, %v8449_v10   ;;  %v2621_v14 = vmul.f32 1.442695, %v2372_v35 }
 0x3a1   :  { %10409 = vst [vmem:[#allocation89_spill] sm:$0xff] %v8442_v52  ;;  %v8469_v47 = vpop.eup %6128 }
 0x3a2   :  { %10412 = vst [vmem:[#allocation167_spill] sm:$0xff] %v8452_v25  ;;  %v8463_v21 = vpop.permute.xlu2 %2959  ;;  %v8471_v10 = vpop.eup %6130  ;;  %6132 = vpow2.f32 %v2621_v14 }
 0x3a3   :  { %10413 = vst [vmem:[#allocation168_spill] sm:$0xff] %v8454_v12  ;;  %6134 = vpow2.f32 %v2587_v32  ;;  %v10425_v32 = vld [vmem:[#allocation79_spill] sm:$0xff] }
 0x3a4   :  { %10416 = vst [vmem:[#allocation92_spill] sm:$0xff] %v8463_v21  ;;  %v2627_v21 = vmul.f32 1.442695, %v2375_v38  ;;  %v2361_v9 = vsub.f32 %v10425_v32, %v2105_v29 }
 0x3a5   :  { %3097 = vperm.xlu1 %5644, %v8454_v12   ;;  %10418 = vst [vmem:[#allocation169_spill] sm:$0xff] %v8469_v47 }
 0x3a6   :  { %3109 = vperm.xlu0 %5643, %v8452_v25   ;;  %v2102_v25 = vperm.slane %v7939_v36, 3  ;;  %10419 = vst [vmem:[#allocation170_spill] sm:$0xff] %v8471_v10  ;;  %6136 = vpow2.f32 %v2627_v21 }
 0x3a7   :  { %v8465_v52 = vpop.permute.xlu1 %2971 }
 0x3a8   :  { %v8461_v19 = vpop.permute.xlu0 %2983  ;;  %10417 = vst [vmem:[#allocation74_spill] sm:$0xff] %v8465_v52  ;;  %3067 = vperm.xlu2 %5645, %v8471_v10   ;;  %v2358_v27 = vsub.f32 %v10421_v20, %v2102_v25  ;;  %v8485_v18 = vpop.eup %6132  ;;  %v10424_v25 = vld [vmem:[#allocation97_spill] sm:$0xff]  ;;  %v10426_v10 = vld [vmem:[#allocation66_spill] sm:$0xff] }
 0x3a9   :  { %10422 = vst [vmem:[#allocation94_spill] sm:$0xff] %v8485_v18  ;;  %v8487_v16 = vpop.eup %6134  ;;  %v2378_v14 = vsub.f32 %v10424_v25, %v2122_v56  ;;  %v3156_v28 = vperm.slane %v8039_v22, %v10426_v10  ;;  %v2599_v56 = vmul.f32 1.442695, %v2361_v9  ;;  %v2108_v25 = vperm.slane %v7946_v58, 1  ;;  %v10429_v22 = vld [vmem:[#allocation82_spill] sm:$0xff] }
 0x3aa   :  { %v8479_v35 = vpop.permute.xlu2 %2968  ;;  %10423 = vst [vmem:[#allocation76_spill] sm:$0xff] %v8487_v16  ;;  %vm5170_vm9 = vcmp.lt.s32.totalorder %v10426_v10, 4 }
 0x3ab   :  { %v2364_v32 = vsub.f32 %v10429_v22, %v2108_v25 }
 0x3ac   :  { %v8504_v21 = vpop.eup %6136 }
 0x3ad   :  { %10427 = vst [vmem:[#allocation97_spill] sm:$0xff] %v8504_v21  ;;  %v2605_v25 = vmul.f32 1.442695, %v2364_v32  ;;  %v10431_v32 = vld [vmem:[#allocation85_spill] sm:$0xff] }
 0x3ae   :  { %3118 = vperm.xlu0 %5643, %v8469_v47   ;;  %v2593_v47 = vmul.f32 1.442695, %v2358_v27  ;;  %v2633_v27 = vmul.f32 1.442695, %v2378_v14  ;;  %v3158_v14 = vperm.slane %v8089_v26, %v10426_v10 }
 0x3af   :  { %v8481_v52 = vpop.permute.xlu1 %2980 }
 0x3b0   :  { %v8477_v12 = vpop.permute.xlu0 %2992  ;;  %3076 = vperm.xlu2 %5645, %v8487_v16   ;;  %6138 = vpow2.f32 %v2593_v47 }
 0x3b1   :  { %6140 = vpow2.f32 %v2633_v27  ;;  %v3180_v27 = vperm.slane %v8217_v57, %v10426_v10  ;;  %v3160_v57 = vperm.slane %v8035_v0, %v10426_v10 }
 0x3b2   :  { %v8495_v38 = vpop.permute.xlu2 %2977  ;;  %6142 = vpow2.f32 %v2599_v56  ;;  %v2111_v56 = vperm.slane %v7946_v58, 4 }
 0x3b3   :  { %6144 = vpow2.f32 %v2605_v25  ;;  %v2114_v25 = vperm.slane %v7946_v58, 7 }
 0x3b6   :  { %3127 = vperm.xlu0 %5643, %v8485_v18   ;;  %v3155_v18 = vperm.slane %v8070_v51, %v10426_v10  ;;  %v8506_v29 = vpop.eup %6138  ;;  %v3157_v51 = vperm.slane %v8010_v7, %v10426_v10  ;;  %v3179_v7 = vperm.slane %v8236_v13, %v10426_v10  ;;  %v3182_v13 = vperm.slane %v8257_v1, %v10426_v10 }
 0x3b7   :  { %v8497_v36 = vpop.permute.xlu1 %2989  ;;  %10428 = vst [vmem:[#allocation79_spill] sm:$0xff] %v8506_v29  ;;  %v8531_v22 = vpop.eup %6140 }
 0x3b8   :  { %v8493_v20 = vpop.permute.xlu0 %3001  ;;  %v3282_v47 = vsel %vm1795_vm1, %v3156_v28, %v3155_v18  ;;  %3085 = vperm.xlu2 %5645, %v8506_v29   ;;  %10430 = vst [vmem:[#allocation66_spill] sm:$0xff] %v8531_v22  ;;  %v8533_v29 = vpop.eup %6142 }
 0x3b9   :  { %v3283_v28 = vsel %vm1797_vm2, %v3157_v51, %v3282_v47  ;;  %v3161_v47 = vperm.slane %v8110_v60, %v10426_v10  ;;  %v2367_v51 = vsub.f32 %v10431_v32, %v2111_v56  ;;  %v3162_v60 = vperm.slane %v8091_v11, %v10426_v10 }
 0x3ba   :  { %v8516_v9 = vpop.permute.xlu2 %2986  ;;  %v3284_v26 = vsel %vm1799_vm3, %v3158_v14, %v3283_v28  ;;  %v3303_v14 = vsel %vm1795_vm1, %v3180_v27, %v3179_v7  ;;  %v3183_v27 = vperm.slane %v8238_v5, %v10426_v10  ;;  %v3203_v11 = vperm.slane %v8404_v37, %v10426_v10  ;;  %v8566_v5 = vpop.eup %6144 }
 0x3bb   :  { %v2611_v32 = vmul.f32 1.442695, %v2367_v51  ;;  %v3206_v37 = vperm.slane %v8425_v45, %v10426_v10  ;;  %v3207_v45 = vperm.slane %v8406_v4, %v10426_v10  ;;  %v3209_v4 = vperm.slane %v8444_v39, %v10426_v10 }
 0x3bd   :  { %6146 = vpow2.f32 %v2611_v32 }
 0x3be   :  { %3136 = vperm.xlu0 %5643, %v8504_v21   ;;  %v3159_v21 = vperm.slane %v8067_v23, %v10426_v10 }
 0x3bf   :  { %v8518_v16 = vpop.permute.xlu1 %2998 }
 0x3c0   :  { %v8523_v18 = vpop.permute.xlu0 %3010  ;;  %v3285_v23 = vsel %vm1801_vm4, %v3159_v21, %v3284_v26  ;;  %3094 = vperm.xlu2 %5645, %v8533_v29   ;;  %v3181_v21 = vperm.slane %v8192_v61, %v10426_v10  ;;  %v3204_v61 = vperm.slane %v8385_v62, %v10426_v10  ;;  %v3184_v62 = vperm.slane %v8213_v8, %v10426_v10 }
 0x3c1   :  { %v3286_v0 = vsel %vm1803_vm5, %v3160_v57, %v3285_v23 }
 0x3c2   :  { %v8550_v28 = vpop.permute.xlu2 %2995  ;;  %v3304_v1 = vsel %vm1797_vm2, %v3181_v21, %v3303_v14  ;;  %v3287_v7 = vsel %vm1805_vm6, %v3161_v47, %v3286_v0  ;;  %v3185_v47 = vperm.slane %v8278_v3, %v10426_v10  ;;  %v3324_v14 = vsel %vm1795_vm1, %v3204_v61, %v3203_v11 }
 0x3c3   :  { %v3305_v56 = vsel %vm1799_vm3, %v3182_v13, %v3304_v1  ;;  %v3288_v23 = vsel %vm1807_vm7, %v3162_v60, %v3287_v7  ;;  %v10432_v13 = vld [vmem:[#allocation88_spill] sm:$0xff]  ;;  %v3205_v21 = vperm.slane %v8360_v40, %v10426_v10  ;;  %v3186_v3 = vperm.slane %v8259_v48, %v10426_v10 }
 0x3c4   :  { %v3306_v57 = vsel %vm1801_vm4, %v3183_v27, %v3305_v56  ;;  %v2370_v51 = vsub.f32 %v10432_v13, %v2114_v25  ;;  %v3406_v60 = vsel %vm1930_vm8, %v3288_v23, 0.0  ;;  %v8592_v25 = vpop.eup %6146  ;;  %v3164_v13 = vperm.slane %v8131_v30, %v10426_v10 }
 0x3c5   :  { %v3307_v27 = vsel %vm1803_vm5, %v3184_v62, %v3306_v57  ;;  %v3325_v1 = vsel %vm1797_vm2, %v3205_v21, %v3324_v14  ;;  %v3208_v57 = vperm.slane %v8381_v31, %v10426_v10  ;;  %v3229_v31 = vperm.slane %v8523_v18, %v10426_v10 }
 0x3c6   :  { %3145 = vperm.xlu0 %5643, %v8531_v22   ;;  %v3308_v7 = vsel %vm1805_vm6, %v3185_v47, %v3307_v27  ;;  %v3326_v40 = vsel %vm1799_vm3, %v3206_v37, %v3325_v1  ;;  %v2617_v56 = vmul.f32 1.442695, %v2370_v51  ;;  %v3210_v47 = vperm.slane %v8427_v53, %v10426_v10 }
 0x3c7   :  { %v3008_v26 = vpop.permute.xlu1 %3007  ;;  %v3309_v48 = vsel %vm1807_vm7, %v3186_v3, %v3308_v7  ;;  %v3327_v32 = vsel %vm1801_vm4, %v3207_v45, %v3326_v40  ;;  %v3163_v53 = vperm.slane %v8062_v50, %v10426_v10 }
 0x3c8   :  { %v8563_v22 = vpop.permute.xlu0 %3019  ;;  %3103 = vperm.xlu2 %5645, %v8566_v5   ;;  %v3228_v61 = vperm.slane %v3008_v26, %v10426_v10  ;;  %6148 = vpow2.f32 %v2617_v56  ;;  %v3415_v26 = vsel %vm1930_vm8, %v3309_v48, 0.0  ;;  %v3328_v39 = vsel %vm1803_vm5, %v3208_v57, %v3327_v32 }
 0x3c9   :  { %v3329_v21 = vsel %vm1805_vm6, %v3209_v4, %v3328_v39  ;;  %v3289_v18 = vsel %vm1795_vm1, %v3164_v13, %v3163_v53  ;;  %v3232_v40 = vperm.slane %v8563_v22, %v10426_v10  ;;  %v3166_v48 = vperm.slane %v8087_v55, %v10426_v10 }
 0x3ca   :  { %v3005_v0 = vpop.permute.xlu2 %3004  ;;  %v3330_v30 = vsel %vm1807_vm7, %v3210_v47, %v3329_v21  ;;  %v3195_v32 = vperm.slane %v8322_v24, %v10426_v10  ;;  %v3168_v22 = vperm.slane %v8133_v49, %v10426_v10  ;;  %v3196_v47 = vperm.slane %v8297_v33, %v10426_v10 }
 0x3cb   :  { %v3227_v11 = vperm.slane %v3005_v0, %v10426_v10  ;;  %v3165_v0 = vperm.slane %v8112_v41, %v10426_v10  ;;  %v3167_v41 = vperm.slane %v8152_v63, %v10426_v10  ;;  %v3197_v63 = vperm.slane %v8362_v17, %v10426_v10 }
 0x3cc   :  { %v3198_v17 = vperm.slane %v8343_v43, %v10426_v10  ;;  %v3170_v49 = vperm.slane %v8173_v2, %v10426_v10  ;;  %v3169_v13 = vperm.slane %v8108_v59, %v10426_v10  ;;  %v3200_v43 = vperm.slane %v8383_v54, %v10426_v10 }
 0x3cd   :  { %v3345_v62 = vsel %vm1795_vm1, %v3228_v61, %v3227_v11  ;;  %v3290_v7 = vsel %vm1797_vm2, %v3165_v0, %v3289_v18  ;;  %v3219_v2 = vperm.slane %v8481_v52, %v10426_v10  ;;  %v3199_v53 = vperm.slane %v8318_v34, %v10426_v10 }
 0x3ce   :  { %v3346_v3 = vsel %vm1797_vm2, %v3229_v31, %v3345_v62  ;;  %v8621_v45 = vpop.eup %6148  ;;  %v3220_v0 = vperm.slane %v8461_v19, %v10426_v10  ;;  %v3201_v54 = vperm.slane %v8364_v44, %v10426_v10  ;;  %v10433_v19 = vld [vmem:[#allocation49_spill] sm:$0xff] }
 0x3cf   :  { %v3017_v8 = vpop.permute.xlu1 %3016  ;;  %3407 = vadd.xlane.f32.xlu1 %v3406_v60 }
 0x3d0   :  { %v8597_v23 = vpop.permute.xlu0 %3028  ;;  %3112 = vperm.xlu2 %5645, %v8592_v25   ;;  %v3231_v60 = vperm.slane %v3017_v8, %v10426_v10  ;;  %v3424_v8 = vsel %vm1930_vm8, %v3330_v30, 0.0  ;;  %v3338_v34 = vsel %vm1795_vm1, %v3220_v0, %v3219_v2  ;;  %v3173_v2 = vperm.slane %v8194_v15, %v10426_v10  ;;  %v10440_v0 = vld [vmem:[#allocation55_spill] sm:$0xff] }
 0x3d2   :  { %v3014_v14 = vpop.permute.xlu2 %3013 }
 0x3d3   :  { %v3230_v51 = vperm.slane %v3014_v14, %v10426_v10  ;;  %v3317_v14 = vsel %vm1795_vm1, %v3196_v47, %v3195_v32  ;;  %v3223_v32 = vperm.slane %v8477_v12, %v10426_v10 }
 0x3d5   :  { %v3347_v27 = vsel %vm1799_vm3, %v3230_v51, %v3346_v3 }
 0x3d6   :  { %v3348_v1 = vsel %vm1801_vm4, %v3231_v60, %v3347_v27  ;;  %v3221_v60 = vperm.slane %v8516_v9, %v10426_v10  ;;  %v3222_v9 = vperm.slane %v8497_v36, %v10426_v10 }
 0x3d7   :  { %v3026_v37 = vpop.permute.xlu1 %3025  ;;  %3416 = vadd.xlane.f32.xlu1 %v3415_v26  ;;  %v3349_v57 = vsel %vm1803_vm5, %v3232_v40, %v3348_v1  ;;  %v3291_v26 = vsel %vm1799_vm3, %v3166_v48, %v3290_v7  ;;  %v10434_v40 = vld [vmem:[#allocation32_spill] sm:$0xff]  ;;  %v3224_v48 = vperm.slane %v8550_v28, %v10426_v10 }
 0x3d8   :  { %3121 = vperm.xlu2 %5645, %v8621_v45   ;;  %v8626_v50 = vpop.permute.xlu0 %3037  ;;  %v3234_v56 = vperm.slane %v3026_v37, %v10426_v10  ;;  %v3292_v62 = vsel %vm1801_vm4, %v3167_v41, %v3291_v26  ;;  %v3318_v37 = vsel %vm1797_vm2, %v3197_v63, %v3317_v14  ;;  %v3339_v18 = vsel %vm1797_vm2, %v3221_v60, %v3338_v34  ;;  %v10435_v63 = vld [vmem:[#allocation36_spill] sm:$0xff] }
 0x3d9   :  { %v3293_v33 = vsel %vm1803_vm5, %v3168_v22, %v3292_v62  ;;  %v3319_v21 = vsel %vm1799_vm3, %v3198_v17, %v3318_v37  ;;  %v3340_v36 = vsel %vm1799_vm3, %v3222_v9, %v3339_v18  ;;  %v3225_v22 = vperm.slane %v8518_v16, %v10426_v10  ;;  %v10441_v18 = vld [vmem:[#allocation52_spill] sm:$0xff] }
 0x3da   :  { %v3023_v61 = vpop.permute.xlu2 %3022  ;;  %v3294_v3 = vsel %vm1805_vm6, %v3169_v13, %v3293_v33  ;;  %v3320_v52 = vsel %vm1801_vm4, %v3199_v53, %v3319_v21  ;;  %v3341_v26 = vsel %vm1801_vm4, %v3223_v32, %v3340_v36  ;;  %v10438_v33 = vld [vmem:[#allocation42_spill] sm:$0xff]  ;;  %v3171_v21 = vperm.slane %v8154_v6, %v10426_v10  ;;  %v10444_v32 = vld [vmem:[#allocation57_spill] sm:$0xff] }
 0x3db   :  { %v3233_v4 = vperm.slane %v3023_v61, %v10426_v10  ;;  %v3295_v27 = vsel %vm1807_vm7, %v3170_v49, %v3294_v3  ;;  %v3321_v30 = vsel %vm1803_vm5, %v3200_v43, %v3320_v52  ;;  %v3202_v61 = vperm.slane %v8339_v46, %v10426_v10  ;;  %v10439_v53 = vld [vmem:[#allocation54_spill] sm:$0xff] }
 0x3dc   :  { %v3409_v1 = vsel %vm1930_vm8, %v3295_v27, 0.0  ;;  %v3322_v41 = vsel %vm1805_vm6, %v3201_v54, %v3321_v30  ;;  %v3342_v28 = vsel %vm1803_vm5, %v3224_v48, %v3341_v26  ;;  %v3152_v13 = vperm.slane %v10438_v33, %v10426_v10 }
 0x3dd   :  { %v3350_v55 = vsel %vm1805_vm6, %v3233_v4, %v3349_v57  ;;  %v3323_v4 = vsel %vm1807_vm7, %v3202_v61, %v3322_v41  ;;  %v3149_v57 = vperm.slane %v10435_v63, %v10426_v10  ;;  %v3343_v49 = vsel %vm1805_vm6, %v3225_v22, %v3342_v28  ;;  %v10443_v61 = vld [vmem:[#allocation137_spill] sm:$0xff]  ;;  %v10447_v28 = vld [vmem:[#allocation63_spill] sm:$0xff] }
 0x3de   :  { %v3351_v24 = vsel %vm1807_vm7, %v3234_v56, %v3350_v55  ;;  %v3147_v56 = vperm.slane %v10434_v40, %v10426_v10  ;;  %v10436_v55 = vld [vmem:[#allocation39_spill] sm:$0xff]  ;;  %v3421_v12 = vsel %vm1930_vm8, %v3323_v4, 0.0  ;;  %v3226_v43 = vperm.slane %v8493_v20, %v10426_v10  ;;  %v10445_v63 = vld [vmem:[#allocation141_spill] sm:$0xff] }
 0x3df   :  { %v8635_v11 = vpop.permute.xlu1 %3034  ;;  %3425 = vadd.xlane.f32.xlu1 %v3424_v8  ;;  %v3433_v39 = vsel %vm1930_vm8, %v3351_v24, 0.0  ;;  %v3148_v8 = vperm.slane %v10433_v19, %v10426_v10  ;;  %v3150_v62 = vperm.slane %v10436_v55, %v10426_v10  ;;  %v10437_v24 = vld [vmem:[#allocation47_spill] sm:$0xff]  ;;  %v3172_v60 = vperm.slane %v10439_v53, %v10426_v10  ;;  %v10442_v19 = vld [vmem:[#allocation72_spill] sm:$0xff]  ;;  %v10446_v22 = vld [vmem:[#allocation149_spill] sm:$0xff] }
 0x3e0   :  { %v8676_v59 = vpop.permute.xlu0 %3046  ;;  %v3151_v14 = vperm.slane %v10437_v24, %v10426_v10  ;;  %v3344_v3 = vsel %vm1807_vm7, %v3226_v43, %v3343_v49  ;;  %v3153_v27 = vperm.slane %v10440_v0, %v10426_v10  ;;  %v3174_v20 = vperm.slane %v8175_v42, %v10426_v10 }
 0x3e1   :  { %v3275_v46 = vsel %vm1795_vm1, %v3148_v8, %v3147_v56  ;;  %v3296_v6 = vsel %vm1795_vm1, %v3172_v60, %v3171_v21  ;;  %v3430_v34 = vsel %vm1930_vm8, %v3344_v3, 0.0  ;;  %v3188_v8 = vperm.slane %v10442_v19, %v10426_v10  ;;  %v10449_v21 = vld [vmem:[#allocation37_spill] sm:$0xff] }
 0x3e2   :  { %v8663_v31 = vpop.permute.xlu2 %3031  ;;  %v3276_v17 = vsel %vm1797_vm2, %v3149_v57, %v3275_v46  ;;  %v3297_v30 = vsel %vm1797_vm2, %v3173_v2, %v3296_v6  ;;  %v3176_v36 = vperm.slane %v10443_v61, %v10426_v10  ;;  %v3175_v4 = vperm.slane %v10444_v32, %v10426_v10 }
 0x3e3   :  { %v3298_v42 = vsel %vm1799_vm3, %v3174_v20, %v3297_v30  ;;  %v3187_v57 = vperm.slane %v10445_v63, %v10426_v10  ;;  %v3189_v26 = vperm.slane %v10446_v22, %v10426_v10  ;;  %v3191_v43 = vperm.slane %v10449_v21, %v10426_v10  ;;  %v10455_v63 = vld [vmem:[#allocation160_spill] sm:$0xff] }
 0x3e5   :  { %v3310_v24 = vsel %vm1795_vm1, %v3188_v8, %v3187_v57  ;;  %v3194_v57 = vperm.slane %v10455_v63, %v10426_v10 }
 0x3e7   :  { %v8665_v51 = vpop.permute.xlu1 %3043  ;;  %3434 = vadd.xlane.f32.xlu1 %v3433_v39  ;;  %v3277_v39 = vsel %vm1799_vm3, %v3150_v62, %v3276_v17 }
 0x3e8   :  { %v3056_v47 = vpop.permute.xlu0 %3055  ;;  %v3278_v54 = vsel %vm1801_vm4, %v3151_v14, %v3277_v39  ;;  %v10448_v39 = vld [vmem:[#allocation70_spill] sm:$0xff] }
 0x3e9   :  { %v3279_v52 = vsel %vm1803_vm5, %v3152_v13, %v3278_v54  ;;  %v3244_v48 = vperm.slane %v3056_v47, %v10426_v10  ;;  %v3177_v47 = vperm.slane %v10447_v28, %v10426_v10  ;;  %v3190_v33 = vperm.slane %v10448_v39, %v10426_v10 }
 0x3ea   :  { %v8693_v7 = vpop.permute.xlu2 %3040  ;;  %v3280_v41 = vsel %vm1805_vm6, %v3153_v27, %v3279_v52  ;;  %v3311_v13 = vsel %vm1797_vm2, %v3189_v26, %v3310_v24  ;;  %v10450_v27 = vld [vmem:[#allocation130_spill] sm:$0xff]  ;;  %v10451_v52 = vld [vmem:[#allocation92_spill] sm:$0xff]  ;;  %v3236_v24 = vperm.slane %v8663_v31, %v10426_v10 }
 0x3eb   :  { %v3178_v54 = vperm.slane %v10450_v27, %v10426_v10  ;;  %v3212_v6 = vperm.slane %v10451_v52, %v10426_v10  ;;  %v10456_v26 = vld [vmem:[#allocation148_spill] sm:$0xff] }
 0x3ef   :  { %v3053_v44 = vpop.permute.xlu1 %3052 }
 0x3f0   :  { %3410 = vadd.xlane.f32.xlu0 %v3409_v1  ;;  %v3065_v15 = vpop.permute.xlu0 %3064  ;;  %v3243_v9 = vperm.slane %v3053_v44, %v10426_v10  ;;  %v3154_v1 = vperm.slane %v10441_v18, %v10426_v10 }
 0x3f1   :  { %v3247_v2 = vperm.slane %v3065_v15, %v10426_v10  ;;  %v3312_v15 = vsel %vm1799_vm3, %v3190_v33, %v3311_v13  ;;  %v3235_v33 = vperm.slane %v8597_v23, %v10426_v10  ;;  %v3218_v23 = vperm.slane %v8495_v38, %v10426_v10 }
 0x3f2   :  { %v8719_v37 = vpop.permute.xlu2 %3049  ;;  %v3359_v46 = vsel %vm1795_vm1, %v3244_v48, %v3243_v9  ;;  %v3281_v55 = vsel %vm1807_vm7, %v3154_v1, %v3280_v41  ;;  %v10453_v1 = vld [vmem:[#allocation67_spill] sm:$0xff] }
 0x3f3   :  { %v3403_v49 = vsel %vm1930_vm8, %v3281_v55, 0.0  ;;  %v3211_v19 = vperm.slane %v10453_v1, %v10426_v10 }
 0x3f5   :  { %v3331_v48 = vsel %vm1795_vm1, %v3212_v6, %v3211_v19 }
 0x3f7   :  { %v3062_v16 = vpop.permute.xlu1 %3061 }
 0x3f8   :  { %3422 = vadd.xlane.f32.xlu0 %v3421_v12  ;;  %v3246_v62 = vperm.slane %v3062_v16, %v10426_v10  ;;  %v3299_v12 = vsel %vm1801_vm4, %v3175_v4, %v3298_v42  ;;  %v3074_v53 = vpop.permute.xlu0 %3073  ;;  %v10454_v42 = vld [vmem:[#allocation62_spill] sm:$0xff] }
 0x3f9   :  { %v3300_v17 = vsel %vm1803_vm5, %v3176_v36, %v3299_v12  ;;  %v3250_v8 = vperm.slane %v3074_v53, %v10426_v10  ;;  %v3213_v61 = vperm.slane %v10454_v42, %v10426_v10  ;;  %v3352_v53 = vsel %vm1795_vm1, %v3236_v24, %v3235_v33  ;;  %v10463_v33 = vld [vmem:[#allocation90_spill] sm:$0xff] }
 0x3fa   :  { %v3059_v40 = vpop.permute.xlu2 %3058  ;;  %v3301_v60 = vsel %vm1805_vm6, %v3177_v47, %v3300_v17  ;;  %v10457_v47 = vld [vmem:[#allocation60_spill] sm:$0xff]  ;;  %v10458_v17 = vld [vmem:[#allocation74_spill] sm:$0xff] }
 0x3fb   :  { %v3245_v44 = vperm.slane %v3059_v40, %v10426_v10  ;;  %v3302_v41 = vsel %vm1807_vm7, %v3178_v54, %v3301_v60  ;;  %v3332_v55 = vsel %vm1797_vm2, %v3213_v61, %v3331_v48  ;;  %v3214_v12 = vperm.slane %v10457_v47, %v10426_v10 }
 0x3fc   :  { %v3412_v32 = vsel %vm1930_vm8, %v3302_v41, 0.0  ;;  %v3241_v61 = vperm.slane %v8676_v59, %v10426_v10 }
 0x3fd   :  { %v3360_v14 = vsel %vm1797_vm2, %v3245_v44, %v3359_v46  ;;  %v3193_v46 = vperm.slane %v10456_v26, %v10426_v10  ;;  %v3333_v39 = vsel %vm1799_vm3, %v3214_v12, %v3332_v55  ;;  %v10460_v55 = vld [vmem:[#allocation84_spill] sm:$0xff]  ;;  %v10461_v12 = vld [vmem:[#allocation87_spill] sm:$0xff] }
 0x3fe   :  { %v3361_v16 = vsel %vm1799_vm3, %v3246_v62, %v3360_v14  ;;  %v3215_v62 = vperm.slane %v8479_v35, %v10426_v10 }
 0x3ff   :  { %v3071_v56 = vpop.permute.xlu1 %3070  ;;  %v3362_v18 = vsel %vm1801_vm4, %v3247_v2, %v3361_v16 }
 0x400   :  { %3431 = vadd.xlane.f32.xlu0 %v3430_v34  ;;  %v3249_v3 = vperm.slane %v3071_v56, %v10426_v10  ;;  %v10452_v34 = vld [vmem:[#allocation153_spill] sm:$0xff]  ;;  %v3313_v56 = vsel %vm1801_vm4, %v3191_v43, %v3312_v15  ;;  %v3083_v13 = vpop.permute.xlu0 %3082  ;;  %v3334_v21 = vsel %vm1801_vm4, %v3215_v62, %v3333_v39  ;;  %v3237_v43 = vperm.slane %v8635_v11, %v10426_v10 }
 0x401   :  { %3404 = vadd.xlane.f32.xlu2 %v3403_v49  ;;  %v3192_v9 = vperm.slane %v10452_v34, %v10426_v10  ;;  %v3216_v49 = vperm.slane %v10458_v17, %v10426_v10  ;;  %v3239_v11 = vperm.slane %v8693_v7, %v10426_v10  ;;  %v3240_v34 = vperm.slane %v8665_v51, %v10426_v10  ;;  %v10462_v17 = vld [vmem:[#allocation34_spill] sm:$0xff] }
 0x402   :  { %v3068_v0 = vpop.permute.xlu2 %3067  ;;  %v3353_v54 = vsel %vm1797_vm2, %v3237_v43, %v3352_v53  ;;  %v3242_v51 = vperm.slane %v8719_v37, %v10426_v10 }
 0x403   :  { %v3248_v20 = vperm.slane %v3068_v0, %v10426_v10  ;;  %v3314_v22 = vsel %vm1803_vm5, %v3192_v9, %v3313_v56  ;;  %v10459_v0 = vld [vmem:[#allocation89_spill] sm:$0xff] }
 0x404   :  { %v3315_v14 = vsel %vm1805_vm6, %v3193_v46, %v3314_v22  ;;  %v3217_v27 = vperm.slane %v10459_v0, %v10426_v10  ;;  %v2109_v46 = vperm.slane %v7946_v58, 2 }
 0x405   :  { %v3363_v40 = vsel %vm1803_vm5, %v3248_v20, %v3362_v18  ;;  %v3316_v35 = vsel %vm1807_vm7, %v3194_v57, %v3315_v14  ;;  %v3238_v20 = vperm.slane %v8626_v50, %v10426_v10 }
 0x406   :  { %v3364_v36 = vsel %vm1805_vm6, %v3249_v3, %v3363_v40  ;;  %v3418_v60 = vsel %vm1930_vm8, %v3316_v35, 0.0  ;;  %v3335_v3 = vsel %vm1803_vm5, %v3216_v49, %v3334_v21  ;;  %v2365_v62 = vsub.f32 %v10460_v55, %v2109_v46  ;;  %v10471_v55 = vld [vmem:[#allocation102_spill] sm:$0xff] }
 0x407   :  { %v3080_v30 = vpop.permute.xlu1 %3079  ;;  %v3365_v44 = vsel %vm1807_vm7, %v3250_v8, %v3364_v36  ;;  %v3336_v9 = vsel %vm1805_vm6, %v3217_v27, %v3335_v3  ;;  %v3354_v15 = vsel %vm1799_vm3, %v3238_v20, %v3353_v54  ;;  %v2115_v49 = vperm.slane %v10462_v17, 0 }
 0x408   :  { %v3439_v4 = vsel %vm1930_vm8, %v3365_v44, 0.0  ;;  %v3252_v31 = vperm.slane %v3080_v30, %v10426_v10  ;;  %v3253_v30 = vperm.slane %v3083_v13, %v10426_v10  ;;  %v3337_v18 = vsel %vm1807_vm7, %v3218_v23, %v3336_v9  ;;  %v3092_v8 = vpop.permute.xlu0 %3091 }
 0x409   :  { %3413 = vadd.xlane.f32.xlu2 %v3412_v32  ;;  %3440 = vadd.xlane.f32.xlu0 %v3439_v4  ;;  %v3355_v19 = vsel %vm1801_vm4, %v3239_v11, %v3354_v15  ;;  %v3427_v40 = vsel %vm1930_vm8, %v3337_v18, 0.0  ;;  %v3256_v36 = vperm.slane %v3092_v8, %v10426_v10  ;;  %v2607_v47 = vmul.f32 1.442695, %v2365_v62  ;;  %v10466_v18 = vld [vmem:[#allocation16_spill] sm:$0xff] }
 0x40a   :  { %v3077_v28 = vpop.permute.xlu2 %3076  ;;  %v3356_v42 = vsel %vm1803_vm5, %v3240_v34, %v3355_v19  ;;  %v2371_v13 = vsub.f32 %v10463_v33, %v2115_v49  ;;  %v2118_v35 = vperm.slane %v10462_v17, 3 }
 0x40b   :  { %v3251_v2 = vperm.slane %v3077_v28, %v10426_v10  ;;  %v3357_v4 = vsel %vm1805_vm6, %v3241_v61, %v3356_v42  ;;  %v2112_v28 = vperm.slane %v7946_v58, 5  ;;  %6150 = vpow2.f32 %v2607_v47  ;;  %v10464_v58 = vld [vmem:[#allocation93_spill] sm:$0xff] }
 0x40c   :  { %v3358_v37 = vsel %vm1807_vm7, %v3242_v51, %v3357_v4  ;;  %v2374_v43 = vsub.f32 %v10464_v58, %v2118_v35  ;;  %v10472_v35 = vld [vmem:[#allocation104_spill] sm:$0xff] }
 0x40d   :  { %v3366_v52 = vsel %vm1795_vm1, %v3252_v31, %v3251_v2  ;;  %v3436_v59 = vsel %vm1930_vm8, %v3358_v37, 0.0  ;;  %v2368_v24 = vsub.f32 %v10461_v12, %v2112_v28  ;;  %v2121_v31 = vperm.slane %v10462_v17, 6 }
 0x40e   :  { %v3367_v1 = vsel %vm1797_vm2, %v3253_v30, %v3366_v52  ;;  %v2625_v2 = vmul.f32 1.442695, %v2374_v43 }
 0x40f   :  { %v3089_v16 = vpop.permute.xlu1 %3088  ;;  %v2613_v14 = vmul.f32 1.442695, %v2368_v24 }
 0x410   :  { %v3255_v7 = vperm.slane %v3089_v16, %v10426_v10  ;;  %v2619_v16 = vmul.f32 1.442695, %v2371_v13  ;;  %v3101_v52 = vpop.permute.xlu0 %3100 }
 0x411   :  { %3419 = vadd.xlane.f32.xlu2 %v3418_v60  ;;  %v8871_v39 = vpop.eup %6150  ;;  %6152 = vpow2.f32 %v2613_v14  ;;  %v10465_v60 = vld [vmem:[#allocation96_spill] sm:$0xff]  ;;  %v3259_v14 = vperm.slane %v3101_v52, %v10426_v10 }
 0x412   :  { %v3086_v6 = vpop.permute.xlu2 %3085  ;;  %6154 = vpow2.f32 %v2619_v16  ;;  %v2377_v23 = vsub.f32 %v10465_v60, %v2121_v31 }
 0x413   :  { %v3254_v38 = vperm.slane %v3086_v6, %v10426_v10  ;;  %6156 = vpow2.f32 %v2625_v2 }
 0x414   :  { %v2631_v3 = vmul.f32 1.442695, %v2377_v23 }
 0x415   :  { %v3368_v50 = vsel %vm1799_vm3, %v3254_v38, %v3367_v1 }
 0x416   :  { %v3369_v56 = vsel %vm1801_vm4, %v3255_v7, %v3368_v50  ;;  %6158 = vpow2.f32 %v2631_v3  ;;  %v10467_v50 = vld [vmem:[#allocation19_spill] sm:$0xff] }
 0x417   :  { %v3098_v41 = vpop.permute.xlu1 %3097  ;;  %v3370_v63 = vsel %vm1803_vm5, %v3256_v36, %v3369_v56  ;;  %v8876_v21 = vpop.eup %6152  ;;  %v10468_v56 = vld [vmem:[#allocation26_spill] sm:$0xff] }
 0x418   :  { %v3258_v48 = vperm.slane %v3098_v41, %v10426_v10  ;;  %v8881_v53 = vpop.eup %6154  ;;  %v3110_v20 = vpop.permute.xlu0 %3109 }
 0x419   :  { %3428 = vadd.xlane.f32.xlu2 %v3427_v40  ;;  %v8885_v0 = vpop.eup %6156  ;;  %v3262_v43 = vperm.slane %v3110_v20, %v10426_v10 }
 0x41a   :  { %v3095_v44 = vpop.permute.xlu2 %3094 }
 0x41b   :  { %v3257_v32 = vperm.slane %v3095_v44, %v10426_v10 }
 0x41c   :  { %v8888_v27 = vpop.eup %6158 }
 0x41d   :  { %v3371_v57 = vsel %vm1805_vm6, %v3257_v32, %v3370_v63  ;;  %v10469_v32 = vld [vmem:[#allocation99_spill] sm:$0xff] }
 0x41e   :  { %v3372_v22 = vsel %vm1807_vm7, %v3258_v48, %v3371_v57 }
 0x41f   :  { %v3442_v26 = vsel %vm1930_vm8, %v3372_v22, 0.0  ;;  %v10470_v22 = vld [vmem:[#allocation20_spill] sm:$0xff] }
 0x420   :  { %3443 = vadd.xlane.f32.xlu1 %v3442_v26  ;;  %v3119_v38 = vpop.permute.xlu0 %3118 }
 0x421   :  { %3437 = vadd.xlane.f32.xlu2 %v3436_v59 }
 0x422   :  { %v3104_v54 = vpop.permute.xlu2 %3103 }
 0x423   :  { %v3260_v47 = vperm.slane %v3104_v54, %v10426_v10  ;;  %v3265_v54 = vperm.slane %v3119_v38, %v10426_v10 }
 0x425   :  { %v3373_v33 = vsel %vm1795_vm1, %v3260_v47, %v3259_v14 }
 0x428   :  { %v8897_v1 = vpop.permute.xlu0 %3127 }
 0x42a   :  { %v3113_v11 = vpop.permute.xlu2 %3112 }
 0x42b   :  { %v3263_v60 = vperm.slane %v3113_v11, %v10426_v10 }
 0x430   :  { %v8902_v51 = vpop.permute.xlu0 %3136 }
 0x432   :  { %v8891_v6 = vpop.permute.xlu2 %3121 }
 0x438   :  { %v8910_v44 = vpop.permute.xlu0 %3145 }
 0x439   :  { %3106 = vperm.xlu1 %5644, %v8871_v39  }
 0x441   :  { %3115 = vperm.xlu1 %5644, %v8876_v21  }
 0x442   :  { %v3408_v15 = vpop.xlane.xlu1 %3407 }
 0x449   :  { %3124 = vperm.xlu1 %5644, %v8881_v53  }
 0x44a   :  { %v3417_v41 = vpop.xlane.xlu1 %3416 }
 0x451   :  { %3133 = vperm.xlu1 %5644, %v8885_v0  }
 0x452   :  { %v8907_v36 = vpop.xlane.xlu1 %3425 }
 0x459   :  { %3142 = vperm.xlu1 %5644, %v8888_v27  }
 0x45a   :  { %v8914_v37 = vpop.xlane.xlu1 %3434 }
 0x463   :  { %v3411_v57 = vpop.xlane.xlu0 %3410 }
 0x474   :  { %v3405_v30 = vpop.xlane.xlu2 %3404 }
 0x475   :  { %6160 = vrcp.f32 %v3405_v30  ;;  %v3266_v30 = vperm.slane %v8891_v6, %v10426_v10  ;;  %v2117_v6 = vperm.slane %v10462_v17, 2 }
 0x476   :  { %6162 = vrcp.f32 %v3408_v15 }
 0x477   :  { %6164 = vrcp.f32 %v3411_v57 }
 0x47b   :  { %v8893_v34 = vpop.eup %6160 }
 0x47c   :  { %v3483_v9 = vperm.slane %v8893_v34, 0  ;;  %v3486_v19 = vperm.slane %v8893_v34, 3  ;;  %v3489_v40 = vperm.slane %v8893_v34, 6  ;;  %v8905_v61 = vpop.eup %6162  ;;  %v3414_v13 = vpop.xlane.xlu2 %3413 }
 0x47d   :  { %v3492_v48 = vperm.slane %v8905_v61, 1  ;;  %v3495_v63 = vperm.slane %v8905_v61, 4  ;;  %v3498_v59 = vperm.slane %v8905_v61, 7  ;;  %v8921_v28 = vpop.eup %6164  ;;  %6166 = vrcp.f32 %v3414_v13 }
 0x47e   :  { %v3739_v7 = vmul.f32 %v10466_v18, %v3483_v9  ;;  %v3742_v8 = vmul.f32 %v10467_v50, %v3486_v19  ;;  %v3745_v42 = vmul.f32 %v10468_v56, %v3489_v40  ;;  %v3501_v12 = vperm.slane %v8921_v28, 2  ;;  %v10473_v9 = vld [vmem:[#allocation105_spill] sm:$0xff]  ;;  %v10474_v50 = vld [vmem:[#allocation108_spill] sm:$0xff]  ;;  %v10475_v56 = vld [vmem:[#allocation91_spill] sm:$0xff] }
 0x47f   :  { %v3748_v4 = vmul.f32 %v10469_v32, %v3492_v48  ;;  %v3751_v26 = vmul.f32 %v10470_v22, %v3495_v63  ;;  %v3754_v62 = vmul.f32 %v10471_v55, %v3498_v59  ;;  %v3504_v2 = vperm.slane %v8921_v28, 5  ;;  %v10476_v48 = vld [vmem:[#allocation110_spill] sm:$0xff]  ;;  %v10477_v22 = vld [vmem:[#allocation95_spill] sm:$0xff]  ;;  %v10478_v59 = vld [vmem:[#allocation112_spill] sm:$0xff] }
 0x480   :  { %3876 = vperm.xlu1 %5644, %v3739_v7   ;;  %v3757_v16 = vmul.f32 %v10472_v35, %v3501_v12  ;;  %6168 = vrcp.f32 %v3417_v41  ;;  %v10480_v35 = vld [vmem:[#allocation38_spill] sm:$0xff] }
 0x481   :  { %v3760_v20 = vmul.f32 %v10473_v9, %v3504_v2  ;;  %v3488_v2 = vperm.slane %v8893_v34, 5  ;;  %v3491_v9 = vperm.slane %v8905_v61, 0 }
 0x483   :  { %v8941_v18 = vpop.eup %6166 }
 0x484   :  { %v3507_v38 = vperm.slane %v8941_v18, 0  ;;  %v3510_v40 = vperm.slane %v8941_v18, 3  ;;  %v3513_v57 = vperm.slane %v8941_v18, 6  ;;  %v3420_v13 = vpop.xlane.xlu2 %3419 }
 0x486   :  { %v3766_v32 = vmul.f32 %v10476_v48, %v3510_v40  ;;  %v3769_v55 = vmul.f32 %v10478_v59, %v3513_v57  ;;  %v10489_v57 = vld [vmem:[#allocation27_spill] sm:$0xff]  ;;  %v3500_v59 = vperm.slane %v8921_v28, 1 }
 0x488   :  { %3885 = vperm.xlu1 %5644, %v3742_v8   ;;  %v3763_v8 = vmul.f32 %v10474_v50, %v3507_v38  ;;  %v3494_v50 = vperm.slane %v8905_v61, 3 }
 0x490   :  { %3894 = vperm.xlu1 %5644, %v3745_v42   ;;  %v2373_v42 = vsub.f32 %v10475_v56, %v2117_v6  ;;  %v10487_v56 = vld [vmem:[#allocation106_spill] sm:$0xff] }
 0x492   :  { %v2623_v63 = vmul.f32 1.442695, %v2373_v42  ;;  %v3750_v42 = vmul.f32 %v10487_v56, %v3494_v50 }
 0x493   :  { %v8918_v46 = vpop.xlane.xlu1 %3443 }
 0x494   :  { %6170 = vpow2.f32 %v2623_v63 }
 0x498   :  { %3948 = vperm.xlu1 %5644, %v3748_v4   ;;  %v2120_v4 = vperm.slane %v10462_v17, 5  ;;  %v10479_v17 = vld [vmem:[#allocation35_spill] sm:$0xff] }
 0x4a0   :  { %3957 = vperm.xlu1 %5644, %v3751_v26   ;;  %v2376_v26 = vsub.f32 %v10477_v22, %v2120_v4  ;;  %v10488_v4 = vld [vmem:[#allocation119_spill] sm:$0xff] }
 0x4a2   :  { %v2629_v47 = vmul.f32 1.442695, %v2376_v26 }
 0x4a4   :  { %6172 = vpow2.f32 %v2629_v47 }
 0x4a5   :  { %6174 = vrcp.f32 %v3420_v13 }
 0x4a8   :  { %3966 = vperm.xlu1 %5644, %v3754_v62   ;;  %v8956_v62 = vpop.eup %6168 }
 0x4a9   :  { %v8958_v12 = vpop.eup %6170 }
 0x4aa   :  { %v8963_v14 = vpop.eup %6172 }
 0x4ab   :  { %v3107_v24 = vpop.permute.xlu1 %3106 }
 0x4ac   :  { %v3261_v49 = vperm.slane %v3107_v24, %v10426_v10  ;;  %v3516_v24 = vperm.slane %v8956_v62, 1 }
 0x4ae   :  { %v3374_v58 = vsel %vm1797_vm2, %v3261_v49, %v3373_v33  ;;  %v3772_v41 = vmul.f32 %v10479_v17, %v3516_v24  ;;  %v3519_v49 = vperm.slane %v8956_v62, 4  ;;  %v3484_v33 = vperm.slane %v8893_v34, 1  ;;  %v10491_v24 = vld [vmem:[#allocation33_spill] sm:$0xff] }
 0x4af   :  { %v3375_v31 = vsel %vm1799_vm3, %v3262_v43, %v3374_v58  ;;  %v10481_v58 = vld [vmem:[#allocation18_spill] sm:$0xff]  ;;  %v3756_v17 = vmul.f32 %v10491_v24, %v3500_v59  ;;  %v10501_v59 = vld [vmem:[#allocation115_spill] sm:$0xff] }
 0x4b0   :  { %4020 = vperm.xlu1 %5644, %v3757_v16   ;;  %v3376_v52 = vsel %vm1801_vm4, %v3263_v60, %v3375_v31  ;;  %v3775_v16 = vmul.f32 %v10480_v35, %v3519_v49  ;;  %v3740_v43 = vmul.f32 %v10481_v58, %v3484_v33  ;;  %v3522_v31 = vperm.slane %v8956_v62, 7  ;;  %v10482_v60 = vld [vmem:[#allocation41_spill] sm:$0xff]  ;;  %v10492_v33 = vld [vmem:[#allocation122_spill] sm:$0xff] }
 0x4b1   :  { %v3503_v49 = vperm.slane %v8921_v28, 4 }
 0x4b3   :  { %v3116_v23 = vpop.permute.xlu1 %3115 }
 0x4b4   :  { %v3264_v3 = vperm.slane %v3116_v23, %v10426_v10  ;;  %v3778_v23 = vmul.f32 %v10482_v60, %v3522_v31  ;;  %v3506_v31 = vperm.slane %v8921_v28, 7 }
 0x4b6   :  { %v3377_v15 = vsel %vm1803_vm5, %v3264_v3, %v3376_v52  ;;  %v8973_v3 = vpop.eup %6174 }
 0x4b7   :  { %v3378_v7 = vsel %vm1805_vm6, %v3265_v54, %v3377_v15  ;;  %v10483_v54 = vld [vmem:[#allocation22_spill] sm:$0xff]  ;;  %v3528_v38 = vperm.slane %v8973_v3, 5 }
 0x4b8   :  { %4029 = vperm.xlu1 %5644, %v3760_v20   ;;  %v3379_v11 = vsel %vm1807_vm7, %v3266_v30, %v3378_v7  ;;  %v3744_v52 = vmul.f32 %v10483_v54, %v3488_v2  ;;  %v3525_v30 = vperm.slane %v8973_v3, 2  ;;  %v3423_v20 = vpop.xlane.xlu0 %3422  ;;  %v10484_v15 = vld [vmem:[#allocation114_spill] sm:$0xff]  ;;  %v10494_v2 = vld [vmem:[#allocation59_spill] sm:$0xff] }
 0x4b9   :  { %v3445_v19 = vsel %vm1930_vm8, %v3379_v11, 0.0  ;;  %v10485_v11 = vld [vmem:[#allocation25_spill] sm:$0xff]  ;;  %6176 = vrcp.f32 %v3423_v20  ;;  %v10496_v20 = vld [vmem:[#allocation124_spill] sm:$0xff] }
 0x4ba   :  { %3446 = vadd.xlane.f32.xlu2 %v3445_v19  ;;  %v3781_v7 = vmul.f32 %v10484_v15, %v3525_v30  ;;  %v3747_v19 = vmul.f32 %v10485_v11, %v3491_v9  ;;  %6178 = vrcp.f32 %v8907_v36  ;;  %v10495_v36 = vld [vmem:[#allocation30_spill] sm:$0xff]  ;;  %v3509_v30 = vperm.slane %v8941_v18, 2 }
 0x4bf   :  { %v8983_v40 = vpop.eup %6176 }
 0x4c0   :  { %4083 = vperm.xlu1 %5644, %v3763_v8   ;;  %v10486_v8 = vld [vmem:[#allocation117_spill] sm:$0xff]  ;;  %v3531_v48 = vperm.slane %v8983_v40, 0  ;;  %v3534_v26 = vperm.slane %v8983_v40, 3  ;;  %v8998_v35 = vpop.eup %6178  ;;  %v3432_v9 = vpop.xlane.xlu0 %3431 }
 0x4c1   :  { %v3784_v6 = vmul.f32 %v10486_v8, %v3528_v38  ;;  %v3543_v54 = vperm.slane %v8998_v35, 4  ;;  %6180 = vrcp.f32 %v3432_v9  ;;  %v3512_v38 = vperm.slane %v8941_v18, 5  ;;  %v10498_v8 = vld [vmem:[#allocation125_spill] sm:$0xff] }
 0x4c2   :  { %v3787_v63 = vmul.f32 %v10488_v4, %v3531_v48  ;;  %v10499_v48 = vld [vmem:[#allocation44_spill] sm:$0xff]  ;;  %v3271_v9 = vperm.slane %v8902_v51, %v10426_v10 }
 0x4c3   :  { %v3799_v15 = vmul.f32 %v10496_v20, %v3543_v54 }
 0x4c7   :  { %v9014_v56 = vpop.eup %6180 }
 0x4c8   :  { %4092 = vperm.xlu1 %5644, %v3766_v32   ;;  %v3497_v32 = vperm.slane %v8905_v61, 6  ;;  %v3555_v4 = vperm.slane %v9014_v56, 0  ;;  %v3557_v24 = vperm.slane %v9014_v56, 2  ;;  %v3560_v51 = vperm.slane %v9014_v56, 5 }
 0x4ca   :  { %v3753_v22 = vmul.f32 %v10489_v57, %v3497_v32  ;;  %v3768_v32 = vmul.f32 %v10499_v48, %v3512_v38 }
 0x4d0   :  { %4101 = vperm.xlu1 %5644, %v3769_v55   ;;  %v10490_v55 = vld [vmem:[#allocation120_spill] sm:$0xff] }
 0x4d1   :  { %v3790_v47 = vmul.f32 %v10490_v55, %v3534_v26 }
 0x4d2   :  { %3130 = vperm.xlu2 %5645, %v8958_v12  }
 0x4d8   :  { %4155 = vperm.xlu1 %5644, %v3772_v41   ;;  %v3537_v41 = vperm.slane %v8983_v40, 6 }
 0x4da   :  { %3139 = vperm.xlu2 %5645, %v8963_v14   ;;  %v3793_v13 = vmul.f32 %v10492_v33, %v3537_v41  ;;  %v3518_v41 = vperm.slane %v8956_v62, 3  ;;  %v3268_v33 = vperm.slane %v8897_v1, %v10426_v10 }
 0x4e0   :  { %4164 = vperm.xlu1 %5644, %v3775_v16   ;;  %v10493_v16 = vld [vmem:[#allocation28_spill] sm:$0xff] }
 0x4e1   :  { %v3759_v58 = vmul.f32 %v10493_v16, %v3503_v49 }
 0x4e2   :  { %3879 = vperm.xlu2 %5645, %v3740_v43   ;;  %v3540_v43 = vperm.slane %v8998_v35, 1 }
 0x4e4   :  { %v3796_v60 = vmul.f32 %v10494_v2, %v3540_v43  ;;  %v10503_v2 = vld [vmem:[#allocation50_spill] sm:$0xff] }
 0x4e8   :  { %4173 = vperm.xlu1 %5644, %v3778_v23   ;;  %v3762_v23 = vmul.f32 %v10495_v36, %v3506_v31 }
 0x4ea   :  { %3891 = vperm.xlu2 %5645, %v3744_v52   ;;  %v3429_v52 = vpop.xlane.xlu2 %3428 }
 0x4eb   :  { %6182 = vrcp.f32 %v3429_v52 }
 0x4ec   :  { %6184 = vrcp.f32 %v8914_v37  ;;  %v10510_v37 = vld [vmem:[#allocation144_spill] sm:$0xff] }
 0x4f0   :  { %4227 = vperm.xlu1 %5644, %v3781_v7   ;;  %v10497_v7 = vld [vmem:[#allocation31_spill] sm:$0xff] }
 0x4f1   :  { %v3765_v11 = vmul.f32 %v10497_v7, %v3509_v30  ;;  %v9030_v43 = vpop.eup %6182  ;;  %v3521_v30 = vperm.slane %v8956_v62, 6 }
 0x4f2   :  { %3945 = vperm.xlu2 %5645, %v3747_v19   ;;  %v3546_v19 = vperm.slane %v8998_v35, 7  ;;  %v9011_v50 = vpop.xlane.xlu2 %3437  ;;  %v3551_v54 = vperm.slane %v9030_v43, 4 }
 0x4f3   :  { %6186 = vrcp.f32 %v9011_v50  ;;  %v3493_v50 = vperm.slane %v8905_v61, 2 }
 0x4f8   :  { %4236 = vperm.xlu1 %5644, %v3784_v6   ;;  %v3802_v6 = vmul.f32 %v10498_v8, %v3546_v19  ;;  %v3274_v8 = vperm.slane %v8910_v44, %v10426_v10  ;;  %v10507_v44 = vld [vmem:[#allocation56_spill] sm:$0xff] }
 0x4fa   :  { %3954 = vperm.xlu2 %5645, %v3750_v42   ;;  %v3125_v42 = vpop.permute.xlu1 %3124 }
 0x500   :  { %4290 = vperm.xlu1 %5644, %v3787_v63   ;;  %v3515_v63 = vperm.slane %v8956_v62, 0 }
 0x502   :  { %3963 = vperm.xlu2 %5645, %v3753_v22   ;;  %v10500_v22 = vld [vmem:[#allocation133_spill] sm:$0xff]  ;;  %v3771_v55 = vmul.f32 %v10501_v59, %v3515_v63 }
 0x503   :  { %v3811_v26 = vmul.f32 %v10500_v22, %v3555_v4  ;;  %v3524_v22 = vperm.slane %v8973_v3, 1 }
 0x508   :  { %4299 = vperm.xlu1 %5644, %v3790_v47   ;;  %v3134_v47 = vpop.permute.xlu1 %3133 }
 0x50a   :  { %4017 = vperm.xlu2 %5645, %v3756_v17   ;;  %v3267_v17 = vperm.slane %v3125_v42, %v10426_v10  ;;  %v10505_v42 = vld [vmem:[#allocation58_spill] sm:$0xff] }
 0x50b   :  { %v3777_v48 = vmul.f32 %v10505_v42, %v3521_v30  ;;  %v3533_v30 = vperm.slane %v8983_v40, 2  ;;  %v10516_v42 = vld [vmem:[#allocation152_spill] sm:$0xff] }
 0x50c   :  { %v3380_v31 = vsel %vm1795_vm1, %v3268_v33, %v3267_v17  ;;  %v10508_v17 = vld [vmem:[#allocation145_spill] sm:$0xff] }
 0x50d   :  { %v10509_v33 = vld [vmem:[#allocation45_spill] sm:$0xff] }
 0x510   :  { %4308 = vperm.xlu1 %5644, %v3793_v13   ;;  %v10502_v13 = vld [vmem:[#allocation150_spill] sm:$0xff]  ;;  %v3143_v52 = vpop.permute.xlu1 %3142 }
 0x511   :  { %v3813_v16 = vmul.f32 %v10502_v13, %v3557_v24  ;;  %v3273_v19 = vperm.slane %v3143_v52, %v10426_v10  ;;  %v3527_v24 = vperm.slane %v8973_v3, 4 }
 0x512   :  { %4026 = vperm.xlu2 %5645, %v3759_v58  }
 0x513   :  { %v3783_v13 = vmul.f32 %v10509_v33, %v3527_v24 }
 0x518   :  { %4362 = vperm.xlu1 %5644, %v3796_v60   ;;  %v3774_v60 = vmul.f32 %v10503_v2, %v3518_v41 }
 0x51a   :  { %4035 = vperm.xlu2 %5645, %v3762_v23   ;;  %v3270_v23 = vperm.slane %v3134_v47, %v10426_v10  ;;  %v3554_v47 = vperm.slane %v9030_v43, 7 }
 0x51c   :  { %v3810_v41 = vmul.f32 %v10508_v17, %v3554_v47  ;;  %v10520_v47 = vld [vmem:[#allocation24_spill] sm:$0xff]  ;;  %v10521_v17 = vld [vmem:[#allocation69_spill] sm:$0xff] }
 0x51d   :  { %v3749_v24 = vmul.f32 %v10520_v47, %v3493_v50 }
 0x520   :  { %4371 = vperm.xlu1 %5644, %v3799_v15   ;;  %v10504_v15 = vld [vmem:[#allocation142_spill] sm:$0xff] }
 0x521   :  { %v3807_v7 = vmul.f32 %v10504_v15, %v3551_v54  ;;  %v10514_v15 = vld [vmem:[#allocation23_spill] sm:$0xff] }
 0x522   :  { %4089 = vperm.xlu2 %5645, %v3765_v11  }
 0x528   :  { %4380 = vperm.xlu1 %5644, %v3802_v6  }
 0x52a   :  { %4098 = vperm.xlu2 %5645, %v3768_v32  }
 0x52d   :  { %v9019_v57 = vpop.xlane.xlu2 %3446 }
 0x530   :  { %4497 = vperm.xlu1 %5644, %v3811_v26   ;;  %v10506_v26 = vld [vmem:[#allocation154_spill] sm:$0xff] }
 0x531   :  { %v3816_v59 = vmul.f32 %v10506_v26, %v3560_v51 }
 0x532   :  { %4152 = vperm.xlu2 %5645, %v3771_v55   ;;  %v3780_v55 = vmul.f32 %v10507_v44, %v3524_v22  ;;  %v10519_v44 = vld [vmem:[#allocation156_spill] sm:$0xff] }
 0x535   :  { %v3131_v49 = vpop.permute.xlu2 %3130 }
 0x536   :  { %v3269_v58 = vperm.slane %v3131_v49, %v10426_v10  ;;  %v9060_v49 = vpop.eup %6184 }
 0x537   :  { %v3567_v52 = vperm.slane %v9060_v49, 4 }
 0x538   :  { %4503 = vperm.xlu1 %5644, %v3813_v16   ;;  %v3381_v36 = vsel %vm1797_vm2, %v3269_v58, %v3380_v31  ;;  %v3564_v16 = vperm.slane %v9060_v49, 1  ;;  %v3485_v58 = vperm.slane %v8893_v34, 2  ;;  %v3530_v31 = vperm.slane %v8973_v3, 7 }
 0x539   :  { %v3382_v1 = vsel %vm1799_vm3, %v3270_v23, %v3381_v36  ;;  %v10512_v23 = vld [vmem:[#allocation48_spill] sm:$0xff] }
 0x53a   :  { %4161 = vperm.xlu2 %5645, %v3774_v60   ;;  %v3383_v38 = vsel %vm1801_vm4, %v3271_v9, %v3382_v1  ;;  %v3820_v2 = vmul.f32 %v10510_v37, %v3564_v16  ;;  %v10511_v60 = vld [vmem:[#allocation100_spill] sm:$0xff]  ;;  %v3786_v54 = vmul.f32 %v10512_v23, %v3530_v31  ;;  %v3487_v1 = vperm.slane %v8893_v34, 4  ;;  %v10513_v9 = vld [vmem:[#allocation147_spill] sm:$0xff] }
 0x53b   :  { %v3741_v36 = vmul.f32 %v10511_v60, %v3485_v58  ;;  %v3542_v16 = vperm.slane %v8998_v35, 3  ;;  %v9093_v58 = vpop.permute.xlu1 %3876  ;;  %v10522_v31 = vld [vmem:[#allocation159_spill] sm:$0xff] }
 0x53c   :  { %v10524_v23 = vld [vmem:[#allocation131_spill] sm:$0xff] }
 0x53d   :  { %v3140_v20 = vpop.permute.xlu2 %3139 }
 0x53e   :  { %v3272_v11 = vperm.slane %v3140_v20, %v10426_v10  ;;  %v3823_v20 = vmul.f32 %v10513_v9, %v3567_v52  ;;  %v10525_v9 = vld [vmem:[#allocation163_spill] sm:$0xff] }
 0x540   :  { %4440 = vperm.xlu1 %5644, %v3807_v7   ;;  %v3384_v6 = vsel %vm1803_vm5, %v3272_v11, %v3383_v38  ;;  %v3743_v7 = vmul.f32 %v10514_v15, %v3487_v1  ;;  %v10515_v11 = vld [vmem:[#allocation51_spill] sm:$0xff]  ;;  %v3570_v38 = vperm.slane %v9060_v49, 7  ;;  %v10526_v15 = vld [vmem:[#allocation17_spill] sm:$0xff] }
 0x541   :  { %v3385_v32 = vsel %vm1805_vm6, %v3273_v19, %v3384_v6  ;;  %v3789_v19 = vmul.f32 %v10515_v11, %v3533_v30  ;;  %v3536_v6 = vperm.slane %v8983_v40, 5  ;;  %v3545_v30 = vperm.slane %v8998_v35, 6 }
 0x542   :  { %4170 = vperm.xlu2 %5645, %v3777_v48   ;;  %v3386_v4 = vsel %vm1807_vm7, %v3274_v8, %v3385_v32  ;;  %v3490_v8 = vperm.slane %v8893_v34, 7  ;;  %v3826_v48 = vmul.f32 %v10516_v42, %v3570_v38  ;;  %v10517_v32 = vld [vmem:[#allocation21_spill] sm:$0xff]  ;;  %v3441_v34 = vpop.xlane.xlu0 %3440 }
 0x543   :  { %v3448_v63 = vsel %vm1930_vm8, %v3386_v4, 0.0  ;;  %v9081_v4 = vpop.eup %6186  ;;  %6188 = vrcp.f32 %v3441_v34  ;;  %v9107_v11 = vpop.permute.xlu1 %3885 }
 0x544   :  { %3449 = vadd.xlane.f32.xlu0 %v3448_v63  ;;  %v3746_v51 = vmul.f32 %v10517_v32, %v3490_v8  ;;  %v10518_v63 = vld [vmem:[#allocation71_spill] sm:$0xff]  ;;  %v3573_v26 = vperm.slane %v9081_v4, 2  ;;  %v3576_v33 = vperm.slane %v9081_v4, 5  ;;  %v10528_v32 = vld [vmem:[#allocation73_spill] sm:$0xff]  ;;  %6190 = vrcp.f32 %v8918_v46 }
 0x545   :  { %v3792_v22 = vmul.f32 %v10518_v63, %v3536_v6  ;;  %v9100_v52 = vpop.permute.xlu2 %3879  ;;  %v3502_v6 = vperm.slane %v8921_v28, 3  ;;  %v10529_v63 = vld [vmem:[#allocation101_spill] sm:$0xff]  ;;  %v10533_v46 = vld [vmem:[#allocation127_spill] sm:$0xff]  ;;  %6192 = vrcp.f32 %v9019_v57  ;;  %v10542_v57 = vld [vmem:[#allocation140_spill] sm:$0xff] }
 0x546   :  { %v3832_v37 = vmul.f32 %v10522_v31, %v3576_v33 }
 0x548   :  { %4512 = vperm.xlu1 %5644, %v3816_v59   ;;  %v3539_v59 = vperm.slane %v8998_v35, 0 }
 0x54a   :  { %4224 = vperm.xlu2 %5645, %v3780_v55   ;;  %v3829_v55 = vmul.f32 %v10519_v44, %v3573_v26  ;;  %v10530_v26 = vld [vmem:[#allocation138_spill] sm:$0xff]  ;;  %v3505_v44 = vperm.slane %v8921_v28, 6 }
 0x54d   :  { %v9112_v42 = vpop.permute.xlu2 %3891 }
 0x550   :  { %4449 = vperm.xlu1 %5644, %v3810_v41   ;;  %v3795_v41 = vmul.f32 %v10521_v17, %v3539_v59  ;;  %v9119_v59 = vpop.permute.xlu1 %3894 }
 0x552   :  { %4233 = vperm.xlu2 %5645, %v3783_v13   ;;  %v3496_v13 = vperm.slane %v8905_v61, 5  ;;  %v3499_v61 = vperm.slane %v8921_v28, 0 }
 0x555   :  { %v9124_v47 = vpop.permute.xlu2 %3945 }
 0x558   :  { %4569 = vperm.xlu1 %5644, %v3820_v2   ;;  %3882 = vperm.xlu0 %5643, %v3741_v36   ;;  %v10523_v2 = vld [vmem:[#allocation98_spill] sm:$0xff]  ;;  %v9097_v36 = vpop.eup %6188  ;;  %v9133_v28 = vpop.permute.xlu1 %3948 }
 0x559   :  { %v3752_v60 = vmul.f32 %v10523_v2, %v3496_v13  ;;  %v3579_v1 = vperm.slane %v9097_v36, 0  ;;  %v3582_v8 = vperm.slane %v9097_v36, 3  ;;  %v3585_v34 = vperm.slane %v9097_v36, 6  ;;  %v9128_v13 = vpop.eup %6190 }
 0x55a   :  { %4242 = vperm.xlu2 %5645, %v3786_v54   ;;  %v3798_v54 = vmul.f32 %v10524_v23, %v3542_v16  ;;  %v3588_v31 = vperm.slane %v9128_v13, 1  ;;  %v3558_v2 = vperm.slane %v9014_v56, 3 }
 0x560   :  { %4578 = vperm.xlu1 %5644, %v3823_v20   ;;  %3888 = vperm.xlu0 %5643, %v3743_v7   ;;  %v3835_v20 = vmul.f32 %v10525_v9, %v3579_v1  ;;  %v3755_v7 = vmul.f32 %v10526_v15, %v3499_v61  ;;  %v9138_v61 = vpop.permute.xlu2 %3954  ;;  %v3511_v15 = vperm.slane %v8941_v18, 4 }
 0x562   :  { %4296 = vperm.xlu2 %5645, %v3789_v19   ;;  %v10527_v19 = vld [vmem:[#allocation134_spill] sm:$0xff] }
 0x563   :  { %v3801_v38 = vmul.f32 %v10527_v19, %v3545_v30  ;;  %v10536_v30 = vld [vmem:[#allocation136_spill] sm:$0xff]  ;;  %v9144_v19 = vpop.permute.xlu1 %3957 }
 0x564   :  { %v3814_v9 = vmul.f32 %v10536_v30, %v3558_v2  ;;  %v10543_v2 = vld [vmem:[#allocation111_spill] sm:$0xff] }
 0x568   :  { %4587 = vperm.xlu1 %5644, %v3826_v48   ;;  %3897 = vperm.xlu0 %5643, %v3746_v51   ;;  %v3548_v48 = vperm.slane %v9030_v43, 1  ;;  %v3838_v51 = vmul.f32 %v10528_v32, %v3582_v8  ;;  %v10539_v32 = vld [vmem:[#allocation129_spill] sm:$0xff] }
 0x56a   :  { %4305 = vperm.xlu2 %5645, %v3792_v22   ;;  %v3758_v22 = vmul.f32 %v10529_v63, %v3502_v6  ;;  %v3804_v50 = vmul.f32 %v10530_v26, %v3548_v48  ;;  %v10538_v6 = vld [vmem:[#allocation107_spill] sm:$0xff]  ;;  %v9150_v63 = vpop.permute.xlu2 %3963  ;;  %v3514_v26 = vperm.slane %v8941_v18, 7 }
 0x56b   :  { %v3767_v48 = vmul.f32 %v10538_v6, %v3511_v15  ;;  %v10546_v6 = vld [vmem:[#allocation161_spill] sm:$0xff] }
 0x570   :  { %4641 = vperm.xlu1 %5644, %v3829_v55   ;;  %3951 = vperm.xlu0 %5643, %v3749_v24   ;;  %v3549_v55 = vperm.slane %v9030_v43, 2  ;;  %v10531_v24 = vld [vmem:[#allocation75_spill] sm:$0xff] }
 0x571   :  { %v3841_v17 = vmul.f32 %v10531_v24, %v3585_v34  ;;  %v10540_v34 = vld [vmem:[#allocation168_spill] sm:$0xff] }
 0x572   :  { %4359 = vperm.xlu2 %5645, %v3795_v41   ;;  %v10532_v41 = vld [vmem:[#allocation103_spill] sm:$0xff]  ;;  %v3805_v16 = vmul.f32 %v10533_v46, %v3549_v55  ;;  %v10541_v55 = vld [vmem:[#allocation109_spill] sm:$0xff] }
 0x573   :  { %v3761_v33 = vmul.f32 %v10532_v41, %v3505_v44  ;;  %v3770_v24 = vmul.f32 %v10541_v55, %v3514_v26  ;;  %v9159_v41 = vpop.permute.xlu1 %3966  ;;  %v10547_v26 = vld [vmem:[#allocation43_spill] sm:$0xff] }
 0x578   :  { %4650 = vperm.xlu1 %5644, %v3832_v37   ;;  %3960 = vperm.xlu0 %5643, %v3752_v60   ;;  %v3508_v37 = vperm.slane %v8941_v18, 1  ;;  %v10534_v60 = vld [vmem:[#allocation164_spill] sm:$0xff]  ;;  %v9164_v18 = vpop.permute.xlu2 %4017 }
 0x579   :  { %v3844_v23 = vmul.f32 %v10534_v60, %v3588_v31  ;;  %v3563_v31 = vperm.slane %v9060_v49, 0 }
 0x57a   :  { %4368 = vperm.xlu2 %5645, %v3798_v54   ;;  %v10535_v54 = vld [vmem:[#allocation29_spill] sm:$0xff] }
 0x57b   :  { %v3764_v1 = vmul.f32 %v10535_v54, %v3508_v37 }
 0x580   :  { %4704 = vperm.xlu1 %5644, %v3835_v20   ;;  %4014 = vperm.xlu0 %5643, %v3755_v7   ;;  %v3591_v20 = vperm.slane %v9128_v13, 4  ;;  %v3552_v7 = vperm.slane %v9030_v43, 5  ;;  %v9175_v15 = vpop.permute.xlu2 %4026 }
 0x582   :  { %4377 = vperm.xlu2 %5645, %v3801_v38   ;;  %v10537_v38 = vld [vmem:[#allocation165_spill] sm:$0xff] }
 0x583   :  { %v3847_v8 = vmul.f32 %v10537_v38, %v3591_v20  ;;  %v3566_v20 = vperm.slane %v9060_v49, 3 }
 0x588   :  { %4713 = vperm.xlu1 %5644, %v3838_v51   ;;  %4023 = vperm.xlu0 %5643, %v3758_v22   ;;  %v3808_v51 = vmul.f32 %v10539_v32, %v3552_v7  ;;  %v3594_v22 = vperm.slane %v9128_v13, 7  ;;  %v3523_v32 = vperm.slane %v8973_v3, 0 }
 0x58a   :  { %4431 = vperm.xlu2 %5645, %v3804_v50   ;;  %v3561_v50 = vperm.slane %v9014_v56, 6  ;;  %v3850_v44 = vmul.f32 %v10540_v34, %v3594_v22  ;;  %v9188_v34 = vpop.permute.xlu2 %4035 }
 0x590   :  { %4722 = vperm.xlu1 %5644, %v3841_v17   ;;  %4032 = vperm.xlu0 %5643, %v3761_v33   ;;  %v9157_v17 = vpop.eup %6192  ;;  %v3817_v33 = vmul.f32 %v10542_v57, %v3561_v50  ;;  %v3779_v50 = vmul.f32 %v10547_v26, %v3523_v32  ;;  %v3526_v57 = vperm.slane %v8973_v3, 3 }
 0x591   :  { %v3597_v46 = vperm.slane %v9157_v17, 2  ;;  %v3600_v30 = vperm.slane %v9157_v17, 5 }
 0x592   :  { %4434 = vperm.xlu2 %5645, %v3805_v16   ;;  %v3517_v16 = vperm.slane %v8956_v62, 2 }
 0x593   :  { %v3853_v37 = vmul.f32 %v8871_v39, %v3597_v46  ;;  %v3856_v7 = vmul.f32 %v8876_v21, %v3600_v30  ;;  %v10545_v39 = vld [vmem:[#allocation40_spill] sm:$0xff]  ;;  %v3529_v30 = vperm.slane %v8973_v3, 6 }
 0x594   :  { %v3773_v60 = vmul.f32 %v10543_v2, %v3517_v16  ;;  %v10550_v2 = vld [vmem:[#allocation61_spill] sm:$0xff] }
 0x598   :  { %4776 = vperm.xlu1 %5644, %v3844_v23   ;;  %4086 = vperm.xlu0 %5643, %v3764_v1   ;;  %v10544_v23 = vld [vmem:[#allocation157_spill] sm:$0xff]  ;;  %v9170_v1 = vpop.permute.xlu1 %4020 }
 0x599   :  { %v3819_v54 = vmul.f32 %v10544_v23, %v3563_v31  ;;  %v10549_v31 = vld [vmem:[#allocation46_spill] sm:$0xff] }
 0x59a   :  { %4506 = vperm.xlu2 %5645, %v3814_v9   ;;  %v3520_v9 = vperm.slane %v8956_v62, 5  ;;  %v3569_v62 = vperm.slane %v9060_v49, 6 }
 0x59c   :  { %v3776_v38 = vmul.f32 %v10545_v39, %v3520_v9  ;;  %v3575_v9 = vperm.slane %v9081_v4, 4 }
 0x5a0   :  { %4785 = vperm.xlu1 %5644, %v3847_v8   ;;  %4095 = vperm.xlu0 %5643, %v3767_v48   ;;  %v3822_v48 = vmul.f32 %v10546_v6, %v3566_v20  ;;  %v3900_v20 = vperm.slane %v9100_v52, %v10426_v10 }
 0x5a2   :  { %4443 = vperm.xlu2 %5645, %v3808_v51   ;;  %v9181_v51 = vpop.permute.xlu1 %4029 }
 0x5a8   :  { %4794 = vperm.xlu1 %5644, %v3850_v44   ;;  %4104 = vperm.xlu0 %5643, %v3770_v24   ;;  %v10548_v44 = vld [vmem:[#allocation68_spill] sm:$0xff] }
 0x5a9   :  { %v3825_v55 = vmul.f32 %v10548_v44, %v3569_v62 }
 0x5aa   :  { %4515 = vperm.xlu2 %5645, %v3817_v33   ;;  %v3572_v33 = vperm.slane %v9081_v4, 1  ;;  %v9194_v46 = vpop.permute.xlu1 %4083 }
 0x5b0   :  { %4848 = vperm.xlu1 %5644, %v3853_v37   ;;  %4158 = vperm.xlu0 %5643, %v3773_v60   ;;  %v3782_v37 = vmul.f32 %v10549_v31, %v3526_v57  ;;  %v3828_v60 = vmul.f32 %v10550_v2, %v3572_v33  ;;  %v10553_v57 = vld [vmem:[#allocation116_spill] sm:$0xff]  ;;  %v10554_v31 = vld [vmem:[#allocation86_spill] sm:$0xff] }
 0x5b2   :  { %4566 = vperm.xlu2 %5645, %v3819_v54   ;;  %v9200_v54 = vpop.permute.xlu2 %4089  ;;  %v9211_v6 = vpop.permute.xlu1 %4092 }
 0x5b7   :  { %v3450_v8 = vpop.xlane.xlu0 %3449 }
 0x5b8   :  { %4857 = vperm.xlu1 %5644, %v3856_v7   ;;  %6194 = vrcp.f32 %v3450_v8  ;;  %4167 = vperm.xlu0 %5643, %v3776_v38   ;;  %v10551_v38 = vld [vmem:[#allocation113_spill] sm:$0xff] }
 0x5b9   :  { %v3785_v8 = vmul.f32 %v10551_v38, %v3529_v30 }
 0x5ba   :  { %4575 = vperm.xlu2 %5645, %v3822_v48   ;;  %v10552_v48 = vld [vmem:[#allocation83_spill] sm:$0xff]  ;;  %v9221_v44 = vpop.permute.xlu2 %4098 }
 0x5bb   :  { %v3831_v3 = vmul.f32 %v10552_v48, %v3575_v9  ;;  %v3968_v48 = vperm.slane %v9124_v47, %v10426_v10  ;;  %v3971_v47 = vperm.slane %v9138_v61, %v10426_v10 }
 0x5be   :  { %v9184_v22 = vpop.eup %6194 }
 0x5bf   :  { %v3603_v21 = vperm.slane %v9184_v22, 0  ;;  %v3606_v16 = vperm.slane %v9184_v22, 3  ;;  %v3609_v7 = vperm.slane %v9184_v22, 6 }
 0x5c0   :  { %4221 = vperm.xlu0 %5643, %v3779_v50   ;;  %v3532_v50 = vperm.slane %v8983_v40, 1 }
 0x5c1   :  { %v3859_v24 = vmul.f32 %v8881_v53, %v3603_v21  ;;  %v3862_v23 = vmul.f32 %v8885_v0, %v3606_v16  ;;  %v3899_v0 = vperm.slane %v9093_v58, %v10426_v10  ;;  %v3865_v62 = vmul.f32 %v8888_v27, %v3609_v7 }
 0x5c2   :  { %4584 = vperm.xlu2 %5645, %v3825_v55   ;;  %v3902_v21 = vperm.slane %v9107_v11, %v10426_v10  ;;  %v3578_v55 = vperm.slane %v9081_v4, 7  ;;  %v3788_v33 = vmul.f32 %v10553_v57, %v3532_v50  ;;  %v3904_v16 = vperm.slane %v9112_v42, %v10426_v10  ;;  %v9230_v11 = vpop.permute.xlu1 %4101  ;;  %v9240_v7 = vpop.permute.xlu2 %4152 }
 0x5c3   :  { %4911 = vperm.xlu1 %5644, %v3859_v24   ;;  %v3907_v32 = vsel %vm1795_vm1, %v3900_v20, %v3899_v0  ;;  %v3581_v42 = vperm.slane %v9097_v36, 2  ;;  %v3584_v50 = vperm.slane %v9097_v36, 5 }
 0x5c8   :  { %4230 = vperm.xlu0 %5643, %v3782_v37   ;;  %v3834_v37 = vmul.f32 %v10554_v31, %v3578_v55  ;;  %v10557_v55 = vld [vmem:[#allocation53_spill] sm:$0xff]  ;;  %v3541_v31 = vperm.slane %v8998_v35, 2 }
 0x5ca   :  { %4638 = vperm.xlu2 %5645, %v3828_v60   ;;  %v3883_v53 = vpop.permute.xlu0 %3882  ;;  %v3905_v60 = vperm.slane %v9119_v59, %v10426_v10  ;;  %v10556_v59 = vld [vmem:[#allocation166_spill] sm:$0xff] }
 0x5cb   :  { %4920 = vperm.xlu1 %5644, %v3862_v23   ;;  %v3901_v39 = vperm.slane %v3883_v53, %v10426_v10  ;;  %v3535_v53 = vperm.slane %v8983_v40, 4  ;;  %v3837_v0 = vmul.f32 %v10556_v59, %v3581_v42  ;;  %v3544_v59 = vperm.slane %v8998_v35, 5 }
 0x5cc   :  { %v3547_v35 = vperm.slane %v9030_v43, 0 }
 0x5cd   :  { %v3908_v52 = vsel %vm1797_vm2, %v3901_v39, %v3907_v32  ;;  %v10555_v39 = vld [vmem:[#allocation118_spill] sm:$0xff]  ;;  %v3538_v32 = vperm.slane %v8983_v40, 7 }
 0x5ce   :  { %v3909_v24 = vsel %vm1799_vm3, %v3902_v21, %v3908_v52  ;;  %v3791_v38 = vmul.f32 %v10555_v39, %v3535_v53  ;;  %v9250_v52 = vpop.permute.xlu1 %4155  ;;  %v10558_v40 = vld [vmem:[#allocation170_spill] sm:$0xff] }
 0x5d0   :  { %4239 = vperm.xlu0 %5643, %v3785_v8   ;;  %v6238_v8 = vld [vmem:[#allocation2 + $0x18] sm:$0xff] }
 0x5d2   :  { %4647 = vperm.xlu2 %5645, %v3831_v3   ;;  %v3889_v26 = vpop.permute.xlu0 %3888 }
 0x5d3   :  { %v3903_v58 = vperm.slane %v3889_v26, %v10426_v10  ;;  %4929 = vperm.xlu1 %5644, %v3865_v62   ;;  %v3969_v62 = vperm.slane %v9133_v28, %v10426_v10  ;;  %v3840_v28 = vmul.f32 %v10558_v40, %v3584_v50  ;;  %v10562_v50 = vld [vmem:[#allocation79_spill] sm:$0xff] }
 0x5d5   :  { %v3910_v27 = vsel %vm1801_vm4, %v3903_v58, %v3909_v24  ;;  %v3976_v21 = vsel %vm1795_vm1, %v3969_v62, %v3968_v48  ;;  %v3794_v24 = vmul.f32 %v10557_v55, %v3538_v32 }
 0x5d6   :  { %v3911_v2 = vsel %vm1803_vm5, %v3904_v16, %v3910_v27  ;;  %v9259_v27 = vpop.permute.xlu2 %4161  ;;  %v9273_v53 = vpop.permute.xlu1 %4164 }
 0x5d7   :  { %v3912_v9 = vsel %vm1805_vm6, %v3905_v60, %v3911_v2  ;;  %v3974_v2 = vperm.slane %v9150_v63, %v10426_v10  ;;  %v3587_v60 = vperm.slane %v9128_v13, 0  ;;  %v10560_v63 = vld [vmem:[#allocation76_spill] sm:$0xff] }
 0x5d8   :  { %4293 = vperm.xlu0 %5643, %v3788_v33   ;;  %v3972_v33 = vperm.slane %v9144_v19, %v10426_v10 }
 0x5d9   :  { %v3843_v39 = vmul.f32 %v10560_v63, %v3587_v60 }
 0x5da   :  { %4656 = vperm.xlu2 %5645, %v3834_v37   ;;  %v3898_v23 = vpop.permute.xlu0 %3897 }
 0x5db   :  { %v3906_v30 = vperm.slane %v3898_v23, %v10426_v10  ;;  %v3975_v23 = vperm.slane %v9159_v41, %v10426_v10 }
 0x5dd   :  { %v3913_v20 = vsel %vm1807_vm7, %v3906_v30, %v3912_v9  ;;  %v10559_v30 = vld [vmem:[#allocation121_spill] sm:$0xff] }
 0x5de   :  { %5598 = vmatmul.msk.f32.vlgmr.msra.gmra.mxu3 %vm1930_vm8, %v3913_v20  ;;  %v3797_v9 = vmul.f32 %v10559_v30, %v3541_v31  ;;  %v9287_v62 = vpop.permute.xlu1 %4173  ;;  %v4041_v31 = vperm.slane %v9175_v15, %v10426_v10  ;;  %v4044_v30 = vperm.slane %v9188_v34, %v10426_v10 }
 0x5df   :  { %4138 = vmatpush.msra.mxu3 %v6238_v8  ;;  %v9281_v8 = vpop.permute.xlu2 %4170 }
 0x5e0   :  { %4302 = vperm.xlu0 %5643, %v3791_v38   ;;  %v6239_v38 = vld [vmem:[#allocation2 + $0x28] sm:$0xff] }
 0x5e2   :  { %4710 = vperm.xlu2 %5645, %v3837_v0   ;;  %v3952_v3 = vpop.permute.xlu0 %3951  ;;  %v3590_v0 = vperm.slane %v9128_v13, 3 }
 0x5e3   :  { %v3970_v26 = vperm.slane %v3952_v3, %v10426_v10  ;;  %v10561_v3 = vld [vmem:[#allocation64_spill] sm:$0xff] }
 0x5e4   :  { %v3800_v32 = vmul.f32 %v10561_v3, %v3544_v59  ;;  %v4106_v3 = vperm.slane %v9194_v46, %v10426_v10  ;;  %v4109_v46 = vperm.slane %v9211_v6, %v10426_v10 }
 0x5e5   :  { %v3977_v58 = vsel %vm1797_vm2, %v3970_v26, %v3976_v21  ;;  %v4038_v26 = vperm.slane %v9164_v18, %v10426_v10  ;;  %v3846_v21 = vmul.f32 %v10562_v50, %v3590_v0 }
 0x5e6   :  { %v3978_v57 = vsel %vm1799_vm3, %v3971_v47, %v3977_v58 }
 0x5e7   :  { %v3979_v61 = vsel %vm1801_vm4, %v3972_v33, %v3978_v57  ;;  %v9297_v40 = vpop.permute.xlu2 %4224  ;;  %v10563_v33 = vld [vmem:[#allocation123_spill] sm:$0xff] }
 0x5e8   :  { %4311 = vperm.xlu0 %5643, %v3794_v24   ;;  %v4039_v24 = vperm.slane %v9170_v1, %v10426_v10 }
 0x5ea   :  { %4719 = vperm.xlu2 %5645, %v3840_v28   ;;  %v3961_v16 = vpop.permute.xlu0 %3960  ;;  %v3593_v28 = vperm.slane %v9128_v13, 6 }
 0x5eb   :  { %v3973_v37 = vperm.slane %v3961_v16, %v10426_v10  ;;  %v3803_v16 = vmul.f32 %v10563_v33, %v3547_v35 }
 0x5ed   :  { %v3980_v19 = vsel %vm1803_vm5, %v3973_v37, %v3979_v61  ;;  %v3849_v37 = vmul.f32 %v8533_v29, %v3593_v28  ;;  %v4042_v61 = vperm.slane %v9181_v51, %v10426_v10  ;;  %v3596_v29 = vperm.slane %v9157_v17, 1  ;;  %v10564_v51 = vld [vmem:[#allocation128_spill] sm:$0xff] }
 0x5ee   :  { %v3981_v42 = vsel %vm1805_vm6, %v3974_v2, %v3980_v19  ;;  %v9306_v2 = vpop.permute.xlu1 %4227  ;;  %v3602_v28 = vperm.slane %v9157_v17, 7 }
 0x5ef   :  { %v3982_v20 = vsel %vm1807_vm7, %v3975_v23, %v3981_v42  ;;  %v3556_v23 = vperm.slane %v9014_v56, 1  ;;  %v9318_v42 = vpop.permute.xlu2 %4233 }
 0x5f0   :  { %4365 = vperm.xlu0 %5643, %v3797_v9   ;;  %5599 = vmatmul.msk.f32.vlgmr.msrb.gmra.mxu3 %vm1930_vm8, %v3982_v20 }
 0x5f1   :  { %4276 = vmatpush.msrb.mxu3 %v6239_v38  ;;  %v3812_v63 = vmul.f32 %v10564_v51, %v3556_v23  ;;  %v6240_v38 = vld [vmem:[#allocation2 + $0x30] sm:$0xff]  ;;  %v3562_v51 = vperm.slane %v9014_v56, 7 }
 0x5f2   :  { %4773 = vperm.xlu2 %5645, %v3843_v39   ;;  %v4015_v41 = vpop.permute.xlu0 %4014  ;;  %v3852_v39 = vmul.f32 %v8566_v5, %v3596_v29  ;;  %v4108_v5 = vperm.slane %v9200_v54, %v10426_v10 }
 0x5f3   :  { %v4037_v48 = vperm.slane %v4015_v41, %v10426_v10  ;;  %v3550_v41 = vperm.slane %v9030_v43, 3 }
 0x5f5   :  { %v4045_v58 = vsel %vm1795_vm1, %v4038_v26, %v4037_v48  ;;  %v3599_v48 = vperm.slane %v9157_v17, 4 }
 0x5f6   :  { %v4046_v18 = vsel %vm1797_vm2, %v4039_v24, %v4045_v58  ;;  %v9325_v59 = vpop.permute.xlu1 %4236  ;;  %v3559_v24 = vperm.slane %v9014_v56, 4 }
 0x5f7   :  { %v3855_v58 = vmul.f32 %v8592_v25, %v3599_v48  ;;  %v10566_v25 = vld [vmem:[#allocation132_spill] sm:$0xff] }
 0x5f8   :  { %4374 = vperm.xlu0 %5643, %v3800_v32   ;;  %v10565_v32 = vld [vmem:[#allocation65_spill] sm:$0xff]  ;;  %v3815_v33 = vmul.f32 %v10566_v25, %v3559_v24  ;;  %v10569_v24 = vld [vmem:[#allocation139_spill] sm:$0xff] }
 0x5f9   :  { %v3806_v26 = vmul.f32 %v10565_v32, %v3550_v41  ;;  %v4179_v32 = vperm.slane %v9273_v53, %v10426_v10  ;;  %v10570_v25 = vld [vmem:[#allocation143_spill] sm:$0xff] }
 0x5fa   :  { %4782 = vperm.xlu2 %5645, %v3846_v21   ;;  %v4024_v55 = vpop.permute.xlu0 %4023  ;;  %v9335_v21 = vpop.permute.xlu2 %4242 }
 0x5fb   :  { %v4040_v47 = vperm.slane %v4024_v55, %v10426_v10 }
 0x5fd   :  { %v4047_v57 = vsel %vm1799_vm3, %v4040_v47, %v4046_v18 }
 0x5fe   :  { %v4048_v1 = vsel %vm1801_vm4, %v4041_v31, %v4047_v57  ;;  %v9344_v18 = vpop.permute.xlu1 %4290  ;;  %v3858_v31 = vmul.f32 %v8621_v45, %v3602_v28  ;;  %v10567_v45 = vld [vmem:[#allocation126_spill] sm:$0xff] }
 0x5ff   :  { %v4049_v15 = vsel %vm1803_vm5, %v4042_v61, %v4048_v1  ;;  %v6242_v28 = vld [vmem:[#allocation2 + $0x40] sm:$0xff] }
 0x600   :  { %4428 = vperm.xlu0 %5643, %v3803_v16   ;;  %v4111_v16 = vperm.slane %v9221_v44, %v10426_v10  ;;  %v3605_v44 = vperm.slane %v9184_v22, 2 }
 0x602   :  { %4791 = vperm.xlu2 %5645, %v3849_v37   ;;  %v4033_v60 = vpop.permute.xlu0 %4032  ;;  %v4112_v37 = vperm.slane %v9230_v11, %v10426_v10  ;;  %v9355_v1 = vpop.permute.xlu2 %4296  ;;  %v6241_v11 = vld [vmem:[#allocation2 + $0x38] sm:$0xff] }
 0x603   :  { %v4043_v19 = vperm.slane %v4033_v60, %v10426_v10  ;;  %v3553_v60 = vperm.slane %v9030_v43, 6  ;;  %v4175_v43 = vperm.slane %v9240_v7, %v10426_v10  ;;  %v4178_v7 = vperm.slane %v9259_v27, %v10426_v10 }
 0x605   :  { %v4050_v9 = vsel %vm1805_vm6, %v4043_v19, %v4049_v15  ;;  %v3809_v15 = vmul.f32 %v10567_v45, %v3553_v60  ;;  %v4248_v45 = vperm.slane %v9318_v42, %v10426_v10 }
 0x606   :  { %v4051_v20 = vsel %vm1807_vm7, %v4044_v30, %v4050_v9  ;;  %v9364_v29 = vpop.permute.xlu1 %4299  ;;  %v3861_v9 = vmul.f32 %v8958_v12, %v3605_v44 }
 0x607   :  { %5600 = vmatmul.msk.f32.vlgmr.msra.gmra.mxu2 %vm1930_vm8, %v4051_v20 }
 0x608   :  { %4500 = vperm.xlu0 %5643, %v3812_v63   ;;  %4345 = vmatpush.msra.mxu2 %v6240_v38  ;;  %v4176_v63 = vperm.slane %v9250_v52, %v10426_v10 }
 0x60a   :  { %4845 = vperm.xlu2 %5645, %v3852_v39   ;;  %v4087_v34 = vpop.permute.xlu0 %4086  ;;  %v9373_v38 = vpop.permute.xlu2 %4305  ;;  %v4183_v41 = vsel %vm1795_vm1, %v4176_v63, %v4175_v43  ;;  %v3574_v43 = vperm.slane %v9081_v4, 3 }
 0x60b   :  { %v4107_v0 = vperm.slane %v4087_v34, %v10426_v10  ;;  %v3608_v34 = vperm.slane %v9184_v22, 5 }
 0x60d   :  { %v4114_v50 = vsel %vm1795_vm1, %v4107_v0, %v4106_v3  ;;  %v10568_v0 = vld [vmem:[#allocation135_spill] sm:$0xff]  ;;  %v3864_v56 = vmul.f32 %v8963_v14, %v3608_v34  ;;  %v4182_v14 = vperm.slane %v9287_v62, %v10426_v10 }
 0x60e   :  { %v4115_v55 = vsel %vm1797_vm2, %v4108_v5, %v4114_v50  ;;  %v3818_v48 = vmul.f32 %v10568_v0, %v3562_v51  ;;  %v9382_v3 = vpop.permute.xlu1 %4308  ;;  %v3565_v50 = vperm.slane %v9060_v49, 2  ;;  %v4251_v51 = vperm.slane %v9335_v21, %v10426_v10  ;;  %v10572_v34 = vld [vmem:[#allocation151_spill] sm:$0xff] }
 0x60f   :  { %v4116_v54 = vsel %vm1799_vm3, %v4109_v46, %v4115_v55 }
 0x610   :  { %4437 = vperm.xlu0 %5643, %v3806_v26   ;;  %v3821_v53 = vmul.f32 %v10569_v24, %v3565_v50  ;;  %v4315_v50 = vperm.slane %v9355_v1, %v10426_v10  ;;  %v10574_v1 = vld [vmem:[#allocation158_spill] sm:$0xff] }
 0x612   :  { %4854 = vperm.xlu2 %5645, %v3855_v58   ;;  %v4096_v35 = vpop.permute.xlu0 %4095  ;;  %v4181_v58 = vperm.slane %v9281_v8, %v10426_v10 }
 0x613   :  { %v4110_v47 = vperm.slane %v4096_v35, %v10426_v10  ;;  %v9395_v35 = vpop.permute.xlu2 %4359 }
 0x615   :  { %v4117_v57 = vsel %vm1801_vm4, %v4110_v47, %v4116_v54  ;;  %v3568_v54 = vperm.slane %v9060_v49, 5  ;;  %v4246_v49 = vperm.slane %v9306_v2, %v10426_v10 }
 0x616   :  { %v4118_v6 = vsel %vm1803_vm5, %v4111_v16, %v4117_v57  ;;  %v9402_v57 = vpop.permute.xlu1 %4362  ;;  %v4245_v16 = vperm.slane %v9297_v40, %v10426_v10  ;;  %v10571_v40 = vld [vmem:[#allocation146_spill] sm:$0xff] }
 0x617   :  { %v4119_v19 = vsel %vm1805_vm6, %v4112_v37, %v4118_v6 }
 0x618   :  { %4509 = vperm.xlu0 %5643, %v3815_v33   ;;  %v3824_v33 = vmul.f32 %v10570_v25, %v3568_v54  ;;  %v3583_v54 = vperm.slane %v9097_v36, 4 }
 0x61a   :  { %4863 = vperm.xlu2 %5645, %v3858_v31   ;;  %v4105_v61 = vpop.permute.xlu0 %4104 }
 0x61b   :  { %v4113_v23 = vperm.slane %v4105_v61, %v10426_v10  ;;  %v9408_v31 = vpop.permute.xlu2 %4368  ;;  %v3571_v61 = vperm.slane %v9081_v4, 0 }
 0x61d   :  { %v4120_v30 = vsel %vm1807_vm7, %v4113_v23, %v4119_v19 }
 0x61e   :  { %5601 = vmatmul.msk.f32.vlgmr.msra.gmra.mxu3 %vm1930_vm8, %v4120_v30  ;;  %v9415_v23 = vpop.permute.xlu1 %4371  ;;  %v3827_v30 = vmul.f32 %v10571_v40, %v3571_v61 }
 0x61f   :  { %4414 = vmatpush.msra.mxu3 %v6241_v11  ;;  %v4249_v11 = vperm.slane %v9325_v59, %v10426_v10  ;;  %v6243_v59 = vld [vmem:[#allocation2 + $0x48] sm:$0xff] }
 0x620   :  { %4446 = vperm.xlu0 %5643, %v3809_v15  }
 0x622   :  { %4917 = vperm.xlu2 %5645, %v3861_v9   ;;  %v4159_v20 = vpop.permute.xlu0 %4158 }
 0x623   :  { %v4177_v39 = vperm.slane %v4159_v20, %v10426_v10  ;;  %v9425_v2 = vpop.permute.xlu2 %4377 }
 0x625   :  { %v4184_v12 = vsel %vm1797_vm2, %v4177_v39, %v4183_v41  ;;  %v3830_v41 = vmul.f32 %v10572_v34, %v3574_v43 }
 0x626   :  { %v4185_v52 = vsel %vm1799_vm3, %v4178_v7, %v4184_v12  ;;  %v9435_v12 = vpop.permute.xlu1 %4380 }
 0x627   :  { %v4186_v27 = vsel %vm1801_vm4, %v4179_v32, %v4185_v52  ;;  %v10573_v52 = vld [vmem:[#allocation155_spill] sm:$0xff] }
 0x628   :  { %4518 = vperm.xlu0 %5643, %v3818_v48   ;;  %v3577_v48 = vperm.slane %v9081_v4, 6 }
 0x62a   :  { %4926 = vperm.xlu2 %5645, %v3864_v56   ;;  %v4168_v26 = vpop.permute.xlu0 %4167  ;;  %v4313_v56 = vperm.slane %v9344_v18, %v10426_v10  ;;  %v3833_v32 = vmul.f32 %v10573_v52, %v3577_v48  ;;  %v6245_v48 = vld [vmem:[#allocation2 + $0x58] sm:$0xff] }
 0x62b   :  { %v4180_v5 = vperm.slane %v4168_v26, %v10426_v10  ;;  %v9440_v7 = vpop.permute.xlu2 %4431 }
 0x62d   :  { %v4187_v55 = vsel %vm1803_vm5, %v4180_v5, %v4186_v27  ;;  %v3580_v27 = vperm.slane %v9097_v36, 1 }
 0x62e   :  { %v4188_v46 = vsel %vm1805_vm6, %v4181_v58, %v4187_v55  ;;  %v9448_v5 = vpop.permute.xlu1 %4497 }
 0x62f   :  { %v4189_v47 = vsel %vm1807_vm7, %v4182_v14, %v4188_v46  ;;  %v4316_v14 = vperm.slane %v9364_v29, %v10426_v10  ;;  %v3836_v46 = vmul.f32 %v10574_v1, %v3580_v27 }
 0x630   :  { %4572 = vperm.xlu0 %5643, %v3821_v53   ;;  %5602 = vmatmul.msk.f32.vlgmr.msrb.gmra.mxu2 %vm1930_vm8, %v4189_v47  ;;  %v4318_v47 = vperm.slane %v9373_v38, %v10426_v10  ;;  %v10575_v38 = vld [vmem:[#allocation162_spill] sm:$0xff] }
 0x631   :  { %4483 = vmatpush.msrb.mxu2 %v6242_v28 }
 0x632   :  { %v4222_v8 = vpop.permute.xlu0 %4221 }
 0x633   :  { %v4244_v62 = vperm.slane %v4222_v8, %v10426_v10  ;;  %v9456_v24 = vpop.permute.xlu2 %4434  ;;  %v4319_v8 = vperm.slane %v9382_v3, %v10426_v10  ;;  %v4382_v3 = vperm.slane %v9395_v35, %v10426_v10 }
 0x635   :  { %v4252_v6 = vsel %vm1795_vm1, %v4245_v16, %v4244_v62 }
 0x636   :  { %v4253_v19 = vsel %vm1797_vm2, %v4246_v49, %v4252_v6  ;;  %v9466_v62 = vpop.permute.xlu1 %4503  ;;  %v3839_v6 = vmul.f32 %v10575_v38, %v3583_v54  ;;  %v3601_v54 = vperm.slane %v9157_v17, 6 }
 0x638   :  { %4581 = vperm.xlu0 %5643, %v3824_v33  }
 0x63a   :  { %v4231_v37 = vpop.permute.xlu0 %4230 }
 0x63b   :  { %v4247_v60 = vperm.slane %v4231_v37, %v10426_v10  ;;  %v6244_v37 = vld [vmem:[#allocation2 + $0x50] sm:$0xff]  ;;  %v9473_v61 = vpop.permute.xlu2 %4506 }
 0x63d   :  { %v4254_v44 = vsel %vm1799_vm3, %v4247_v60, %v4253_v19  ;;  %v3586_v60 = vperm.slane %v9097_v36, 7  ;;  %v4383_v19 = vperm.slane %v9402_v57, %v10426_v10  ;;  %v4386_v36 = vperm.slane %v9415_v23, %v10426_v10 }
 0x63e   :  { %v4255_v15 = vsel %vm1801_vm4, %v4248_v45, %v4254_v44  ;;  %v4441_v40 = vpop.permute.xlu1 %4440 }
 0x63f   :  { %v4256_v63 = vsel %vm1803_vm5, %v4249_v11, %v4255_v15  ;;  %v10576_v15 = vld [vmem:[#allocation77_spill] sm:$0xff] }
 0x640   :  { %4635 = vperm.xlu0 %5643, %v3827_v30   ;;  %v4390_v30 = vsel %vm1795_vm1, %v4383_v19, %v4382_v3  ;;  %v3842_v11 = vmul.f32 %v10576_v15, %v3586_v60  ;;  %v3604_v15 = vperm.slane %v9184_v22, 1 }
 0x642   :  { %v4240_v9 = vpop.permute.xlu0 %4239 }
 0x643   :  { %v4250_v20 = vperm.slane %v4240_v9, %v10426_v10  ;;  %v4385_v9 = vperm.slane %v9408_v31, %v10426_v10  ;;  %v4444_v43 = vpop.permute.xlu2 %4443  ;;  %v4389_v31 = vperm.slane %v9435_v12, %v10426_v10  ;;  %v10578_v12 = vld [vmem:[#allocation78_spill] sm:$0xff] }
 0x645   :  { %v4257_v42 = vsel %vm1805_vm6, %v4250_v20, %v4256_v63  ;;  %v3589_v20 = vperm.slane %v9128_v13, 2  ;;  %v4388_v63 = vperm.slane %v9425_v2, %v10426_v10 }
 0x646   :  { %v4258_v39 = vsel %vm1807_vm7, %v4251_v51, %v4257_v42 }
 0x647   :  { %5603 = vmatmul.msk.f32.vlgmr.msrb.gmra.mxu3 %vm1930_vm8, %v4258_v39 }
 0x648   :  { %4644 = vperm.xlu0 %5643, %v3830_v41   ;;  %4552 = vmatpush.msrb.mxu3 %v6243_v59  ;;  %v10577_v41 = vld [vmem:[#allocation80_spill] sm:$0xff]  ;;  %v9499_v59 = vpop.permute.xlu1 %4512 }
 0x649   :  { %v3845_v23 = vmul.f32 %v10577_v41, %v3589_v20  ;;  %v10582_v20 = vld [vmem:[#allocation94_spill] sm:$0xff]  ;;  %v3607_v41 = vperm.slane %v9184_v22, 4 }
 0x64a   :  { %v4294_v0 = vpop.permute.xlu0 %4293 }
 0x64b   :  { %v4314_v21 = vperm.slane %v4294_v0, %v10426_v10 }
 0x64d   :  { %v4321_v26 = vsel %vm1795_vm1, %v4314_v21, %v4313_v56  ;;  %v3592_v21 = vperm.slane %v9128_v13, 5  ;;  %v4516_v56 = vpop.permute.xlu2 %4515 }
 0x64e   :  { %v4322_v58 = vsel %vm1797_vm2, %v4315_v50, %v4321_v26  ;;  %v3595_v50 = vperm.slane %v9157_v17, 0 }
 0x64f   :  { %v4323_v55 = vsel %vm1799_vm3, %v4316_v14, %v4322_v58  ;;  %v3848_v52 = vmul.f32 %v10578_v12, %v3592_v21  ;;  %v6247_v12 = vld [vmem:[#allocation2 + $0x68] sm:$0xff] }
 0x650   :  { %4653 = vperm.xlu0 %5643, %v3833_v32   ;;  %v4450_v32 = vpop.permute.xlu1 %4449 }
 0x652   :  { %v4303_v4 = vpop.permute.xlu0 %4302 }
 0x653   :  { %v4317_v18 = vperm.slane %v4303_v4, %v10426_v10  ;;  %v10579_v4 = vld [vmem:[#allocation81_spill] sm:$0xff] }
 0x654   :  { %v3851_v27 = vmul.f32 %v10579_v4, %v3595_v50 }
 0x655   :  { %v4324_v53 = vsel %vm1801_vm4, %v4317_v18, %v4323_v55  ;;  %v9506_v58 = vpop.permute.xlu2 %4566  ;;  %v3598_v18 = vperm.slane %v9157_v17, 3 }
 0x656   :  { %v4325_v28 = vsel %vm1803_vm5, %v4318_v47, %v4324_v53  ;;  %v10580_v53 = vld [vmem:[#allocation167_spill] sm:$0xff] }
 0x657   :  { %v4326_v33 = vsel %vm1805_vm6, %v4319_v8, %v4325_v28  ;;  %v3854_v1 = vmul.f32 %v10580_v53, %v3598_v18 }
 0x658   :  { %4707 = vperm.xlu0 %5643, %v3836_v46   ;;  %v9510_v55 = vpop.permute.xlu1 %4569  ;;  %v4452_v46 = vperm.slane %v9440_v7, %v10426_v10 }
 0x659   :  { %v4590_v50 = vperm.slane %v9510_v55, %v10426_v10 }
 0x65a   :  { %v4312_v29 = vpop.permute.xlu0 %4311 }
 0x65b   :  { %v4320_v25 = vperm.slane %v4312_v29, %v10426_v10 }
 0x65d   :  { %v4327_v16 = vsel %vm1807_vm7, %v4320_v25, %v4326_v33  ;;  %v9516_v47 = vpop.permute.xlu2 %4575  ;;  %v4453_v25 = vperm.slane %v9456_v24, %v10426_v10  ;;  %v4522_v24 = vperm.slane %v9466_v62, %v10426_v10  ;;  %v4458_v62 = vperm.slane %v4450_v32, %v10426_v10 }
 0x65e   :  { %5604 = vmatmul.msk.f32.vlgmr.msra.gmra.mxu2 %vm1930_vm8, %v4327_v16  ;;  %v4520_v16 = vperm.slane %v9448_v5, %v10426_v10  ;;  %v4456_v5 = vperm.slane %v4444_v43, %v10426_v10 }
 0x65f   :  { %4621 = vmatpush.msra.mxu2 %v6244_v37  ;;  %v10581_v37 = vld [vmem:[#allocation169_spill] sm:$0xff] }
 0x660   :  { %4716 = vperm.xlu0 %5643, %v3839_v6   ;;  %v9526_v38 = vpop.permute.xlu1 %4578  ;;  %v3857_v3 = vmul.f32 %v10581_v37, %v3601_v54 }
 0x662   :  { %v4366_v49 = vpop.permute.xlu0 %4365 }
 0x663   :  { %v4384_v44 = vperm.slane %v4366_v49, %v10426_v10  ;;  %v4455_v49 = vperm.slane %v4441_v40, %v10426_v10  ;;  %v4523_v40 = vperm.slane %v9473_v61, %v10426_v10 }
 0x665   :  { %v4391_v45 = vsel %vm1797_vm2, %v4384_v44, %v4390_v30  ;;  %v4585_v19 = vpop.permute.xlu2 %4584 }
 0x666   :  { %v4392_v35 = vsel %vm1799_vm3, %v4385_v9, %v4391_v45 }
 0x667   :  { %v4393_v42 = vsel %vm1801_vm4, %v4386_v36, %v4392_v35 }
 0x668   :  { %4725 = vperm.xlu0 %5643, %v3842_v11   ;;  %v4588_v61 = vpop.permute.xlu1 %4587 }
 0x669   :  { %v4596_v54 = vperm.slane %v4588_v61, %v10426_v10 }
 0x66a   :  { %v4375_v57 = vpop.permute.xlu0 %4374 }
 0x66b   :  { %v4387_v51 = vperm.slane %v4375_v57, %v10426_v10 }
 0x66d   :  { %v4394_v39 = vsel %vm1803_vm5, %v4387_v51, %v4393_v42  ;;  %v3860_v51 = vmul.f32 %v10582_v20, %v3604_v15  ;;  %v6246_v42 = vld [vmem:[#allocation2 + $0x60] sm:$0xff]  ;;  %v6249_v20 = vld [vmem:[#allocation2 + $0x78] sm:$0xff] }
 0x66e   :  { %v4395_v34 = vsel %vm1805_vm6, %v4388_v63, %v4394_v39  ;;  %v4525_v63 = vperm.slane %v9499_v59, %v10426_v10  ;;  %v4526_v39 = vperm.slane %v4516_v56, %v10426_v10  ;;  %v4589_v56 = vperm.slane %v9506_v58, %v10426_v10 }
 0x66f   :  { %v4396_v0 = vsel %vm1807_vm7, %v4389_v31, %v4395_v34 }
 0x670   :  { %4779 = vperm.xlu0 %5643, %v3845_v23   ;;  %5605 = vmatmul.msk.f32.vlgmr.msra.gmra.mxu3 %vm1930_vm8, %v4396_v0  ;;  %v4639_v0 = vpop.permute.xlu2 %4638 }
 0x671   :  { %4690 = vmatpush.msra.mxu3 %v6245_v48 }
 0x672   :  { %v4429_v2 = vpop.permute.xlu0 %4428 }
 0x673   :  { %v4451_v13 = vperm.slane %v4429_v2, %v10426_v10  ;;  %v10583_v2 = vld [vmem:[#allocation97_spill] sm:$0xff] }
 0x674   :  { %v3863_v21 = vmul.f32 %v10583_v2, %v3607_v41 }
 0x675   :  { %v4459_v28 = vsel %vm1795_vm1, %v4452_v46, %v4451_v13  ;;  %v10584_v13 = vld [vmem:[#allocation66_spill] sm:$0xff] }
 0x676   :  { %v4460_v7 = vsel %vm1797_vm2, %v4453_v25, %v4459_v28 }
 0x678   :  { %4788 = vperm.xlu0 %5643, %v3848_v52   ;;  %v4642_v52 = vpop.permute.xlu1 %4641 }
 0x67a   :  { %v4501_v26 = vpop.permute.xlu0 %4500 }
 0x67b   :  { %v4521_v33 = vperm.slane %v4501_v26, %v10426_v10  ;;  %v3610_v26 = vperm.slane %v9184_v22, 7  ;;  %v4593_v22 = vperm.slane %v9526_v38, %v10426_v10  ;;  %v6248_v38 = vld [vmem:[#allocation2 + $0x70] sm:$0xff] }
 0x67d   :  { %v4528_v17 = vsel %vm1795_vm1, %v4521_v33, %v4520_v16  ;;  %v3866_v53 = vmul.f32 %v10584_v13, %v3610_v26 }
 0x67e   :  { %v4529_v44 = vsel %vm1797_vm2, %v4522_v24, %v4528_v17 }
 0x67f   :  { %v4530_v35 = vsel %vm1799_vm3, %v4523_v40, %v4529_v44 }
 0x680   :  { %4842 = vperm.xlu0 %5643, %v3851_v27   ;;  %v4597_v27 = vsel %vm1795_vm1, %v4590_v50, %v4589_v56  ;;  %v4651_v55 = vpop.permute.xlu1 %4650 }
 0x681   :  { %v4663_v40 = vperm.slane %v4651_v55, %v10426_v10 }
 0x682   :  { %v4438_v14 = vpop.permute.xlu0 %4437 }
 0x683   :  { %v4454_v8 = vperm.slane %v4438_v14, %v10426_v10  ;;  %v4648_v14 = vpop.permute.xlu2 %4647 }
 0x685   :  { %v4461_v6 = vsel %vm1799_vm3, %v4454_v8, %v4460_v7  ;;  %v4595_v8 = vperm.slane %v4585_v19, %v10426_v10 }
 0x686   :  { %v4462_v60 = vsel %vm1801_vm4, %v4455_v49, %v4461_v6 }
 0x687   :  { %v4463_v9 = vsel %vm1803_vm5, %v4456_v5, %v4462_v60  ;;  %v4660_v60 = vperm.slane %v4642_v52, %v10426_v10 }
 0x688   :  { %4851 = vperm.xlu0 %5643, %v3854_v1   ;;  %v4592_v1 = vperm.slane %v9516_v47, %v10426_v10  ;;  %v4705_v6 = vpop.permute.xlu1 %4704 }
 0x68a   :  { %v4510_v29 = vpop.permute.xlu0 %4509 }
 0x68b   :  { %v4524_v30 = vperm.slane %v4510_v29, %v10426_v10  ;;  %v4657_v16 = vpop.permute.xlu2 %4656 }
 0x68d   :  { %v4531_v43 = vsel %vm1801_vm4, %v4524_v30, %v4530_v35 }
 0x68e   :  { %v4532_v31 = vsel %vm1803_vm5, %v4525_v63, %v4531_v43 }
 0x68f   :  { %v4533_v48 = vsel %vm1805_vm6, %v4526_v39, %v4532_v31 }
 0x690   :  { %4860 = vperm.xlu0 %5643, %v3857_v3   ;;  %v4659_v3 = vperm.slane %v4639_v0, %v10426_v10  ;;  %v4714_v30 = vpop.permute.xlu1 %4713 }
 0x691   :  { %v4730_v0 = vperm.slane %v4714_v30, %v10426_v10 }
 0x692   :  { %v4447_v45 = vpop.permute.xlu0 %4446 }
 0x693   :  { %v4457_v11 = vperm.slane %v4447_v45, %v10426_v10  ;;  %v4711_v49 = vpop.permute.xlu2 %4710  ;;  %v4662_v45 = vperm.slane %v4648_v14, %v10426_v10 }
 0x695   :  { %v4464_v36 = vsel %vm1805_vm6, %v4457_v11, %v4463_v9  ;;  %v4665_v9 = vperm.slane %v4657_v16, %v10426_v10 }
 0x696   :  { %v4465_v57 = vsel %vm1807_vm7, %v4458_v62, %v4464_v36 }
 0x697   :  { %5606 = vmatmul.msk.f32.vlgmr.msrb.gmra.mxu2 %vm1930_vm8, %v4465_v57 }
 0x698   :  { %4914 = vperm.xlu0 %5643, %v3860_v51   ;;  %4759 = vmatpush.msrb.mxu2 %v6246_v42  ;;  %v4723_v51 = vpop.permute.xlu1 %4722  ;;  %v4727_v42 = vperm.slane %v4705_v6, %v10426_v10 }
 0x69a   :  { %v4519_v34 = vpop.permute.xlu0 %4518 }
 0x69b   :  { %v4527_v23 = vperm.slane %v4519_v34, %v10426_v10  ;;  %v4720_v35 = vpop.permute.xlu2 %4719  ;;  %v4729_v34 = vperm.slane %v4711_v49, %v10426_v10  ;;  %v150_v49 = vld [vmem:[#allocation10 + $0x8] sm:$0xff] }
 0x69d   :  { %v4534_v59 = vsel %vm1807_vm7, %v4527_v23, %v4533_v48 }
 0x69e   :  { %5607 = vmatmul.msk.f32.vlgmr.msrb.gmra.mxu3 %vm1930_vm8, %v4534_v59 }
 0x69f   :  { %4828 = vmatpush.msrb.mxu3 %v6247_v12  ;;  %v4732_v12 = vperm.slane %v4720_v35, %v10426_v10 }
 0x6a0   :  { %4923 = vperm.xlu0 %5643, %v3863_v21   ;;  %v4777_v48 = vpop.permute.xlu1 %4776 }
 0x6a2   :  { %v4573_v32 = vpop.permute.xlu0 %4572 }
 0x6a3   :  { %v4591_v4 = vperm.slane %v4573_v32, %v10426_v10  ;;  %v4774_v31 = vpop.permute.xlu2 %4773  ;;  %v4733_v32 = vperm.slane %v4723_v51, %v10426_v10 }
 0x6a5   :  { %v4598_v18 = vsel %vm1797_vm2, %v4591_v4, %v4597_v27 }
 0x6a6   :  { %v4599_v58 = vsel %vm1799_vm3, %v4592_v1, %v4598_v18  ;;  %v4796_v18 = vperm.slane %v4774_v31, %v10426_v10  ;;  %v4797_v1 = vperm.slane %v4777_v48, %v10426_v10 }
 0x6a7   :  { %v4600_v29 = vsel %vm1801_vm4, %v4593_v22, %v4599_v58 }
 0x6a8   :  { %4932 = vperm.xlu0 %5643, %v3866_v53   ;;  %v4786_v27 = vpop.permute.xlu1 %4785  ;;  %v4804_v22 = vsel %vm1795_vm1, %v4797_v1, %v4796_v18 }
 0x6aa   :  { %v4582_v46 = vpop.permute.xlu0 %4581 }
 0x6ab   :  { %v4594_v28 = vperm.slane %v4582_v46, %v10426_v10  ;;  %v4783_v52 = vpop.permute.xlu2 %4782 }
 0x6ad   :  { %v4601_v25 = vsel %vm1803_vm5, %v4594_v28, %v4600_v29  ;;  %v4799_v28 = vperm.slane %v4783_v52, %v10426_v10  ;;  %v151_v29 = vld [vmem:[#allocation10 + $0x10] sm:$0xff] }
 0x6ae   :  { %v4602_v47 = vsel %vm1805_vm6, %v4595_v8, %v4601_v25  ;;  %v152_v8 = vld [vmem:[#allocation10 + $0x18] sm:$0xff]  ;;  %v4800_v25 = vperm.slane %v4786_v27, %v10426_v10 }
 0x6af   :  { %v4603_v33 = vsel %vm1807_vm7, %v4596_v54, %v4602_v47 }
 0x6b0   :  { %5608 = vmatmul.msk.f32.vlgmr.msra.gmra.mxu2 %vm1930_vm8, %v4603_v33  ;;  %v4795_v55 = vpop.permute.xlu1 %4794 }
 0x6b1   :  { %4897 = vmatpush.msra.mxu2 %v6248_v38  ;;  %v4803_v6 = vperm.slane %v4795_v55, %v10426_v10 }
 0x6b2   :  { %v4636_v7 = vpop.permute.xlu0 %4635 }
 0x6b3   :  { %v4658_v37 = vperm.slane %v4636_v7, %v10426_v10  ;;  %v4792_v13 = vpop.permute.xlu2 %4791 }
 0x6b4   :  { %v4802_v16 = vperm.slane %v4792_v13, %v10426_v10 }
 0x6b5   :  { %v4666_v17 = vsel %vm1795_vm1, %v4659_v3, %v4658_v37 }
 0x6b6   :  { %v4667_v19 = vsel %vm1797_vm2, %v4660_v60, %v4666_v17  ;;  %v149_v17 = vld [vmem:[#allocation10] sm:$0xff] }
 0x6b8   :  { %v4849_v60 = vpop.permute.xlu1 %4848 }
 0x6ba   :  { %v4645_v24 = vpop.permute.xlu0 %4644 }
 0x6bb   :  { %v4661_v5 = vperm.slane %v4645_v24, %v10426_v10  ;;  %v4846_v38 = vpop.permute.xlu2 %4845 }
 0x6bc   :  { %v4866_v30 = vperm.slane %v4846_v38, %v10426_v10 }
 0x6bd   :  { %v4668_v44 = vsel %vm1799_vm3, %v4661_v5, %v4667_v19 }
 0x6be   :  { %v4669_v15 = vsel %vm1801_vm4, %v4662_v45, %v4668_v44 }
 0x6bf   :  { %v4670_v36 = vsel %vm1803_vm5, %v4663_v40, %v4669_v15  ;;  %v4867_v40 = vperm.slane %v4849_v60, %v10426_v10  ;;  %v9732_v60 = vld [vmem:[%s9886_s7] ss:$0 sm:$0xff] }
 0x6c2   :  { %v4654_v11 = vpop.permute.xlu0 %4653 }
 0x6c3   :  { %v4664_v62 = vperm.slane %v4654_v11, %v10426_v10  ;;  %v4855_v19 = vpop.permute.xlu2 %4854  ;;  %v4858_v11 = vpop.permute.xlu1 %4857 }
 0x6c4   :  { %v4870_v51 = vperm.slane %v4858_v11, %v10426_v10 }
 0x6c5   :  { %v4671_v43 = vsel %vm1805_vm6, %v4664_v62, %v4670_v36 }
 0x6c6   :  { %v4672_v57 = vsel %vm1807_vm7, %v4665_v9, %v4671_v43  ;;  %v9636_v9 = vpop.f32.mrf.mxu3  ;;  %v4869_v43 = vperm.slane %v4855_v19, %v10426_v10 }
 0x6c7   :  { %5609 = vmatmul.msk.f32.vlgmr.msra.gmra.mxu3 %vm1930_vm8, %v4672_v57 }
 0x6c8   :  { %4966 = vmatpush.msra.mxu3 %v6249_v20 }
 0x6ca   :  { %v4708_v63 = vpop.permute.xlu0 %4707 }
 0x6cb   :  { %v4728_v61 = vperm.slane %v4708_v63, %v10426_v10  ;;  %v4864_v57 = vpop.permute.xlu2 %4863 }
 0x6cc   :  { %v4872_v31 = vperm.slane %v4864_v57, %v10426_v10 }
 0x6cd   :  { %v4735_v39 = vsel %vm1795_vm1, %v4728_v61, %v4727_v42  ;;  %v4912_v61 = vpop.permute.xlu1 %4911 }
 0x6ce   :  { %v4736_v41 = vsel %vm1797_vm2, %v4729_v34, %v4735_v39  ;;  %v9646_v34 = vpop.f32.mrf.mxu3 }
 0x6cf   :  { %v4737_v2 = vsel %vm1799_vm3, %v4730_v0, %v4736_v41 }
 0x6d2   :  { %v4717_v23 = vpop.permute.xlu0 %4716 }
 0x6d3   :  { %v4731_v59 = vperm.slane %v4717_v23, %v10426_v10  ;;  %v4918_v0 = vpop.permute.xlu2 %4917 }
 0x6d5   :  { %v4738_v21 = vsel %vm1801_vm4, %v4731_v59, %v4737_v2  ;;  %v4934_v2 = vperm.slane %v4912_v61, %v10426_v10 }
 0x6d6   :  { %v4739_v56 = vsel %vm1803_vm5, %v4732_v12, %v4738_v21  ;;  %v4921_v21 = vpop.permute.xlu1 %4920  ;;  %v9653_v12 = vpop.f32.mrf.mxu3 }
 0x6d7   :  { %v4740_v4 = vsel %vm1805_vm6, %v4733_v32, %v4739_v56  ;;  %v4936_v56 = vperm.slane %v4918_v0, %v10426_v10 }
 0x6da   :  { %v4726_v26 = vpop.permute.xlu0 %4725 }
 0x6db   :  { %v4734_v50 = vperm.slane %v4726_v26, %v10426_v10 }
 0x6dd   :  { %v4741_v14 = vsel %vm1807_vm7, %v4734_v50, %v4740_v4  ;;  %v4937_v50 = vperm.slane %v4921_v21, %v10426_v10  ;;  %v9661_v4 = vpop.f32.mrf.mxu2 }
 0x6de   :  { %5610 = vmatmul.msk.f32.vlgmr.msrb.gmra.mxu2 %vm1930_vm8, %v4741_v14  ;;  %v4927_v14 = vpop.permute.xlu2 %4926  ;;  %v9664_v18 = vpop.f32.mrf.mxu3 }
 0x6df   :  { %5034 = vmatpush.msrb.mxu2 %v152_v8  ;;  %v4930_v1 = vpop.permute.xlu1 %4929 }
 0x6e1   :  { %5035 = vmatpush.msrb.mxu2 %v151_v29 }
 0x6e2   :  { %v4780_v53 = vpop.permute.xlu0 %4779 }
 0x6e3   :  { %v4798_v58 = vperm.slane %v4780_v53, %v10426_v10  ;;  %5036 = vmatpush.msrb.mxu2 %v150_v49 }
 0x6e5   :  { %v4805_v46 = vsel %vm1797_vm2, %v4798_v58, %v4804_v22  ;;  %5037 = vmatpush.msrb.mxu2 %v149_v17  ;;  %v4939_v58 = vperm.slane %v4927_v14, %v10426_v10 }
 0x6e6   :  { %v4806_v54 = vsel %vm1799_vm3, %v4799_v28, %v4805_v46  ;;  %v4940_v46 = vperm.slane %v4930_v1, %v10426_v10  ;;  %v9673_v28 = vpop.f32.mrf.mxu2 }
 0x6e7   :  { %v4807_v7 = vsel %vm1801_vm4, %v4800_v25, %v4806_v54 }
 0x6ea   :  { %v4789_v47 = vpop.permute.xlu0 %4788 }
 0x6eb   :  { %v4801_v33 = vperm.slane %v4789_v47, %v10426_v10 }
 0x6ed   :  { %v4808_v37 = vsel %vm1803_vm5, %v4801_v33, %v4807_v7 }
 0x6ee   :  { %v4809_v3 = vsel %vm1805_vm6, %v4802_v16, %v4808_v37  ;;  %v9683_v47 = vpop.f32.mrf.mxu2 }
 0x6ef   :  { %v4810_v24 = vsel %vm1807_vm7, %v4803_v6, %v4809_v3 }
 0x6f0   :  { %5611 = vmatmul.msk.f32.vlgmr.msrb.gmra.mxu3 %vm1930_vm8, %v4810_v24 }
 0x6f1   :  { %5630 = vmatpush.msrb.mxu3 %v152_v8 }
 0x6f2   :  { %v4843_v5 = vpop.permute.xlu0 %4842 }
 0x6f3   :  { %5631 = vmatpush.msrb.mxu3 %v151_v29  ;;  %v4865_v44 = vperm.slane %v4843_v5, %v10426_v10  ;;  %v9677_v54 = vpop.f32.mrf.mxu3 }
 0x6f5   :  { %5632 = vmatpush.msrb.mxu3 %v150_v49  ;;  %v4873_v45 = vsel %vm1795_vm1, %v4866_v30, %v4865_v44  ;;  %v9726_v49 = vld [vmem:[%s9885_s6] ss:$0 sm:$0xff]  ;;  %s6410_s6 = smov [#allocation11]  }
 0x6f6   :  { %v4874_v35 = vsel %vm1797_vm2, %v4867_v40, %v4873_v45  ;;  %s5549_s7 = sshll.u32 %s6410_s6, 4  ;;  %s5550_s7 = int_to_ptr.vmem [resolvable:$true] %s5549_s7 }
 0x6f7   :  { %5633 = vmatpush.msrb.mxu3 %v149_v17 }
 0x6fa   :  { %v4852_v15 = vpop.permute.xlu0 %4851 }
 0x6fb   :  { %v4868_v62 = vperm.slane %v4852_v15, %v10426_v10 }
 0x6fd   :  { %v4875_v36 = vsel %vm1799_vm3, %v4868_v62, %v4874_v35 }
 0x6fe   :  { %v4876_v20 = vsel %vm1801_vm4, %v4869_v43, %v4875_v36 }
 0x6ff   :  { %v4877_v39 = vsel %vm1803_vm5, %v4870_v51, %v4876_v20 }
 0x702   :  { %v4861_v63 = vpop.permute.xlu0 %4860 }
 0x703   :  { %v4871_v42 = vperm.slane %v4861_v63, %v10426_v10 }
 0x705   :  { %v4878_v41 = vsel %vm1805_vm6, %v4871_v42, %v4877_v39 }
 0x706   :  { %v4879_v23 = vsel %vm1807_vm7, %v4872_v31, %v4878_v41 }
 0x707   :  { %5612 = vmatmul.msk.f32.vlgmr.msra.gmra.mxu2 %vm1930_vm8, %v4879_v23 }
 0x70a   :  { %v4915_v48 = vpop.permute.xlu0 %4914 }
 0x70b   :  { %v4935_v59 = vperm.slane %v4915_v48, %v10426_v10 }
 0x70d   :  { %v4942_v52 = vsel %vm1795_vm1, %v4935_v59, %v4934_v2 }
 0x70e   :  { %v4943_v32 = vsel %vm1797_vm2, %v4936_v56, %v4942_v52 }
 0x70f   :  { %5614 = vmatmul.msk.f32.vlgmr.msrb.gmra.mxu2 %vm155_vm0, %v9636_v9  ;;  %v4944_v13 = vsel %vm1799_vm3, %v4937_v50, %v4943_v32 }
 0x712   :  { %v4924_v26 = vpop.permute.xlu0 %4923 }
 0x713   :  { %v4938_v27 = vperm.slane %v4924_v26, %v10426_v10 }
 0x715   :  { %v4945_v53 = vsel %vm1801_vm4, %v4938_v27, %v4944_v13 }
 0x716   :  { %v4946_v22 = vsel %vm1803_vm5, %v4939_v58, %v4945_v53 }
 0x717   :  { %5615 = vmatmul.msk.f32.gmra.mxu2 %vm155_vm0, %v9646_v34  ;;  %v4947_v29 = vsel %vm1805_vm6, %v4940_v46, %v4946_v22 }
 0x71a   :  { %v4933_v55 = vpop.permute.xlu0 %4932  ;;  %v9691_v16 = vpop.f32.mrf.mxu2 }
 0x71b   :  { %v4941_v8 = vperm.slane %v4933_v55, %v10426_v10 }
 0x71d   :  { %v4948_v25 = vsel %vm1807_vm7, %v4941_v8, %v4947_v29 }
 0x71e   :  { %5613 = vmatmul.msk.f32.vlgmr.msra.gmra.mxu3 %vm1930_vm8, %v4948_v25 }
 0x71f   :  { %5616 = vmatmul.msk.f32.gmra.mxu2 %vm155_vm0, %v9661_v4 }
 0x721   :  { %v9685_v33 = vpop.f32.mrf.mxu3 }
 0x726   :  { %5623 = vmatmul.msk.f32.vlgmr.msrb.gmra.mxu3 %vm155_vm0, %v9685_v33 }
 0x727   :  { %5617 = vmatmul.msk.f32.gmra.mxu2 %vm155_vm0, %v9653_v12 }
 0x72f   :  { %5618 = vmatmul.msk.f32.gmra.mxu2 %vm155_vm0, %v9673_v28 }
 0x733   :  { %v9695_v38 = vpop.f32.mrf.mxu2 }
 0x734   :  { %5624 = vmatmul.msk.f32.gmra.mxu3 %vm155_vm0, %v9695_v38 }
 0x737   :  { %5619 = vmatmul.msk.f32.gmra.mxu2 %vm155_vm0, %v9664_v18 }
 0x73f   :  { %5620 = vmatmul.msk.f32.gmra.mxu2 %vm155_vm0, %v9683_v47 }
 0x747   :  { %5621 = vmatmul.msk.f32.gmra.mxu2 %vm155_vm0, %v9677_v54 }
 0x74a   :  { %v9705_v7 = vpop.f32.mrf.mxu3 }
 0x74b   :  { %5625 = vmatmul.msk.f32.gmra.mxu3 %vm155_vm0, %v9705_v7 }
 0x74f   :  { %5622 = vmatmul.msk.f32.gmra.mxu2 %vm155_vm0, %v9691_v16 }
 0x761   :  { %v9711_v6 = vpop.f32.mrf.mxu2 }
 0x762   :  { %5626 = vmatmul.msk.f32.gmra.mxu3 %vm155_vm0, %v9711_v6 }
 0x773   :  { %v9715_v37 = vpop.f32.mrf.mxu3 }
 0x774   :  { %5627 = vmatmul.msk.f32.gmra.mxu3 %vm155_vm0, %v9715_v37 }
 0x78a   :  { %v9719_v3 = vpop.f32.mrf.mxu2 }
 0x78b   :  { %5628 = vmatmul.msk.f32.gmra.mxu3 %vm155_vm0, %v9719_v3 }
 0x792   :  { %v5039_v17 = vpop.f32.mrf.mxu2 }
 0x793   :  { %v5040_v24 = vadd.f32 %v9726_v49, %v5039_v17 }
 0x795   :  { %6196 = vtanh.f32 %v5040_v24 }
 0x79a   :  { %v5042_v5 = vpop.f32.mrf.mxu2 }
 0x79b   :  { %v6197_v19 = vpop.eup %6196  ;;  %v5043_v44 = vadd.f32 %v9726_v49, %v5042_v5 }
 0x79c   :  { %v5106_v30 = vmul.f32 %v6197_v19, %v9732_v60 }
 0x79d   :  { %6198 = vtanh.f32 %v5043_v44 }
 0x79e   :  { %v5122_v45 = vsel %vm155_vm0, %v5106_v30, 0.0 }
 0x79f   :  { %5123 = vadd.xlane.f32.xlu2 %v5122_v45 }
 0x7a1   :  { %v9737_v15 = vpop.f32.mrf.mxu3 }
 0x7a2   :  { %v5045_v40 = vpop.f32.mrf.mxu2  ;;  %5629 = vmatmul.msk.f32.gmra.mxu3 %vm155_vm0, %v9737_v15 }
 0x7a3   :  { %v6199_v11 = vpop.eup %6198  ;;  %v5046_v62 = vadd.f32 %v9726_v49, %v5045_v40 }
 0x7a4   :  { %v5107_v35 = vmul.f32 %v6199_v11, %v9732_v60 }
 0x7a5   :  { %6200 = vtanh.f32 %v5046_v62 }
 0x7a6   :  { %v5125_v36 = vsel %vm155_vm0, %v5107_v35, 0.0 }
 0x7a7   :  { %5126 = vadd.xlane.f32.xlu1 %v5125_v36 }
 0x7a9   :  { %v5066_v43 = vpop.f32.mrf.mxu3 }
 0x7aa   :  { %v5067_v57 = vadd.f32 %v9726_v49, %v5066_v43  ;;  %v5048_v20 = vpop.f32.mrf.mxu2 }
 0x7ab   :  { %v6201_v51 = vpop.eup %6200  ;;  %v5049_v63 = vadd.f32 %v9726_v49, %v5048_v20 }
 0x7ac   :  { %6202 = vtanh.f32 %v5067_v57  ;;  %v5108_v61 = vmul.f32 %v6201_v51, %v9732_v60 }
 0x7ad   :  { %6204 = vtanh.f32 %v5049_v63 }
 0x7ae   :  { %v5128_v42 = vsel %vm155_vm0, %v5108_v61, 0.0 }
 0x7af   :  { %5129 = vadd.xlane.f32.xlu1 %v5128_v42 }
 0x7b2   :  { %v6203_v31 = vpop.eup %6202  ;;  %v5051_v39 = vpop.f32.mrf.mxu2 }
 0x7b3   :  { %v5115_v41 = vmul.f32 %v6203_v31, %v9732_v60  ;;  %v6205_v0 = vpop.eup %6204  ;;  %v5052_v8 = vadd.f32 %v9726_v49, %v5051_v39 }
 0x7b4   :  { %v5109_v48 = vmul.f32 %v6205_v0, %v9732_v60 }
 0x7b5   :  { %v5149_v23 = vsel %vm155_vm0, %v5115_v41, 0.0 }
 0x7b6   :  { %5150 = vadd.xlane.f32.xlu2 %v5149_v23  ;;  %v5131_v2 = vsel %vm155_vm0, %v5109_v48, 0.0 }
 0x7b7   :  { %v5069_v52 = vpop.f32.mrf.mxu3 }
 0x7b8   :  { %v5070_v13 = vadd.f32 %v9726_v49, %v5069_v52 }
 0x7ba   :  { %v5054_v59 = vpop.f32.mrf.mxu2 }
 0x7bb   :  { %v5055_v50 = vadd.f32 %v9726_v49, %v5054_v59 }
 0x7be   :  { %5132 = vadd.xlane.f32.xlu2 %v5131_v2 }
 0x7c2   :  { %v5057_v21 = vpop.f32.mrf.mxu2 }
 0x7c3   :  { %v5058_v40 = vadd.f32 %v9726_v49, %v5057_v21 }
 0x7ca   :  { %v5060_v56 = vpop.f32.mrf.mxu2 }
 0x7cb   :  { %v5061_v42 = vadd.f32 %v9726_v49, %v5060_v56 }
 0x7ce   :  { %v5072_v32 = vpop.f32.mrf.mxu3 }
 0x7cf   :  { %v5073_v26 = vadd.f32 %v9726_v49, %v5072_v32 }
 0x7d1   :  { %6206 = vtanh.f32 %v5073_v26 }
 0x7d2   :  { %v5063_v27 = vpop.f32.mrf.mxu2  ;;  %6208 = vtanh.f32 %v5055_v50 }
 0x7d3   :  { %v5064_v14 = vadd.f32 %v9726_v49, %v5063_v27 }
 0x7d5   :  { %6210 = vtanh.f32 %v5064_v14 }
 0x7d6   :  { %6212 = vtanh.f32 %v5070_v13 }
 0x7d7   :  { %v6207_v53 = vpop.eup %6206  ;;  %6214 = vtanh.f32 %v5052_v8 }
 0x7d8   :  { %v5117_v1 = vmul.f32 %v6207_v53, %v9732_v60  ;;  %v6209_v58 = vpop.eup %6208 }
 0x7d9   :  { %v5111_v25 = vmul.f32 %v6209_v58, %v9732_v60 }
 0x7da   :  { %v5155_v22 = vsel %vm155_vm0, %v5117_v1, 0.0 }
 0x7db   :  { %v6211_v46 = vpop.eup %6210  ;;  %5156 = vadd.xlane.f32.xlu1 %v5155_v22  ;;  %v5137_v24 = vsel %vm155_vm0, %v5111_v25, 0.0 }
 0x7dc   :  { %v5114_v55 = vmul.f32 %v6211_v46, %v9732_v60  ;;  %v6213_v17 = vpop.eup %6212 }
 0x7dd   :  { %v5116_v5 = vmul.f32 %v6213_v17, %v9732_v60  ;;  %v6215_v45 = vpop.eup %6214 }
 0x7de   :  { %v5146_v29 = vsel %vm155_vm0, %v5114_v55, 0.0  ;;  %v5110_v11 = vmul.f32 %v6215_v45, %v9732_v60 }
 0x7df   :  { %5147 = vadd.xlane.f32.xlu0 %v5146_v29  ;;  %v5152_v30 = vsel %vm155_vm0, %v5116_v5, 0.0 }
 0x7e0   :  { %v5134_v35 = vsel %vm155_vm0, %v5110_v11, 0.0 }
 0x7e3   :  { %5138 = vadd.xlane.f32.xlu1 %v5137_v24 }
 0x7e5   :  { %v5075_v19 = vpop.f32.mrf.mxu3 }
 0x7e6   :  { %v5076_v44 = vadd.f32 %v9726_v49, %v5075_v19 }
 0x7e7   :  { %5153 = vadd.xlane.f32.xlu0 %v5152_v30 }
 0x7e8   :  { %6216 = vtanh.f32 %v5076_v44 }
 0x7e9   :  { %6218 = vtanh.f32 %v5058_v40 }
 0x7ee   :  { %v6217_v62 = vpop.eup %6216 }
 0x7ef   :  { %5135 = vadd.xlane.f32.xlu0 %v5134_v35  ;;  %v5118_v36 = vmul.f32 %v6217_v62, %v9732_v60  ;;  %v6219_v57 = vpop.eup %6218 }
 0x7f0   :  { %v5112_v20 = vmul.f32 %v6219_v57, %v9732_v60 }
 0x7f1   :  { %v5158_v43 = vsel %vm155_vm0, %v5118_v36, 0.0 }
 0x7f2   :  { %5159 = vadd.xlane.f32.xlu2 %v5158_v43  ;;  %v5140_v61 = vsel %vm155_vm0, %v5112_v20, 0.0 }
 0x7f7   :  { %v5078_v51 = vpop.f32.mrf.mxu3 }
 0x7f8   :  { %v5079_v63 = vadd.f32 %v9726_v49, %v5078_v51 }
 0x7fa   :  { %6220 = vtanh.f32 %v5079_v63  ;;  %5141 = vadd.xlane.f32.xlu2 %v5140_v61 }
 0x7fb   :  { %6222 = vtanh.f32 %v5061_v42 }
 0x800   :  { %v6221_v31 = vpop.eup %6220 }
 0x801   :  { %v5119_v39 = vmul.f32 %v6221_v31, %v9732_v60  ;;  %v6223_v23 = vpop.eup %6222 }
 0x802   :  { %v5113_v0 = vmul.f32 %v6223_v23, %v9732_v60 }
 0x803   :  { %v5161_v41 = vsel %vm155_vm0, %v5119_v39, 0.0 }
 0x804   :  { %5162 = vadd.xlane.f32.xlu0 %v5161_v41  ;;  %v5143_v48 = vsel %vm155_vm0, %v5113_v0, 0.0 }
 0x80c   :  { %5144 = vadd.xlane.f32.xlu0 %v5143_v48 }
 0x80e   :  { %v5081_v59 = vpop.f32.mrf.mxu3 }
 0x80f   :  { %v5082_v2 = vadd.f32 %v9726_v49, %v5081_v59 }
 0x811   :  { %6224 = vtanh.f32 %v5082_v2 }
 0x812   :  { %v5124_v13 = vpop.xlane.xlu2 %5123 }
 0x817   :  { %v6225_v21 = vpop.eup %6224 }
 0x818   :  { %v5120_v52 = vmul.f32 %v6225_v21, %v9732_v60 }
 0x81a   :  { %v5164_v56 = vsel %vm155_vm0, %v5120_v52, 0.0  ;;  %v5127_v58 = vpop.xlane.xlu1 %5126 }
 0x81b   :  { %5165 = vadd.xlane.f32.xlu1 %v5164_v56  ;;  %v5190_v17 = vperm.slane %v5127_v58, %v10426_v10 }
 0x822   :  { %v5130_v55 = vpop.xlane.xlu1 %5129 }
 0x825   :  { %v5084_v32 = vpop.f32.mrf.mxu3 }
 0x826   :  { %v5085_v26 = vadd.f32 %v9726_v49, %v5084_v32  ;;  %v5191_v49 = vperm.slane %v5130_v55, %v10426_v10 }
 0x828   :  { %6226 = vtanh.f32 %v5085_v26 }
 0x829   :  { %v5151_v1 = vpop.xlane.xlu2 %5150 }
 0x82a   :  { %v5198_v41 = vperm.slane %v5151_v1, %v10426_v10 }
 0x82e   :  { %v6227_v50 = vpop.eup %6226 }
 0x82f   :  { %v5121_v27 = vmul.f32 %v6227_v50, %v9732_v60  ;;  %v5189_v60 = vperm.slane %v5124_v13, %v10426_v10 }
 0x831   :  { %v5167_v14 = vsel %vm155_vm0, %v5121_v27, 0.0  ;;  %v5133_v46 = vpop.xlane.xlu2 %5132  ;;  %v5205_v44 = vsel %vm1795_vm1, %v5190_v17, %v5189_v60 }
 0x832   :  { %5168 = vadd.xlane.f32.xlu2 %v5167_v14  ;;  %v5192_v5 = vperm.slane %v5133_v46, %v10426_v10  ;;  %v5206_v45 = vsel %vm1797_vm2, %v5191_v49, %v5205_v44 }
 0x834   :  { %v5207_v11 = vsel %vm1799_vm3, %v5192_v5, %v5206_v45 }
 0x84e   :  { %v5157_v25 = vpop.xlane.xlu1 %5156 }
 0x84f   :  { %v5200_v2 = vperm.slane %v5157_v25, %v10426_v10 }
 0x852   :  { %v5148_v53 = vpop.xlane.xlu0 %5147 }
 0x853   :  { %v5197_v31 = vperm.slane %v5148_v53, %v10426_v10 }
 0x855   :  { %v5212_v23 = vsel %vm1795_vm1, %v5198_v41, %v5197_v31 }
 0x856   :  { %v5139_v40 = vpop.xlane.xlu1 %5138 }
 0x857   :  { %v5194_v36 = vperm.slane %v5139_v40, %v10426_v10 }
 0x85a   :  { %v5154_v22 = vpop.xlane.xlu0 %5153 }
 0x85b   :  { %v5199_v39 = vperm.slane %v5154_v22, %v10426_v10 }
 0x85d   :  { %v5213_v48 = vsel %vm1797_vm2, %v5199_v39, %v5212_v23 }
 0x85e   :  { %v5214_v56 = vsel %vm1799_vm3, %v5200_v2, %v5213_v48 }
 0x862   :  { %v5136_v8 = vpop.xlane.xlu0 %5135 }
 0x863   :  { %v5193_v19 = vperm.slane %v5136_v8, %v10426_v10 }
 0x865   :  { %v5160_v29 = vpop.xlane.xlu2 %5159  ;;  %v5208_v62 = vsel %vm1801_vm4, %v5193_v19, %v5207_v11 }
 0x866   :  { %v5209_v57 = vsel %vm1803_vm5, %v5194_v36, %v5208_v62  ;;  %v5201_v59 = vperm.slane %v5160_v29, %v10426_v10 }
 0x868   :  { %v5215_v32 = vsel %vm1801_vm4, %v5201_v59, %v5214_v56 }
 0x86d   :  { %v5142_v30 = vpop.xlane.xlu2 %5141 }
 0x86e   :  { %v5195_v35 = vperm.slane %v5142_v30, %v10426_v10 }
 0x870   :  { %v5210_v51 = vsel %vm1805_vm6, %v5195_v35, %v5209_v57 }
 0x877   :  { %v5163_v24 = vpop.xlane.xlu0 %5162 }
 0x878   :  { %v5202_v21 = vperm.slane %v5163_v24, %v10426_v10 }
 0x87a   :  { %v5216_v50 = vsel %vm1803_vm5, %v5202_v21, %v5215_v32 }
 0x87f   :  { %v5145_v43 = vpop.xlane.xlu0 %5144 }
 0x880   :  { %v5196_v20 = vperm.slane %v5145_v43, %v10426_v10 }
 0x882   :  { %v5211_v63 = vsel %vm1807_vm7, %v5196_v20, %v5210_v51 }
 0x883   :  { %v5221_v61 = vsel %vm5170_vm9, %v5211_v63, -inf }
 0x884   :  { %v5223_v42 = vsel %vm1930_vm8, %v5221_v61, -inf }
 0x885   :  { %5224 = vmax.xlane.f32.xlu1 %v5223_v42 }
 0x88e   :  { %v5166_v0 = vpop.xlane.xlu1 %5165 }
 0x88f   :  { %v5203_v52 = vperm.slane %v5166_v0, %v10426_v10 }
 0x891   :  { %v5217_v14 = vsel %vm1805_vm6, %v5203_v52, %v5216_v50 }
 0x8a5   :  { %v5169_v26 = vpop.xlane.xlu2 %5168 }
 0x8a6   :  { %v5204_v27 = vperm.slane %v5169_v26, %v10426_v10  ;;  %v10585_v10 = vlaneseq }
 0x8a8   :  { %v5218_v13 = vsel %vm1807_vm7, %v5204_v27, %v5217_v14  ;;  %v5273_v60 = vshrl.u32 %v10585_v10, 7 }
 0x8a9   :  { %v5222_v53 = vsel %vm5170_vm9, %v5218_v13, -inf }
 0x8aa   :  { %v5226_v1 = vsel %vm1930_vm8, %v5222_v53, -inf  ;;  %5647 = vset.pattern.permute.xlu2 %v5273_v60  ;;  %5646 = vset.pattern.permute.xlu0 %v5273_v60 }
 0x8ab   :  { %5227 = vmax.xlane.f32.xlu0 %v5226_v1  ;;  %5648 = vset.pattern.permute.xlu1 %v5273_v60 }
 0x8f8   :  { %v5225_v58 = vpop.xlane.xlu1 %5224 }
 0x8f9   :  { %v5229_v22 = vsub.f32 %v5221_v61, %v5225_v58 }
 0x8fb   :  { %v5231_v46 = vmul.f32 1.442695, %v5229_v22 }
 0x8fd   :  { %6228 = vpow2.f32 %v5231_v46 }
 0x903   :  { %v6229_v55 = vpop.eup %6228 }
 0x904   :  { %v5235_v8 = vsel %vm1930_vm8, %v6229_v55, 0.0 }
 0x905   :  { %5236 = vadd.xlane.f32.xlu2 %v5235_v8 }
 0x91e   :  { %v5228_v29 = vpop.xlane.xlu0 %5227 }
 0x91f   :  { %v5230_v25 = vsub.f32 %v5222_v53, %v5228_v29 }
 0x921   :  { %v5233_v17 = vmul.f32 1.442695, %v5230_v25 }
 0x923   :  { %6230 = vpow2.f32 %v5233_v17 }
 0x929   :  { %v6231_v49 = vpop.eup %6230 }
 0x92a   :  { %v5238_v24 = vsel %vm1930_vm8, %v6231_v49, 0.0 }
 0x92b   :  { %5239 = vadd.xlane.f32.xlu1 %v5238_v24 }
 0x978   :  { %v5237_v5 = vpop.xlane.xlu2 %5236 }
 0x979   :  { %6232 = vrcp.f32 %v5237_v5  ;;  %v5252_v45 = vand.u32 2147483648, %v5237_v5  ;;  %v5250_v11 = vand.u32 2147483647, %v5237_v5  ;;  %vm5246_vm11 = vweird.f32 %v5237_v5 }
 0x97b   :  { %v5253_v35 = vor.u32 1.1754944e-38, %v5252_v45  ;;  %vm5251_vm13 = vcmp.eq.f32.partialorder %v5250_v11, 8.507059e+37 }
 0x97f   :  { %v6233_v19 = vpop.eup %6232 }
 0x980   :  { %v5242_v44 = vmul.f32 %v6233_v19, %v5237_v5  ;;  %vm5247_vm10 = vweird.f32 %v6233_v19 }
 0x981   :  { %vm5248_vm12 = vmor %vm5246_vm11, %vm5247_vm10 }
 0x982   :  { %v5243_v30 = vsub.f32 1.0, %v5242_v44 }
 0x984   :  { %v5244_v40 = vmul.f32 %v6233_v19, %v5243_v30 }
 0x986   :  { %v5245_v62 = vadd.f32 %v6233_v19, %v5244_v40 }
 0x988   :  { %v5249_v36 = vsel %vm5248_vm12, %v6233_v19, %v5245_v62 }
 0x989   :  { %v5254_v43 = vsel %vm5251_vm13, %v5253_v35, %v5249_v36 }
 0x98a   :  { %v5255_v57 = vmul.f32 %v6229_v55, %v5254_v43 }
 0x98c   :  { %v5278_v20 = vperm.slane %v5255_v57, 1  ;;  %v5271_v51 = vperm.slane %v5255_v57, 0  ;;  %v5285_v63 = vperm.slane %v5255_v57, 2  ;;  %v5292_v61 = vperm.slane %v5255_v57, 3 }
 0x98d   :  { %v5299_v42 = vperm.slane %v5255_v57, 4  ;;  %v5306_v31 = vperm.slane %v5255_v57, 5  ;;  %v5313_v39 = vperm.slane %v5255_v57, 6  ;;  %v5320_v22 = vperm.slane %v5255_v57, 7 }
 0x98e   :  { %5283 = vperm.xlu2 %5647, %v5278_v20   ;;  %5276 = vperm.xlu0 %5646, %v5271_v51  }
 0x98f   :  { %5290 = vperm.xlu1 %5648, %v5285_v63  }
 0x996   :  { %5297 = vperm.xlu2 %5647, %v5292_v61  }
 0x997   :  { %5304 = vperm.xlu1 %5648, %v5299_v42  }
 0x99e   :  { %5311 = vperm.xlu2 %5647, %v5306_v31   ;;  %v5240_v41 = vpop.xlane.xlu1 %5239 }
 0x99f   :  { %5318 = vperm.xlu1 %5648, %v5313_v39   ;;  %6234 = vrcp.f32 %v5240_v41  ;;  %v5267_v59 = vand.u32 2147483648, %v5240_v41  ;;  %v5265_v21 = vand.u32 2147483647, %v5240_v41  ;;  %vm5261_vm15 = vweird.f32 %v5240_v41 }
 0x9a1   :  { %v5268_v56 = vor.u32 1.1754944e-38, %v5267_v59  ;;  %vm5266_vm9 = vcmp.eq.f32.partialorder %v5265_v21, 8.507059e+37 }
 0x9a5   :  { %v6235_v23 = vpop.eup %6234 }
 0x9a6   :  { %v5257_v0 = vmul.f32 %v6235_v23, %v5240_v41  ;;  %vm5262_vm14 = vweird.f32 %v6235_v23 }
 0x9a7   :  { %vm5263_vm8 = vmor %vm5261_vm15, %vm5262_vm14 }
 0x9a8   :  { %v5258_v48 = vsub.f32 1.0, %v5257_v0 }
 0x9aa   :  { %v5259_v2 = vmul.f32 %v6235_v23, %v5258_v48 }
 0x9ac   :  { %v5260_v52 = vadd.f32 %v6235_v23, %v5259_v2 }
 0x9ae   :  { %v5264_v32 = vsel %vm5263_vm8, %v6235_v23, %v5260_v52 }
 0x9af   :  { %v5269_v26 = vsel %vm5266_vm9, %v5268_v56, %v5264_v32 }
 0x9b0   :  { %v5270_v50 = vmul.f32 %v6231_v49, %v5269_v26 }
 0x9b2   :  { %v5341_v27 = vperm.slane %v5270_v50, 2  ;;  %v5334_v14 = vperm.slane %v5270_v50, 1  ;;  %v5327_v13 = vperm.slane %v5270_v50, 0  ;;  %v5362_v53 = vperm.slane %v5270_v50, 5 }
 0x9b3   :  { %v5355_v1 = vperm.slane %v5270_v50, 4  ;;  %v5348_v58 = vperm.slane %v5270_v50, 3  ;;  %v5369_v46 = vperm.slane %v5270_v50, 6  ;;  %v5376_v55 = vperm.slane %v5270_v50, 7 }
 0x9b4   :  { %5346 = vperm.xlu2 %5647, %v5341_v27   ;;  %5339 = vperm.xlu0 %5646, %v5334_v14  }
 0x9b5   :  { %5332 = vperm.xlu1 %5648, %v5327_v13  }
 0x9bc   :  { %5367 = vperm.xlu2 %5647, %v5362_v53   ;;  %5360 = vperm.xlu0 %5646, %v5355_v1  }
 0x9bd   :  { %5353 = vperm.xlu1 %5648, %v5348_v58  }
 0x9c4   :  { %5325 = vperm.xlu2 %5647, %v5320_v22   ;;  %5374 = vperm.xlu0 %5646, %v5369_v46  }
 0x9c5   :  { %5381 = vperm.xlu1 %5648, %v5376_v55  }
 0x9e8   :  { %v5284_v8 = vpop.permute.xlu2 %5283 }
 0x9e9   :  { %v5384_v24 = vmul.f32 %v5284_v8, %v9646_v34 }
 0x9eb   :  { %v5406_v19 = vsel %vm155_vm0, %v5384_v24, 0.0 }
 0x9ec   :  { %v5407_v62 = vrot.slane %v5406_v19, 4 }
 0x9ee   :  { %v5408_v57 = vadd.f32 %v5407_v62, %v5406_v19 }
 0x9f0   :  { %v5298_v29 = vpop.permute.xlu2 %5297  ;;  %v5409_v31 = vrot.slane %v5408_v57, 2 }
 0x9f1   :  { %v5386_v11 = vmul.f32 %v5298_v29, %v9653_v12 }
 0x9f2   :  { %v5410_v21 = vadd.f32 %v5409_v31, %v5408_v57 }
 0x9f8   :  { %v5312_v60 = vpop.permute.xlu2 %5311 }
 0x9f9   :  { %v5388_v43 = vmul.f32 %v5312_v60, %v9664_v18 }
 0x9fb   :  { %v5434_v12 = vsel %vm155_vm0, %v5388_v43, 0.0 }
 0x9fc   :  { %v5435_v59 = vrot.slane %v5434_v12, 4 }
 0x9fe   :  { %v5436_v50 = vadd.f32 %v5435_v59, %v5434_v12 }
 0xa00   :  { %v5277_v25 = vpop.permute.xlu0 %5276  ;;  %v5437_v58 = vrot.slane %v5436_v50, 2 }
 0xa01   :  { %v5291_v17 = vpop.permute.xlu1 %5290  ;;  %v5383_v49 = vmul.f32 %v5277_v25, %v9636_v9 }
 0xa02   :  { %v5385_v10 = vmul.f32 %v5291_v17, %v9661_v4  ;;  %v5420_v4 = vsel %vm155_vm0, %v5386_v11, 0.0  ;;  %v5438_v60 = vadd.f32 %v5437_v58, %v5436_v50 }
 0xa03   :  { %v5399_v5 = vsel %vm155_vm0, %v5383_v49, 0.0  ;;  %v5421_v61 = vrot.slane %v5420_v4, 4 }
 0xa04   :  { %v5413_v44 = vsel %vm155_vm0, %v5385_v10, 0.0  ;;  %v5400_v45 = vrot.slane %v5399_v5, 4  ;;  %v5439_v62 = vrot.slane %v5438_v60, 1 }
 0xa05   :  { %v5414_v35 = vrot.slane %v5413_v44, 4  ;;  %v5422_v48 = vadd.f32 %v5421_v61, %v5420_v4 }
 0xa06   :  { %v5401_v9 = vadd.f32 %v5400_v45, %v5399_v5 }
 0xa07   :  { %v5415_v20 = vadd.f32 %v5414_v35, %v5413_v44  ;;  %v5423_v26 = vrot.slane %v5422_v48, 2 }
 0xa08   :  { %v5402_v42 = vrot.slane %v5401_v9, 2 }
 0xa09   :  { %v5305_v30 = vpop.permute.xlu1 %5304  ;;  %v5416_v39 = vrot.slane %v5415_v20, 2  ;;  %v5424_v1 = vadd.f32 %v5423_v26, %v5422_v48 }
 0xa0a   :  { %v5387_v40 = vmul.f32 %v5305_v30, %v9673_v28  ;;  %v5403_v2 = vadd.f32 %v5402_v42, %v5401_v9  ;;  %v5440_v42 = vadd.f32 %v5439_v62, %v5438_v60 }
 0xa0b   :  { %v5417_v52 = vadd.f32 %v5416_v39, %v5415_v20  ;;  %v5425_v10 = vrot.slane %v5424_v1, 1 }
 0xa0c   :  { %v5427_v34 = vsel %vm155_vm0, %v5387_v40, 0.0  ;;  %v5404_v27 = vrot.slane %v5403_v2, 1 }
 0xa0d   :  { %v5428_v51 = vrot.slane %v5427_v34, 4  ;;  %v5418_v14 = vrot.slane %v5417_v52, 1  ;;  %v5426_v11 = vadd.f32 %v5425_v10, %v5424_v1 }
 0xa0e   :  { %v5347_v36 = vpop.permute.xlu2 %5346  ;;  %v5405_v22 = vadd.f32 %v5404_v27, %v5403_v2 }
 0xa0f   :  { %v5429_v23 = vadd.f32 %v5428_v51, %v5427_v34  ;;  %v5419_v29 = vadd.f32 %v5418_v14, %v5417_v52  ;;  %v5393_v17 = vmul.f32 %v5347_v36, %v9695_v38 }
 0xa11   :  { %v5319_v63 = vpop.permute.xlu1 %5318  ;;  %v5430_v56 = vrot.slane %v5429_v23, 2  ;;  %v5469_v40 = vsel %vm155_vm0, %v5393_v17, 0.0 }
 0xa12   :  { %v5389_v28 = vmul.f32 %v5319_v63, %v9683_v47  ;;  %v5411_v47 = vrot.slane %v5410_v21, 1  ;;  %v5470_v43 = vrot.slane %v5469_v40, 4 }
 0xa13   :  { %v5431_v13 = vadd.f32 %v5430_v56, %v5429_v23 }
 0xa14   :  { %v5441_v41 = vsel %vm155_vm0, %v5389_v28, 0.0  ;;  %v5412_v8 = vadd.f32 %v5411_v47, %v5410_v21 }
 0xa15   :  { %v5442_v0 = vrot.slane %v5441_v41, 4  ;;  %v5432_v25 = vrot.slane %v5431_v13, 1 }
 0xa16   :  { %v5368_v18 = vpop.permute.xlu2 %5367  ;;  %v5527_v5 = vsel %vm1795_vm1, %v5412_v8, %v5405_v22 }
 0xa17   :  { %v5443_v32 = vadd.f32 %v5442_v0, %v5441_v41  ;;  %v5528_v30 = vsel %vm1797_vm2, %v5419_v29, %v5527_v5  ;;  %v5433_v45 = vadd.f32 %v5432_v25, %v5431_v13  ;;  %v5396_v38 = vmul.f32 %v5368_v18, %v9715_v37 }
 0xa18   :  { %v5529_v4 = vsel %vm1799_vm3, %v5426_v11, %v5528_v30 }
 0xa19   :  { %v5444_v53 = vrot.slane %v5443_v32, 2  ;;  %v5530_v51 = vsel %vm1801_vm4, %v5433_v45, %v5529_v4  ;;  %v5490_v37 = vsel %vm155_vm0, %v5396_v38, 0.0 }
 0xa1a   :  { %v5531_v0 = vsel %vm1803_vm5, %v5440_v42, %v5530_v51  ;;  %v5491_v59 = vrot.slane %v5490_v37, 4 }
 0xa1b   :  { %v5445_v49 = vadd.f32 %v5444_v53, %v5443_v32 }
 0xa1c   :  { %v5492_v13 = vadd.f32 %v5491_v59, %v5490_v37 }
 0xa1e   :  { %v5326_v46 = vpop.permute.xlu2 %5325 }
 0xa1f   :  { %v5390_v55 = vmul.f32 %v5326_v46, %v9677_v54  ;;  %v5446_v54 = vrot.slane %v5445_v49, 1 }
 0xa21   :  { %v5448_v24 = vsel %vm155_vm0, %v5390_v55, 0.0  ;;  %v5447_v63 = vadd.f32 %v5446_v54, %v5445_v49 }
 0xa22   :  { %v5449_v19 = vrot.slane %v5448_v24, 4 }
 0xa24   :  { %v5450_v44 = vadd.f32 %v5449_v19, %v5448_v24 }
 0xa26   :  { %v5451_v35 = vrot.slane %v5450_v44, 2  ;;  %v5340_v9 = vpop.permute.xlu0 %5339 }
 0xa27   :  { %v5333_v34 = vpop.permute.xlu1 %5332  ;;  %v5392_v36 = vmul.f32 %v5340_v9, %v9685_v33  ;;  %v5471_v33 = vadd.f32 %v5470_v43, %v5469_v40 }
 0xa28   :  { %v5452_v57 = vadd.f32 %v5451_v35, %v5450_v44  ;;  %v5391_v20 = vmul.f32 %v5333_v34, %v9691_v16  ;;  %v5532_v16 = vsel %vm1805_vm6, %v5447_v63, %v5531_v0 }
 0xa29   :  { %v5462_v61 = vsel %vm155_vm0, %v5392_v36, 0.0  ;;  %v5472_v26 = vrot.slane %v5471_v33, 2 }
 0xa2a   :  { %v5453_v28 = vrot.slane %v5452_v57, 1  ;;  %v5455_v12 = vsel %vm155_vm0, %v5391_v20, 0.0  ;;  %v5463_v31 = vrot.slane %v5462_v61, 4 }
 0xa2b   :  { %v5456_v39 = vrot.slane %v5455_v12, 4  ;;  %v5473_v55 = vadd.f32 %v5472_v26, %v5471_v33 }
 0xa2c   :  { %v5454_v41 = vadd.f32 %v5453_v28, %v5452_v57  ;;  %v5464_v23 = vadd.f32 %v5463_v31, %v5462_v61 }
 0xa2d   :  { %v5457_v48 = vadd.f32 %v5456_v39, %v5455_v12  ;;  %v5474_v5 = vrot.slane %v5473_v55, 1 }
 0xa2e   :  { %v5465_v2 = vrot.slane %v5464_v23, 2  ;;  %v5361_v18 = vpop.permute.xlu0 %5360  ;;  %v5533_v21 = vsel %vm1807_vm7, %v5454_v41, %v5532_v16 }
 0xa2f   :  { %v5458_v52 = vrot.slane %v5457_v48, 2  ;;  %v5354_v56 = vpop.permute.xlu1 %5353  ;;  %v5395_v32 = vmul.f32 %v5361_v18, %v9711_v6  ;;  %5543 = vst.msk [vmem:[#allocation11] sm:$0xff] %vm155_vm0, %v5533_v21  ;;  %v5493_v6 = vrot.slane %v5492_v13, 2  ;;  %v5475_v34 = vadd.f32 %v5474_v5, %v5473_v55 }
 0xa30   :  { %v5466_v50 = vadd.f32 %v5465_v2, %v5464_v23  ;;  %v5394_v27 = vmul.f32 %v5354_v56, %v9705_v7 }
 0xa31   :  { %v5459_v47 = vadd.f32 %v5458_v52, %v5457_v48  ;;  %v5483_v14 = vsel %vm155_vm0, %v5395_v32, 0.0  ;;  %v5494_v62 = vadd.f32 %v5493_v6, %v5492_v13 }
 0xa32   :  { %v5476_v53 = vsel %vm155_vm0, %v5394_v27, 0.0  ;;  %v5484_v1 = vrot.slane %v5483_v14, 4  ;;  %v5467_v22 = vrot.slane %v5466_v50, 1 }
 0xa33   :  { %v5460_v58 = vrot.slane %v5459_v47, 1  ;;  %v5477_v46 = vrot.slane %v5476_v53, 4  ;;  %v5495_v20 = vrot.slane %v5494_v62, 1 }
 0xa34   :  { %v5485_v8 = vadd.f32 %v5484_v1, %v5483_v14  ;;  %v5468_v24 = vadd.f32 %v5467_v22, %v5466_v50 }
 0xa35   :  { %v5478_v29 = vadd.f32 %v5477_v46, %v5476_v53  ;;  %v5461_v49 = vadd.f32 %v5460_v58, %v5459_v47  ;;  %v5496_v31 = vadd.f32 %v5495_v20, %v5494_v62 }
 0xa36   :  { %v5486_v25 = vrot.slane %v5485_v8, 2  ;;  %v5375_v17 = vpop.permute.xlu0 %5374 }
 0xa37   :  { %v5479_v10 = vrot.slane %v5478_v29, 2  ;;  %v5382_v7 = vpop.permute.xlu1 %5381  ;;  %v5397_v60 = vmul.f32 %v5375_v17, %v9719_v3  ;;  %v5534_v35 = vsel %vm1795_vm1, %v5468_v24, %v5461_v49 }
 0xa38   :  { %v5487_v19 = vadd.f32 %v5486_v25, %v5485_v8  ;;  %v5398_v44 = vmul.f32 %v5382_v7, %v9737_v15  ;;  %v5535_v43 = vsel %vm1797_vm2, %v5475_v34, %v5534_v35 }
 0xa39   :  { %v5480_v30 = vadd.f32 %v5479_v10, %v5478_v29  ;;  %v5497_v45 = vsel %vm155_vm0, %v5397_v60, 0.0 }
 0xa3a   :  { %v5488_v40 = vrot.slane %v5487_v19, 1  ;;  %v5504_v54 = vsel %vm155_vm0, %v5398_v44, 0.0  ;;  %v5498_v11 = vrot.slane %v5497_v45, 4 }
 0xa3b   :  { %v5481_v9 = vrot.slane %v5480_v30, 1  ;;  %v5505_v38 = vrot.slane %v5504_v54, 4 }
 0xa3c   :  { %v5499_v36 = vadd.f32 %v5498_v11, %v5497_v45  ;;  %v5489_v57 = vadd.f32 %v5488_v40, %v5487_v19 }
 0xa3d   :  { %v5482_v4 = vadd.f32 %v5481_v9, %v5480_v30  ;;  %v5506_v3 = vadd.f32 %v5505_v38, %v5504_v54 }
 0xa3e   :  { %v5500_v15 = vrot.slane %v5499_v36, 2 }
 0xa3f   :  { %v5536_v51 = vsel %vm1799_vm3, %v5482_v4, %v5535_v43  ;;  %v5507_v63 = vrot.slane %v5506_v3, 2 }
 0xa40   :  { %v5501_v61 = vadd.f32 %v5500_v15, %v5499_v36  ;;  %v5537_v28 = vsel %vm1801_vm4, %v5489_v57, %v5536_v51 }
 0xa41   :  { %v5508_v42 = vadd.f32 %v5507_v63, %v5506_v3  ;;  %v5538_v41 = vsel %vm1803_vm5, %v5496_v31, %v5537_v28 }
 0xa42   :  { %v5502_v12 = vrot.slane %v5501_v61, 1 }
 0xa43   :  { %v5509_v37 = vrot.slane %v5508_v42, 1 }
 0xa44   :  { %v5503_v39 = vadd.f32 %v5502_v12, %v5501_v61 }
 0xa45   :  { %v5510_v33 = vadd.f32 %v5509_v37, %v5508_v42 }
 0xa46   :  { %v5539_v23 = vsel %vm1805_vm6, %v5503_v39, %v5538_v41 }
 0xa47   :  { %v5540_v0 = vsel %vm1807_vm7, %v5510_v33, %v5539_v23 }
 0xa48   :  { %5544 = vst.msk [vmem:[#allocation11 + $0x8] sm:$0xff] %vm155_vm0, %v5540_v0 }
 0xa49   :  { %5557 = dma.vmem_to_hbm [thread:$0]  %s5550_s7, 256, %s5552_s18, [#allocation4], %s6403_s13, %s6403_s13, %s6404_s14  }
 0xa4a   :  { %6400 = dma.done.wait [#allocation4], 256  }
 0xa4b   :  { %6401 = vsyncadd [#allocation4], 4294967040 }
 0xa4c   :  { %5562 = vsyncpa [#allocation3], 1 }
 0xa4d   :  { %5563 = vsyncpa [#allocation6], 1 }
 0xa4e   :  { %5564 = vsyncpa [#allocation9], 1 }
 0xa4f   :  { %5565 = vsyncpa [#allocation4], 1 }

</bundles_post_ra>
